<compile_context>
chip_gen: v7x
topology: tpu7x:2x2x1
jax: 0.10.0
libtpu: 0.0.40
codegen_flags: <defaults>
</compile_context>

<pallas_src>
import functools
from typing import NamedTuple

import numpy as np
import jax
import jax.numpy as jnp
from jax.experimental import pallas as pl
from jax.experimental.pallas import tpu as pltpu


class BlockCfg(NamedTuple):
    H: int
    W: int
    Ho: int
    Wo: int
    Cin: int
    Cmid: int
    F: int


# blocks whose kron(Ah,Aw) upsample matrix has at most this many elements stay
# fused in the channel-major front kernel; larger blocks use the separable path
_FUSE_KUP_MAX_ELEMS = 1 << 18      # 256K elems = 512 KiB bf16


# ----------------------------- host-side helpers -----------------------------
def _interp_matrix(n_in, n_out):
    """1-D linear interpolation matrix, PyTorch align_corners=True semantics."""
    A = np.zeros((n_out, n_in), dtype=np.float32)
    if n_out == 1 or n_in == 1:
        A[:, 0] = 1.0
        return A
    scale = (n_in - 1) / (n_out - 1)
    for i in range(n_out):
        src = i * scale
        i0 = min(int(np.floor(src)), n_in - 1)
        i1 = min(i0 + 1, n_in - 1)
        w1 = src - i0
        A[i, i0] += 1.0 - w1
        A[i, i1] += w1
    return A


def _full_spec(shape):
    nd = len(shape)
    return pl.BlockSpec(shape, lambda *_: (0,) * nd)


def _halo_base(Wo):
    return ((Wo + 1 + 127) // 128) * 128          # lane-aligned halo offset


def _is_fused(cfg):
    return cfg.H * cfg.W * cfg.Ho * cfg.Wo <= _FUSE_KUP_MAX_ELEMS


def _split_index(cfgs):
    for k, cfg in enumerate(cfgs):
        if not _is_fused(cfg):
            return k
    return len(cfgs)


def _cost(flops, ins, out_bytes):
    b = int(out_bytes) + sum(int(np.prod(a.shape)) * a.dtype.itemsize for a in ins)
    return pl.CostEstimate(flops=int(flops), transcendentals=0, bytes_accessed=b)


_CPARAMS = pltpu.CompilerParams(vmem_limit_bytes=32 * 1024 * 1024)


# -------------------------- in-kernel building blocks -------------------------
def _conv3x3_relu6(u_f32, wconv_ref, mask_ref, pad_ref, *, Wo, base):
    """3x3 'same' conv + ReLU6 on a channel-major (C, Ho*Wo) activation.

    The activation is written once into a zero-padded lane-halo scratch and 9
    statically shifted lane slices are accumulated with (F,C)@(C,HoWo) MXU dots
    (row-wrap columns of the +/-1 lane shifts are killed by 0/1 masks)."""
    HoWo = u_f32.shape[1]
    F = wconv_ref.shape[1]
    pad_ref[...] = jnp.zeros_like(pad_ref)
    pad_ref[:, base:base + HoWo] = u_f32.astype(jnp.bfloat16)

    acc = jnp.zeros((F, HoWo), jnp.float32)
    for dy in range(3):
        for dx in range(3):
            start = base + (dy - 1) * Wo + (dx - 1)
            patch = pad_ref[:, start:start + HoWo]        # (C, HoWo) bf16
            if dx == 0:                                   # left shift wraps
                patch = patch * mask_ref[0:1, :]
            elif dx == 2:                                  # right shift wraps
                patch = patch * mask_ref[1:2, :]
            acc = acc + jnp.dot(wconv_ref[dy * 3 + dx], patch,
                                preferred_element_type=jnp.float32)
    return jnp.clip(acc, 0.0, 6.0)


def _pw_relu6(wpw_ref, act_f32):
    """1x1 pointwise conv (bias=False) + ReLU6, bf16 operands / f32 acc."""
    y = jnp.dot(wpw_ref[...], act_f32.astype(jnp.bfloat16),
                preferred_element_type=jnp.float32)
    return jnp.clip(y, 0.0, 6.0)


# --------------------------------- kernels ------------------------------------
def _front_kernel(*refs, cfgs, tail_pw, bases):
    """Channel-major mega-kernel: all 'small' blocks (PW -> kron-upsample ->
    3x3 conv, each with ReLU6) fully fused, plus (optionally) the pointwise
    conv of the first 'big' block."""
    nf = len(cfgs)
    pos = 0
    x_ref = refs[pos]; pos += 1
    blk = [refs[pos + 4 * k: pos + 4 * k + 4] for k in range(nf)]
    pos += 4 * nf
    wpw_tail_ref = refs[pos] if tail_pw else None
    pos += int(tail_pw)
    o_ref = refs[pos]; pos += 1
    pad_refs = refs[pos:pos + nf]

    act = x_ref[...]                                       # (C0, H0*W0) f32
    for k, cfg in enumerate(cfgs):
        wpw_ref, kup_ref, wconv_ref, mask_ref = blk[k]
        y = _pw_relu6(wpw_ref, act)                        # (Cmid, H*W)
        # bilinear x2 upsample (align_corners=True) as one kron-matrix matmul
        u = jnp.dot(y.astype(jnp.bfloat16), kup_ref[...],
                    preferred_element_type=jnp.float32)    # (Cmid, Ho*Wo)
        act = _conv3x3_relu6(u, wconv_ref, mask_ref, pad_refs[k],
                             Wo=cfg.Wo, base=bases[k])     # (F, Ho*Wo)
    if tail_pw:
        act = _pw_relu6(wpw_tail_ref, act)                 # PW of next block
    o_ref[...] = act.astype(o_ref.dtype)


def _upsample_kernel(x_ref, awT_ref, ahK_ref, o_ref):
    """Separable bilinear x2 upsample in channel*height-major layout.
       x:(C*H, W) f32   ahK = kron(I_C, Ah):(C*Ho, C*H) f32   awT:(W, Wo) f32
       out:(C*Ho, Wo) f32.  Two tiny f32 MXU matmuls, cheaper-order first."""
    t = jnp.dot(ahK_ref[...], x_ref[...],
                preferred_element_type=jnp.float32)        # (C*Ho, W)
    o_ref[...] = jnp.dot(t, awT_ref[...],
                         preferred_element_type=jnp.float32)  # (C*Ho, Wo)


def _conv_block_kernel(*refs, Wo, base, has_pw):
    """Channel-major 3x3 'same' conv + ReLU6 of one block, optionally followed
    by the pointwise conv (+ReLU6) of the NEXT block."""
    if has_pw:
        x_ref, wconv_ref, mask_ref, wpw_ref, o_ref, pad_ref = refs
    else:
        x_ref, wconv_ref, mask_ref, o_ref, pad_ref = refs
        wpw_ref = None
    act = _conv3x3_relu6(x_ref[...], wconv_ref, mask_ref, pad_ref,
                         Wo=Wo, base=base)
    if has_pw:
        act = _pw_relu6(wpw_ref, act)
    o_ref[...] = act.astype(o_ref.dtype)


# ------------------------------ pallas_call wrappers ---------------------------
def _front_call(x, params, cfgs, s):
    nb = len(cfgs)
    fcfgs = tuple(cfgs[:s])
    tail_pw = s < nb

    ins = [x]
    for k in range(s):
        p = params[k]
        ins += [p["wpw"], p["kup"], p["wconv"], p["masks"]]
    if tail_pw:
        ins.append(params[s]["wpw"])

    if s > 0:
        out_s = cfgs[s - 1].Ho * cfgs[s - 1].Wo
        out_c = cfgs[s].Cmid if tail_pw else cfgs[s - 1].F
    else:
        out_s = x.shape[1]
        out_c = cfgs[0].Cmid

    bases = tuple(_halo_base(c.Wo) for c in fcfgs)
    scratch = [pltpu.VMEM((c.Cmid, bases[i] + c.Ho * c.Wo + c.Wo + 1),
                          jnp.bfloat16) for i, c in enumerate(fcfgs)]

    flops = 0
    for cfg in fcfgs:
        HW, HoWo = cfg.H * cfg.W, cfg.Ho * cfg.Wo
        flops += 2 * (cfg.Cmid * cfg.Cin * HW + cfg.Cmid * HW * HoWo
                      + 9 * cfg.F * cfg.Cmid * HoWo)
    if tail_pw:
        flops += 2 * cfgs[s].Cmid * cfgs[s].Cin * out_s

    return pl.pallas_call(
        functools.partial(_front_kernel, cfgs=fcfgs, tail_pw=tail_pw, bases=bases),
        out_shape=jax.ShapeDtypeStruct((out_c, out_s), jnp.float32),
        in_specs=[_full_spec(a.shape) for a in ins],
        out_specs=_full_spec((out_c, out_s)),
        scratch_shapes=scratch,
        compiler_params=_CPARAMS,
        cost_estimate=_cost(flops, ins, out_c * out_s * 4),
    )(*ins)


def _upsample_call(x_rm, p, cfg):
    out_shape = (cfg.Cmid * cfg.Ho, cfg.Wo)
    ins = [x_rm, p["awT"], p["ahK"]]
    flops = 2 * (cfg.Cmid * cfg.Ho * cfg.Cmid * cfg.H * cfg.W
                 + cfg.Cmid * cfg.Ho * cfg.W * cfg.Wo)
    return pl.pallas_call(
        _upsample_kernel,
        out_shape=jax.ShapeDtypeStruct(out_shape, jnp.float32),
        in_specs=[_full_spec(a.shape) for a in ins],
        out_specs=_full_spec(out_shape),
        compiler_params=_CPARAMS,
        cost_estimate=_cost(flops, ins, out_shape[0] * out_shape[1] * 4),
    )(*ins)


def _conv_call(x_cm, p, cfg, wpw_next):
    HoWo = cfg.Ho * cfg.Wo
    base = _halo_base(cfg.Wo)
    has_pw = wpw_next is not None
    out_c = wpw_next.shape[0] if has_pw else cfg.F
    ins = [x_cm, p["wconv"], p["masks"]] + ([wpw_next] if has_pw else [])
    flops = 2 * 9 * cfg.F * cfg.Cmid * HoWo
    if has_pw:
        flops += 2 * out_c * cfg.F * HoWo
    return pl.pallas_call(
        functools.partial(_conv_block_kernel, Wo=cfg.Wo, base=base, has_pw=has_pw),
        out_shape=jax.ShapeDtypeStruct((out_c, HoWo), jnp.float32),
        in_specs=[_full_spec(a.shape) for a in ins],
        out_specs=_full_spec((out_c, HoWo)),
        scratch_shapes=[pltpu.VMEM((cfg.Cmid, base + HoWo + cfg.Wo + 1),
                                   jnp.bfloat16)],
        compiler_params=_CPARAMS,
        cost_estimate=_cost(flops, ins, out_c * HoWo * 4),
    )(*ins)


# --------------------------- model (forward pass) ----------------------------
def phinect_gan_decoder(x_chw, params, *, cfgs):
    C, H0, W0 = x_chw.shape
    nb = len(cfgs)
    s = _split_index(cfgs)
    x = x_chw.reshape(C, H0 * W0).astype(jnp.float32)      # CHW is already (C, HW)

    # launch 1: all small blocks fused (+ PW of the first big block)
    act = _front_call(x, params, cfgs, s)

    # remaining big blocks: [separable upsample] + [3x3 conv (+ next PW)]
    for k in range(s, nb):
        cfg, p = cfgs[k], params[k]
        # (Cmid, H*W) -> (Cmid*H, W) is a free row-major bitcast in XLA
        u = _upsample_call(act.reshape(cfg.Cmid * cfg.H, cfg.W), p, cfg)
        wpw_next = params[k + 1]["wpw"] if k + 1 < nb else None
        act = _conv_call(u.reshape(cfg.Cmid, cfg.Ho * cfg.Wo), p, cfg, wpw_next)

    last = cfgs[-1]
    return act.reshape(last.F, last.Ho, last.Wo)           # lane-dense == CHW


# ------------------------- deterministic parameters ---------------------------
def init_decoder_params(key, latent_in_shape, alpha, k_size, expansion, up_factor):
    assert k_size == 3, "fused kernel implements the 3x3 'same' convolution"
    C, H, W = latent_in_shape
    filters = [int(96 * alpha), int(48 * alpha), int(24 * alpha), 3]
    params, cfgs = [], []
    cin = C
    for f in filters:
        cmid = cin // expansion
        Ho, Wo = H * up_factor, W * up_factor
        key, k1, k2 = jax.random.split(key, 3)
        # torch PW weight (Cmid, Cin, 1, 1) -> (Cmid, Cin)
        wpw = jax.random.normal(k1, (cmid, cin), jnp.float32) / np.sqrt(cin)
        # torch conv weight (F, Cmid, 3, 3) -> per-tap (9, F, Cmid), k = dy*3+dx
        wconv = (jax.random.normal(k2, (f, cmid, 3, 3), jnp.float32)
                 / np.sqrt(9 * cmid))
        wconv9 = jnp.transpose(wconv, (2, 3, 0, 1)).reshape(9, f, cmid)
        Ah = _interp_matrix(H, Ho)
        Aw = _interp_matrix(W, Wo)
        # 0/1 masks killing row-wrap columns of the +/-1 lane shifts
        wo_idx = np.arange(Ho * Wo) % Wo
        masks = np.stack([(wo_idx != 0), (wo_idx != Wo - 1)]).astype(np.float32)
        cfg = BlockCfg(H=H, W=W, Ho=Ho, Wo=Wo, Cin=cin, Cmid=cmid, F=f)
        p = dict(
            wpw=wpw.astype(jnp.bfloat16),
            wconv=wconv9.astype(jnp.bfloat16),
            masks=jnp.asarray(masks, dtype=jnp.bfloat16),
        )
        if _is_fused(cfg):
            # separable bilinear as one small kron matrix (HW, HoWo), bf16
            p["kup"] = jnp.asarray(np.kron(Ah, Aw).T, dtype=jnp.bfloat16)
        else:
            # separable factors for the channel*height-major upsample kernel
            p["awT"] = jnp.asarray(Aw.T, dtype=jnp.float32)
            p["ahK"] = jnp.asarray(np.kron(np.eye(cmid, dtype=np.float32), Ah),
                                   dtype=jnp.float32)
        params.append(p)
        cfgs.append(cfg)
        cin, H, W = f, Ho, Wo
    return params, tuple(cfgs)


# ------------------------------ pure-JAX reference ----------------------------
def _reference_decoder(x_chw, params, cfgs):
    hi = jax.lax.Precision.HIGHEST
    x = x_chw.astype(jnp.float32)
    for p, cfg in zip(params, cfgs):
        wpw = p["wpw"].astype(jnp.float32)
        y = jnp.clip(jnp.einsum("oc,chw->ohw", wpw, x, precision=hi), 0.0, 6.0)
        Ah = jnp.asarray(_interp_matrix(cfg.H, cfg.Ho))
        Aw = jnp.asarray(_interp_matrix(cfg.W, cfg.Wo))
        u = jnp.einsum("Hh,Ww,chw->cHW", Ah, Aw, y, precision=hi)
        wc = p["wconv"].astype(jnp.float32).reshape(3, 3, cfg.F, cfg.Cmid)
        wc = jnp.transpose(wc, (2, 3, 0, 1))               # OIHW
        z = jax.lax.conv_general_dilated(
            u[None], wc, window_strides=(1, 1), padding="SAME",
            dimension_numbers=("NCHW", "OIHW", "NCHW"), precision=hi)[0]
        x = jnp.clip(z, 0.0, 6.0)
    return x


# ------------------------------------ main ------------------------------------
if __name__ == "__main__":
    latent_in_shape = (8, 4, 4)            # (C, H, W) coming from latent space
    alpha, k_size, expansion, up_factor = 0.5, 3, 2, 2

    key = jax.random.PRNGKey(0)
    key, xkey = jax.random.split(key)
    x = jax.random.normal(xkey, latent_in_shape, dtype=jnp.float32)
    params, cfgs = init_decoder_params(key, latent_in_shape, alpha, k_size,
                                       expansion, up_factor)

    fwd = jax.jit(functools.partial(phinect_gan_decoder, cfgs=cfgs))
    out = jax.block_until_ready(fwd(x, params))

    expected = (3,
                latent_in_shape[1] * up_factor ** 4,
                latent_in_shape[2] * up_factor ** 4)
    assert out.shape == expected, (out.shape, expected)
    assert out.dtype == jnp.float32

    # correctness check vs pure-JAX reference (loose tol: bf16 matmul operands)
    ref = jax.block_until_ready(_reference_decoder(x, params, cfgs))
    np.testing.assert_allclose(np.asarray(out), np.asarray(ref),
                               rtol=0.1, atol=0.1)
    print("KERNEL_OK")
</pallas_src>

<mosaic_0001>
module attributes {stable_mosaic.version = 11 : i64} {
  func.func @_front_kernel(%arg0: memref<8x16xf32, #tpu.memory_space<vmem>>, %arg1: memref<4x8xbf16, #tpu.memory_space<vmem>>, %arg2: memref<16x64xbf16, #tpu.memory_space<vmem>>, %arg3: memref<9x48x4xbf16, #tpu.memory_space<vmem>>, %arg4: memref<2x64xbf16, #tpu.memory_space<vmem>>, %arg5: memref<24x48xbf16, #tpu.memory_space<vmem>>, %arg6: memref<64x256xbf16, #tpu.memory_space<vmem>>, %arg7: memref<9x24x24xbf16, #tpu.memory_space<vmem>>, %arg8: memref<2x256xbf16, #tpu.memory_space<vmem>>, %arg9: memref<12x24xbf16, #tpu.memory_space<vmem>>, %arg10: memref<256x1024xbf16, #tpu.memory_space<vmem>>, %arg11: memref<9x12x12xbf16, #tpu.memory_space<vmem>>, %arg12: memref<2x1024xbf16, #tpu.memory_space<vmem>>, %arg13: memref<6x12xbf16, #tpu.memory_space<vmem>>, %arg14: memref<6x1024xf32, #tpu.memory_space<vmem>>, %arg15: memref<4x201xbf16, #tpu.memory_space<vmem>>, %arg16: memref<24x401xbf16, #tpu.memory_space<vmem>>, %arg17: memref<12x1185xbf16, #tpu.memory_space<vmem>>) attributes {dimension_semantics = [], scalar_prefetch = 0 : i64, scratch_operands = 3 : i64, tpu.core_type = #tpu.core_type<tc>} {
    %c0 = arith.constant 0 : index
    %c0_0 = arith.constant 0 : index
    %0 = vector.load %arg0[%c0, %c0_0] : memref<8x16xf32, #tpu.memory_space<vmem>>, vector<8x16xf32>
    %c0_1 = arith.constant 0 : index
    %c0_2 = arith.constant 0 : index
    %1 = vector.load %arg1[%c0_1, %c0_2] : memref<4x8xbf16, #tpu.memory_space<vmem>>, vector<4x8xbf16>
    %2 = arith.truncf %0 : vector<8x16xf32> to vector<8x16xbf16>
    %cst = arith.constant dense<0.000000e+00> : vector<4x16xf32>
    %3 = tpu.matmul %1, %2, %cst {dimension_numbers = #tpu.dot_dimension_numbers<[1], [0], [0], [1], [0, 0, 1, 1], [], []>} : vector<4x8xbf16>, vector<8x16xbf16>, vector<4x16xf32> -> vector<4x16xf32>
    %cst_3 = arith.constant 0.000000e+00 : f32
    %cst_4 = arith.constant 6.000000e+00 : f32
    %4 = vector.broadcast %cst_3 : f32 to vector<4x16xf32>
    %5 = arith.maximumf %4, %3 : vector<4x16xf32>
    %6 = vector.broadcast %cst_4 : f32 to vector<4x16xf32>
    %7 = arith.minimumf %6, %5 : vector<4x16xf32>
    %8 = arith.truncf %7 : vector<4x16xf32> to vector<4x16xbf16>
    %c0_5 = arith.constant 0 : index
    %c0_6 = arith.constant 0 : index
    %9 = vector.load %arg2[%c0_5, %c0_6] : memref<16x64xbf16, #tpu.memory_space<vmem>>, vector<16x64xbf16>
    %cst_7 = arith.constant dense<0.000000e+00> : vector<4x64xf32>
    %10 = tpu.matmul %8, %9, %cst_7 {dimension_numbers = #tpu.dot_dimension_numbers<[1], [0], [0], [1], [0, 0, 1, 1], [], []>} : vector<4x16xbf16>, vector<16x64xbf16>, vector<4x64xf32> -> vector<4x64xf32>
    %cst_8 = arith.constant 0.000000e+00 : bf16
    %11 = vector.broadcast %cst_8 : bf16 to vector<4x201xbf16>
    %c0_9 = arith.constant 0 : index
    %c0_10 = arith.constant 0 : index
    %12 = vector.load %arg15[%c0_9, %c0_10] : memref<4x201xbf16, #tpu.memory_space<vmem>>, vector<4x201xbf16>
    tpu.vector_store %arg15[%c0_9, %c0_10], %11 {strides = array<i32>} : memref<4x201xbf16, #tpu.memory_space<vmem>>, vector<4x201xbf16>,
    %13 = arith.truncf %10 : vector<4x64xf32> to vector<4x64xbf16>
    %c0_11 = arith.constant 0 : index
    %c128 = arith.constant 128 : index
    %14 = vector.load %arg15[%c0_11, %c128] : memref<4x201xbf16, #tpu.memory_space<vmem>>, vector<4x64xbf16>
    tpu.vector_store %arg15[%c0_11, %c128], %13 {strides = array<i32>} : memref<4x201xbf16, #tpu.memory_space<vmem>>, vector<4x64xbf16>,
    %cst_12 = arith.constant 0.000000e+00 : f32
    %15 = vector.broadcast %cst_12 : f32 to vector<48x64xf32>
    %c0_13 = arith.constant 0 : index
    %c119 = arith.constant 119 : index
    %16 = vector.load %arg15[%c0_13, %c119] : memref<4x201xbf16, #tpu.memory_space<vmem>>, vector<4x64xbf16>
    %c0_14 = arith.constant 0 : index
    %c0_15 = arith.constant 0 : index
    %17 = vector.load %arg4[%c0_14, %c0_15] : memref<2x64xbf16, #tpu.memory_space<vmem>>, vector<1x64xbf16>
    %18 = vector.broadcast %17 : vector<1x64xbf16> to vector<4x64xbf16>
    %19 = arith.mulf %16, %18 : vector<4x64xbf16>
    %c0_16 = arith.constant 0 : index
    %c0_17 = arith.constant 0 : index
    %c0_18 = arith.constant 0 : index
    %20 = vector.load %arg3[%c0_16, %c0_17, %c0_18] : memref<9x48x4xbf16, #tpu.memory_space<vmem>>, vector<1x48x4xbf16>
    %21 = vector.shape_cast %20 : vector<1x48x4xbf16> to vector<48x4xbf16>
    %cst_19 = arith.constant dense<0.000000e+00> : vector<48x64xf32>
    %22 = tpu.matmul %21, %19, %cst_19 {dimension_numbers = #tpu.dot_dimension_numbers<[1], [0], [0], [1], [0, 0, 1, 1], [], []>} : vector<48x4xbf16>, vector<4x64xbf16>, vector<48x64xf32> -> vector<48x64xf32>
    %23 = arith.addf %15, %22 : vector<48x64xf32>
    %c0_20 = arith.constant 0 : index
    %c120 = arith.constant 120 : index
    %24 = vector.load %arg15[%c0_20, %c120] : memref<4x201xbf16, #tpu.memory_space<vmem>>, vector<4x64xbf16>
    %c1 = arith.constant 1 : index
    %c0_21 = arith.constant 0 : index
    %c0_22 = arith.constant 0 : index
    %25 = vector.load %arg3[%c1, %c0_21, %c0_22] : memref<9x48x4xbf16, #tpu.memory_space<vmem>>, vector<1x48x4xbf16>
    %26 = vector.shape_cast %25 : vector<1x48x4xbf16> to vector<48x4xbf16>
    %cst_23 = arith.constant dense<0.000000e+00> : vector<48x64xf32>
    %27 = tpu.matmul %26, %24, %cst_23 {dimension_numbers = #tpu.dot_dimension_numbers<[1], [0], [0], [1], [0, 0, 1, 1], [], []>} : vector<48x4xbf16>, vector<4x64xbf16>, vector<48x64xf32> -> vector<48x64xf32>
    %28 = arith.addf %23, %27 : vector<48x64xf32>
    %c0_24 = arith.constant 0 : index
    %c121 = arith.constant 121 : index
    %29 = vector.load %arg15[%c0_24, %c121] : memref<4x201xbf16, #tpu.memory_space<vmem>>, vector<4x64xbf16>
    %c1_25 = arith.constant 1 : index
    %c0_26 = arith.constant 0 : index
    %30 = vector.load %arg4[%c1_25, %c0_26] : memref<2x64xbf16, #tpu.memory_space<vmem>>, vector<1x64xbf16>
    %31 = vector.broadcast %30 : vector<1x64xbf16> to vector<4x64xbf16>
    %32 = arith.mulf %29, %31 : vector<4x64xbf16>
    %c2 = arith.constant 2 : index
    %c0_27 = arith.constant 0 : index
    %c0_28 = arith.constant 0 : index
    %33 = vector.load %arg3[%c2, %c0_27, %c0_28] : memref<9x48x4xbf16, #tpu.memory_space<vmem>>, vector<1x48x4xbf16>
    %34 = vector.shape_cast %33 : vector<1x48x4xbf16> to vector<48x4xbf16>
    %cst_29 = arith.constant dense<0.000000e+00> : vector<48x64xf32>
    %35 = tpu.matmul %34, %32, %cst_29 {dimension_numbers = #tpu.dot_dimension_numbers<[1], [0], [0], [1], [0, 0, 1, 1], [], []>} : vector<48x4xbf16>, vector<4x64xbf16>, vector<48x64xf32> -> vector<48x64xf32>
    %36 = arith.addf %28, %35 : vector<48x64xf32>
    %c0_30 = arith.constant 0 : index
    %c127 = arith.constant 127 : index
    %37 = vector.load %arg15[%c0_30, %c127] : memref<4x201xbf16, #tpu.memory_space<vmem>>, vector<4x64xbf16>
    %c0_31 = arith.constant 0 : index
    %c0_32 = arith.constant 0 : index
    %38 = vector.load %arg4[%c0_31, %c0_32] : memref<2x64xbf16, #tpu.memory_space<vmem>>, vector<1x64xbf16>
    %39 = vector.broadcast %38 : vector<1x64xbf16> to vector<4x64xbf16>
    %40 = arith.mulf %37, %39 : vector<4x64xbf16>
    %c3 = arith.constant 3 : index
    %c0_33 = arith.constant 0 : index
    %c0_34 = arith.constant 0 : index
    %41 = vector.load %arg3[%c3, %c0_33, %c0_34] : memref<9x48x4xbf16, #tpu.memory_space<vmem>>, vector<1x48x4xbf16>
    %42 = vector.shape_cast %41 : vector<1x48x4xbf16> to vector<48x4xbf16>
    %cst_35 = arith.constant dense<0.000000e+00> : vector<48x64xf32>
    %43 = tpu.matmul %42, %40, %cst_35 {dimension_numbers = #tpu.dot_dimension_numbers<[1], [0], [0], [1], [0, 0, 1, 1], [], []>} : vector<48x4xbf16>, vector<4x64xbf16>, vector<48x64xf32> -> vector<48x64xf32>
    %44 = arith.addf %36, %43 : vector<48x64xf32>
    %c0_36 = arith.constant 0 : index
    %c128_37 = arith.constant 128 : index
    %45 = vector.load %arg15[%c0_36, %c128_37] : memref<4x201xbf16, #tpu.memory_space<vmem>>, vector<4x64xbf16>
    %c4 = arith.constant 4 : index
    %c0_38 = arith.constant 0 : index
    %c0_39 = arith.constant 0 : index
    %46 = vector.load %arg3[%c4, %c0_38, %c0_39] : memref<9x48x4xbf16, #tpu.memory_space<vmem>>, vector<1x48x4xbf16>
    %47 = vector.shape_cast %46 : vector<1x48x4xbf16> to vector<48x4xbf16>
    %cst_40 = arith.constant dense<0.000000e+00> : vector<48x64xf32>
    %48 = tpu.matmul %47, %45, %cst_40 {dimension_numbers = #tpu.dot_dimension_numbers<[1], [0], [0], [1], [0, 0, 1, 1], [], []>} : vector<48x4xbf16>, vector<4x64xbf16>, vector<48x64xf32> -> vector<48x64xf32>
    %49 = arith.addf %44, %48 : vector<48x64xf32>
    %c0_41 = arith.constant 0 : index
    %c129 = arith.constant 129 : index
    %50 = vector.load %arg15[%c0_41, %c129] : memref<4x201xbf16, #tpu.memory_space<vmem>>, vector<4x64xbf16>
    %c1_42 = arith.constant 1 : index
    %c0_43 = arith.constant 0 : index
    %51 = vector.load %arg4[%c1_42, %c0_43] : memref<2x64xbf16, #tpu.memory_space<vmem>>, vector<1x64xbf16>
    %52 = vector.broadcast %51 : vector<1x64xbf16> to vector<4x64xbf16>
    %53 = arith.mulf %50, %52 : vector<4x64xbf16>
    %c5 = arith.constant 5 : index
    %c0_44 = arith.constant 0 : index
    %c0_45 = arith.constant 0 : index
    %54 = vector.load %arg3[%c5, %c0_44, %c0_45] : memref<9x48x4xbf16, #tpu.memory_space<vmem>>, vector<1x48x4xbf16>
    %55 = vector.shape_cast %54 : vector<1x48x4xbf16> to vector<48x4xbf16>
    %cst_46 = arith.constant dense<0.000000e+00> : vector<48x64xf32>
    %56 = tpu.matmul %55, %53, %cst_46 {dimension_numbers = #tpu.dot_dimension_numbers<[1], [0], [0], [1], [0, 0, 1, 1], [], []>} : vector<48x4xbf16>, vector<4x64xbf16>, vector<48x64xf32> -> vector<48x64xf32>
    %57 = arith.addf %49, %56 : vector<48x64xf32>
    %c0_47 = arith.constant 0 : index
    %c135 = arith.constant 135 : index
    %58 = vector.load %arg15[%c0_47, %c135] : memref<4x201xbf16, #tpu.memory_space<vmem>>, vector<4x64xbf16>
    %c0_48 = arith.constant 0 : index
    %c0_49 = arith.constant 0 : index
    %59 = vector.load %arg4[%c0_48, %c0_49] : memref<2x64xbf16, #tpu.memory_space<vmem>>, vector<1x64xbf16>
    %60 = vector.broadcast %59 : vector<1x64xbf16> to vector<4x64xbf16>
    %61 = arith.mulf %58, %60 : vector<4x64xbf16>
    %c6 = arith.constant 6 : index
    %c0_50 = arith.constant 0 : index
    %c0_51 = arith.constant 0 : index
    %62 = vector.load %arg3[%c6, %c0_50, %c0_51] : memref<9x48x4xbf16, #tpu.memory_space<vmem>>, vector<1x48x4xbf16>
    %63 = vector.shape_cast %62 : vector<1x48x4xbf16> to vector<48x4xbf16>
    %cst_52 = arith.constant dense<0.000000e+00> : vector<48x64xf32>
    %64 = tpu.matmul %63, %61, %cst_52 {dimension_numbers = #tpu.dot_dimension_numbers<[1], [0], [0], [1], [0, 0, 1, 1], [], []>} : vector<48x4xbf16>, vector<4x64xbf16>, vector<48x64xf32> -> vector<48x64xf32>
    %65 = arith.addf %57, %64 : vector<48x64xf32>
    %c0_53 = arith.constant 0 : index
    %c136 = arith.constant 136 : index
    %66 = vector.load %arg15[%c0_53, %c136] : memref<4x201xbf16, #tpu.memory_space<vmem>>, vector<4x64xbf16>
    %c7 = arith.constant 7 : index
    %c0_54 = arith.constant 0 : index
    %c0_55 = arith.constant 0 : index
    %67 = vector.load %arg3[%c7, %c0_54, %c0_55] : memref<9x48x4xbf16, #tpu.memory_space<vmem>>, vector<1x48x4xbf16>
    %68 = vector.shape_cast %67 : vector<1x48x4xbf16> to vector<48x4xbf16>
    %cst_56 = arith.constant dense<0.000000e+00> : vector<48x64xf32>
    %69 = tpu.matmul %68, %66, %cst_56 {dimension_numbers = #tpu.dot_dimension_numbers<[1], [0], [0], [1], [0, 0, 1, 1], [], []>} : vector<48x4xbf16>, vector<4x64xbf16>, vector<48x64xf32> -> vector<48x64xf32>
    %70 = arith.addf %65, %69 : vector<48x64xf32>
    %c0_57 = arith.constant 0 : index
    %c137 = arith.constant 137 : index
    %71 = vector.load %arg15[%c0_57, %c137] : memref<4x201xbf16, #tpu.memory_space<vmem>>, vector<4x64xbf16>
    %c1_58 = arith.constant 1 : index
    %c0_59 = arith.constant 0 : index
    %72 = vector.load %arg4[%c1_58, %c0_59] : memref<2x64xbf16, #tpu.memory_space<vmem>>, vector<1x64xbf16>
    %73 = vector.broadcast %72 : vector<1x64xbf16> to vector<4x64xbf16>
    %74 = arith.mulf %71, %73 : vector<4x64xbf16>
    %c8 = arith.constant 8 : index
    %c0_60 = arith.constant 0 : index
    %c0_61 = arith.constant 0 : index
    %75 = vector.load %arg3[%c8, %c0_60, %c0_61] : memref<9x48x4xbf16, #tpu.memory_space<vmem>>, vector<1x48x4xbf16>
    %76 = vector.shape_cast %75 : vector<1x48x4xbf16> to vector<48x4xbf16>
    %cst_62 = arith.constant dense<0.000000e+00> : vector<48x64xf32>
    %77 = tpu.matmul %76, %74, %cst_62 {dimension_numbers = #tpu.dot_dimension_numbers<[1], [0], [0], [1], [0, 0, 1, 1], [], []>} : vector<48x4xbf16>, vector<4x64xbf16>, vector<48x64xf32> -> vector<48x64xf32>
    %78 = arith.addf %70, %77 : vector<48x64xf32>
    %cst_63 = arith.constant 0.000000e+00 : f32
    %cst_64 = arith.constant 6.000000e+00 : f32
    %79 = vector.broadcast %cst_63 : f32 to vector<48x64xf32>
    %80 = arith.maximumf %79, %78 : vector<48x64xf32>
    %81 = vector.broadcast %cst_64 : f32 to vector<48x64xf32>
    %82 = arith.minimumf %81, %80 : vector<48x64xf32>
    %c0_65 = arith.constant 0 : index
    %c0_66 = arith.constant 0 : index
    %83 = vector.load %arg5[%c0_65, %c0_66] : memref<24x48xbf16, #tpu.memory_space<vmem>>, vector<24x48xbf16>
    %84 = arith.truncf %82 : vector<48x64xf32> to vector<48x64xbf16>
    %cst_67 = arith.constant dense<0.000000e+00> : vector<24x64xf32>
    %85 = tpu.matmul %83, %84, %cst_67 {dimension_numbers = #tpu.dot_dimension_numbers<[1], [0], [0], [1], [0, 0, 1, 1], [], []>} : vector<24x48xbf16>, vector<48x64xbf16>, vector<24x64xf32> -> vector<24x64xf32>
    %cst_68 = arith.constant 0.000000e+00 : f32
    %cst_69 = arith.constant 6.000000e+00 : f32
    %86 = vector.broadcast %cst_68 : f32 to vector<24x64xf32>
    %87 = arith.maximumf %86, %85 : vector<24x64xf32>
    %88 = vector.broadcast %cst_69 : f32 to vector<24x64xf32>
    %89 = arith.minimumf %88, %87 : vector<24x64xf32>
    %90 = arith.truncf %89 : vector<24x64xf32> to vector<24x64xbf16>
    %c0_70 = arith.constant 0 : index
    %c0_71 = arith.constant 0 : index
    %91 = vector.load %arg6[%c0_70, %c0_71] : memref<64x256xbf16, #tpu.memory_space<vmem>>, vector<64x256xbf16>
    %cst_72 = arith.constant dense<0.000000e+00> : vector<24x256xf32>
    %92 = tpu.matmul %90, %91, %cst_72 {dimension_numbers = #tpu.dot_dimension_numbers<[1], [0], [0], [1], [0, 0, 1, 1], [], []>} : vector<24x64xbf16>, vector<64x256xbf16>, vector<24x256xf32> -> vector<24x256xf32>
    %cst_73 = arith.constant 0.000000e+00 : bf16
    %93 = vector.broadcast %cst_73 : bf16 to vector<24x401xbf16>
    %c0_74 = arith.constant 0 : index
    %c0_75 = arith.constant 0 : index
    %94 = vector.load %arg16[%c0_74, %c0_75] : memref<24x401xbf16, #tpu.memory_space<vmem>>, vector<24x401xbf16>
    tpu.vector_store %arg16[%c0_74, %c0_75], %93 {strides = array<i32>} : memref<24x401xbf16, #tpu.memory_space<vmem>>, vector<24x401xbf16>,
    %95 = arith.truncf %92 : vector<24x256xf32> to vector<24x256xbf16>
    %c0_76 = arith.constant 0 : index
    %c128_77 = arith.constant 128 : index
    %96 = vector.load %arg16[%c0_76, %c128_77] : memref<24x401xbf16, #tpu.memory_space<vmem>>, vector<24x256xbf16>
    tpu.vector_store %arg16[%c0_76, %c128_77], %95 {strides = array<i32>} : memref<24x401xbf16, #tpu.memory_space<vmem>>, vector<24x256xbf16>,
    %cst_78 = arith.constant 0.000000e+00 : f32
    %97 = vector.broadcast %cst_78 : f32 to vector<24x256xf32>
    %c0_79 = arith.constant 0 : index
    %c111 = arith.constant 111 : index
    %98 = vector.load %arg16[%c0_79, %c111] : memref<24x401xbf16, #tpu.memory_space<vmem>>, vector<24x256xbf16>
    %c0_80 = arith.constant 0 : index
    %c0_81 = arith.constant 0 : index
    %99 = vector.load %arg8[%c0_80, %c0_81] : memref<2x256xbf16, #tpu.memory_space<vmem>>, vector<1x256xbf16>
    %100 = vector.broadcast %99 : vector<1x256xbf16> to vector<24x256xbf16>
    %101 = arith.mulf %98, %100 : vector<24x256xbf16>
    %c0_82 = arith.constant 0 : index
    %c0_83 = arith.constant 0 : index
    %c0_84 = arith.constant 0 : index
    %102 = vector.load %arg7[%c0_82, %c0_83, %c0_84] : memref<9x24x24xbf16, #tpu.memory_space<vmem>>, vector<1x24x24xbf16>
    %103 = vector.shape_cast %102 : vector<1x24x24xbf16> to vector<24x24xbf16>
    %cst_85 = arith.constant dense<0.000000e+00> : vector<24x256xf32>
    %104 = tpu.matmul %103, %101, %cst_85 {dimension_numbers = #tpu.dot_dimension_numbers<[1], [0], [0], [1], [0, 0, 1, 1], [], []>} : vector<24x24xbf16>, vector<24x256xbf16>, vector<24x256xf32> -> vector<24x256xf32>
    %105 = arith.addf %97, %104 : vector<24x256xf32>
    %c0_86 = arith.constant 0 : index
    %c112 = arith.constant 112 : index
    %106 = vector.load %arg16[%c0_86, %c112] : memref<24x401xbf16, #tpu.memory_space<vmem>>, vector<24x256xbf16>
    %c1_87 = arith.constant 1 : index
    %c0_88 = arith.constant 0 : index
    %c0_89 = arith.constant 0 : index
    %107 = vector.load %arg7[%c1_87, %c0_88, %c0_89] : memref<9x24x24xbf16, #tpu.memory_space<vmem>>, vector<1x24x24xbf16>
    %108 = vector.shape_cast %107 : vector<1x24x24xbf16> to vector<24x24xbf16>
    %cst_90 = arith.constant dense<0.000000e+00> : vector<24x256xf32>
    %109 = tpu.matmul %108, %106, %cst_90 {dimension_numbers = #tpu.dot_dimension_numbers<[1], [0], [0], [1], [0, 0, 1, 1], [], []>} : vector<24x24xbf16>, vector<24x256xbf16>, vector<24x256xf32> -> vector<24x256xf32>
    %110 = arith.addf %105, %109 : vector<24x256xf32>
    %c0_91 = arith.constant 0 : index
    %c113 = arith.constant 113 : index
    %111 = vector.load %arg16[%c0_91, %c113] : memref<24x401xbf16, #tpu.memory_space<vmem>>, vector<24x256xbf16>
    %c1_92 = arith.constant 1 : index
    %c0_93 = arith.constant 0 : index
    %112 = vector.load %arg8[%c1_92, %c0_93] : memref<2x256xbf16, #tpu.memory_space<vmem>>, vector<1x256xbf16>
    %113 = vector.broadcast %112 : vector<1x256xbf16> to vector<24x256xbf16>
    %114 = arith.mulf %111, %113 : vector<24x256xbf16>
    %c2_94 = arith.constant 2 : index
    %c0_95 = arith.constant 0 : index
    %c0_96 = arith.constant 0 : index
    %115 = vector.load %arg7[%c2_94, %c0_95, %c0_96] : memref<9x24x24xbf16, #tpu.memory_space<vmem>>, vector<1x24x24xbf16>
    %116 = vector.shape_cast %115 : vector<1x24x24xbf16> to vector<24x24xbf16>
    %cst_97 = arith.constant dense<0.000000e+00> : vector<24x256xf32>
    %117 = tpu.matmul %116, %114, %cst_97 {dimension_numbers = #tpu.dot_dimension_numbers<[1], [0], [0], [1], [0, 0, 1, 1], [], []>} : vector<24x24xbf16>, vector<24x256xbf16>, vector<24x256xf32> -> vector<24x256xf32>
    %118 = arith.addf %110, %117 : vector<24x256xf32>
    %c0_98 = arith.constant 0 : index
    %c127_99 = arith.constant 127 : index
    %119 = vector.load %arg16[%c0_98, %c127_99] : memref<24x401xbf16, #tpu.memory_space<vmem>>, vector<24x256xbf16>
    %c0_100 = arith.constant 0 : index
    %c0_101 = arith.constant 0 : index
    %120 = vector.load %arg8[%c0_100, %c0_101] : memref<2x256xbf16, #tpu.memory_space<vmem>>, vector<1x256xbf16>
    %121 = vector.broadcast %120 : vector<1x256xbf16> to vector<24x256xbf16>
    %122 = arith.mulf %119, %121 : vector<24x256xbf16>
    %c3_102 = arith.constant 3 : index
    %c0_103 = arith.constant 0 : index
    %c0_104 = arith.constant 0 : index
    %123 = vector.load %arg7[%c3_102, %c0_103, %c0_104] : memref<9x24x24xbf16, #tpu.memory_space<vmem>>, vector<1x24x24xbf16>
    %124 = vector.shape_cast %123 : vector<1x24x24xbf16> to vector<24x24xbf16>
    %cst_105 = arith.constant dense<0.000000e+00> : vector<24x256xf32>
    %125 = tpu.matmul %124, %122, %cst_105 {dimension_numbers = #tpu.dot_dimension_numbers<[1], [0], [0], [1], [0, 0, 1, 1], [], []>} : vector<24x24xbf16>, vector<24x256xbf16>, vector<24x256xf32> -> vector<24x256xf32>
    %126 = arith.addf %118, %125 : vector<24x256xf32>
    %c0_106 = arith.constant 0 : index
    %c128_107 = arith.constant 128 : index
    %127 = vector.load %arg16[%c0_106, %c128_107] : memref<24x401xbf16, #tpu.memory_space<vmem>>, vector<24x256xbf16>
    %c4_108 = arith.constant 4 : index
    %c0_109 = arith.constant 0 : index
    %c0_110 = arith.constant 0 : index
    %128 = vector.load %arg7[%c4_108, %c0_109, %c0_110] : memref<9x24x24xbf16, #tpu.memory_space<vmem>>, vector<1x24x24xbf16>
    %129 = vector.shape_cast %128 : vector<1x24x24xbf16> to vector<24x24xbf16>
    %cst_111 = arith.constant dense<0.000000e+00> : vector<24x256xf32>
    %130 = tpu.matmul %129, %127, %cst_111 {dimension_numbers = #tpu.dot_dimension_numbers<[1], [0], [0], [1], [0, 0, 1, 1], [], []>} : vector<24x24xbf16>, vector<24x256xbf16>, vector<24x256xf32> -> vector<24x256xf32>
    %131 = arith.addf %126, %130 : vector<24x256xf32>
    %c0_112 = arith.constant 0 : index
    %c129_113 = arith.constant 129 : index
    %132 = vector.load %arg16[%c0_112, %c129_113] : memref<24x401xbf16, #tpu.memory_space<vmem>>, vector<24x256xbf16>
    %c1_114 = arith.constant 1 : index
    %c0_115 = arith.constant 0 : index
    %133 = vector.load %arg8[%c1_114, %c0_115] : memref<2x256xbf16, #tpu.memory_space<vmem>>, vector<1x256xbf16>
    %134 = vector.broadcast %133 : vector<1x256xbf16> to vector<24x256xbf16>
    %135 = arith.mulf %132, %134 : vector<24x256xbf16>
    %c5_116 = arith.constant 5 : index
    %c0_117 = arith.constant 0 : index
    %c0_118 = arith.constant 0 : index
    %136 = vector.load %arg7[%c5_116, %c0_117, %c0_118] : memref<9x24x24xbf16, #tpu.memory_space<vmem>>, vector<1x24x24xbf16>
    %137 = vector.shape_cast %136 : vector<1x24x24xbf16> to vector<24x24xbf16>
    %cst_119 = arith.constant dense<0.000000e+00> : vector<24x256xf32>
    %138 = tpu.matmul %137, %135, %cst_119 {dimension_numbers = #tpu.dot_dimension_numbers<[1], [0], [0], [1], [0, 0, 1, 1], [], []>} : vector<24x24xbf16>, vector<24x256xbf16>, vector<24x256xf32> -> vector<24x256xf32>
    %139 = arith.addf %131, %138 : vector<24x256xf32>
    %c0_120 = arith.constant 0 : index
    %c143 = arith.constant 143 : index
    %140 = vector.load %arg16[%c0_120, %c143] : memref<24x401xbf16, #tpu.memory_space<vmem>>, vector<24x256xbf16>
    %c0_121 = arith.constant 0 : index
    %c0_122 = arith.constant 0 : index
    %141 = vector.load %arg8[%c0_121, %c0_122] : memref<2x256xbf16, #tpu.memory_space<vmem>>, vector<1x256xbf16>
    %142 = vector.broadcast %141 : vector<1x256xbf16> to vector<24x256xbf16>
    %143 = arith.mulf %140, %142 : vector<24x256xbf16>
    %c6_123 = arith.constant 6 : index
    %c0_124 = arith.constant 0 : index
    %c0_125 = arith.constant 0 : index
    %144 = vector.load %arg7[%c6_123, %c0_124, %c0_125] : memref<9x24x24xbf16, #tpu.memory_space<vmem>>, vector<1x24x24xbf16>
    %145 = vector.shape_cast %144 : vector<1x24x24xbf16> to vector<24x24xbf16>
    %cst_126 = arith.constant dense<0.000000e+00> : vector<24x256xf32>
    %146 = tpu.matmul %145, %143, %cst_126 {dimension_numbers = #tpu.dot_dimension_numbers<[1], [0], [0], [1], [0, 0, 1, 1], [], []>} : vector<24x24xbf16>, vector<24x256xbf16>, vector<24x256xf32> -> vector<24x256xf32>
    %147 = arith.addf %139, %146 : vector<24x256xf32>
    %c0_127 = arith.constant 0 : index
    %c144 = arith.constant 144 : index
    %148 = vector.load %arg16[%c0_127, %c144] : memref<24x401xbf16, #tpu.memory_space<vmem>>, vector<24x256xbf16>
    %c7_128 = arith.constant 7 : index
    %c0_129 = arith.constant 0 : index
    %c0_130 = arith.constant 0 : index
    %149 = vector.load %arg7[%c7_128, %c0_129, %c0_130] : memref<9x24x24xbf16, #tpu.memory_space<vmem>>, vector<1x24x24xbf16>
    %150 = vector.shape_cast %149 : vector<1x24x24xbf16> to vector<24x24xbf16>
    %cst_131 = arith.constant dense<0.000000e+00> : vector<24x256xf32>
    %151 = tpu.matmul %150, %148, %cst_131 {dimension_numbers = #tpu.dot_dimension_numbers<[1], [0], [0], [1], [0, 0, 1, 1], [], []>} : vector<24x24xbf16>, vector<24x256xbf16>, vector<24x256xf32> -> vector<24x256xf32>
    %152 = arith.addf %147, %151 : vector<24x256xf32>
    %c0_132 = arith.constant 0 : index
    %c145 = arith.constant 145 : index
    %153 = vector.load %arg16[%c0_132, %c145] : memref<24x401xbf16, #tpu.memory_space<vmem>>, vector<24x256xbf16>
    %c1_133 = arith.constant 1 : index
    %c0_134 = arith.constant 0 : index
    %154 = vector.load %arg8[%c1_133, %c0_134] : memref<2x256xbf16, #tpu.memory_space<vmem>>, vector<1x256xbf16>
    %155 = vector.broadcast %154 : vector<1x256xbf16> to vector<24x256xbf16>
    %156 = arith.mulf %153, %155 : vector<24x256xbf16>
    %c8_135 = arith.constant 8 : index
    %c0_136 = arith.constant 0 : index
    %c0_137 = arith.constant 0 : index
    %157 = vector.load %arg7[%c8_135, %c0_136, %c0_137] : memref<9x24x24xbf16, #tpu.memory_space<vmem>>, vector<1x24x24xbf16>
    %158 = vector.shape_cast %157 : vector<1x24x24xbf16> to vector<24x24xbf16>
    %cst_138 = arith.constant dense<0.000000e+00> : vector<24x256xf32>
    %159 = tpu.matmul %158, %156, %cst_138 {dimension_numbers = #tpu.dot_dimension_numbers<[1], [0], [0], [1], [0, 0, 1, 1], [], []>} : vector<24x24xbf16>, vector<24x256xbf16>, vector<24x256xf32> -> vector<24x256xf32>
    %160 = arith.addf %152, %159 : vector<24x256xf32>
    %cst_139 = arith.constant 0.000000e+00 : f32
    %cst_140 = arith.constant 6.000000e+00 : f32
    %161 = vector.broadcast %cst_139 : f32 to vector<24x256xf32>
    %162 = arith.maximumf %161, %160 : vector<24x256xf32>
    %163 = vector.broadcast %cst_140 : f32 to vector<24x256xf32>
    %164 = arith.minimumf %163, %162 : vector<24x256xf32>
    %c0_141 = arith.constant 0 : index
    %c0_142 = arith.constant 0 : index
    %165 = vector.load %arg9[%c0_141, %c0_142] : memref<12x24xbf16, #tpu.memory_space<vmem>>, vector<12x24xbf16>
    %166 = arith.truncf %164 : vector<24x256xf32> to vector<24x256xbf16>
    %cst_143 = arith.constant dense<0.000000e+00> : vector<12x256xf32>
    %167 = tpu.matmul %165, %166, %cst_143 {dimension_numbers = #tpu.dot_dimension_numbers<[1], [0], [0], [1], [0, 0, 1, 1], [], []>} : vector<12x24xbf16>, vector<24x256xbf16>, vector<12x256xf32> -> vector<12x256xf32>
    %cst_144 = arith.constant 0.000000e+00 : f32
    %cst_145 = arith.constant 6.000000e+00 : f32
    %168 = vector.broadcast %cst_144 : f32 to vector<12x256xf32>
    %169 = arith.maximumf %168, %167 : vector<12x256xf32>
    %170 = vector.broadcast %cst_145 : f32 to vector<12x256xf32>
    %171 = arith.minimumf %170, %169 : vector<12x256xf32>
    %172 = arith.truncf %171 : vector<12x256xf32> to vector<12x256xbf16>
    %c0_146 = arith.constant 0 : index
    %c0_147 = arith.constant 0 : index
    %173 = vector.load %arg10[%c0_146, %c0_147] : memref<256x1024xbf16, #tpu.memory_space<vmem>>, vector<256x1024xbf16>
    %cst_148 = arith.constant dense<0.000000e+00> : vector<12x1024xf32>
    %174 = tpu.matmul %172, %173, %cst_148 {dimension_numbers = #tpu.dot_dimension_numbers<[1], [0], [0], [1], [0, 0, 1, 1], [], []>} : vector<12x256xbf16>, vector<256x1024xbf16>, vector<12x1024xf32> -> vector<12x1024xf32>
    %cst_149 = arith.constant 0.000000e+00 : bf16
    %175 = vector.broadcast %cst_149 : bf16 to vector<12x1185xbf16>
    %c0_150 = arith.constant 0 : index
    %c0_151 = arith.constant 0 : index
    %176 = vector.load %arg17[%c0_150, %c0_151] : memref<12x1185xbf16, #tpu.memory_space<vmem>>, vector<12x1185xbf16>
    tpu.vector_store %arg17[%c0_150, %c0_151], %175 {strides = array<i32>} : memref<12x1185xbf16, #tpu.memory_space<vmem>>, vector<12x1185xbf16>,
    %177 = arith.truncf %174 : vector<12x1024xf32> to vector<12x1024xbf16>
    %c0_152 = arith.constant 0 : index
    %c128_153 = arith.constant 128 : index
    %178 = vector.load %arg17[%c0_152, %c128_153] : memref<12x1185xbf16, #tpu.memory_space<vmem>>, vector<12x1024xbf16>
    tpu.vector_store %arg17[%c0_152, %c128_153], %177 {strides = array<i32>} : memref<12x1185xbf16, #tpu.memory_space<vmem>>, vector<12x1024xbf16>,
    %cst_154 = arith.constant 0.000000e+00 : f32
    %179 = vector.broadcast %cst_154 : f32 to vector<12x1024xf32>
    %c0_155 = arith.constant 0 : index
    %c95 = arith.constant 95 : index
    %180 = vector.load %arg17[%c0_155, %c95] : memref<12x1185xbf16, #tpu.memory_space<vmem>>, vector<12x1024xbf16>
    %c0_156 = arith.constant 0 : index
    %c0_157 = arith.constant 0 : index
    %181 = vector.load %arg12[%c0_156, %c0_157] : memref<2x1024xbf16, #tpu.memory_space<vmem>>, vector<1x1024xbf16>
    %182 = vector.broadcast %181 : vector<1x1024xbf16> to vector<12x1024xbf16>
    %183 = arith.mulf %180, %182 : vector<12x1024xbf16>
    %c0_158 = arith.constant 0 : index
    %c0_159 = arith.constant 0 : index
    %c0_160 = arith.constant 0 : index
    %184 = vector.load %arg11[%c0_158, %c0_159, %c0_160] : memref<9x12x12xbf16, #tpu.memory_space<vmem>>, vector<1x12x12xbf16>
    %185 = vector.shape_cast %184 : vector<1x12x12xbf16> to vector<12x12xbf16>
    %cst_161 = arith.constant dense<0.000000e+00> : vector<12x1024xf32>
    %186 = tpu.matmul %185, %183, %cst_161 {dimension_numbers = #tpu.dot_dimension_numbers<[1], [0], [0], [1], [0, 0, 1, 1], [], []>} : vector<12x12xbf16>, vector<12x1024xbf16>, vector<12x1024xf32> -> vector<12x1024xf32>
    %187 = arith.addf %179, %186 : vector<12x1024xf32>
    %c0_162 = arith.constant 0 : index
    %c96 = arith.constant 96 : index
    %188 = vector.load %arg17[%c0_162, %c96] : memref<12x1185xbf16, #tpu.memory_space<vmem>>, vector<12x1024xbf16>
    %c1_163 = arith.constant 1 : index
    %c0_164 = arith.constant 0 : index
    %c0_165 = arith.constant 0 : index
    %189 = vector.load %arg11[%c1_163, %c0_164, %c0_165] : memref<9x12x12xbf16, #tpu.memory_space<vmem>>, vector<1x12x12xbf16>
    %190 = vector.shape_cast %189 : vector<1x12x12xbf16> to vector<12x12xbf16>
    %cst_166 = arith.constant dense<0.000000e+00> : vector<12x1024xf32>
    %191 = tpu.matmul %190, %188, %cst_166 {dimension_numbers = #tpu.dot_dimension_numbers<[1], [0], [0], [1], [0, 0, 1, 1], [], []>} : vector<12x12xbf16>, vector<12x1024xbf16>, vector<12x1024xf32> -> vector<12x1024xf32>
    %192 = arith.addf %187, %191 : vector<12x1024xf32>
    %c0_167 = arith.constant 0 : index
    %c97 = arith.constant 97 : index
    %193 = vector.load %arg17[%c0_167, %c97] : memref<12x1185xbf16, #tpu.memory_space<vmem>>, vector<12x1024xbf16>
    %c1_168 = arith.constant 1 : index
    %c0_169 = arith.constant 0 : index
    %194 = vector.load %arg12[%c1_168, %c0_169] : memref<2x1024xbf16, #tpu.memory_space<vmem>>, vector<1x1024xbf16>
    %195 = vector.broadcast %194 : vector<1x1024xbf16> to vector<12x1024xbf16>
    %196 = arith.mulf %193, %195 : vector<12x1024xbf16>
    %c2_170 = arith.constant 2 : index
    %c0_171 = arith.constant 0 : index
    %c0_172 = arith.constant 0 : index
    %197 = vector.load %arg11[%c2_170, %c0_171, %c0_172] : memref<9x12x12xbf16, #tpu.memory_space<vmem>>, vector<1x12x12xbf16>
    %198 = vector.shape_cast %197 : vector<1x12x12xbf16> to vector<12x12xbf16>
    %cst_173 = arith.constant dense<0.000000e+00> : vector<12x1024xf32>
    %199 = tpu.matmul %198, %196, %cst_173 {dimension_numbers = #tpu.dot_dimension_numbers<[1], [0], [0], [1], [0, 0, 1, 1], [], []>} : vector<12x12xbf16>, vector<12x1024xbf16>, vector<12x1024xf32> -> vector<12x1024xf32>
    %200 = arith.addf %192, %199 : vector<12x1024xf32>
    %c0_174 = arith.constant 0 : index
    %c127_175 = arith.constant 127 : index
    %201 = vector.load %arg17[%c0_174, %c127_175] : memref<12x1185xbf16, #tpu.memory_space<vmem>>, vector<12x1024xbf16>
    %c0_176 = arith.constant 0 : index
    %c0_177 = arith.constant 0 : index
    %202 = vector.load %arg12[%c0_176, %c0_177] : memref<2x1024xbf16, #tpu.memory_space<vmem>>, vector<1x1024xbf16>
    %203 = vector.broadcast %202 : vector<1x1024xbf16> to vector<12x1024xbf16>
    %204 = arith.mulf %201, %203 : vector<12x1024xbf16>
    %c3_178 = arith.constant 3 : index
    %c0_179 = arith.constant 0 : index
    %c0_180 = arith.constant 0 : index
    %205 = vector.load %arg11[%c3_178, %c0_179, %c0_180] : memref<9x12x12xbf16, #tpu.memory_space<vmem>>, vector<1x12x12xbf16>
    %206 = vector.shape_cast %205 : vector<1x12x12xbf16> to vector<12x12xbf16>
    %cst_181 = arith.constant dense<0.000000e+00> : vector<12x1024xf32>
    %207 = tpu.matmul %206, %204, %cst_181 {dimension_numbers = #tpu.dot_dimension_numbers<[1], [0], [0], [1], [0, 0, 1, 1], [], []>} : vector<12x12xbf16>, vector<12x1024xbf16>, vector<12x1024xf32> -> vector<12x1024xf32>
    %208 = arith.addf %200, %207 : vector<12x1024xf32>
    %c0_182 = arith.constant 0 : index
    %c128_183 = arith.constant 128 : index
    %209 = vector.load %arg17[%c0_182, %c128_183] : memref<12x1185xbf16, #tpu.memory_space<vmem>>, vector<12x1024xbf16>
    %c4_184 = arith.constant 4 : index
    %c0_185 = arith.constant 0 : index
    %c0_186 = arith.constant 0 : index
    %210 = vector.load %arg11[%c4_184, %c0_185, %c0_186] : memref<9x12x12xbf16, #tpu.memory_space<vmem>>, vector<1x12x12xbf16>
    %211 = vector.shape_cast %210 : vector<1x12x12xbf16> to vector<12x12xbf16>
    %cst_187 = arith.constant dense<0.000000e+00> : vector<12x1024xf32>
    %212 = tpu.matmul %211, %209, %cst_187 {dimension_numbers = #tpu.dot_dimension_numbers<[1], [0], [0], [1], [0, 0, 1, 1], [], []>} : vector<12x12xbf16>, vector<12x1024xbf16>, vector<12x1024xf32> -> vector<12x1024xf32>
    %213 = arith.addf %208, %212 : vector<12x1024xf32>
    %c0_188 = arith.constant 0 : index
    %c129_189 = arith.constant 129 : index
    %214 = vector.load %arg17[%c0_188, %c129_189] : memref<12x1185xbf16, #tpu.memory_space<vmem>>, vector<12x1024xbf16>
    %c1_190 = arith.constant 1 : index
    %c0_191 = arith.constant 0 : index
    %215 = vector.load %arg12[%c1_190, %c0_191] : memref<2x1024xbf16, #tpu.memory_space<vmem>>, vector<1x1024xbf16>
    %216 = vector.broadcast %215 : vector<1x1024xbf16> to vector<12x1024xbf16>
    %217 = arith.mulf %214, %216 : vector<12x1024xbf16>
    %c5_192 = arith.constant 5 : index
    %c0_193 = arith.constant 0 : index
    %c0_194 = arith.constant 0 : index
    %218 = vector.load %arg11[%c5_192, %c0_193, %c0_194] : memref<9x12x12xbf16, #tpu.memory_space<vmem>>, vector<1x12x12xbf16>
    %219 = vector.shape_cast %218 : vector<1x12x12xbf16> to vector<12x12xbf16>
    %cst_195 = arith.constant dense<0.000000e+00> : vector<12x1024xf32>
    %220 = tpu.matmul %219, %217, %cst_195 {dimension_numbers = #tpu.dot_dimension_numbers<[1], [0], [0], [1], [0, 0, 1, 1], [], []>} : vector<12x12xbf16>, vector<12x1024xbf16>, vector<12x1024xf32> -> vector<12x1024xf32>
    %221 = arith.addf %213, %220 : vector<12x1024xf32>
    %c0_196 = arith.constant 0 : index
    %c159 = arith.constant 159 : index
    %222 = vector.load %arg17[%c0_196, %c159] : memref<12x1185xbf16, #tpu.memory_space<vmem>>, vector<12x1024xbf16>
    %c0_197 = arith.constant 0 : index
    %c0_198 = arith.constant 0 : index
    %223 = vector.load %arg12[%c0_197, %c0_198] : memref<2x1024xbf16, #tpu.memory_space<vmem>>, vector<1x1024xbf16>
    %224 = vector.broadcast %223 : vector<1x1024xbf16> to vector<12x1024xbf16>
    %225 = arith.mulf %222, %224 : vector<12x1024xbf16>
    %c6_199 = arith.constant 6 : index
    %c0_200 = arith.constant 0 : index
    %c0_201 = arith.constant 0 : index
    %226 = vector.load %arg11[%c6_199, %c0_200, %c0_201] : memref<9x12x12xbf16, #tpu.memory_space<vmem>>, vector<1x12x12xbf16>
    %227 = vector.shape_cast %226 : vector<1x12x12xbf16> to vector<12x12xbf16>
    %cst_202 = arith.constant dense<0.000000e+00> : vector<12x1024xf32>
    %228 = tpu.matmul %227, %225, %cst_202 {dimension_numbers = #tpu.dot_dimension_numbers<[1], [0], [0], [1], [0, 0, 1, 1], [], []>} : vector<12x12xbf16>, vector<12x1024xbf16>, vector<12x1024xf32> -> vector<12x1024xf32>
    %229 = arith.addf %221, %228 : vector<12x1024xf32>
    %c0_203 = arith.constant 0 : index
    %c160 = arith.constant 160 : index
    %230 = vector.load %arg17[%c0_203, %c160] : memref<12x1185xbf16, #tpu.memory_space<vmem>>, vector<12x1024xbf16>
    %c7_204 = arith.constant 7 : index
    %c0_205 = arith.constant 0 : index
    %c0_206 = arith.constant 0 : index
    %231 = vector.load %arg11[%c7_204, %c0_205, %c0_206] : memref<9x12x12xbf16, #tpu.memory_space<vmem>>, vector<1x12x12xbf16>
    %232 = vector.shape_cast %231 : vector<1x12x12xbf16> to vector<12x12xbf16>
    %cst_207 = arith.constant dense<0.000000e+00> : vector<12x1024xf32>
    %233 = tpu.matmul %232, %230, %cst_207 {dimension_numbers = #tpu.dot_dimension_numbers<[1], [0], [0], [1], [0, 0, 1, 1], [], []>} : vector<12x12xbf16>, vector<12x1024xbf16>, vector<12x1024xf32> -> vector<12x1024xf32>
    %234 = arith.addf %229, %233 : vector<12x1024xf32>
    %c0_208 = arith.constant 0 : index
    %c161 = arith.constant 161 : index
    %235 = vector.load %arg17[%c0_208, %c161] : memref<12x1185xbf16, #tpu.memory_space<vmem>>, vector<12x1024xbf16>
    %c1_209 = arith.constant 1 : index
    %c0_210 = arith.constant 0 : index
    %236 = vector.load %arg12[%c1_209, %c0_210] : memref<2x1024xbf16, #tpu.memory_space<vmem>>, vector<1x1024xbf16>
    %237 = vector.broadcast %236 : vector<1x1024xbf16> to vector<12x1024xbf16>
    %238 = arith.mulf %235, %237 : vector<12x1024xbf16>
    %c8_211 = arith.constant 8 : index
    %c0_212 = arith.constant 0 : index
    %c0_213 = arith.constant 0 : index
    %239 = vector.load %arg11[%c8_211, %c0_212, %c0_213] : memref<9x12x12xbf16, #tpu.memory_space<vmem>>, vector<1x12x12xbf16>
    %240 = vector.shape_cast %239 : vector<1x12x12xbf16> to vector<12x12xbf16>
    %cst_214 = arith.constant dense<0.000000e+00> : vector<12x1024xf32>
    %241 = tpu.matmul %240, %238, %cst_214 {dimension_numbers = #tpu.dot_dimension_numbers<[1], [0], [0], [1], [0, 0, 1, 1], [], []>} : vector<12x12xbf16>, vector<12x1024xbf16>, vector<12x1024xf32> -> vector<12x1024xf32>
    %242 = arith.addf %234, %241 : vector<12x1024xf32>
    %cst_215 = arith.constant 0.000000e+00 : f32
    %cst_216 = arith.constant 6.000000e+00 : f32
    %243 = vector.broadcast %cst_215 : f32 to vector<12x1024xf32>
    %244 = arith.maximumf %243, %242 : vector<12x1024xf32>
    %245 = vector.broadcast %cst_216 : f32 to vector<12x1024xf32>
    %246 = arith.minimumf %245, %244 : vector<12x1024xf32>
    %c0_217 = arith.constant 0 : index
    %c0_218 = arith.constant 0 : index
    %247 = vector.load %arg13[%c0_217, %c0_218] : memref<6x12xbf16, #tpu.memory_space<vmem>>, vector<6x12xbf16>
    %248 = arith.truncf %246 : vector<12x1024xf32> to vector<12x1024xbf16>
    %cst_219 = arith.constant dense<0.000000e+00> : vector<6x1024xf32>
    %249 = tpu.matmul %247, %248, %cst_219 {dimension_numbers = #tpu.dot_dimension_numbers<[1], [0], [0], [1], [0, 0, 1, 1], [], []>} : vector<6x12xbf16>, vector<12x1024xbf16>, vector<6x1024xf32> -> vector<6x1024xf32>
    %cst_220 = arith.constant 0.000000e+00 : f32
    %cst_221 = arith.constant 6.000000e+00 : f32
    %250 = vector.broadcast %cst_220 : f32 to vector<6x1024xf32>
    %251 = arith.maximumf %250, %249 : vector<6x1024xf32>
    %252 = vector.broadcast %cst_221 : f32 to vector<6x1024xf32>
    %253 = arith.minimumf %252, %251 : vector<6x1024xf32>
    %c0_222 = arith.constant 0 : index
    %c0_223 = arith.constant 0 : index
    %254 = vector.load %arg14[%c0_222, %c0_223] : memref<6x1024xf32, #tpu.memory_space<vmem>>, vector<6x1024xf32>
    tpu.vector_store %arg14[%c0_222, %c0_223], %253 {strides = array<i32>} : memref<6x1024xf32, #tpu.memory_space<vmem>>, vector<6x1024xf32>,
    return
  }
}

module attributes {stable_mosaic.version = 11 : i64} {
  func.func @_upsample_kernel(%arg0: memref<192x32xf32, #tpu.memory_space<vmem>>, %arg1: memref<32x64xf32, #tpu.memory_space<vmem>>, %arg2: memref<384x192xf32, #tpu.memory_space<vmem>>, %arg3: memref<384x64xf32, #tpu.memory_space<vmem>>) attributes {dimension_semantics = [], scalar_prefetch = 0 : i64, scratch_operands = 0 : i64, tpu.core_type = #tpu.core_type<tc>} {
    %c0 = arith.constant 0 : index
    %c0_0 = arith.constant 0 : index
    %0 = vector.load %arg2[%c0, %c0_0] : memref<384x192xf32, #tpu.memory_space<vmem>>, vector<384x192xf32>
    %c0_1 = arith.constant 0 : index
    %c0_2 = arith.constant 0 : index
    %1 = vector.load %arg0[%c0_1, %c0_2] : memref<192x32xf32, #tpu.memory_space<vmem>>, vector<192x32xf32>
    %cst = arith.constant dense<0.000000e+00> : vector<384x32xf32>
    %2 = tpu.matmul %0, %1, %cst {dimension_numbers = #tpu.dot_dimension_numbers<[1], [0], [0], [1], [0, 0, 1, 1], [], []>} : vector<384x192xf32>, vector<192x32xf32>, vector<384x32xf32> -> vector<384x32xf32>
    %c0_3 = arith.constant 0 : index
    %c0_4 = arith.constant 0 : index
    %3 = vector.load %arg1[%c0_3, %c0_4] : memref<32x64xf32, #tpu.memory_space<vmem>>, vector<32x64xf32>
    %cst_5 = arith.constant dense<0.000000e+00> : vector<384x64xf32>
    %4 = tpu.matmul %2, %3, %cst_5 {dimension_numbers = #tpu.dot_dimension_numbers<[1], [0], [0], [1], [0, 0, 1, 1], [], []>} : vector<384x32xf32>, vector<32x64xf32>, vector<384x64xf32> -> vector<384x64xf32>
    %c0_6 = arith.constant 0 : index
    %c0_7 = arith.constant 0 : index
    %5 = vector.load %arg3[%c0_6, %c0_7] : memref<384x64xf32, #tpu.memory_space<vmem>>, vector<384x64xf32>
    tpu.vector_store %arg3[%c0_6, %c0_7], %4 {strides = array<i32>} : memref<384x64xf32, #tpu.memory_space<vmem>>, vector<384x64xf32>,
    return
  }
}

module attributes {stable_mosaic.version = 11 : i64} {
  func.func @_conv_block_kernel(%arg0: memref<6x4096xf32, #tpu.memory_space<vmem>>, %arg1: memref<9x3x6xbf16, #tpu.memory_space<vmem>>, %arg2: memref<2x4096xbf16, #tpu.memory_space<vmem>>, %arg3: memref<3x4096xf32, #tpu.memory_space<vmem>>, %arg4: memref<6x4289xbf16, #tpu.memory_space<vmem>>) attributes {dimension_semantics = [], scalar_prefetch = 0 : i64, scratch_operands = 1 : i64, tpu.core_type = #tpu.core_type<tc>} {
    %c0 = arith.constant 0 : index
    %c0_0 = arith.constant 0 : index
    %0 = vector.load %arg0[%c0, %c0_0] : memref<6x4096xf32, #tpu.memory_space<vmem>>, vector<6x4096xf32>
    %cst = arith.constant 0.000000e+00 : bf16
    %1 = vector.broadcast %cst : bf16 to vector<6x4289xbf16>
    %c0_1 = arith.constant 0 : index
    %c0_2 = arith.constant 0 : index
    %2 = vector.load %arg4[%c0_1, %c0_2] : memref<6x4289xbf16, #tpu.memory_space<vmem>>, vector<6x4289xbf16>
    tpu.vector_store %arg4[%c0_1, %c0_2], %1 {strides = array<i32>} : memref<6x4289xbf16, #tpu.memory_space<vmem>>, vector<6x4289xbf16>,
    %3 = arith.truncf %0 : vector<6x4096xf32> to vector<6x4096xbf16>
    %c0_3 = arith.constant 0 : index
    %c128 = arith.constant 128 : index
    %4 = vector.load %arg4[%c0_3, %c128] : memref<6x4289xbf16, #tpu.memory_space<vmem>>, vector<6x4096xbf16>
    tpu.vector_store %arg4[%c0_3, %c128], %3 {strides = array<i32>} : memref<6x4289xbf16, #tpu.memory_space<vmem>>, vector<6x4096xbf16>,
    %cst_4 = arith.constant 0.000000e+00 : f32
    %5 = vector.broadcast %cst_4 : f32 to vector<3x4096xf32>
    %c0_5 = arith.constant 0 : index
    %c63 = arith.constant 63 : index
    %6 = vector.load %arg4[%c0_5, %c63] : memref<6x4289xbf16, #tpu.memory_space<vmem>>, vector<6x4096xbf16>
    %c0_6 = arith.constant 0 : index
    %c0_7 = arith.constant 0 : index
    %7 = vector.load %arg2[%c0_6, %c0_7] : memref<2x4096xbf16, #tpu.memory_space<vmem>>, vector<1x4096xbf16>
    %8 = vector.broadcast %7 : vector<1x4096xbf16> to vector<6x4096xbf16>
    %9 = arith.mulf %6, %8 : vector<6x4096xbf16>
    %c0_8 = arith.constant 0 : index
    %c0_9 = arith.constant 0 : index
    %c0_10 = arith.constant 0 : index
    %10 = vector.load %arg1[%c0_8, %c0_9, %c0_10] : memref<9x3x6xbf16, #tpu.memory_space<vmem>>, vector<1x3x6xbf16>
    %11 = vector.shape_cast %10 : vector<1x3x6xbf16> to vector<3x6xbf16>
    %cst_11 = arith.constant dense<0.000000e+00> : vector<3x4096xf32>
    %12 = tpu.matmul %11, %9, %cst_11 {dimension_numbers = #tpu.dot_dimension_numbers<[1], [0], [0], [1], [0, 0, 1, 1], [], []>} : vector<3x6xbf16>, vector<6x4096xbf16>, vector<3x4096xf32> -> vector<3x4096xf32>
    %13 = arith.addf %5, %12 : vector<3x4096xf32>
    %c0_12 = arith.constant 0 : index
    %c64 = arith.constant 64 : index
    %14 = vector.load %arg4[%c0_12, %c64] : memref<6x4289xbf16, #tpu.memory_space<vmem>>, vector<6x4096xbf16>
    %c1 = arith.constant 1 : index
    %c0_13 = arith.constant 0 : index
    %c0_14 = arith.constant 0 : index
    %15 = vector.load %arg1[%c1, %c0_13, %c0_14] : memref<9x3x6xbf16, #tpu.memory_space<vmem>>, vector<1x3x6xbf16>
    %16 = vector.shape_cast %15 : vector<1x3x6xbf16> to vector<3x6xbf16>
    %cst_15 = arith.constant dense<0.000000e+00> : vector<3x4096xf32>
    %17 = tpu.matmul %16, %14, %cst_15 {dimension_numbers = #tpu.dot_dimension_numbers<[1], [0], [0], [1], [0, 0, 1, 1], [], []>} : vector<3x6xbf16>, vector<6x4096xbf16>, vector<3x4096xf32> -> vector<3x4096xf32>
    %18 = arith.addf %13, %17 : vector<3x4096xf32>
    %c0_16 = arith.constant 0 : index
    %c65 = arith.constant 65 : index
    %19 = vector.load %arg4[%c0_16, %c65] : memref<6x4289xbf16, #tpu.memory_space<vmem>>, vector<6x4096xbf16>
    %c1_17 = arith.constant 1 : index
    %c0_18 = arith.constant 0 : index
    %20 = vector.load %arg2[%c1_17, %c0_18] : memref<2x4096xbf16, #tpu.memory_space<vmem>>, vector<1x4096xbf16>
    %21 = vector.broadcast %20 : vector<1x4096xbf16> to vector<6x4096xbf16>
    %22 = arith.mulf %19, %21 : vector<6x4096xbf16>
    %c2 = arith.constant 2 : index
    %c0_19 = arith.constant 0 : index
    %c0_20 = arith.constant 0 : index
    %23 = vector.load %arg1[%c2, %c0_19, %c0_20] : memref<9x3x6xbf16, #tpu.memory_space<vmem>>, vector<1x3x6xbf16>
    %24 = vector.shape_cast %23 : vector<1x3x6xbf16> to vector<3x6xbf16>
    %cst_21 = arith.constant dense<0.000000e+00> : vector<3x4096xf32>
    %25 = tpu.matmul %24, %22, %cst_21 {dimension_numbers = #tpu.dot_dimension_numbers<[1], [0], [0], [1], [0, 0, 1, 1], [], []>} : vector<3x6xbf16>, vector<6x4096xbf16>, vector<3x4096xf32> -> vector<3x4096xf32>
    %26 = arith.addf %18, %25 : vector<3x4096xf32>
    %c0_22 = arith.constant 0 : index
    %c127 = arith.constant 127 : index
    %27 = vector.load %arg4[%c0_22, %c127] : memref<6x4289xbf16, #tpu.memory_space<vmem>>, vector<6x4096xbf16>
    %c0_23 = arith.constant 0 : index
    %c0_24 = arith.constant 0 : index
    %28 = vector.load %arg2[%c0_23, %c0_24] : memref<2x4096xbf16, #tpu.memory_space<vmem>>, vector<1x4096xbf16>
    %29 = vector.broadcast %28 : vector<1x4096xbf16> to vector<6x4096xbf16>
    %30 = arith.mulf %27, %29 : vector<6x4096xbf16>
    %c3 = arith.constant 3 : index
    %c0_25 = arith.constant 0 : index
    %c0_26 = arith.constant 0 : index
    %31 = vector.load %arg1[%c3, %c0_25, %c0_26] : memref<9x3x6xbf16, #tpu.memory_space<vmem>>, vector<1x3x6xbf16>
    %32 = vector.shape_cast %31 : vector<1x3x6xbf16> to vector<3x6xbf16>
    %cst_27 = arith.constant dense<0.000000e+00> : vector<3x4096xf32>
    %33 = tpu.matmul %32, %30, %cst_27 {dimension_numbers = #tpu.dot_dimension_numbers<[1], [0], [0], [1], [0, 0, 1, 1], [], []>} : vector<3x6xbf16>, vector<6x4096xbf16>, vector<3x4096xf32> -> vector<3x4096xf32>
    %34 = arith.addf %26, %33 : vector<3x4096xf32>
    %c0_28 = arith.constant 0 : index
    %c128_29 = arith.constant 128 : index
    %35 = vector.load %arg4[%c0_28, %c128_29] : memref<6x4289xbf16, #tpu.memory_space<vmem>>, vector<6x4096xbf16>
    %c4 = arith.constant 4 : index
    %c0_30 = arith.constant 0 : index
    %c0_31 = arith.constant 0 : index
    %36 = vector.load %arg1[%c4, %c0_30, %c0_31] : memref<9x3x6xbf16, #tpu.memory_space<vmem>>, vector<1x3x6xbf16>
    %37 = vector.shape_cast %36 : vector<1x3x6xbf16> to vector<3x6xbf16>
    %cst_32 = arith.constant dense<0.000000e+00> : vector<3x4096xf32>
    %38 = tpu.matmul %37, %35, %cst_32 {dimension_numbers = #tpu.dot_dimension_numbers<[1], [0], [0], [1], [0, 0, 1, 1], [], []>} : vector<3x6xbf16>, vector<6x4096xbf16>, vector<3x4096xf32> -> vector<3x4096xf32>
    %39 = arith.addf %34, %38 : vector<3x4096xf32>
    %c0_33 = arith.constant 0 : index
    %c129 = arith.constant 129 : index
    %40 = vector.load %arg4[%c0_33, %c129] : memref<6x4289xbf16, #tpu.memory_space<vmem>>, vector<6x4096xbf16>
    %c1_34 = arith.constant 1 : index
    %c0_35 = arith.constant 0 : index
    %41 = vector.load %arg2[%c1_34, %c0_35] : memref<2x4096xbf16, #tpu.memory_space<vmem>>, vector<1x4096xbf16>
    %42 = vector.broadcast %41 : vector<1x4096xbf16> to vector<6x4096xbf16>
    %43 = arith.mulf %40, %42 : vector<6x4096xbf16>
    %c5 = arith.constant 5 : index
    %c0_36 = arith.constant 0 : index
    %c0_37 = arith.constant 0 : index
    %44 = vector.load %arg1[%c5, %c0_36, %c0_37] : memref<9x3x6xbf16, #tpu.memory_space<vmem>>, vector<1x3x6xbf16>
    %45 = vector.shape_cast %44 : vector<1x3x6xbf16> to vector<3x6xbf16>
    %cst_38 = arith.constant dense<0.000000e+00> : vector<3x4096xf32>
    %46 = tpu.matmul %45, %43, %cst_38 {dimension_numbers = #tpu.dot_dimension_numbers<[1], [0], [0], [1], [0, 0, 1, 1], [], []>} : vector<3x6xbf16>, vector<6x4096xbf16>, vector<3x4096xf32> -> vector<3x4096xf32>
    %47 = arith.addf %39, %46 : vector<3x4096xf32>
    %c0_39 = arith.constant 0 : index
    %c191 = arith.constant 191 : index
    %48 = vector.load %arg4[%c0_39, %c191] : memref<6x4289xbf16, #tpu.memory_space<vmem>>, vector<6x4096xbf16>
    %c0_40 = arith.constant 0 : index
    %c0_41 = arith.constant 0 : index
    %49 = vector.load %arg2[%c0_40, %c0_41] : memref<2x4096xbf16, #tpu.memory_space<vmem>>, vector<1x4096xbf16>
    %50 = vector.broadcast %49 : vector<1x4096xbf16> to vector<6x4096xbf16>
    %51 = arith.mulf %48, %50 : vector<6x4096xbf16>
    %c6 = arith.constant 6 : index
    %c0_42 = arith.constant 0 : index
    %c0_43 = arith.constant 0 : index
    %52 = vector.load %arg1[%c6, %c0_42, %c0_43] : memref<9x3x6xbf16, #tpu.memory_space<vmem>>, vector<1x3x6xbf16>
    %53 = vector.shape_cast %52 : vector<1x3x6xbf16> to vector<3x6xbf16>
    %cst_44 = arith.constant dense<0.000000e+00> : vector<3x4096xf32>
    %54 = tpu.matmul %53, %51, %cst_44 {dimension_numbers = #tpu.dot_dimension_numbers<[1], [0], [0], [1], [0, 0, 1, 1], [], []>} : vector<3x6xbf16>, vector<6x4096xbf16>, vector<3x4096xf32> -> vector<3x4096xf32>
    %55 = arith.addf %47, %54 : vector<3x4096xf32>
    %c0_45 = arith.constant 0 : index
    %c192 = arith.constant 192 : index
    %56 = vector.load %arg4[%c0_45, %c192] : memref<6x4289xbf16, #tpu.memory_space<vmem>>, vector<6x4096xbf16>
    %c7 = arith.constant 7 : index
    %c0_46 = arith.constant 0 : index
    %c0_47 = arith.constant 0 : index
    %57 = vector.load %arg1[%c7, %c0_46, %c0_47] : memref<9x3x6xbf16, #tpu.memory_space<vmem>>, vector<1x3x6xbf16>
    %58 = vector.shape_cast %57 : vector<1x3x6xbf16> to vector<3x6xbf16>
    %cst_48 = arith.constant dense<0.000000e+00> : vector<3x4096xf32>
    %59 = tpu.matmul %58, %56, %cst_48 {dimension_numbers = #tpu.dot_dimension_numbers<[1], [0], [0], [1], [0, 0, 1, 1], [], []>} : vector<3x6xbf16>, vector<6x4096xbf16>, vector<3x4096xf32> -> vector<3x4096xf32>
    %60 = arith.addf %55, %59 : vector<3x4096xf32>
    %c0_49 = arith.constant 0 : index
    %c193 = arith.constant 193 : index
    %61 = vector.load %arg4[%c0_49, %c193] : memref<6x4289xbf16, #tpu.memory_space<vmem>>, vector<6x4096xbf16>
    %c1_50 = arith.constant 1 : index
    %c0_51 = arith.constant 0 : index
    %62 = vector.load %arg2[%c1_50, %c0_51] : memref<2x4096xbf16, #tpu.memory_space<vmem>>, vector<1x4096xbf16>
    %63 = vector.broadcast %62 : vector<1x4096xbf16> to vector<6x4096xbf16>
    %64 = arith.mulf %61, %63 : vector<6x4096xbf16>
    %c8 = arith.constant 8 : index
    %c0_52 = arith.constant 0 : index
    %c0_53 = arith.constant 0 : index
    %65 = vector.load %arg1[%c8, %c0_52, %c0_53] : memref<9x3x6xbf16, #tpu.memory_space<vmem>>, vector<1x3x6xbf16>
    %66 = vector.shape_cast %65 : vector<1x3x6xbf16> to vector<3x6xbf16>
    %cst_54 = arith.constant dense<0.000000e+00> : vector<3x4096xf32>
    %67 = tpu.matmul %66, %64, %cst_54 {dimension_numbers = #tpu.dot_dimension_numbers<[1], [0], [0], [1], [0, 0, 1, 1], [], []>} : vector<3x6xbf16>, vector<6x4096xbf16>, vector<3x4096xf32> -> vector<3x4096xf32>
    %68 = arith.addf %60, %67 : vector<3x4096xf32>
    %cst_55 = arith.constant 0.000000e+00 : f32
    %cst_56 = arith.constant 6.000000e+00 : f32
    %69 = vector.broadcast %cst_55 : f32 to vector<3x4096xf32>
    %70 = arith.maximumf %69, %68 : vector<3x4096xf32>
    %71 = vector.broadcast %cst_56 : f32 to vector<3x4096xf32>
    %72 = arith.minimumf %71, %70 : vector<3x4096xf32>
    %c0_57 = arith.constant 0 : index
    %c0_58 = arith.constant 0 : index
    %73 = vector.load %arg3[%c0_57, %c0_58] : memref<3x4096xf32, #tpu.memory_space<vmem>>, vector<3x4096xf32>
    tpu.vector_store %arg3[%c0_57, %c0_58], %72 {strides = array<i32>} : memref<3x4096xf32, #tpu.memory_space<vmem>>, vector<3x4096xf32>,
    return
  }
}

</mosaic_0001>

<bundles_post_ra>
// kernel: phinect_gan_decoder.4
= control target key start
LH: loop header
LB: loop body
LE: loop exit
PB: predicated region body
PF: predicated region fallthrough
CT: control target
= control target key end

     0   :  { %v1387_v0 = vmov 0.0|0.0   ;;  %vm134_vm0 = vcmask 523264   ;;  %vm588_vm1 = vcmask 261120   ;;  %s2128_s0 = inlined_call_operand.vmem [shape: f32[192,32], index: 0, kind: input, shape index: {}]   ;;  %s2129_s2 = inlined_call_operand.vmem [shape: f32[384,192], index: 2, kind: input, shape index: {}]   ;;  %s2130_s1 = inlined_call_operand.vmem [shape: f32[32,64], index: 1, kind: input, shape index: {}]   ;;  %s2131_s3 = inlined_call_operand.vmem [shape: f32[384,64], index: 3, kind: output, shape index: {}]  }
   0x1   :  { %1318 = vmatprep.subr.bf16.mxu0 %v1387_v0  ;;  %v110_v1 = vld [vmem:[%s2128_s0] sm:$0xff]  ;;  %v111_v2 = vld [vmem:[%s2128_s0 + $0x8] sm:$0xff]  ;;  %v112_v3 = vld [vmem:[%s2128_s0 + $0x10] sm:$0xff]  ;;  %1362 = vmatprep.subr.bf16.mxu1 %v1387_v0 }
   0x2   :  { %v1319_v4 = vpack.c.bf16 %v111_v2, %v110_v1  ;;  %v113_v5 = vld [vmem:[%s2128_s0 + $0x18] sm:$0xff]  ;;  %v114_v7 = vld [vmem:[%s2128_s0 + $0x20] sm:$0xff]  ;;  %v115_v8 = vld [vmem:[%s2128_s0 + $0x28] sm:$0xff] }
   0x3   :  { %v1322_v6 = vpack.c.bf16 %v113_v5, %v112_v3  ;;  %v1325_v9 = vpack.c.bf16 %v115_v8, %v114_v7  ;;  %v116_v10 = vld [vmem:[%s2128_s0 + $0x30] sm:$0xff]  ;;  %v117_v11 = vld [vmem:[%s2128_s0 + $0x38] sm:$0xff]  ;;  %v15_v12 = vld [vmem:[%s2129_s2 + $0x8] sm:$0xff] }
   0x4   :  { %1320 = vmatpush1.bf16.msra.mxu0 %v1319_v4  ;;  %1374 = vmatpush1.bf16.msra.mxu1 %v1319_v4  ;;  %v1328_v13 = vpack.c.bf16 %v117_v11, %v116_v10  ;;  %v118_v14 = vld [vmem:[%s2128_s0 + $0x40] sm:$0xff]  ;;  %v119_v15 = vld [vmem:[%s2128_s0 + $0x48] sm:$0xff]  ;;  %v120_v17 = vld [vmem:[%s2128_s0 + $0x50] sm:$0xff] }
   0x5   :  { %1321 = vmatprep.subr.bf16.mxu0 %v1387_v0  ;;  %1363 = vmatprep.subr.bf16.mxu1 %v1387_v0  ;;  %v1331_v16 = vpack.c.bf16 %v119_v15, %v118_v14  ;;  %v121_v18 = vld [vmem:[%s2128_s0 + $0x58] sm:$0xff]  ;;  %v122_v20 = vld [vmem:[%s2128_s0 + $0x60] sm:$0xff]  ;;  %v123_v21 = vld [vmem:[%s2128_s0 + $0x68] sm:$0xff] }
   0x6   :  { %1090 = vmatprep.mubr.msk.f32.mxu0 %vm134_vm0, %v15_v12  ;;  %v1334_v19 = vpack.c.bf16 %v121_v18, %v120_v17  ;;  %v1337_v22 = vpack.c.bf16 %v123_v21, %v122_v20  ;;  %v124_v23 = vld [vmem:[%s2128_s0 + $0x70] sm:$0xff]  ;;  %v125_v24 = vld [vmem:[%s2128_s0 + $0x78] sm:$0xff]  ;;  %v126_v26 = vld [vmem:[%s2128_s0 + $0x80] sm:$0xff] }
   0x7   :  { %v1340_v25 = vpack.c.bf16 %v125_v24, %v124_v23  ;;  %v127_v27 = vld [vmem:[%s2128_s0 + $0x88] sm:$0xff]  ;;  %v128_v29 = vld [vmem:[%s2128_s0 + $0x90] sm:$0xff]  ;;  %v129_v30 = vld [vmem:[%s2128_s0 + $0x98] sm:$0xff] }
   0x8   :  { %1323 = vmatpush1.bf16.msra.mxu0 %v1322_v6  ;;  %1375 = vmatpush1.bf16.msra.mxu1 %v1322_v6  ;;  %v1343_v28 = vpack.c.bf16 %v127_v27, %v126_v26  ;;  %v1346_v31 = vpack.c.bf16 %v129_v30, %v128_v29  ;;  %v130_v32 = vld [vmem:[%s2128_s0 + $0xa0] sm:$0xff]  ;;  %v131_v33 = vld [vmem:[%s2128_s0 + $0xa8] sm:$0xff]  ;;  %v132_v36 = vld [vmem:[%s2128_s0 + $0xb0] sm:$0xff] }
   0x9   :  { %1324 = vmatprep.subr.bf16.mxu0 %v1387_v0  ;;  %1364 = vmatprep.subr.bf16.mxu1 %v1387_v0  ;;  %v87_v34 = vld [vmem:[%s2129_s2 + $0x248] sm:$0xff]  ;;  %v1349_v35 = vpack.c.bf16 %v131_v33, %v130_v32  ;;  %v133_v37 = vld [vmem:[%s2128_s0 + $0xb8] sm:$0xff]  ;;  %v14_v39 = vld [vmem:[%s2129_s2] sm:$0xff] }
   0xa   :  { %1126 = vmatprep.mubr.msk.f32.mxu1 %vm134_vm0, %v87_v34  ;;  %v1352_v38 = vpack.c.bf16 %v133_v37, %v132_v36  ;;  %v86_v40 = vld [vmem:[%s2129_s2 + $0x240] sm:$0xff]  ;;  %v17_v41 = vld [vmem:[%s2129_s2 + $0x18] sm:$0xff]  ;;  %v16_v43 = vld [vmem:[%s2129_s2 + $0x10] sm:$0xff] }
   0xb   :  { %v89_v42 = vld [vmem:[%s2129_s2 + $0x258] sm:$0xff]  ;;  %v88_v44 = vld [vmem:[%s2129_s2 + $0x250] sm:$0xff]  ;;  %v19_v45 = vld [vmem:[%s2129_s2 + $0x28] sm:$0xff] }
   0xc   :  { %1326 = vmatpush1.bf16.msra.mxu0 %v1325_v9  ;;  %1376 = vmatpush1.bf16.msra.mxu1 %v1325_v9  ;;  %v91_v46 = vld [vmem:[%s2129_s2 + $0x268] sm:$0xff]  ;;  %v18_v47 = vld [vmem:[%s2129_s2 + $0x20] sm:$0xff]  ;;  %v21_v49 = vld [vmem:[%s2129_s2 + $0x38] sm:$0xff] }
   0xd   :  { %1327 = vmatprep.subr.bf16.mxu0 %v1387_v0  ;;  %1365 = vmatprep.subr.bf16.mxu1 %v1387_v0  ;;  %v90_v48 = vld [vmem:[%s2129_s2 + $0x260] sm:$0xff]  ;;  %v93_v50 = vld [vmem:[%s2129_s2 + $0x278] sm:$0xff]  ;;  %v20_v51 = vld [vmem:[%s2129_s2 + $0x30] sm:$0xff] }
   0xe   :  { %v92_v52 = vld [vmem:[%s2129_s2 + $0x270] sm:$0xff]  ;;  %v23_v53 = vld [vmem:[%s2129_s2 + $0x48] sm:$0xff]  ;;  %v22_v55 = vld [vmem:[%s2129_s2 + $0x40] sm:$0xff] }
   0xf   :  { %v95_v54 = vld [vmem:[%s2129_s2 + $0x288] sm:$0xff]  ;;  %v94_v56 = vld [vmem:[%s2129_s2 + $0x280] sm:$0xff]  ;;  %v25_v57 = vld [vmem:[%s2129_s2 + $0x58] sm:$0xff] }
  0x10   :  { %1329 = vmatpush1.bf16.msra.mxu0 %v1328_v13  ;;  %1377 = vmatpush1.bf16.msra.mxu1 %v1328_v13  ;;  %v97_v58 = vld [vmem:[%s2129_s2 + $0x298] sm:$0xff]  ;;  %v584_v59 = vld [vmem:[%s2130_s1] sm:$0xff]  ;;  %v585_v60 = vld [vmem:[%s2130_s1 + $0x8] sm:$0xff] }
  0x11   :  { %1330 = vmatprep.subr.bf16.mxu0 %v1387_v0  ;;  %1366 = vmatprep.subr.bf16.mxu1 %v1387_v0  ;;  %v24_v61 = vld [vmem:[%s2129_s2 + $0x50] sm:$0xff]  ;;  %v1354_v63 = vpack.c.bf16 %v585_v60, %v584_v59  ;;  %v99_v1 = vld [vmem:[%s2129_s2 + $0x2a8] sm:$0xff]  ;;  %v26_v2 = vld [vmem:[%s2129_s2 + $0x60] sm:$0xff] }
  0x12   :  { %v96_v62 = vld [vmem:[%s2129_s2 + $0x290] sm:$0xff]  ;;  %v98_v3 = vld [vmem:[%s2129_s2 + $0x2a0] sm:$0xff]  ;;  %v29_v4 = vld [vmem:[%s2129_s2 + $0x78] sm:$0xff] }
  0x13   :  { %v101_v5 = vld [vmem:[%s2129_s2 + $0x2b8] sm:$0xff]  ;;  %v28_v6 = vld [vmem:[%s2129_s2 + $0x70] sm:$0xff]  ;;  %v31_v8 = vld [vmem:[%s2129_s2 + $0x88] sm:$0xff] }
  0x14   :  { %1332 = vmatpush1.bf16.msra.mxu0 %v1331_v16  ;;  %1378 = vmatpush1.bf16.msra.mxu1 %v1331_v16  ;;  %v100_v7 = vld [vmem:[%s2129_s2 + $0x2b0] sm:$0xff]  ;;  %v103_v9 = vld [vmem:[%s2129_s2 + $0x2c8] sm:$0xff]  ;;  %v30_v10 = vld [vmem:[%s2129_s2 + $0x80] sm:$0xff] }
  0x15   :  { %1333 = vmatprep.subr.bf16.mxu0 %v1387_v0  ;;  %1367 = vmatprep.subr.bf16.mxu1 %v1387_v0  ;;  %v102_v11 = vld [vmem:[%s2129_s2 + $0x2c0] sm:$0xff]  ;;  %v33_v12 = vld [vmem:[%s2129_s2 + $0x98] sm:$0xff]  ;;  %v32_v14 = vld [vmem:[%s2129_s2 + $0x90] sm:$0xff] }
  0x16   :  { %v105_v13 = vld [vmem:[%s2129_s2 + $0x2d8] sm:$0xff]  ;;  %v104_v15 = vld [vmem:[%s2129_s2 + $0x2d0] sm:$0xff]  ;;  %v35_v16 = vld [vmem:[%s2129_s2 + $0xa8] sm:$0xff] }
  0x17   :  { %v107_v17 = vld [vmem:[%s2129_s2 + $0x2e8] sm:$0xff]  ;;  %v34_v18 = vld [vmem:[%s2129_s2 + $0xa0] sm:$0xff]  ;;  %v37_v20 = vld [vmem:[%s2129_s2 + $0xb8] sm:$0xff] }
  0x18   :  { %1335 = vmatpush1.bf16.msra.mxu0 %v1334_v19  ;;  %1379 = vmatpush1.bf16.msra.mxu1 %v1334_v19  ;;  %v106_v19 = vld [vmem:[%s2129_s2 + $0x2e0] sm:$0xff]  ;;  %v109_v21 = vld [vmem:[%s2129_s2 + $0x2f8] sm:$0xff]  ;;  %v108_v23 = vld [vmem:[%s2129_s2 + $0x2f0] sm:$0xff] }
  0x19   :  { %1336 = vmatprep.subr.bf16.mxu0 %v1387_v0  ;;  %1368 = vmatprep.subr.bf16.mxu1 %v1387_v0  ;;  %v39_v24 = vld [vmem:[%s2129_s2 + $0xc8] sm:$0xff]  ;;  %v41_v26 = vld [vmem:[%s2129_s2 + $0xd8] sm:$0xff]  ;;  %v40_v27 = vld [vmem:[%s2129_s2 + $0xd0] sm:$0xff] }
  0x1a   :  { %v42_v29 = vld [vmem:[%s2129_s2 + $0xe0] sm:$0xff]  ;;  %v45_v30 = vld [vmem:[%s2129_s2 + $0xf8] sm:$0xff]  ;;  %v47_v32 = vld [vmem:[%s2129_s2 + $0x108] sm:$0xff] }
  0x1b   :  { %v46_v33 = vld [vmem:[%s2129_s2 + $0x100] sm:$0xff]  ;;  %v49_v34 = vld [vmem:[%s2129_s2 + $0x118] sm:$0xff]  ;;  %v51_v36 = vld [vmem:[%s2129_s2 + $0x128] sm:$0xff] }
  0x1c   :  { %1338 = vmatpush1.bf16.msra.mxu0 %v1337_v22  ;;  %1380 = vmatpush1.bf16.msra.mxu1 %v1337_v22  ;;  %v36_v22 = vld [vmem:[%s2129_s2 + $0xb0] sm:$0xff]  ;;  %v50_v37 = vld [vmem:[%s2129_s2 + $0x120] sm:$0xff]  ;;  %v71_v59 = vld [vmem:[%s2129_s2 + $0x1c8] sm:$0xff] }
  0x1d   :  { %1339 = vmatprep.subr.bf16.mxu0 %v1387_v0  ;;  %1369 = vmatprep.subr.bf16.mxu1 %v1387_v0  ;;  %v70_v60 = vld [vmem:[%s2129_s2 + $0x1c0] sm:$0xff] }
  0x20   :  { %1341 = vmatpush1.bf16.msra.mxu0 %v1340_v25  ;;  %1381 = vmatpush1.bf16.msra.mxu1 %v1340_v25  ;;  %v38_v25 = vld [vmem:[%s2129_s2 + $0xc0] sm:$0xff] }
  0x21   :  { %1342 = vmatprep.subr.bf16.mxu0 %v1387_v0  ;;  %1370 = vmatprep.subr.bf16.mxu1 %v1387_v0 }
  0x24   :  { %1344 = vmatpush1.bf16.msra.mxu0 %v1343_v28  ;;  %1382 = vmatpush1.bf16.msra.mxu1 %v1343_v28  ;;  %v43_v28 = vld [vmem:[%s2129_s2 + $0xe8] sm:$0xff] }
  0x25   :  { %1345 = vmatprep.subr.bf16.mxu0 %v1387_v0  ;;  %1371 = vmatprep.subr.bf16.mxu1 %v1387_v0 }
  0x28   :  { %1347 = vmatpush1.bf16.msra.mxu0 %v1346_v31  ;;  %1383 = vmatpush1.bf16.msra.mxu1 %v1346_v31  ;;  %v44_v31 = vld [vmem:[%s2129_s2 + $0xf0] sm:$0xff] }
  0x29   :  { %1348 = vmatprep.subr.bf16.mxu0 %v1387_v0  ;;  %1372 = vmatprep.subr.bf16.mxu1 %v1387_v0 }
  0x2c   :  { %1350 = vmatpush1.bf16.msra.mxu0 %v1349_v35  ;;  %1384 = vmatpush1.bf16.msra.mxu1 %v1349_v35  ;;  %v48_v35 = vld [vmem:[%s2129_s2 + $0x110] sm:$0xff] }
  0x2d   :  { %1351 = vmatprep.subr.bf16.mxu0 %v1387_v0  ;;  %1373 = vmatprep.subr.bf16.mxu1 %v1387_v0  ;;  %v27_v0 = vld [vmem:[%s2129_s2 + $0x68] sm:$0xff] }
  0x30   :  { %1353 = vmatpush1.bf16.msra.mxu0 %v1352_v38  ;;  %1385 = vmatpush1.bf16.msra.mxu1 %v1352_v38  ;;  %v53_v38 = vld [vmem:[%s2129_s2 + $0x138] sm:$0xff] }
  0x31   :  { %1355 = vmatprep.subr.bf16.mxu1 %v1354_v63 }
  0x33   :  { %344 = vmatmul.mubr.f32.vlgmr.msra.gmra.mrb[0].mxu0 %v14_v39  ;;  %524 = vmatmul.mubr.f32.vlgmr.msra.gmra.mrb[0].mxu1 %v86_v40  ;;  %v52_v39 = vld [vmem:[%s2129_s2 + $0x130] sm:$0xff]  ;;  %v55_v40 = vld [vmem:[%s2129_s2 + $0x148] sm:$0xff] }
  0x34   :  { %1091 = vmatprep.mubr.msk.f32.mxu0 %vm134_vm0, %v17_v41  ;;  %1127 = vmatprep.mubr.msk.f32.mxu1 %vm134_vm0, %v89_v42  ;;  %v54_v41 = vld [vmem:[%s2129_s2 + $0x140] sm:$0xff]  ;;  %v57_v42 = vld [vmem:[%s2129_s2 + $0x158] sm:$0xff] }
  0x35   :  { %1357 = vmatpush3.bf16.msra.mxu1 %v1354_v63  ;;  %v75_v63 = vld [vmem:[%s2129_s2 + $0x1e8] sm:$0xff] }
  0x37   :  { %349 = vmatmul.mubr.f32.gmra.mrb[2].mxu0 %v16_v43  ;;  %529 = vmatmul.mubr.f32.gmra.mrb[2].mxu1 %v88_v44  ;;  %v56_v43 = vld [vmem:[%s2129_s2 + $0x150] sm:$0xff] }
  0x38   :  { %1092 = vmatprep.mubr.msk.f32.mxu0 %vm134_vm0, %v19_v45  ;;  %1128 = vmatprep.mubr.msk.f32.mxu1 %vm134_vm0, %v91_v46  ;;  %v586_v44 = vld [vmem:[%s2130_s1 + $0x10] sm:$0xff]  ;;  %v587_v45 = vld [vmem:[%s2130_s1 + $0x18] sm:$0xff]  ;;  %v59_v46 = vld [vmem:[%s2129_s2 + $0x168] sm:$0xff] }
  0x3b   :  { %354 = vmatmul.mubr.f32.gmra.mrb[4].mxu0 %v18_v47  ;;  %534 = vmatmul.mubr.f32.gmra.mrb[4].mxu1 %v90_v48  ;;  %v1358_v47 = vpack.c.bf16 %v587_v45, %v586_v44  ;;  %v58_v48 = vld [vmem:[%s2129_s2 + $0x160] sm:$0xff] }
  0x3c   :  { %1093 = vmatprep.mubr.msk.f32.mxu0 %vm134_vm0, %v21_v49  ;;  %1129 = vmatprep.mubr.msk.f32.mxu1 %vm134_vm0, %v93_v50  ;;  %v61_v49 = vld [vmem:[%s2129_s2 + $0x178] sm:$0xff]  ;;  %v60_v50 = vld [vmem:[%s2129_s2 + $0x170] sm:$0xff] }
  0x3d   :  { %1359 = vmatprep.subr.bf16.mxu1 %v1358_v47 }
  0x3e   :  { %1361 = vmatpush3.bf16.msra.mxu1 %v1358_v47 }
  0x3f   :  { %359 = vmatmul.mubr.f32.gmra.mrb[6].mxu0 %v20_v51  ;;  %539 = vmatmul.mubr.f32.gmra.mrb[6].mxu1 %v92_v52  ;;  %v63_v51 = vld [vmem:[%s2129_s2 + $0x188] sm:$0xff]  ;;  %v62_v52 = vld [vmem:[%s2129_s2 + $0x180] sm:$0xff] }
  0x40   :  { %1094 = vmatprep.mubr.msk.f32.mxu0 %vm134_vm0, %v23_v53  ;;  %1130 = vmatprep.mubr.msk.f32.mxu1 %vm134_vm0, %v95_v54  ;;  %v65_v53 = vld [vmem:[%s2129_s2 + $0x198] sm:$0xff]  ;;  %v64_v54 = vld [vmem:[%s2129_s2 + $0x190] sm:$0xff] }
  0x43   :  { %364 = vmatmul.mubr.f32.gmra.mrb[8].mxu0 %v22_v55  ;;  %544 = vmatmul.mubr.f32.gmra.mrb[8].mxu1 %v94_v56  ;;  %v67_v55 = vld [vmem:[%s2129_s2 + $0x1a8] sm:$0xff]  ;;  %v66_v56 = vld [vmem:[%s2129_s2 + $0x1a0] sm:$0xff] }
  0x44   :  { %1095 = vmatprep.mubr.msk.f32.mxu0 %vm134_vm0, %v25_v57  ;;  %1131 = vmatprep.mubr.msk.f32.mxu1 %vm134_vm0, %v97_v58  ;;  %v69_v57 = vld [vmem:[%s2129_s2 + $0x1b8] sm:$0xff]  ;;  %v68_v58 = vld [vmem:[%s2129_s2 + $0x1b0] sm:$0xff] }
  0x47   :  { %369 = vmatmul.mubr.f32.gmra.mrb[10].mxu0 %v24_v61  ;;  %549 = vmatmul.mubr.f32.gmra.mrb[10].mxu1 %v96_v62  ;;  %v73_v61 = vld [vmem:[%s2129_s2 + $0x1d8] sm:$0xff]  ;;  %v72_v62 = vld [vmem:[%s2129_s2 + $0x1d0] sm:$0xff] }
  0x48   :  { %1096 = vmatprep.mubr.msk.f32.mxu0 %vm134_vm0, %v27_v0  ;;  %1132 = vmatprep.mubr.msk.f32.mxu1 %vm134_vm0, %v99_v1  ;;  %v74_v0 = vld [vmem:[%s2129_s2 + $0x1e0] sm:$0xff]  ;;  %v77_v1 = vld [vmem:[%s2129_s2 + $0x1f8] sm:$0xff] }
  0x4b   :  { %374 = vmatmul.mubr.f32.gmra.mrb[12].mxu0 %v26_v2  ;;  %554 = vmatmul.mubr.f32.gmra.mrb[12].mxu1 %v98_v3  ;;  %v76_v2 = vld [vmem:[%s2129_s2 + $0x1f0] sm:$0xff]  ;;  %v79_v3 = vld [vmem:[%s2129_s2 + $0x208] sm:$0xff] }
  0x4c   :  { %1097 = vmatprep.mubr.msk.f32.mxu0 %vm134_vm0, %v29_v4  ;;  %1133 = vmatprep.mubr.msk.f32.mxu1 %vm134_vm0, %v101_v5  ;;  %v78_v4 = vld [vmem:[%s2129_s2 + $0x200] sm:$0xff]  ;;  %v81_v5 = vld [vmem:[%s2129_s2 + $0x218] sm:$0xff] }
  0x4f   :  { %379 = vmatmul.mubr.f32.gmra.mrb[14].mxu0 %v28_v6  ;;  %559 = vmatmul.mubr.f32.gmra.mrb[14].mxu1 %v100_v7  ;;  %v80_v6 = vld [vmem:[%s2129_s2 + $0x210] sm:$0xff]  ;;  %v83_v7 = vld [vmem:[%s2129_s2 + $0x228] sm:$0xff] }
  0x50   :  { %1098 = vmatprep.mubr.msk.f32.mxu0 %vm134_vm0, %v31_v8  ;;  %1134 = vmatprep.mubr.msk.f32.mxu1 %vm134_vm0, %v103_v9  ;;  %v82_v8 = vld [vmem:[%s2129_s2 + $0x220] sm:$0xff]  ;;  %v85_v9 = vld [vmem:[%s2129_s2 + $0x238] sm:$0xff] }
  0x53   :  { %384 = vmatmul.mubr.f32.gmra.mrb[16].mxu0 %v30_v10  ;;  %564 = vmatmul.mubr.f32.gmra.mrb[16].mxu1 %v102_v11  ;;  %v84_v10 = vld [vmem:[%s2129_s2 + $0x230] sm:$0xff] }
  0x54   :  { %1099 = vmatprep.mubr.msk.f32.mxu0 %vm134_vm0, %v33_v12  ;;  %1135 = vmatprep.mubr.msk.f32.mxu1 %vm134_vm0, %v105_v13 }
  0x57   :  { %389 = vmatmul.mubr.f32.gmra.mrb[18].mxu0 %v32_v14  ;;  %569 = vmatmul.mubr.f32.gmra.mrb[18].mxu1 %v104_v15 }
  0x58   :  { %1100 = vmatprep.mubr.msk.f32.mxu0 %vm134_vm0, %v35_v16  ;;  %1136 = vmatprep.mubr.msk.f32.mxu1 %vm134_vm0, %v107_v17 }
  0x5b   :  { %394 = vmatmul.mubr.f32.gmra.mrb[20].mxu0 %v34_v18  ;;  %574 = vmatmul.mubr.f32.gmra.mrb[20].mxu1 %v106_v19 }
  0x5c   :  { %1101 = vmatprep.mubr.msk.f32.mxu0 %vm134_vm0, %v37_v20  ;;  %1137 = vmatprep.mubr.msk.f32.mxu1 %vm134_vm0, %v109_v21 }
  0x5f   :  { %399 = vmatmul.mubr.f32.gmra.mrb[22].mxu0 %v36_v22  ;;  %579 = vmatmul.mubr.f32.gmra.mrb[22].mxu1 %v108_v23 }
  0x60   :  { %1102 = vmatprep.mubr.msk.f32.mxu0 %vm134_vm0, %v39_v24 }
  0x63   :  { %404 = vmatmul.mubr.f32.gmra.mrb[24].mxu0 %v38_v25 }
  0x64   :  { %1103 = vmatprep.mubr.msk.f32.mxu0 %vm134_vm0, %v41_v26 }
  0x67   :  { %409 = vmatmul.mubr.f32.gmra.mrb[26].mxu0 %v40_v27 }
  0x68   :  { %1104 = vmatprep.mubr.msk.f32.mxu0 %vm134_vm0, %v43_v28 }
  0x6b   :  { %414 = vmatmul.mubr.f32.gmra.mrb[28].mxu0 %v42_v29 }
  0x6c   :  { %1105 = vmatprep.mubr.msk.f32.mxu0 %vm134_vm0, %v45_v30 }
  0x6f   :  { %419 = vmatmul.mubr.f32.gmra.mrb[30].mxu0 %v44_v31 }
  0x70   :  { %1106 = vmatprep.mubr.msk.f32.mxu0 %vm134_vm0, %v47_v32 }
  0x73   :  { %424 = vmatmul.mubr.f32.gmra.mrb[32].mxu0 %v46_v33 }
  0x74   :  { %1107 = vmatprep.mubr.msk.f32.mxu0 %vm134_vm0, %v49_v34 }
  0x77   :  { %429 = vmatmul.mubr.f32.gmra.mrb[34].mxu0 %v48_v35 }
  0x78   :  { %1108 = vmatprep.mubr.msk.f32.mxu0 %vm134_vm0, %v51_v36 }
  0x7b   :  { %434 = vmatmul.mubr.f32.gmra.mrb[36].mxu0 %v50_v37 }
  0x7c   :  { %1109 = vmatprep.mubr.msk.f32.mxu0 %vm134_vm0, %v53_v38 }
  0x7f   :  { %439 = vmatmul.mubr.f32.gmra.mrb[38].mxu0 %v52_v39 }
  0x80   :  { %1110 = vmatprep.mubr.msk.f32.mxu0 %vm134_vm0, %v55_v40 }
  0x83   :  { %444 = vmatmul.mubr.f32.gmra.mrb[40].mxu0 %v54_v41 }
  0x84   :  { %1111 = vmatprep.mubr.msk.f32.mxu0 %vm134_vm0, %v57_v42 }
  0x87   :  { %449 = vmatmul.mubr.f32.gmra.mrb[42].mxu0 %v56_v43 }
  0x88   :  { %1112 = vmatprep.mubr.msk.f32.mxu0 %vm134_vm0, %v59_v46 }
  0x8b   :  { %454 = vmatmul.mubr.f32.gmra.mrb[44].mxu0 %v58_v48 }
  0x8c   :  { %1113 = vmatprep.mubr.msk.f32.mxu0 %vm134_vm0, %v61_v49 }
  0x8f   :  { %459 = vmatmul.mubr.f32.gmra.mrb[46].mxu0 %v60_v50 }
  0x90   :  { %1114 = vmatprep.mubr.msk.f32.mxu0 %vm134_vm0, %v63_v51 }
  0x93   :  { %464 = vmatmul.mubr.f32.gmra.mrb[48].mxu0 %v62_v52 }
  0x94   :  { %1115 = vmatprep.mubr.msk.f32.mxu0 %vm134_vm0, %v65_v53 }
  0x97   :  { %469 = vmatmul.mubr.f32.gmra.mrb[50].mxu0 %v64_v54 }
  0x98   :  { %1116 = vmatprep.mubr.msk.f32.mxu0 %vm134_vm0, %v67_v55 }
  0x9b   :  { %474 = vmatmul.mubr.f32.gmra.mrb[52].mxu0 %v66_v56 }
  0x9c   :  { %1117 = vmatprep.mubr.msk.f32.mxu0 %vm134_vm0, %v69_v57 }
  0x9f   :  { %479 = vmatmul.mubr.f32.gmra.mrb[54].mxu0 %v68_v58 }
  0xa0   :  { %1118 = vmatprep.mubr.msk.f32.mxu0 %vm134_vm0, %v71_v59 }
  0xa3   :  { %484 = vmatmul.mubr.f32.gmra.mrb[56].mxu0 %v70_v60 }
  0xa4   :  { %1119 = vmatprep.mubr.msk.f32.mxu0 %vm134_vm0, %v73_v61 }
  0xa7   :  { %489 = vmatmul.mubr.f32.gmra.mrb[58].mxu0 %v72_v62 }
  0xa8   :  { %1120 = vmatprep.mubr.msk.f32.mxu0 %vm134_vm0, %v75_v63 }
  0xab   :  { %494 = vmatmul.mubr.f32.gmra.mrb[60].mxu0 %v74_v0 }
  0xac   :  { %1121 = vmatprep.mubr.msk.f32.mxu0 %vm134_vm0, %v77_v1 }
  0xaf   :  { %499 = vmatmul.mubr.f32.gmra.mrb[62].mxu0 %v76_v2 }
  0xb0   :  { %1122 = vmatprep.mubr.msk.f32.mxu0 %vm134_vm0, %v79_v3 }
  0xb3   :  { %504 = vmatmul.mubr.f32.gmra.mrb[64].mxu0 %v78_v4 }
  0xb4   :  { %1123 = vmatprep.mubr.msk.f32.mxu0 %vm134_vm0, %v81_v5 }
  0xb7   :  { %509 = vmatmul.mubr.f32.gmra.mrb[66].mxu0 %v80_v6 }
  0xb8   :  { %1124 = vmatprep.mubr.msk.f32.mxu0 %vm134_vm0, %v83_v7 }
  0xbb   :  { %514 = vmatmul.mubr.f32.gmra.mrb[68].mxu0 %v82_v8 }
  0xbc   :  { %1125 = vmatprep.mubr.msk.f32.mxu0 %vm134_vm0, %v85_v9 }
  0xbf   :  { %519 = vmatmul.mubr.f32.gmra.mrb[70].mxu0 %v84_v10 }
 0x106   :  { %v345_v11 = vpop.f32.mrb[0].mxu0  ;;  %v1852_v12 = vpop.f32.mrb[0].mxu1 }
 0x107   :  { %v347_v13 = vpop.f32.mrb[1].mxu0  ;;  %1246 = vmatprep.mubr.msk.f32.mxu1 %vm588_vm1, %v345_v11  ;;  %v527_v14 = vpop.f32.mrb[1].mxu1 }
 0x10a   :  { %v350_v15 = vpop.f32.mrb[2].mxu0  ;;  %v1855_v16 = vpop.f32.mrb[2].mxu1 }
 0x10b   :  { %v352_v17 = vpop.f32.mrb[3].mxu0  ;;  %1247 = vmatmul.mubr.msk.f32.vlgmr.msra.gmra.mrb[24].mxu1 %vm588_vm1, %v350_v15  ;;  %v532_v18 = vpop.f32.mrb[3].mxu1 }
 0x10e   :  { %v355_v19 = vpop.f32.mrb[4].mxu0  ;;  %v1858_v20 = vpop.f32.mrb[4].mxu1 }
 0x10f   :  { %v357_v21 = vpop.f32.mrb[5].mxu0  ;;  %1249 = vmatprep.mubr.msk.f32.mxu1 %vm588_vm1, %v355_v19  ;;  %v537_v22 = vpop.f32.mrb[5].mxu1 }
 0x112   :  { %v360_v23 = vpop.f32.mrb[6].mxu0  ;;  %v1861_v24 = vpop.f32.mrb[6].mxu1 }
 0x113   :  { %v362_v25 = vpop.f32.mrb[7].mxu0  ;;  %1250 = vmatmul.mubr.msk.f32.gmra.mrb[26].mxu1 %vm588_vm1, %v360_v23  ;;  %v542_v26 = vpop.f32.mrb[7].mxu1 }
 0x116   :  { %v365_v27 = vpop.f32.mrb[8].mxu0  ;;  %v1864_v28 = vpop.f32.mrb[8].mxu1 }
 0x117   :  { %v367_v29 = vpop.f32.mrb[9].mxu0  ;;  %1252 = vmatprep.mubr.msk.f32.mxu1 %vm588_vm1, %v365_v27  ;;  %v547_v30 = vpop.f32.mrb[9].mxu1 }
 0x11a   :  { %v370_v31 = vpop.f32.mrb[10].mxu0  ;;  %v1867_v32 = vpop.f32.mrb[10].mxu1 }
 0x11b   :  { %v372_v33 = vpop.f32.mrb[11].mxu0  ;;  %1253 = vmatmul.mubr.msk.f32.gmra.mrb[28].mxu1 %vm588_vm1, %v370_v31  ;;  %v552_v34 = vpop.f32.mrb[11].mxu1 }
 0x11e   :  { %v375_v35 = vpop.f32.mrb[12].mxu0  ;;  %v1870_v36 = vpop.f32.mrb[12].mxu1 }
 0x11f   :  { %v377_v37 = vpop.f32.mrb[13].mxu0  ;;  %1255 = vmatprep.mubr.msk.f32.mxu1 %vm588_vm1, %v375_v35  ;;  %v557_v38 = vpop.f32.mrb[13].mxu1 }
 0x122   :  { %v380_v39 = vpop.f32.mrb[14].mxu0  ;;  %v1873_v40 = vpop.f32.mrb[14].mxu1 }
 0x123   :  { %v382_v41 = vpop.f32.mrb[15].mxu0  ;;  %1256 = vmatmul.mubr.msk.f32.gmra.mrb[30].mxu1 %vm588_vm1, %v380_v39  ;;  %v562_v42 = vpop.f32.mrb[15].mxu1 }
 0x126   :  { %v385_v43 = vpop.f32.mrb[16].mxu0  ;;  %v1876_v44 = vpop.f32.mrb[16].mxu1 }
 0x127   :  { %v387_v45 = vpop.f32.mrb[17].mxu0  ;;  %1258 = vmatprep.mubr.msk.f32.mxu1 %vm588_vm1, %v385_v43  ;;  %v567_v46 = vpop.f32.mrb[17].mxu1 }
 0x12a   :  { %v390_v47 = vpop.f32.mrb[18].mxu0  ;;  %v1879_v48 = vpop.f32.mrb[18].mxu1 }
 0x12b   :  { %v392_v49 = vpop.f32.mrb[19].mxu0  ;;  %1259 = vmatmul.mubr.msk.f32.gmra.mrb[32].mxu1 %vm588_vm1, %v390_v47  ;;  %v572_v50 = vpop.f32.mrb[19].mxu1 }
 0x12e   :  { %v395_v51 = vpop.f32.mrb[20].mxu0  ;;  %v1882_v52 = vpop.f32.mrb[20].mxu1 }
 0x12f   :  { %v397_v53 = vpop.f32.mrb[21].mxu0  ;;  %1261 = vmatprep.mubr.msk.f32.mxu1 %vm588_vm1, %v395_v51  ;;  %v577_v54 = vpop.f32.mrb[21].mxu1 }
 0x132   :  { %v400_v55 = vpop.f32.mrb[22].mxu0  ;;  %v1885_v56 = vpop.f32.mrb[22].mxu1 }
 0x133   :  { %v402_v57 = vpop.f32.mrb[23].mxu0  ;;  %1262 = vmatmul.mubr.msk.f32.gmra.mrb[34].mxu1 %vm588_vm1, %v400_v55  ;;  %v582_v58 = vpop.f32.mrb[23].mxu1 }
 0x136   :  { %v405_v59 = vpop.f32.mrb[24].mxu0 }
 0x137   :  { %v407_v60 = vpop.f32.mrb[25].mxu0  ;;  %1264 = vmatprep.mubr.msk.f32.mxu1 %vm588_vm1, %v405_v59 }
 0x13a   :  { %v410_v61 = vpop.f32.mrb[26].mxu0 }
 0x13b   :  { %v412_v62 = vpop.f32.mrb[27].mxu0  ;;  %1265 = vmatmul.mubr.msk.f32.gmra.mrb[36].mxu1 %vm588_vm1, %v410_v61 }
 0x13e   :  { %v415_v63 = vpop.f32.mrb[28].mxu0 }
 0x13f   :  { %v417_v0 = vpop.f32.mrb[29].mxu0  ;;  %1267 = vmatprep.mubr.msk.f32.mxu1 %vm588_vm1, %v415_v63 }
 0x142   :  { %v420_v1 = vpop.f32.mrb[30].mxu0 }
 0x143   :  { %v422_v2 = vpop.f32.mrb[31].mxu0  ;;  %1268 = vmatmul.mubr.msk.f32.gmra.mrb[38].mxu1 %vm588_vm1, %v420_v1 }
 0x146   :  { %v425_v3 = vpop.f32.mrb[32].mxu0 }
 0x147   :  { %v427_v4 = vpop.f32.mrb[33].mxu0  ;;  %1270 = vmatprep.mubr.msk.f32.mxu1 %vm588_vm1, %v425_v3 }
 0x14a   :  { %v430_v5 = vpop.f32.mrb[34].mxu0 }
 0x14b   :  { %v432_v6 = vpop.f32.mrb[35].mxu0  ;;  %1271 = vmatmul.mubr.msk.f32.gmra.mrb[40].mxu1 %vm588_vm1, %v430_v5 }
 0x14e   :  { %v435_v7 = vpop.f32.mrb[36].mxu0 }
 0x14f   :  { %v437_v8 = vpop.f32.mrb[37].mxu0  ;;  %1273 = vmatprep.mubr.msk.f32.mxu1 %vm588_vm1, %v435_v7 }
 0x152   :  { %v440_v9 = vpop.f32.mrb[38].mxu0 }
 0x153   :  { %v442_v10 = vpop.f32.mrb[39].mxu0  ;;  %1274 = vmatmul.mubr.msk.f32.gmra.mrb[42].mxu1 %vm588_vm1, %v440_v9 }
 0x156   :  { %v445_v11 = vpop.f32.mrb[40].mxu0 }
 0x157   :  { %v447_v13 = vpop.f32.mrb[41].mxu0  ;;  %1276 = vmatprep.mubr.msk.f32.mxu1 %vm588_vm1, %v445_v11 }
 0x15a   :  { %v450_v14 = vpop.f32.mrb[42].mxu0 }
 0x15b   :  { %v452_v15 = vpop.f32.mrb[43].mxu0  ;;  %1277 = vmatmul.mubr.msk.f32.gmra.mrb[44].mxu1 %vm588_vm1, %v450_v14 }
 0x15e   :  { %v455_v17 = vpop.f32.mrb[44].mxu0 }
 0x15f   :  { %v457_v18 = vpop.f32.mrb[45].mxu0  ;;  %1279 = vmatprep.mubr.msk.f32.mxu1 %vm588_vm1, %v455_v17 }
 0x162   :  { %v460_v19 = vpop.f32.mrb[46].mxu0 }
 0x163   :  { %v462_v21 = vpop.f32.mrb[47].mxu0  ;;  %1280 = vmatmul.mubr.msk.f32.gmra.mrb[46].mxu1 %vm588_vm1, %v460_v19 }
 0x166   :  { %v465_v22 = vpop.f32.mrb[48].mxu0 }
 0x167   :  { %v467_v23 = vpop.f32.mrb[49].mxu0  ;;  %1282 = vmatprep.mubr.msk.f32.mxu1 %vm588_vm1, %v465_v22 }
 0x16a   :  { %v470_v25 = vpop.f32.mrb[50].mxu0 }
 0x16b   :  { %v472_v26 = vpop.f32.mrb[51].mxu0  ;;  %1283 = vmatmul.mubr.msk.f32.gmra.mrb[48].mxu1 %vm588_vm1, %v470_v25 }
 0x16e   :  { %v475_v27 = vpop.f32.mrb[52].mxu0 }
 0x16f   :  { %v477_v29 = vpop.f32.mrb[53].mxu0  ;;  %1285 = vmatprep.mubr.msk.f32.mxu1 %vm588_vm1, %v475_v27 }
 0x172   :  { %v480_v30 = vpop.f32.mrb[54].mxu0 }
 0x173   :  { %v482_v31 = vpop.f32.mrb[55].mxu0  ;;  %1286 = vmatmul.mubr.msk.f32.gmra.mrb[50].mxu1 %vm588_vm1, %v480_v30 }
 0x176   :  { %v485_v33 = vpop.f32.mrb[56].mxu0 }
 0x177   :  { %v487_v34 = vpop.f32.mrb[57].mxu0  ;;  %1288 = vmatprep.mubr.msk.f32.mxu1 %vm588_vm1, %v485_v33 }
 0x17a   :  { %v490_v35 = vpop.f32.mrb[58].mxu0 }
 0x17b   :  { %v492_v37 = vpop.f32.mrb[59].mxu0  ;;  %1289 = vmatmul.mubr.msk.f32.gmra.mrb[52].mxu1 %vm588_vm1, %v490_v35 }
 0x17e   :  { %v495_v38 = vpop.f32.mrb[60].mxu0 }
 0x17f   :  { %v497_v39 = vpop.f32.mrb[61].mxu0  ;;  %1291 = vmatprep.mubr.msk.f32.mxu1 %vm588_vm1, %v495_v38 }
 0x182   :  { %v500_v41 = vpop.f32.mrb[62].mxu0 }
 0x183   :  { %v502_v42 = vpop.f32.mrb[63].mxu0  ;;  %1292 = vmatmul.mubr.msk.f32.gmra.mrb[54].mxu1 %vm588_vm1, %v500_v41 }
 0x186   :  { %v505_v43 = vpop.f32.mrb[64].mxu0 }
 0x187   :  { %v507_v45 = vpop.f32.mrb[65].mxu0  ;;  %1294 = vmatprep.mubr.msk.f32.mxu1 %vm588_vm1, %v505_v43 }
 0x18a   :  { %v510_v46 = vpop.f32.mrb[66].mxu0 }
 0x18b   :  { %v512_v47 = vpop.f32.mrb[67].mxu0  ;;  %1295 = vmatmul.mubr.msk.f32.gmra.mrb[56].mxu1 %vm588_vm1, %v510_v46 }
 0x18e   :  { %v515_v49 = vpop.f32.mrb[68].mxu0 }
 0x18f   :  { %v517_v50 = vpop.f32.mrb[69].mxu0  ;;  %1297 = vmatprep.mubr.msk.f32.mxu1 %vm588_vm1, %v515_v49 }
 0x192   :  { %v520_v51 = vpop.f32.mrb[70].mxu0 }
 0x193   :  { %v522_v53 = vpop.f32.mrb[71].mxu0  ;;  %1298 = vmatmul.mubr.msk.f32.gmra.mrb[58].mxu1 %vm588_vm1, %v520_v51 }
 0x194   :  { %1300 = vmatprep.mubr.msk.f32.mxu1 %vm588_vm1, %v1852_v12 }
 0x197   :  { %1301 = vmatmul.mubr.msk.f32.gmra.mrb[60].mxu1 %vm588_vm1, %v1855_v16 }
 0x198   :  { %1303 = vmatprep.mubr.msk.f32.mxu1 %vm588_vm1, %v1858_v20 }
 0x19b   :  { %1304 = vmatmul.mubr.msk.f32.gmra.mrb[62].mxu1 %vm588_vm1, %v1861_v24 }
 0x19c   :  { %1306 = vmatprep.mubr.msk.f32.mxu1 %vm588_vm1, %v1864_v28 }
 0x19f   :  { %1307 = vmatmul.mubr.msk.f32.gmra.mrb[64].mxu1 %vm588_vm1, %v1867_v32 }
 0x1a0   :  { %1309 = vmatprep.mubr.msk.f32.mxu1 %vm588_vm1, %v1870_v36 }
 0x1a3   :  { %1310 = vmatmul.mubr.msk.f32.gmra.mrb[66].mxu1 %vm588_vm1, %v1873_v40 }
 0x1a4   :  { %1312 = vmatprep.mubr.msk.f32.mxu1 %vm588_vm1, %v1876_v44 }
 0x1a7   :  { %1313 = vmatmul.mubr.msk.f32.gmra.mrb[68].mxu1 %vm588_vm1, %v1879_v48 }
 0x1a8   :  { %1315 = vmatprep.mubr.msk.f32.mxu1 %vm588_vm1, %v1882_v52 }
 0x1ab   :  { %1316 = vmatmul.mubr.msk.f32.gmra.mrb[70].mxu1 %vm588_vm1, %v1885_v56 }
 0x1de   :  { %v1248_v12 = vpop.f32.mrb[24].mxu1 }
 0x1df   :  { %1039 = vst.msk [vmem:[%s2131_s3 + $0x8] sm:$0xff] %vm134_vm0, %v1248_v12  ;;  %v799_v16 = vpop.f32.mrb[25].mxu1 }
 0x1e0   :  { %1038 = vst.msk [vmem:[%s2131_s3] sm:$0xff] %vm134_vm0, %v799_v16 }
 0x1e6   :  { %v1251_v20 = vpop.f32.mrb[26].mxu1 }
 0x1e7   :  { %1041 = vst.msk [vmem:[%s2131_s3 + $0x18] sm:$0xff] %vm134_vm0, %v1251_v20  ;;  %v809_v24 = vpop.f32.mrb[27].mxu1 }
 0x1e8   :  { %1040 = vst.msk [vmem:[%s2131_s3 + $0x10] sm:$0xff] %vm134_vm0, %v809_v24 }
 0x1ee   :  { %v1254_v28 = vpop.f32.mrb[28].mxu1 }
 0x1ef   :  { %1043 = vst.msk [vmem:[%s2131_s3 + $0x28] sm:$0xff] %vm134_vm0, %v1254_v28  ;;  %v819_v32 = vpop.f32.mrb[29].mxu1 }
 0x1f0   :  { %1042 = vst.msk [vmem:[%s2131_s3 + $0x20] sm:$0xff] %vm134_vm0, %v819_v32 }
 0x1f6   :  { %v1257_v36 = vpop.f32.mrb[30].mxu1 }
 0x1f7   :  { %1045 = vst.msk [vmem:[%s2131_s3 + $0x38] sm:$0xff] %vm134_vm0, %v1257_v36  ;;  %v829_v40 = vpop.f32.mrb[31].mxu1 }
 0x1f8   :  { %1044 = vst.msk [vmem:[%s2131_s3 + $0x30] sm:$0xff] %vm134_vm0, %v829_v40 }
 0x1fe   :  { %v1260_v44 = vpop.f32.mrb[32].mxu1 }
 0x1ff   :  { %1047 = vst.msk [vmem:[%s2131_s3 + $0x48] sm:$0xff] %vm134_vm0, %v1260_v44  ;;  %v839_v48 = vpop.f32.mrb[33].mxu1 }
 0x200   :  { %1046 = vst.msk [vmem:[%s2131_s3 + $0x40] sm:$0xff] %vm134_vm0, %v839_v48 }
 0x206   :  { %v1263_v52 = vpop.f32.mrb[34].mxu1 }
 0x207   :  { %1049 = vst.msk [vmem:[%s2131_s3 + $0x58] sm:$0xff] %vm134_vm0, %v1263_v52  ;;  %v849_v54 = vpop.f32.mrb[35].mxu1 }
 0x208   :  { %1048 = vst.msk [vmem:[%s2131_s3 + $0x50] sm:$0xff] %vm134_vm0, %v849_v54 }
 0x20e   :  { %v1266_v55 = vpop.f32.mrb[36].mxu1 }
 0x20f   :  { %1051 = vst.msk [vmem:[%s2131_s3 + $0x68] sm:$0xff] %vm134_vm0, %v1266_v55  ;;  %v859_v56 = vpop.f32.mrb[37].mxu1 }
 0x210   :  { %1050 = vst.msk [vmem:[%s2131_s3 + $0x60] sm:$0xff] %vm134_vm0, %v859_v56 }
 0x216   :  { %v1269_v57 = vpop.f32.mrb[38].mxu1 }
 0x217   :  { %1053 = vst.msk [vmem:[%s2131_s3 + $0x78] sm:$0xff] %vm134_vm0, %v1269_v57  ;;  %v869_v58 = vpop.f32.mrb[39].mxu1 }
 0x218   :  { %1052 = vst.msk [vmem:[%s2131_s3 + $0x70] sm:$0xff] %vm134_vm0, %v869_v58 }
 0x21e   :  { %v1272_v59 = vpop.f32.mrb[40].mxu1 }
 0x21f   :  { %1055 = vst.msk [vmem:[%s2131_s3 + $0x88] sm:$0xff] %vm134_vm0, %v1272_v59  ;;  %v879_v60 = vpop.f32.mrb[41].mxu1 }
 0x220   :  { %1054 = vst.msk [vmem:[%s2131_s3 + $0x80] sm:$0xff] %vm134_vm0, %v879_v60 }
 0x226   :  { %v1275_v61 = vpop.f32.mrb[42].mxu1 }
 0x227   :  { %1057 = vst.msk [vmem:[%s2131_s3 + $0x98] sm:$0xff] %vm134_vm0, %v1275_v61  ;;  %v889_v62 = vpop.f32.mrb[43].mxu1 }
 0x228   :  { %1056 = vst.msk [vmem:[%s2131_s3 + $0x90] sm:$0xff] %vm134_vm0, %v889_v62 }
 0x22e   :  { %v1278_v63 = vpop.f32.mrb[44].mxu1 }
 0x22f   :  { %1059 = vst.msk [vmem:[%s2131_s3 + $0xa8] sm:$0xff] %vm134_vm0, %v1278_v63  ;;  %v899_v0 = vpop.f32.mrb[45].mxu1 }
 0x230   :  { %1058 = vst.msk [vmem:[%s2131_s3 + $0xa0] sm:$0xff] %vm134_vm0, %v899_v0 }
 0x236   :  { %v1281_v1 = vpop.f32.mrb[46].mxu1 }
 0x237   :  { %1061 = vst.msk [vmem:[%s2131_s3 + $0xb8] sm:$0xff] %vm134_vm0, %v1281_v1  ;;  %v909_v2 = vpop.f32.mrb[47].mxu1 }
 0x238   :  { %1060 = vst.msk [vmem:[%s2131_s3 + $0xb0] sm:$0xff] %vm134_vm0, %v909_v2 }
 0x23e   :  { %v1284_v3 = vpop.f32.mrb[48].mxu1 }
 0x23f   :  { %1063 = vst.msk [vmem:[%s2131_s3 + $0xc8] sm:$0xff] %vm134_vm0, %v1284_v3  ;;  %v919_v4 = vpop.f32.mrb[49].mxu1 }
 0x240   :  { %1062 = vst.msk [vmem:[%s2131_s3 + $0xc0] sm:$0xff] %vm134_vm0, %v919_v4 }
 0x246   :  { %v1287_v5 = vpop.f32.mrb[50].mxu1 }
 0x247   :  { %1065 = vst.msk [vmem:[%s2131_s3 + $0xd8] sm:$0xff] %vm134_vm0, %v1287_v5  ;;  %v929_v6 = vpop.f32.mrb[51].mxu1 }
 0x248   :  { %1064 = vst.msk [vmem:[%s2131_s3 + $0xd0] sm:$0xff] %vm134_vm0, %v929_v6 }
 0x24e   :  { %v1290_v7 = vpop.f32.mrb[52].mxu1 }
 0x24f   :  { %1067 = vst.msk [vmem:[%s2131_s3 + $0xe8] sm:$0xff] %vm134_vm0, %v1290_v7  ;;  %v939_v8 = vpop.f32.mrb[53].mxu1 }
 0x250   :  { %1066 = vst.msk [vmem:[%s2131_s3 + $0xe0] sm:$0xff] %vm134_vm0, %v939_v8 }
 0x256   :  { %v1293_v9 = vpop.f32.mrb[54].mxu1 }
 0x257   :  { %1069 = vst.msk [vmem:[%s2131_s3 + $0xf8] sm:$0xff] %vm134_vm0, %v1293_v9  ;;  %v949_v10 = vpop.f32.mrb[55].mxu1 }
 0x258   :  { %1068 = vst.msk [vmem:[%s2131_s3 + $0xf0] sm:$0xff] %vm134_vm0, %v949_v10 }
 0x25e   :  { %v1296_v11 = vpop.f32.mrb[56].mxu1 }
 0x25f   :  { %1071 = vst.msk [vmem:[%s2131_s3 + $0x108] sm:$0xff] %vm134_vm0, %v1296_v11  ;;  %v959_v13 = vpop.f32.mrb[57].mxu1 }
 0x260   :  { %1070 = vst.msk [vmem:[%s2131_s3 + $0x100] sm:$0xff] %vm134_vm0, %v959_v13 }
 0x266   :  { %v1299_v14 = vpop.f32.mrb[58].mxu1 }
 0x267   :  { %1073 = vst.msk [vmem:[%s2131_s3 + $0x118] sm:$0xff] %vm134_vm0, %v1299_v14  ;;  %v969_v15 = vpop.f32.mrb[59].mxu1 }
 0x268   :  { %1072 = vst.msk [vmem:[%s2131_s3 + $0x110] sm:$0xff] %vm134_vm0, %v969_v15 }
 0x26a   :  { %v1302_v17 = vpop.f32.mrb[60].mxu1 }
 0x26b   :  { %1075 = vst.msk [vmem:[%s2131_s3 + $0x128] sm:$0xff] %vm134_vm0, %v1302_v17  ;;  %v979_v18 = vpop.f32.mrb[61].mxu1 }
 0x26c   :  { %1074 = vst.msk [vmem:[%s2131_s3 + $0x120] sm:$0xff] %vm134_vm0, %v979_v18 }
 0x26e   :  { %v1305_v19 = vpop.f32.mrb[62].mxu1 }
 0x26f   :  { %1077 = vst.msk [vmem:[%s2131_s3 + $0x138] sm:$0xff] %vm134_vm0, %v1305_v19  ;;  %v989_v21 = vpop.f32.mrb[63].mxu1 }
 0x270   :  { %1076 = vst.msk [vmem:[%s2131_s3 + $0x130] sm:$0xff] %vm134_vm0, %v989_v21 }
 0x272   :  { %v1308_v22 = vpop.f32.mrb[64].mxu1 }
 0x273   :  { %1079 = vst.msk [vmem:[%s2131_s3 + $0x148] sm:$0xff] %vm134_vm0, %v1308_v22  ;;  %v999_v23 = vpop.f32.mrb[65].mxu1 }
 0x274   :  { %1078 = vst.msk [vmem:[%s2131_s3 + $0x140] sm:$0xff] %vm134_vm0, %v999_v23 }
 0x276   :  { %v1311_v25 = vpop.f32.mrb[66].mxu1 }
 0x277   :  { %1081 = vst.msk [vmem:[%s2131_s3 + $0x158] sm:$0xff] %vm134_vm0, %v1311_v25  ;;  %v1009_v26 = vpop.f32.mrb[67].mxu1 }
 0x278   :  { %1080 = vst.msk [vmem:[%s2131_s3 + $0x150] sm:$0xff] %vm134_vm0, %v1009_v26 }
 0x27a   :  { %v1314_v27 = vpop.f32.mrb[68].mxu1 }
 0x27b   :  { %1083 = vst.msk [vmem:[%s2131_s3 + $0x168] sm:$0xff] %vm134_vm0, %v1314_v27  ;;  %v1019_v29 = vpop.f32.mrb[69].mxu1 }
 0x27c   :  { %1082 = vst.msk [vmem:[%s2131_s3 + $0x160] sm:$0xff] %vm134_vm0, %v1019_v29 }
 0x27e   :  { %v1317_v30 = vpop.f32.mrb[70].mxu1 }
 0x27f   :  { %1085 = vst.msk [vmem:[%s2131_s3 + $0x178] sm:$0xff] %vm134_vm0, %v1317_v30  ;;  %v1029_v31 = vpop.f32.mrb[71].mxu1 }
 0x280   :  { %1084 = vst.msk [vmem:[%s2131_s3 + $0x170] sm:$0xff] %vm134_vm0, %v1029_v31 }

// kernel: phinect_gan_decoder.3
= control target key start
LH: loop header
LB: loop body
LE: loop exit
PB: predicated region body
PF: predicated region fallthrough
CT: control target
= control target key end

     0   :  { %v8224_v0 = vmov 0.0   ;;  %vm55_vm0 = vcmask 1043456   ;;  %vm8225_vm1 = vmmov 0   ;;  %vm51_vm2 = vcmask 64512   ;;  %s8229_s21 = smov 121   ;;  %s8231_s22 = smov 8   ;;  %s10147_s0 = inlined_call_operand.vmem [shape: f32[8,16], index: 0, kind: input, shape index: {}]   ;;  %s10148_s1 = inlined_call_operand.vmem [shape: bf16[4,8], index: 1, kind: input, shape index: {}]   ;;  %s10149_s2 = inlined_call_operand.vmem [shape: bf16[16,64], index: 2, kind: input, shape index: {}]   ;;  %s10150_s4 = inlined_call_operand.vmem [shape: bf16[2,64], index: 4, kind: input, shape index: {}]   ;;  %s10151_s3 = inlined_call_operand.vmem [shape: bf16[9,48,4], index: 3, kind: input, shape index: {}]   ;;  %s10152_s5 = inlined_call_operand.vmem [shape: bf16[24,48], index: 5, kind: input, shape index: {}]   ;;  %s10153_s6 = inlined_call_operand.vmem [shape: bf16[64,256], index: 6, kind: input, shape index: {}]   ;;  %s10154_s8 = inlined_call_operand.vmem [shape: bf16[2,256], index: 8, kind: input, shape index: {}]   ;;  %s10155_s7 = inlined_call_operand.vmem [shape: bf16[9,24,24], index: 7, kind: input, shape index: {}]   ;;  %s10156_s9 = inlined_call_operand.vmem [shape: bf16[12,24], index: 9, kind: input, shape index: {}]   ;;  %s10157_s10 = inlined_call_operand.vmem [shape: bf16[256,1024], index: 10, kind: input, shape index: {}]   ;;  %s10158_s12 = inlined_call_operand.vmem [shape: bf16[2,1024], index: 12, kind: input, shape index: {}]   ;;  %s10159_s11 = inlined_call_operand.vmem [shape: bf16[9,12,12], index: 11, kind: input, shape index: {}]   ;;  %s10160_s13 = inlined_call_operand.vmem [shape: bf16[6,12], index: 13, kind: input, shape index: {}]   ;;  %s10161_s14 = inlined_call_operand.vmem [shape: f32[6,1024], index: 14, kind: output, shape index: {}]  }
   0x1   :  { %7666 = vmatprep.subr.bf16.mxu0 %v8224_v0  ;;  %v48_v1 = vld [vmem:[%s10147_s0] sm:$0xff]  ;;  %7668 = vmatprep.mubr.msk.bf16.mxu0 %vm8225_vm1, %v8224_v0  ;;  %v166_v6 = vlaneseq  ;;  %v8226_v8 = vmov 1983009808   ;;  %vm110_vm3 = vcmask 130048   ;;  %vm154_vm4 = vcmask 1041408   ;;  %s8232_s23 = smov 9  }
   0x2   :  { %v50_v2 = vpack.c.bf16 %v48_v1, %v48_v1  ;;  %7672 = vmatprep.subr.bf16.mxu1 %v8224_v0  ;;  %7674 = vmatprep.mubr.msk.bf16.mxu1 %vm8225_vm1, %v8224_v0  ;;  %v49_v4 = vld [vmem:[%s10148_s1] sm:$0x3]  ;;  %v172_v9 = vunpack.c.l.s4 %v8226_v8  ;;  %vm155_vm5 = vcmask 592898   ;;  %v8230_v29 = vmov 0   ;;  %s8233_s24 = smov 7   ;;  %s8234_s25 = smov 1  }
   0x3   :  { %v8125_v5 = vld [vmem:[%s10149_s2] sm:$0xff]   ;;  %v8351_v12 = vshrl.u32 %v166_v6, 7  ;;  %s8227_s2 = smov 119   ;;  %vm156_vm6 = vmor %vm155_vm5, %vm154_vm4  ;;  %1390 = vst [vmem:[#allocation3] sm:$0xff] %v8230_v29  ;;  %vm159_vm7 = vcmask 517120   ;;  %vm181_vm8 = vcmask 973824  }
   0x4   :  { %v57_v3 = vsel %vm55_vm0, %v50_v2, 0  ;;  %7673 = vmatpush3.bf16.msra.mxu1 %v8125_v5  ;;  %v162_v7 = vld [vmem:[%s10150_s4] sm:$0x1]  ;;  %v173_v14 = vunpack.c.0.s8 %v172_v9  ;;  %1394 = vst [vmem:[#allocation3 + $0x10] sm:$0xff] %v8230_v29  ;;  %1396 = vst [vmem:[#allocation3 + $0x20] sm:$0xff] %v8230_v29  ;;  %vm418_vm9 = vcmask 990208  }
   0x5   :  { %7667 = vmatpush3.bf16.msra.mxu0 %v57_v3  ;;  %7814 = vmatprep.subr.bf16.mxu1 %v8224_v0  ;;  %v398_v10 = vld [vmem:[%s10150_s4] sm:$0x1]  ;;  %v164_v11 = vpack.i.b16 %v162_v7, %v162_v7  ;;  %v8354_v15 = vsub.s32 0, %v8351_v12  ;;  %s8228_s4 = smov 127   ;;  %3677 = vst [vmem:[#allocation4] sm:$0xff] %v8230_v29  ;;  %3678 = vst [vmem:[#allocation4 + $0x8] sm:$0xff] %v8230_v29 }
   0x6   :  { %7678 = vmatprep.subr.bf16.mxu0 %v8224_v0  ;;  %v400_v13 = vshrl.u32 %v398_v10, 16  ;;  %v8357_v17 = vsub.s32 %v173_v14, %v8351_v12  ;;  %3679 = vst [vmem:[#allocation4 + $0x10] sm:$0xff] %v8230_v29  ;;  %3680 = vst [vmem:[#allocation4 + $0x18] sm:$0xff] %v8230_v29  ;;  %vm538_vm10 = vcmask 1039360   ;;  %s8235_s26 = smov 120   ;;  %vm326_vm11 = vcmask 72704  }
   0x7   :  { %v169_v18 = vrot.slane %v164_v11, %v8354_v15  ;;  %3684 = vst [vmem:[#allocation4 + $0x28] sm:$0x33] %v8230_v29  ;;  %3685 = vst [vmem:[#allocation4 + $0x30] sm:$0x33] %v8230_v29  ;;  %v8126_v1 = vld [vmem:[%s10151_s3 + $0x18] sm:$0xff]   ;;  %vm228_vm12 = vcmask 31744  }
   0x8   :  { %7669 = vmatmul.mubr.msk.bf16.vlgmr.msra.gmra.mrb[0].mxu0 %vm51_vm2, %v49_v4  ;;  %v401_v16 = vpack.i.b16 %v400_v13, %v400_v13  ;;  %3686 = vst [vmem:[#allocation4 + $0x38] sm:$0x33] %v8230_v29  ;;  %3687 = vst [vmem:[#allocation4 + $0x40] sm:$0x33] %v8230_v29  ;;  %vm457_vm13 = vcmask 56320   ;;  %v8127_v13 = vld [vmem:[%s10151_s3] sm:$0xff]  }
   0x9   :  { %7680 = vmatprep.mubr.msk.bf16.mxu0 %vm8225_vm1, %v8224_v0  ;;  %v8362_v20 = vrot.slane %v169_v18, %v8357_v17  ;;  %157 = vst.msk [vmem:[#allocation2] sm:$0xf] %vm156_vm6, %v8230_v29  ;;  %vm577_vm14 = vcmask 7168   ;;  %vm1221_vm15 = vcmask 392192   ;;  %vm1473_vm6 = vcmask 908288   ;;  %s8240_s29 = smov 17  }
   0xa   :  { %v406_v19 = vrot.slane %v401_v16, %v8354_v15  ;;  %s8241_s30 = smov 15  }
   0xb   :  { %178 = vrot.lane.b32.xlu0 %v8362_v20, %s8227_s2  ;;  %535 = vrot.lane.b32.xlu1 %v8362_v20, %s8228_s4 }
   0xc   :  { %v8369_v21 = vrot.slane %v406_v19, %v8357_v17 }
   0xf   :  { %415 = vrot.lane.b32.xlu0 %v8369_v21, %s8229_s21 }
  0x7d   :  { %v179_v30 = vpop.permute.xlu0 %178  ;;  %v536_v40 = vpop.permute.xlu1 %535 }
  0x7e   :  { %v180_v37 = vrot.slane %v179_v30, 6  ;;  %v537_v46 = vrot.slane %v536_v40, 6 }
  0x80   :  { %v182_v39 = vsel %vm181_vm8, %v180_v37, %v179_v30  ;;  %v539_v51 = vsel %vm538_vm10, %v537_v46, %v536_v40  ;;  %v8135_v37 = vld [vmem:[%s10151_s3 + $0x58] sm:$0xff]   ;;  %v8151_v40 = vld [vmem:[%s10151_s3 + $0x28] sm:$0xff]   ;;  %vm1538_vm8 = vcmask 195584  }
  0x81   :  { %v416_v36 = vpop.permute.xlu0 %415 }
  0x82   :  { %v417_v38 = vrot.slane %v416_v36, 6 }
  0x84   :  { %v419_v43 = vsel %vm418_vm9, %v417_v38, %v416_v36  ;;  %v8134_v36 = vld [vmem:[%s10151_s3 + $0x50] sm:$0xff]   ;;  %v8149_v38 = vld [vmem:[%s10151_s3 + $0x20] sm:$0xff]   ;;  %vm1643_vm9 = vcmask 138240  }
  0xdb   :  { %v93_v22 = vpop.f32.mrb[0].mxu0 }
  0xdc   :  { %v99_v23 = vmax.f32 %v93_v22, 0.0  ;;  %v7670_v24 = vpop.f32.mrb[1].mxu0 }
  0xdd   :  { %v96_v25 = vpop.f32.mrb[2].mxu0 }
  0xde   :  { %v100_v26 = vmin.f32 %v99_v23, 6.0  ;;  %v7671_v27 = vpop.f32.mrb[3].mxu0  ;;  %v8128_v25 = vld [vmem:[%s10151_s3 + $0x8] sm:$0xff]  }
  0xdf   :  { %v8129_v27 = vld [vmem:[%s10151_s3 + $0x10] sm:$0xff]  }
  0xe0   :  { %v101_v28 = vpack.c.bf16 %v100_v26, %v100_v26 }
  0xe2   :  { %7675 = vmatmul.mubr.msk.bf16.vlgmr.msra.gmra.mrb[0].mxu1 %vm110_vm3, %v101_v28 }
  0xe3   :  { %7684 = vmatprep.mubr.msk.bf16.mxu1 %vm8225_vm1, %v8224_v0 }
 0x1b5   :  { %v148_v31 = vpop.f32.mrb[0].mxu1 }
 0x1b6   :  { %v158_v32 = vpack.c.bf16 %v148_v31, %v148_v31  ;;  %v7676_v33 = vpop.f32.mrb[1].mxu1 }
 0x1b7   :  { %v151_v34 = vpop.f32.mrb[2].mxu1  ;;  %v8132_v33 = vld [vmem:[%s10151_s3 + $0x40] sm:$0xff]  }
 0x1b8   :  { %160 = vst.msk [vmem:[#allocation2 + $0x2] sm:$0x3] %vm159_vm7, %v158_v32  ;;  %v7677_v35 = vpop.f32.mrb[3].mxu1  ;;  %v8131_v32 = vld [vmem:[%s10151_s3 + $0x38] sm:$0xff]   ;;  %v8133_v34 = vld [vmem:[%s10151_s3 + $0x48] sm:$0xff]   ;;  %vm1761_vm7 = vcmask 924672  }
 0x1bf   :  { %v161_v41 = vld [vmem:[#allocation2] sm:$0xf] }
 0x1c0   :  { %v397_v42 = vld [vmem:[#allocation2] sm:$0xf]  ;;  %v184_v44 = vmul.bf16 %v182_v39, %v161_v41  ;;  %v220_v45 = vrot.slane %v161_v41, %v8357_v17  ;;  %v8137_v41 = vld [vmem:[%s10151_s3 + $0x68] sm:$0xff]  }
 0x1c1   :  { %v421_v47 = vmul.bf16 %v419_v43, %v397_v42  ;;  %v534_v50 = vld [vmem:[#allocation2] sm:$0xf]  ;;  %v8138_v42 = vld [vmem:[%s10151_s3 + $0x70] sm:$0xff]  }
 0x1c2   :  { %222 = vrot.lane.b32.xlu1 %v220_v45, %s8231_s22  ;;  %v221_v48 = vcombine.high %v220_v45, %v220_v45  ;;  %v320_v49 = vrot.slane %v184_v44, %v8357_v17  ;;  %v541_v54 = vmul.bf16 %v539_v51, %v534_v50  ;;  %v7120_v58 = vld.sshfl [vmem:[#allocation2 + $0x2] sm:$0x3 pattern:$0x76325410]  ;;  %v8139_v45 = vld [vmem:[%s10151_s3 + $0x78] sm:$0xff]   ;;  %v8142_v50 = vld [vmem:[%s10151_s3 + $0x90] sm:$0xff]  }
 0x1c3   :  { %v451_v53 = vrot.slane %v421_v47, %v8357_v17  ;;  %v654_v7 = vld [vmem:[#allocation2 + $0x2] sm:$0x3] }
 0x1c4   :  { %224 = vrot.lane.b32.xlu0 %v221_v48, %s8231_s22  ;;  %v321_v52 = vcombine.high %v320_v49, %v320_v49  ;;  %v571_v56 = vrot.slane %v541_v54, %v8357_v17  ;;  %v863_v16 = vld [vmem:[#allocation2 + $0x2] sm:$0x3]  ;;  %v687_v35 = vsel %vm154_vm4, %v654_v7, 0 }
 0x1c5   :  { %v452_v55 = vcombine.high %v451_v53, %v451_v53  ;;  %v1083_v22 = vld [vmem:[#allocation2 + $0x2] sm:$0x3] }
 0x1c6   :  { %322 = vrot.lane.b32.xlu1 %v320_v49, %s8232_s23  ;;  %v572_v57 = vcombine.high %v571_v56, %v571_v56  ;;  %v8136_v39 = vld [vmem:[%s10151_s3 + $0x60] sm:$0xff]   ;;  %v8141_v49 = vld [vmem:[%s10151_s3 + $0x88] sm:$0xff]  }
 0x1c7   :  { %v8140_v48 = vld [vmem:[%s10151_s3 + $0x80] sm:$0xff]  }
 0x1c8   :  { %324 = vrot.lane.b32.xlu0 %v321_v52, %s8232_s23  ;;  %v8144_v54 = vld [vmem:[%s10151_s3 + $0xa0] sm:$0xff]  }
 0x1ca   :  { %453 = vrot.lane.b32.xlu1 %v451_v53, %s8233_s24  ;;  %v8143_v53 = vld [vmem:[%s10151_s3 + $0x98] sm:$0xff]  }
 0x1cc   :  { %455 = vrot.lane.b32.xlu0 %v452_v55, %s8233_s24  ;;  %v8145_v55 = vld [vmem:[%s10151_s3 + $0xa8] sm:$0xff]  }
 0x1ce   :  { %752 = vrot.lane.b32.xlu1 %v8369_v21, %s8234_s25 }
 0x1d0   :  { %573 = vrot.lane.b32.xlu0 %v571_v56, %s8234_s25 }
 0x1d2   :  { %575 = vrot.lane.b32.xlu1 %v572_v57, %s8234_s25 }
 0x1d4   :  { %864 = vrot.lane.b32.xlu0 %v8362_v20, %s8233_s24 }
 0x1d8   :  { %1084 = vrot.lane.b32.xlu0 %v8369_v21, %s8232_s23 }
 0x1dc   :  { %1006 = vrot.lane.b32.xlu0 %v7120_v58, %s8235_s26  ;;  %v8146_v58 = vld [vmem:[%s10151_s3 + $0xb0] sm:$0xff]  }
 0x234   :  { %v223_v59 = vpop.permute.xlu1 %222 }
 0x236   :  { %v225_v60 = vpop.permute.xlu0 %224 }
 0x237   :  { %v227_v61 = vsel %vm51_vm2, %v223_v59, %v225_v60  ;;  %v8147_v59 = vld [vmem:[%s10151_s3 + $0xb8] sm:$0xff]   ;;  %v8148_v60 = vld [vmem:[%s10151_s3 + $0xc0] sm:$0xff]   ;;  %vm1391_vm2 = vcmask 138244  }
 0x238   :  { %v239_v62 = vsel %vm154_vm4, %v227_v61, 0  ;;  %v323_v63 = vpop.permute.xlu1 %322  ;;  %v8150_v61 = vld [vmem:[%s10151_s3 + $0xc8] sm:$0xff]   ;;  %vm1392_vm5 = vmor %vm1391_vm2, %vm55_vm0  ;;  %vm4610_vm2 = vcmask 793600  }
 0x239   :  { %7679 = vmatpush3.bf16.msra.mxu0 %v239_v62  ;;  %7815 = vmatpush3.bf16.msra.mxu1 %v239_v62  ;;  %v8152_v62 = vld [vmem:[%s10151_s3 + $0xd0] sm:$0xff]   ;;  %1393 = vst.msk [vmem:[#allocation3 + $0x8] sm:$0xff] %vm1392_vm5, %v8230_v29  ;;  %1395 = vst.msk [vmem:[#allocation3 + $0x18] sm:$0xff] %vm1392_vm5, %v8230_v29 }
 0x23a   :  { %v325_v2 = vpop.permute.xlu0 %324  ;;  %7692 = vmatprep.subr.bf16.mxu0 %v8224_v0  ;;  %1397 = vst.msk [vmem:[#allocation3 + $0x28] sm:$0xff] %vm1392_vm5, %v8230_v29  ;;  %vm3985_vm5 = vcmask 261120  }
 0x23b   :  { %v327_v3 = vsel %vm326_vm11, %v323_v63, %v325_v2  ;;  %vm2444_vm11 = vcmask 916480  }
 0x23c   :  { %v338_v4 = vsel %vm154_vm4, %v327_v3, 0  ;;  %7681 = vmatmul.mubr.msk.bf16.vlgmr.msra.gmra.mrb[4].mxu0 %vm228_vm12, %v8126_v1  ;;  %v454_v5 = vpop.permute.xlu1 %453  ;;  %7685 = vmatmul.mubr.msk.bf16.vlgmr.msra.gmra.mrb[4].mxu1 %vm228_vm12, %v8149_v38 }
 0x23d   :  { %7693 = vmatpush3.bf16.msra.mxu0 %v338_v4  ;;  %7694 = vmatprep.mubr.msk.bf16.mxu0 %vm8225_vm1, %v8224_v0 }
 0x23e   :  { %v456_v6 = vpop.permute.xlu0 %455  ;;  %7706 = vmatprep.subr.bf16.mxu0 %v8224_v0  ;;  %7688 = vmatprep.mubr.msk.bf16.mxu1 %vm8225_vm1, %v8224_v0 }
 0x23f   :  { %v458_v14 = vsel %vm457_vm13, %v454_v5, %v456_v6 }
 0x240   :  { %v753_v8 = vpop.permute.xlu1 %752  ;;  %v469_v20 = vsel %vm154_vm4, %v458_v14, 0 }
 0x241   :  { %v755_v9 = vmul.bf16 %v753_v8, %v654_v7  ;;  %v8153_v8 = vld [vmem:[%s10152_s5] sm:$0xff]  }
 0x242   :  { %v574_v10 = vpop.permute.xlu0 %573 }
 0x243   :  { %v785_v11 = vrot.slane %v755_v9, %v8357_v17 }
 0x244   :  { %v576_v28 = vpop.permute.xlu1 %575  ;;  %7689 = vmatmul.mubr.msk.bf16.gmra.mrb[8].mxu1 %vm228_vm12, %v8151_v40 }
 0x245   :  { %786 = vrot.lane.b32.xlu1 %v785_v11, %s8228_s4  ;;  %v578_v30 = vsel %vm577_vm14, %v574_v10, %v576_v28  ;;  %7810 = vmatprep.mubr.msk.bf16.mxu1 %vm1221_vm15, %v8153_v8 }
 0x246   :  { %v865_v18 = vpop.permute.xlu0 %864  ;;  %v589_v31 = vsel %vm154_vm4, %v578_v30, 0 }
 0x247   :  { %v867_v19 = vmul.bf16 %v865_v18, %v863_v16 }
 0x248   :  { %7695 = vmatmul.mubr.msk.bf16.vlgmr.msra.gmra.mrb[4].mxu0 %vm228_vm12, %v8127_v13 }
 0x249   :  { %v897_v21 = vrot.slane %v867_v19, %v8357_v17  ;;  %7707 = vmatpush3.bf16.msra.mxu0 %v469_v20  ;;  %7698 = vmatprep.mubr.msk.bf16.mxu0 %vm8225_vm1, %v8224_v0 }
 0x24a   :  { %v1085_v23 = vpop.permute.xlu0 %1084  ;;  %7720 = vmatprep.subr.bf16.mxu0 %v8224_v0 }
 0x24b   :  { %v1087_v24 = vmul.bf16 %v1085_v23, %v1083_v22  ;;  %898 = vrot.lane.b32.xlu1 %v897_v21, %s8229_s21  ;;  %s8242_s21 = smov 112  }
 0x24d   :  { %v1117_v26 = vrot.slane %v1087_v24, %v8357_v17  ;;  %v8130_v17 = vld [vmem:[%s10151_s3 + $0x30] sm:$0xff]   ;;  %s8239_s3 = smov 16  }
 0x24e   :  { %v1007_v51 = vpop.permute.xlu0 %1006 }
 0x24f   :  { %1118 = vrot.lane.b32.xlu1 %v1117_v26, %s8227_s2  ;;  %v1018_v52 = vsel %vm154_vm4, %v1007_v51, 0 }
 0x250   :  { %7699 = vmatmul.mubr.msk.bf16.gmra.mrb[8].mxu0 %vm228_vm12, %v8128_v25 }
 0x251   :  { %7702 = vmatprep.mubr.msk.bf16.mxu0 %vm8225_vm1, %v8224_v0 }
 0x258   :  { %7703 = vmatmul.mubr.msk.bf16.gmra.mrb[12].mxu0 %vm228_vm12, %v8129_v27 }
 0x259   :  { %7708 = vmatprep.mubr.msk.bf16.mxu0 %vm8225_vm1, %v8224_v0 }
 0x260   :  { %7709 = vmatmul.mubr.msk.bf16.vlgmr.msra.gmra.mrb[4].mxu0 %vm228_vm12, %v8130_v17 }
 0x261   :  { %7721 = vmatpush3.bf16.msra.mxu0 %v589_v31  ;;  %7712 = vmatprep.mubr.msk.bf16.mxu0 %vm8225_vm1, %v8224_v0 }
 0x262   :  { %7734 = vmatprep.subr.bf16.mxu0 %v8224_v0 }
 0x268   :  { %7713 = vmatmul.mubr.msk.bf16.gmra.mrb[8].mxu0 %vm228_vm12, %v8131_v32 }
 0x269   :  { %7716 = vmatprep.mubr.msk.bf16.mxu0 %vm8225_vm1, %v8224_v0 }
 0x270   :  { %7717 = vmatmul.mubr.msk.bf16.gmra.mrb[12].mxu0 %vm228_vm12, %v8132_v33 }
 0x271   :  { %7722 = vmatprep.mubr.msk.bf16.mxu0 %vm8225_vm1, %v8224_v0 }
 0x278   :  { %7723 = vmatmul.mubr.msk.bf16.vlgmr.msra.gmra.mrb[4].mxu0 %vm228_vm12, %v8133_v34 }
 0x279   :  { %7735 = vmatpush3.bf16.msra.mxu0 %v687_v35  ;;  %7726 = vmatprep.mubr.msk.bf16.mxu0 %vm8225_vm1, %v8224_v0 }
 0x27a   :  { %7748 = vmatprep.subr.bf16.mxu0 %v8224_v0 }
 0x280   :  { %7727 = vmatmul.mubr.msk.bf16.gmra.mrb[8].mxu0 %vm228_vm12, %v8134_v36 }
 0x281   :  { %7730 = vmatprep.mubr.msk.bf16.mxu0 %vm8225_vm1, %v8224_v0 }
 0x288   :  { %7731 = vmatmul.mubr.msk.bf16.gmra.mrb[12].mxu0 %vm228_vm12, %v8135_v37 }
 0x289   :  { %7736 = vmatprep.mubr.msk.bf16.mxu0 %vm8225_vm1, %v8224_v0 }
 0x290   :  { %7737 = vmatmul.mubr.msk.bf16.vlgmr.msra.gmra.mrb[4].mxu0 %vm228_vm12, %v8136_v39 }
 0x291   :  { %7740 = vmatprep.mubr.msk.bf16.mxu0 %vm8225_vm1, %v8224_v0 }
 0x298   :  { %7741 = vmatmul.mubr.msk.bf16.gmra.mrb[8].mxu0 %vm228_vm12, %v8137_v41 }
 0x299   :  { %7744 = vmatprep.mubr.msk.bf16.mxu0 %vm8225_vm1, %v8224_v0 }
 0x2a0   :  { %7745 = vmatmul.mubr.msk.bf16.gmra.mrb[12].mxu0 %vm228_vm12, %v8138_v42  ;;  %v8157_v42 = vld [vmem:[%s10153_s6 + $0x4] ss:$8 sps:$4 sm:$0xff]  }
 0x2a1   :  { %7750 = vmatprep.mubr.msk.bf16.mxu0 %vm8225_vm1, %v8224_v0 }
 0x2b7   :  { %v787_v43 = vpop.permute.xlu1 %786 }
 0x2b8   :  { %v798_v44 = vsel %vm154_vm4, %v787_v43, 0  ;;  %v8154_v43 = vld [vmem:[%s10152_s5 + $0x8] ss:$0 sps:$4 sm:$0xff]   ;;  %s8248_s5 = smov 96  }
 0x2b9   :  { %7749 = vmatpush3.bf16.msra.mxu0 %v798_v44  ;;  %v8155_v44 = vld [vmem:[%s10153_s6] ss:$8 sps:$4 sm:$0xff]  }
 0x2ba   :  { %7762 = vmatprep.subr.bf16.mxu0 %v8224_v0 }
 0x2bc   :  { %7751 = vmatmul.mubr.msk.bf16.vlgmr.msra.gmra.mrb[4].mxu0 %vm228_vm12, %v8139_v45  ;;  %v8160_v45 = vld [vmem:[%s10153_s6 + $0x14] ss:$8 sps:$4 sm:$0xff]  }
 0x2bd   :  { %v899_v46 = vpop.permute.xlu1 %898  ;;  %7754 = vmatprep.mubr.msk.bf16.mxu0 %vm8225_vm1, %v8224_v0 }
 0x2be   :  { %v910_v47 = vsel %vm154_vm4, %v899_v46, 0  ;;  %v8158_v46 = vld [vmem:[%s10153_s6 + $0x10] ss:$8 sps:$4 sm:$0xff]  }
 0x2bf   :  { %7763 = vmatpush3.bf16.msra.mxu0 %v910_v47  ;;  %v8163_v47 = vld [vmem:[%s10153_s6 + $0x24] ss:$8 sps:$4 sm:$0xff]  }
 0x2c0   :  { %7776 = vmatprep.subr.bf16.mxu0 %v8224_v0 }
 0x2c1   :  { %v1119_v56 = vpop.permute.xlu1 %1118 }
 0x2c2   :  { %v1130_v57 = vsel %vm154_vm4, %v1119_v56, 0 }
 0x2c4   :  { %7755 = vmatmul.mubr.msk.bf16.gmra.mrb[8].mxu0 %vm228_vm12, %v8140_v48  ;;  %v8161_v48 = vld [vmem:[%s10153_s6 + $0x20] ss:$8 sps:$4 sm:$0xff]  }
 0x2c5   :  { %7758 = vmatprep.mubr.msk.bf16.mxu0 %vm8225_vm1, %v8224_v0 }
 0x2cc   :  { %7759 = vmatmul.mubr.msk.bf16.gmra.mrb[12].mxu0 %vm228_vm12, %v8141_v49  ;;  %v8166_v49 = vld [vmem:[%s10153_s6 + $0x34] ss:$8 sps:$4 sm:$0xff]  }
 0x2cd   :  { %7764 = vmatprep.mubr.msk.bf16.mxu0 %vm8225_vm1, %v8224_v0 }
 0x2d4   :  { %7765 = vmatmul.mubr.msk.bf16.vlgmr.msra.gmra.mrb[4].mxu0 %vm228_vm12, %v8142_v50  ;;  %v8236_v50 = vmov 1966171168  }
 0x2d5   :  { %7777 = vmatpush3.bf16.msra.mxu0 %v1018_v52  ;;  %7768 = vmatprep.mubr.msk.bf16.mxu0 %vm8225_vm1, %v8224_v0  ;;  %v1438_v51 = vunpack.c.l.s4 %v8236_v50  ;;  %v8164_v52 = vld [vmem:[%s10153_s6 + $0x30] ss:$8 sps:$4 sm:$0xff]   ;;  %s8237_s6 = smov 111  }
 0x2d6   :  { %7790 = vmatprep.subr.bf16.mxu0 %v8224_v0 }
 0x2dc   :  { %7769 = vmatmul.mubr.msk.bf16.gmra.mrb[8].mxu0 %vm228_vm12, %v8143_v53  ;;  %v1439_v53 = vunpack.c.0.s8 %v1438_v51 }
 0x2dd   :  { %7772 = vmatprep.mubr.msk.bf16.mxu0 %vm8225_vm1, %v8224_v0 }
 0x2e4   :  { %7773 = vmatmul.mubr.msk.bf16.gmra.mrb[12].mxu0 %vm228_vm12, %v8144_v54  ;;  %v8617_v54 = vsub.s32 %v1439_v53, %v8351_v12 }
 0x2e5   :  { %7778 = vmatprep.mubr.msk.bf16.mxu0 %vm8225_vm1, %v8224_v0 }
 0x2ec   :  { %7779 = vmatmul.mubr.msk.bf16.vlgmr.msra.gmra.mrb[4].mxu0 %vm228_vm12, %v8145_v55  ;;  %v7153_v55 = vld.sshfl [vmem:[%s10154_s8] sm:$0x11 pattern:$0x75316420]  ;;  %s8238_s8 = smov 113  }
 0x2ed   :  { %7791 = vmatpush3.bf16.msra.mxu0 %v1130_v57  ;;  %7782 = vmatprep.mubr.msk.bf16.mxu0 %vm8225_vm1, %v8224_v0  ;;  %v1436_v56 = vcombine.high %v7153_v55, %v7153_v55  ;;  %v1443_v57 = vrot.slane %v7153_v55, %v8617_v54 }
 0x2f4   :  { %7783 = vmatmul.mubr.msk.bf16.gmra.mrb[8].mxu0 %vm228_vm12, %v8146_v58  ;;  %v1450_v58 = vrot.slane %v1436_v56, %v8617_v54 }
 0x2f5   :  { %7786 = vmatprep.mubr.msk.bf16.mxu0 %vm8225_vm1, %v8224_v0 }
 0x2fc   :  { %7787 = vmatmul.mubr.msk.bf16.gmra.mrb[12].mxu0 %vm228_vm12, %v8147_v59  ;;  %v1452_v59 = vpack.i.b16 %v1443_v57, %v1443_v57 }
 0x2fd   :  { %7792 = vmatprep.mubr.msk.bf16.mxu0 %vm8225_vm1, %v8224_v0 }
 0x304   :  { %7793 = vmatmul.mubr.msk.bf16.vlgmr.msra.gmra.mrb[4].mxu0 %vm228_vm12, %v8148_v60  ;;  %v1738_v60 = vshrl.u32 %v1443_v57, 16 }
 0x305   :  { %7796 = vmatprep.mubr.msk.bf16.mxu0 %vm8225_vm1, %v8224_v0 }
 0x30c   :  { %7797 = vmatmul.mubr.msk.bf16.gmra.mrb[8].mxu0 %vm228_vm12, %v8150_v61  ;;  %v1457_v61 = vrot.slane %v1452_v59, %v8354_v15 }
 0x30d   :  { %7800 = vmatprep.mubr.msk.bf16.mxu0 %vm8225_vm1, %v8224_v0  ;;  %vm1332_vm1 = vcmask 523264  }
 0x30f   :  { %v283_v63 = vpop.f32.mrb[4].mxu1 }
 0x310   :  { %v7686_v1 = vpop.f32.mrb[5].mxu1 }
 0x311   :  { %v286_v2 = vpop.f32.mrb[6].mxu1  ;;  %v1746_v1 = vshrl.u32 %v1450_v58, 16 }
 0x312   :  { %v7687_v3 = vpop.f32.mrb[7].mxu1 }
 0x313   :  { %v1747_v3 = vpack.i.b16 %v1746_v1, %v1746_v1 }
 0x314   :  { %7801 = vmatmul.mubr.msk.bf16.gmra.mrb[12].mxu0 %vm228_vm12, %v8152_v62  ;;  %v1459_v62 = vpack.i.b16 %v1450_v58, %v1450_v58  ;;  %vm3681_vm12 = vcmask 269316  }
 0x315   :  { %vm3682_vm13 = vmor %vm3681_vm12, %vm55_vm0 }
 0x317   :  { %v291_v4 = vpop.f32.mrb[8].mxu1 }
 0x318   :  { %v7690_v5 = vpop.f32.mrb[9].mxu1 }
 0x319   :  { %v294_v6 = vpop.f32.mrb[10].mxu1  ;;  %v1752_v5 = vrot.slane %v1747_v3, %v8354_v15 }
 0x31a   :  { %v7691_v7 = vpop.f32.mrb[11].mxu1 }
 0x3d7   :  { %v1166_v0 = vpop.f32.mrb[4].mxu0 }
 0x3d8   :  { %v1195_v9 = vmax.f32 %v1166_v0, 0.0  ;;  %v7794_v10 = vpop.f32.mrb[5].mxu0 }
 0x3d9   :  { %v1169_v11 = vpop.f32.mrb[6].mxu0 }
 0x3da   :  { %v1196_v13 = vmax.f32 %v1169_v11, 0.0  ;;  %v7795_v14 = vpop.f32.mrb[7].mxu0  ;;  %v1201_v16 = vmin.f32 %v1195_v9, 6.0 }
 0x3dc   :  { %v1202_v18 = vmin.f32 %v1196_v13, 6.0 }
 0x3de   :  { %v1210_v19 = vpack.c.bf16 %v1202_v18, %v1201_v16 }
 0x3df   :  { %v1174_v20 = vpop.f32.mrb[8].mxu0 }
 0x3e0   :  { %v7816_v21 = vadd.f32 %v1174_v20, %v283_v63  ;;  %v7798_v22 = vpop.f32.mrb[9].mxu0  ;;  %7804 = vmatprep.subr.bf16.mxu1 %v1210_v19  ;;  %v1739_v63 = vpack.i.b16 %v1738_v60, %v1738_v60 }
 0x3e1   :  { %v1177_v23 = vpop.f32.mrb[10].mxu0  ;;  %7805 = vmatpush3.bf16.msra.mxu1 %v1210_v19 }
 0x3e2   :  { %v1197_v24 = vmax.f32 %v7816_v21, 0.0  ;;  %v7817_v25 = vadd.f32 %v1177_v23, %v286_v2  ;;  %v7799_v26 = vpop.f32.mrb[11].mxu0  ;;  %v1464_v2 = vrot.slane %v1459_v62, %v8354_v15  ;;  %v1744_v12 = vrot.slane %v1739_v63, %v8354_v15 }
 0x3e4   :  { %v1198_v27 = vmax.f32 %v7817_v25, 0.0  ;;  %v1203_v28 = vmin.f32 %v1197_v24, 6.0 }
 0x3e6   :  { %v1204_v17 = vmin.f32 %v1198_v27, 6.0 }
 0x3e7   :  { %v1182_v30 = vpop.f32.mrb[12].mxu0 }
 0x3e8   :  { %v1211_v31 = vpack.c.bf16 %v1204_v17, %v1203_v28  ;;  %v7818_v32 = vadd.f32 %v1182_v30, %v291_v4  ;;  %v7802_v33 = vpop.f32.mrb[13].mxu0  ;;  %v8627_v4 = vcombine.low %v1457_v61, %v1464_v2 }
 0x3e9   :  { %v1185_v34 = vpop.f32.mrb[14].mxu0 }
 0x3ea   :  { %v1199_v35 = vmax.f32 %v7818_v32, 0.0  ;;  %v7819_v36 = vadd.f32 %v1185_v34, %v294_v6  ;;  %v7803_v37 = vpop.f32.mrb[15].mxu0  ;;  %7806 = vmatprep.subr.bf16.mxu1 %v1211_v31  ;;  %1470 = vrot.lane.b32.xlu0 %v8627_v4, %s8237_s6  ;;  %v8632_v6 = vcombine.low %v1744_v12, %v1752_v5 }
 0x3eb   :  { %7807 = vmatpush3.bf16.msra.mxu1 %v1211_v31 }
 0x3ec   :  { %v1200_v38 = vmax.f32 %v7819_v36, 0.0  ;;  %v1205_v39 = vmin.f32 %v1199_v35, 6.0  ;;  %1758 = vrot.lane.b32.xlu1 %v8632_v6, %s8238_s8 }
 0x3ee   :  { %v1206_v40 = vmin.f32 %v1200_v38, 6.0  ;;  %1898 = vrot.lane.b32.xlu0 %v8627_v4, %s8228_s4 }
 0x3f0   :  { %v1212_v41 = vpack.c.bf16 %v1206_v40, %v1205_v39 }
 0x3f2   :  { %7808 = vmatprep.subr.bf16.mxu1 %v1212_v41 }
 0x3f3   :  { %7809 = vmatpush3.bf16.msra.mxu1 %v1212_v41 }
 0x3f4   :  { %1339 = vmatprep.subr.bf16.mxu1 %v8157_v42 }
 0x3f6   :  { %7811 = vmatmul.mubr.msk.bf16.vlgmr.msra.gmra.mrb[12].mxu1 %vm1221_vm15, %v8154_v43  ;;  %vm3688_vm15 = vcmask 267268  }
 0x3f7   :  { %1340 = vmatpush1.bf16.msra.mxu1 %v8155_v44  ;;  %1371 = vmatprep.mubr.bf16.mxu1 %v8230_v29 }
 0x3f8   :  { %1341 = vmatprep.subr.bf16.mxu1 %v8160_v45 }
 0x3fb   :  { %1342 = vmatpush1.bf16.msra.mxu1 %v8158_v46 }
 0x3fc   :  { %1343 = vmatprep.subr.bf16.mxu1 %v8163_v47 }
 0x3ff   :  { %1344 = vmatpush1.bf16.msra.mxu1 %v8161_v48 }
 0x400   :  { %1345 = vmatprep.subr.bf16.mxu1 %v8166_v49 }
 0x403   :  { %1346 = vmatpush1.bf16.msra.mxu1 %v8164_v52 }
 0x45c   :  { %v1471_v37 = vpop.permute.xlu0 %1470 }
 0x45d   :  { %v1472_v40 = vrot.slane %v1471_v37, 4 }
 0x45e   :  { %v1759_v52 = vpop.permute.xlu1 %1758 }
 0x45f   :  { %v1474_v44 = vsel %vm1473_vm6, %v1472_v40, %v1471_v37  ;;  %v1760_v56 = vrot.slane %v1759_v52, 4 }
 0x460   :  { %v1899_v2 = vpop.permute.xlu0 %1898 }
 0x461   :  { %v1762_v60 = vsel %vm1761_vm7, %v1760_v56, %v1759_v52  ;;  %v8725_v52 = vld [vmem:[#allocation3 + $0x1c] sm:$0xf] }
 0x4c9   :  { %v7812_v7 = vpop.f32.mrb[12].mxu1 }
 0x4ca   :  { %v1262_v8 = vpop.f32.mrb[13].mxu1  ;;  %v1278_v16 = vmax.f32 %v7812_v7, 0.0 }
 0x4cb   :  { %v1276_v0 = vmax.f32 %v1262_v8, 0.0  ;;  %v7813_v9 = vpop.f32.mrb[14].mxu1  ;;  %v1900_v8 = vrot.slane %v1899_v2, 4 }
 0x4cc   :  { %v1265_v10 = vpop.f32.mrb[15].mxu1  ;;  %v1281_v19 = vmin.f32 %v1278_v16, 6.0 }
 0x4cd   :  { %v1277_v11 = vmax.f32 %v1265_v10, 0.0  ;;  %v1279_v13 = vmin.f32 %v1276_v0, 6.0 }
 0x4ce   :  { %v1283_v20 = vpack.c.bf16 %v1281_v19, %v1281_v19 }
 0x4cf   :  { %v1280_v14 = vmin.f32 %v1277_v11, 6.0  ;;  %v1901_v11 = vsel %vm538_vm10, %v1900_v8, %v1899_v2  ;;  %v8735_v2 = vld [vmem:[#allocation4] sm:$0xff] }
 0x4d1   :  { %v1282_v18 = vpack.c.bf16 %v1280_v14, %v1279_v13 }
 0x4d3   :  { %7148 = vmatmul.mubr.msk.bf16.vlgmr.msra.gmra.mrb[16].mxu1 %vm1332_vm1, %v1282_v18 }
 0x4d4   :  { %1381 = vmatprep.mubr.bf16.mxu1 %v8230_v29 }
 0x4db   :  { %7149 = vmatmul.mubr.msk.bf16.gmra.mrb[20].mxu1 %vm1332_vm1, %v1283_v20  ;;  %vm3689_vm1 = vmor %vm3688_vm15, %vm154_vm4  ;;  %vm3896_vm4 = vcmask 777216  }
 0x4dc   :  { %1583 = vmatprep.mubr.bf16.mxu1 %v8230_v29 }
 0x5a6   :  { %v8644_v21 = vpop.f32.mrb[16].mxu1 }
 0x5a7   :  { %v8646_v22 = vpop.f32.mrb[17].mxu1 }
 0x5a8   :  { %v8650_v23 = vpack.c.bf16 %v8646_v22, %v8644_v21  ;;  %v8652_v24 = vpop.f32.mrb[18].mxu1 }
 0x5a9   :  { %v8654_v25 = vpop.f32.mrb[19].mxu1 }
 0x5aa   :  { %1418 = vst [vmem:[#allocation3 + $0x4] sm:$0xff] %v8650_v23  ;;  %v8659_v26 = vpack.c.bf16 %v8654_v25, %v8652_v24 }
 0x5ac   :  { %1419 = vst [vmem:[#allocation3 + $0x14] sm:$0xff] %v8659_v26 }
 0x5ae   :  { %v8662_v29 = vpop.f32.mrb[20].mxu1 }
 0x5af   :  { %v8664_v27 = vpop.f32.mrb[21].mxu1 }
 0x5b0   :  { %v8668_v28 = vpack.c.bf16 %v8664_v27, %v8662_v29  ;;  %v1387_v17 = vpop.f32.mrb[22].mxu1 }
 0x5b1   :  { %v1388_v30 = vpop.f32.mrb[23].mxu1  ;;  %v8671_v31 = vld [vmem:[#allocation3] sm:$0xff]  ;;  %v1422_v35 = vld [vmem:[#allocation3 + $0x8] sm:$0xf] }
 0x5b2   :  { %1420 = vst [vmem:[#allocation3 + $0x24] sm:$0xff] %v8668_v28  ;;  %v1477_v47 = vmul.bf16 %v1474_v44, %v8671_v31  ;;  %v1478_v50 = vmul.bf16 %v1472_v40, %v1422_v35  ;;  %v1765_v63 = vmul.bf16 %v1762_v60, %v8671_v31  ;;  %v1766_v3 = vmul.bf16 %v1760_v56, %v1422_v35 }
 0x5b3   :  { %v8673_v32 = vld [vmem:[#allocation3 + $0x10] sm:$0xff]  ;;  %v1424_v33 = vld [vmem:[#allocation3 + $0x18] sm:$0xf]  ;;  %v1904_v18 = vmul.bf16 %v1901_v11, %v8671_v31 }
 0x5b4   :  { %v7161_v34 = vcombine.high %v8671_v31, %v8673_v32  ;;  %v7162_v36 = vcombine.low %v1422_v35, %v1424_v33  ;;  %v7160_v38 = vcombine.low %v8671_v31, %v8673_v32  ;;  %v1479_v45 = vmul.bf16 %v1474_v44, %v8673_v32  ;;  %v1895_v13 = vld [vmem:[#allocation3 + $0x18] sm:$0xf] }
 0x5b5   :  { %v1480_v48 = vmul.bf16 %v1472_v40, %v1424_v33  ;;  %v1767_v61 = vmul.bf16 %v1762_v60, %v8673_v32  ;;  %v1768_v1 = vmul.bf16 %v1760_v56, %v1424_v33  ;;  %v1906_v14 = vmul.bf16 %v1901_v11, %v8673_v32 }
 0x5b6   :  { %1521 = vrot.lane.b32.xlu1 %v7161_v34, %s8239_s3  ;;  %1523 = vrot.lane.b32.xlu0 %v7162_v36, %s8239_s3  ;;  %v7172_v49 = vcombine.high %v1477_v47, %v1479_v45  ;;  %v7171_v55 = vcombine.low %v1477_v47, %v1479_v45  ;;  %v1907_v20 = vmul.bf16 %v1900_v8, %v1895_v13 }
 0x5b7   :  { %v7173_v53 = vcombine.low %v1478_v50, %v1480_v48  ;;  %v7188_v12 = vcombine.high %v1765_v63, %v1767_v61  ;;  %v7189_v7 = vcombine.low %v1766_v3, %v1768_v1  ;;  %v7187_v0 = vcombine.low %v1765_v63, %v1767_v61  ;;  %v8173_v50 = vld [vmem:[%s10155_s7 + $0xc] sm:$0xff]  }
 0x5b8   :  { %v7202_v17 = vcombine.high %v1904_v18, %v1906_v14  ;;  %v7201_v32 = vcombine.low %v1904_v18, %v1906_v14 }
 0x5b9   :  { %v8679_v39 = vld [vmem:[#allocation3 + $0x20] sm:$0xff]  ;;  %v1426_v42 = vld [vmem:[#allocation3 + $0x28] sm:$0xf] }
 0x5ba   :  { %1519 = vrot.lane.b32.xlu1 %v7160_v38, %s8239_s3  ;;  %v7163_v41 = vcombine.low %v8679_v39, %v8679_v39  ;;  %v7164_v43 = vcombine.high %v8679_v39, %v8679_v39  ;;  %v7165_v46 = vcombine.low %v1426_v42, %v1426_v42  ;;  %v1481_v51 = vmul.bf16 %v1474_v44, %v8679_v39  ;;  %v1897_v35 = vld [vmem:[#allocation3 + $0x28] sm:$0xf] }
 0x5bb   :  { %v1482_v58 = vmul.bf16 %v1472_v40, %v1426_v42  ;;  %v1769_v5 = vmul.bf16 %v1762_v60, %v8679_v39  ;;  %v1770_v10 = vmul.bf16 %v1760_v56, %v1426_v42  ;;  %v1908_v33 = vmul.bf16 %v1901_v11, %v8679_v39 }
 0x5bc   :  { %1525 = vrot.lane.b32.xlu0 %v7163_v41, %s8239_s3  ;;  %v7174_v57 = vcombine.low %v1481_v51, %v1481_v51  ;;  %v7175_v59 = vcombine.high %v1481_v51, %v1481_v51  ;;  %v1909_v37 = vmul.bf16 %v1900_v8, %v1897_v35  ;;  %v8723_v51 = vld [vmem:[#allocation3 + $0xc] sm:$0xf] }
 0x5bd   :  { %v7176_v62 = vcombine.low %v1482_v58, %v1482_v58  ;;  %v7190_v9 = vcombine.low %v1769_v5, %v1769_v5  ;;  %v7191_v16 = vcombine.high %v1769_v5, %v1769_v5  ;;  %v7192_v19 = vcombine.low %v1770_v10, %v1770_v10  ;;  %v8738_v5 = vld [vmem:[#allocation3 + $0x2c] sm:$0xf] }
 0x5be   :  { %1527 = vrot.lane.b32.xlu1 %v7164_v43, %s8239_s3  ;;  %v7204_v36 = vcombine.low %v1908_v33, %v1908_v33  ;;  %v7205_v31 = vcombine.high %v1908_v33, %v1908_v33  ;;  %v7206_v38 = vcombine.low %v1909_v37, %v1909_v37 }
 0x5c0   :  { %1529 = vrot.lane.b32.xlu0 %v7165_v46, %s8239_s3 }
 0x5c2   :  { %2135 = vrot.lane.b32.xlu1 %v8632_v6, %s8234_s25 }
 0x5c4   :  { %1633 = vrot.lane.b32.xlu0 %v7172_v49, %s8240_s29 }
 0x5c6   :  { %1635 = vrot.lane.b32.xlu1 %v7173_v53, %s8240_s29 }
 0x5c8   :  { %1631 = vrot.lane.b32.xlu0 %v7171_v55, %s8240_s29 }
 0x5ca   :  { %1637 = vrot.lane.b32.xlu1 %v7174_v57, %s8240_s29 }
 0x5cc   :  { %1639 = vrot.lane.b32.xlu0 %v7175_v59, %s8240_s29 }
 0x5ce   :  { %1641 = vrot.lane.b32.xlu1 %v7176_v62, %s8240_s29 }
 0x5d0   :  { %2267 = vrot.lane.b32.xlu0 %v8627_v4, %s8241_s30  ;;  %v1893_v4 = vld [vmem:[#allocation3 + $0x8] sm:$0xf] }
 0x5d1   :  { %v1905_v30 = vmul.bf16 %v1900_v8, %v1893_v4 }
 0x5d2   :  { %1806 = vrot.lane.b32.xlu1 %v7188_v12, %s8241_s30 }
 0x5d3   :  { %v7203_v34 = vcombine.low %v1905_v30, %v1907_v20 }
 0x5d4   :  { %1808 = vrot.lane.b32.xlu0 %v7189_v7, %s8241_s30 }
 0x5d6   :  { %1804 = vrot.lane.b32.xlu1 %v7187_v0, %s8241_s30  ;;  %v8174_v0 = vld [vmem:[%s10155_s7 + $0x14] ss:$0 sps:$4 sm:$0xff]  }
 0x5d8   :  { %1810 = vrot.lane.b32.xlu0 %v7190_v9, %s8241_s30 }
 0x5da   :  { %1812 = vrot.lane.b32.xlu1 %v7191_v16, %s8241_s30 }
 0x5dc   :  { %1814 = vrot.lane.b32.xlu0 %v7192_v19, %s8241_s30  ;;  %s8247_s30 = smov 31  }
 0x5de   :  { %1945 = vrot.lane.b32.xlu1 %v7202_v17, %s8234_s25 }
 0x5e0   :  { %1947 = vrot.lane.b32.xlu0 %v7203_v34, %s8234_s25  ;;  %v8175_v34 = vld [vmem:[%s10155_s7] sm:$0xff]  }
 0x5e2   :  { %1943 = vrot.lane.b32.xlu1 %v7201_v32, %s8234_s25 }
 0x5e4   :  { %1949 = vrot.lane.b32.xlu0 %v7204_v36, %s8234_s25 }
 0x5e6   :  { %1951 = vrot.lane.b32.xlu1 %v7205_v31, %s8234_s25 }
 0x5e8   :  { %1953 = vrot.lane.b32.xlu0 %v7206_v38, %s8234_s25 }
 0x5ea   :  { %2520 = vrot.lane.b32.xlu1 %v8632_v6, %s8240_s29  ;;  %s8246_s29 = smov 33  }
 0x628   :  { %v1522_v39 = vpop.permute.xlu1 %1521  ;;  %v1524_v40 = vpop.permute.xlu0 %1523 }
 0x629   :  { %v1533_v41 = vsel %vm110_vm3, %v1522_v39, %v1524_v40 }
 0x62a   :  { %1551 = vmatprep.subr.bf16.mxu1 %v1533_v41 }
 0x62c   :  { %v1520_v42 = vpop.permute.xlu1 %1519 }
 0x62d   :  { %v1532_v43 = vsel %vm110_vm3, %v1520_v42, %v1522_v39 }
 0x62e   :  { %v1526_v44 = vpop.permute.xlu0 %1525  ;;  %1552 = vmatpush1.bf16.msra.mxu1 %v1532_v43 }
 0x630   :  { %v1528_v45 = vpop.permute.xlu1 %1527 }
 0x631   :  { %v1534_v46 = vsel %vm110_vm3, %v1526_v44, %v1528_v45 }
 0x632   :  { %v1530_v47 = vpop.permute.xlu0 %1529  ;;  %v1546_v6 = vsel %vm55_vm0, %v1534_v46, 0 }
 0x633   :  { %v1535_v48 = vsel %vm110_vm3, %v1528_v45, %v1530_v47  ;;  %vm1816_vm3 = vcmask 121856  }
 0x634   :  { %v2136_v49 = vpop.permute.xlu1 %2135  ;;  %7166 = vmatprep.subr.msk.bf16.mxu1 %vm55_vm0, %v1535_v48 }
 0x635   :  { %v2137_v53 = vrot.slane %v2136_v49, 4  ;;  %1554 = vmatpush1.bf16.msra.mxu1 %v1546_v6  ;;  %v8176_v6 = vld [vmem:[%s10155_s7 + $0x8] ss:$0 sps:$4 sm:$0xff]  }
 0x636   :  { %v1634_v55 = vpop.permute.xlu0 %1633 }
 0x637   :  { %v2138_v56 = vsel %vm577_vm14, %v2137_v53, %v2136_v49  ;;  %v2142_v57 = vmul.bf16 %v2137_v53, %v8723_v51  ;;  %v2144_v58 = vmul.bf16 %v2137_v53, %v8725_v52  ;;  %v2146_v10 = vmul.bf16 %v2137_v53, %v8738_v5 }
 0x638   :  { %v2141_v59 = vmul.bf16 %v8650_v23, %v2138_v56  ;;  %v2143_v60 = vmul.bf16 %v8659_v26, %v2138_v56  ;;  %v1636_v61 = vpop.permute.xlu1 %1635  ;;  %7167 = vmatmul.mubr.msk.bf16.vlgmr.msra.gmra.mrb[24].mxu1 %vm1538_vm8, %v8173_v50  ;;  %v2145_v62 = vmul.bf16 %v8668_v28, %v2138_v56 }
 0x639   :  { %v1645_v63 = vsel %vm1643_vm9, %v1634_v55, %v1636_v61  ;;  %v7229_v1 = vcombine.low %v2142_v57, %v2144_v58  ;;  %1593 = vmatprep.mubr.bf16.mxu1 %v8735_v2  ;;  %v7232_v18 = vcombine.low %v2146_v10, %v2146_v10 }
 0x63a   :  { %1662 = vmatprep.subr.bf16.mxu1 %v1645_v63  ;;  %v1632_v12 = vpop.permute.xlu0 %1631  ;;  %v7228_v3 = vcombine.high %v2141_v59, %v2143_v60  ;;  %v7230_v9 = vcombine.low %v2145_v62, %v2145_v62  ;;  %v7227_v13 = vcombine.low %v2141_v59, %v2143_v60  ;;  %v7231_v17 = vcombine.high %v2145_v62, %v2145_v62 }
 0x63b   :  { %v1644_v7 = vsel %vm1643_vm9, %v1632_v12, %v1634_v55  ;;  %2184 = vrot.lane.b32.xlu1 %v7229_v1, %s8228_s4  ;;  %v7257_v60 = vcombine.low %v8723_v51, %v8725_v52  ;;  %v8220_v1 = vpack.c.bf16 %v8654_v25, %v8646_v22  ;;  %v8178_v12 = vld [vmem:[%s10155_s7 + $0x18] sm:$0xff]   ;;  %v7260_v25 = vcombine.low %v8738_v5, %v8738_v5 }
 0x63c   :  { %1663 = vmatpush1.bf16.msra.mxu1 %v1644_v7  ;;  %2182 = vrot.lane.b32.xlu0 %v7228_v3, %s8228_s4  ;;  %v1638_v8 = vpop.permute.xlu1 %1637  ;;  %v8221_v7 = vpack.c.bf16 %v8662_v29, %v8662_v29 }
 0x63e   :  { %v1640_v11 = vpop.permute.xlu0 %1639 }
 0x63f   :  { %v1646_v14 = vsel %vm1643_vm9, %v1638_v8, %v1640_v11  ;;  %2186 = vrot.lane.b32.xlu1 %v7230_v9, %s8228_s4  ;;  %v8222_v9 = vpack.c.bf16 %v8652_v24, %v8644_v21  ;;  %v8223_v21 = vpack.c.bf16 %v8664_v27, %v8664_v27  ;;  %v8180_v24 = vld [vmem:[%s10155_s7 + $0x20] ss:$0 sps:$4 sm:$0xff]  }
 0x640   :  { %7168 = vmatmul.mubr.msk.bf16.gmra.mrb[28].mxu1 %vm1538_vm8, %v8174_v0  ;;  %2180 = vrot.lane.b32.xlu0 %v7227_v13, %s8228_s4  ;;  %v1642_v16 = vpop.permute.xlu1 %1641  ;;  %v1657_v20 = vsel %vm55_vm0, %v1646_v14, 0 }
 0x641   :  { %v1647_v4 = vsel %vm1643_vm9, %v1640_v11, %v1642_v16  ;;  %1694 = vmatprep.mubr.bf16.mxu1 %v8735_v2 }
 0x642   :  { %v2268_v19 = vpop.permute.xlu0 %2267  ;;  %7177 = vmatprep.subr.msk.bf16.mxu1 %vm55_vm0, %v1647_v4 }
 0x643   :  { %v2269_v30 = vrot.slane %v2268_v19, 4  ;;  %1665 = vmatpush1.bf16.msra.mxu1 %v1657_v20  ;;  %2190 = vrot.lane.b32.xlu1 %v7232_v18, %s8228_s4 }
 0x644   :  { %2188 = vrot.lane.b32.xlu0 %v7231_v17, %s8228_s4  ;;  %v1807_v33 = vpop.permute.xlu1 %1806 }
 0x645   :  { %v2270_v35 = vsel %vm1816_vm3, %v2269_v30, %v2268_v19  ;;  %v2274_v32 = vmul.bf16 %v2269_v30, %v8723_v51  ;;  %v2276_v36 = vmul.bf16 %v2269_v30, %v8725_v52  ;;  %v2278_v47 = vmul.bf16 %v2269_v30, %v8738_v5 }
 0x646   :  { %v2273_v37 = vmul.bf16 %v8650_v23, %v2270_v35  ;;  %v2275_v31 = vmul.bf16 %v8659_v26, %v2270_v35  ;;  %v1809_v38 = vpop.permute.xlu0 %1808  ;;  %v2277_v39 = vmul.bf16 %v8668_v28, %v2270_v35  ;;  %v8183_v35 = vld [vmem:[%s10155_s7 + $0x30] sm:$0xff]  }
 0x647   :  { %v1818_v40 = vsel %vm1816_vm3, %v1807_v33, %v1809_v38  ;;  %v7243_v41 = vcombine.low %v2274_v32, %v2276_v36  ;;  %v7246_v56 = vcombine.low %v2278_v47, %v2278_v47  ;;  %v8184_v32 = vld [vmem:[%s10155_s7 + $0x38] ss:$0 sps:$4 sm:$0xff]  }
 0x648   :  { %7178 = vmatmul.mubr.msk.bf16.vlgmr.msra.gmra.mrb[24].mxu1 %vm1538_vm8, %v8175_v34  ;;  %1835 = vmatprep.subr.bf16.mxu1 %v1818_v40  ;;  %v1805_v42 = vpop.permute.xlu1 %1804  ;;  %v7242_v43 = vcombine.high %v2273_v37, %v2275_v31  ;;  %v7244_v46 = vcombine.low %v2277_v39, %v2277_v39  ;;  %v7241_v49 = vcombine.low %v2273_v37, %v2275_v31  ;;  %v8182_v34 = vld [vmem:[%s10155_s7 + $0x2c] ss:$0 sps:$4 sm:$0xff]  }
 0x649   :  { %v1817_v44 = vsel %vm1816_vm3, %v1805_v42, %v1807_v33  ;;  %2316 = vrot.lane.b32.xlu1 %v7243_v41, %s8238_s8  ;;  %1704 = vmatprep.mubr.bf16.mxu1 %v8735_v2  ;;  %v7245_v59 = vcombine.high %v2277_v39, %v2277_v39 }
 0x64a   :  { %2314 = vrot.lane.b32.xlu0 %v7242_v43, %s8238_s8  ;;  %v1811_v45 = vpop.permute.xlu0 %1810  ;;  %1836 = vmatpush1.bf16.msra.mxu1 %v1817_v44 }
 0x64c   :  { %v1813_v48 = vpop.permute.xlu1 %1812 }
 0x64d   :  { %v1819_v50 = vsel %vm1816_vm3, %v1811_v45, %v1813_v48  ;;  %2318 = vrot.lane.b32.xlu1 %v7244_v46, %s8238_s8  ;;  %v8185_v46 = vld [vmem:[%s10155_s7 + $0x3c] sm:$0xff]  }
 0x64e   :  { %2312 = vrot.lane.b32.xlu0 %v7241_v49, %s8238_s8  ;;  %v1815_v53 = vpop.permute.xlu0 %1814  ;;  %v1830_v58 = vsel %vm55_vm0, %v1819_v50, 0 }
 0x64f   :  { %v1820_v55 = vsel %vm1816_vm3, %v1813_v48, %v1815_v53  ;;  %v8186_v53 = vld [vmem:[%s10155_s7 + $0x44] ss:$0 sps:$4 sm:$0xff]  }
 0x650   :  { %7179 = vmatmul.mubr.msk.bf16.gmra.mrb[28].mxu1 %vm1538_vm8, %v8176_v6  ;;  %7193 = vmatprep.subr.msk.bf16.mxu1 %vm55_vm0, %v1820_v55  ;;  %v1946_v57 = vpop.permute.xlu1 %1945 }
 0x651   :  { %2322 = vrot.lane.b32.xlu1 %v7246_v56, %s8238_s8  ;;  %1838 = vmatpush1.bf16.msra.mxu1 %v1830_v58 }
 0x652   :  { %2320 = vrot.lane.b32.xlu0 %v7245_v59, %s8238_s8  ;;  %v1948_v61 = vpop.permute.xlu0 %1947  ;;  %1867 = vmatprep.mubr.bf16.mxu1 %v8735_v2 }
 0x653   :  { %v1956_v62 = vsel %vm577_vm14, %v1946_v57, %v1948_v61 }
 0x654   :  { %1973 = vmatprep.subr.bf16.mxu1 %v1956_v62  ;;  %v1944_v63 = vpop.permute.xlu1 %1943 }
 0x655   :  { %2436 = vrot.lane.b32.xlu1 %v7257_v60, %s8242_s21  ;;  %v1955_v8 = vsel %vm577_vm14, %v1944_v63, %v1946_v57  ;;  %v8187_v63 = vld [vmem:[%s10155_s7 + $0x48] sm:$0xff]  }
 0x656   :  { %2434 = vrot.lane.b32.xlu0 %v8220_v1, %s8242_s21  ;;  %v1950_v3 = vpop.permute.xlu0 %1949 }
 0x658   :  { %7194 = vmatmul.mubr.msk.bf16.vlgmr.msra.gmra.mrb[24].mxu1 %vm1538_vm8, %v8178_v12  ;;  %v1952_v0 = vpop.permute.xlu1 %1951 }
 0x659   :  { %1974 = vmatpush1.bf16.msra.mxu1 %v1955_v8  ;;  %v1957_v22 = vsel %vm577_vm14, %v1950_v3, %v1952_v0  ;;  %2438 = vrot.lane.b32.xlu1 %v8221_v7, %s8242_s21 }
 0x65a   :  { %2432 = vrot.lane.b32.xlu0 %v8222_v9, %s8242_s21  ;;  %v1954_v10 = vpop.permute.xlu0 %1953  ;;  %1877 = vmatprep.mubr.bf16.mxu1 %v8735_v2  ;;  %v1968_v13 = vsel %vm55_vm0, %v1957_v22, 0 }
 0x65b   :  { %v1958_v29 = vsel %vm577_vm14, %v1952_v0, %v1954_v10 }
 0x65c   :  { %7207 = vmatprep.subr.msk.bf16.mxu1 %vm55_vm0, %v1958_v29  ;;  %v2521_v11 = vpop.permute.xlu1 %2520 }
 0x65d   :  { %v2522_v14 = vrot.slane %v2521_v11, 4  ;;  %1976 = vmatpush1.bf16.msra.mxu1 %v1968_v13  ;;  %2442 = vrot.lane.b32.xlu1 %v7260_v25, %s8242_s21 }
 0x65e   :  { %2440 = vrot.lane.b32.xlu0 %v8223_v21, %s8242_s21  ;;  %2072 = vmatprep.subr.bf16.mxu1 %v8220_v1  ;;  %s8244_s21 = smov 97  }
 0x65f   :  { %v2523_v16 = vsel %vm1643_vm9, %v2522_v14, %v2521_v11  ;;  %v2527_v4 = vmul.bf16 %v2522_v14, %v8723_v51  ;;  %v2529_v18 = vmul.bf16 %v2522_v14, %v8725_v52  ;;  %v2531_v33 = vmul.bf16 %v2522_v14, %v8738_v5 }
 0x660   :  { %v2526_v19 = vmul.bf16 %v8650_v23, %v2523_v16  ;;  %v2528_v20 = vmul.bf16 %v8659_v26, %v2523_v16  ;;  %7195 = vmatmul.mubr.msk.bf16.gmra.mrb[28].mxu1 %vm1538_vm8, %v8180_v24  ;;  %v2530_v27 = vmul.bf16 %v8668_v28, %v2523_v16  ;;  %v8181_v23 = vld [vmem:[%s10155_s7 + $0x24] sm:$0xff]   ;;  %v2067_v5 = vsel %vm55_vm0, %v8221_v7, 0 }
 0x661   :  { %v7271_v17 = vcombine.low %v2527_v4, %v2529_v18  ;;  %2005 = vmatprep.mubr.bf16.mxu1 %v8735_v2  ;;  %v7274_v52 = vcombine.low %v2531_v33, %v2531_v33  ;;  %v8192_v33 = vld [vmem:[%s10155_s7 + $0x68] ss:$0 sps:$4 sm:$0xff]   ;;  %vm4696_vm9 = vcmask 252928  }
 0x662   :  { %v7270_v30 = vcombine.high %v2526_v19, %v2528_v20  ;;  %v7272_v51 = vcombine.low %v2530_v27, %v2530_v27  ;;  %v7269_v26 = vcombine.low %v2526_v19, %v2528_v20  ;;  %v7273_v28 = vcombine.high %v2530_v27, %v2530_v27 }
 0x663   :  { %2569 = vrot.lane.b32.xlu1 %v7271_v17, %s8237_s6  ;;  %v8190_v17 = vld [vmem:[%s10155_s7 + $0x5c] ss:$0 sps:$4 sm:$0xff]  }
 0x664   :  { %2567 = vrot.lane.b32.xlu0 %v7270_v30, %s8237_s6  ;;  %v8191_v30 = vld [vmem:[%s10155_s7 + $0x60] sm:$0xff]  }
 0x667   :  { %2571 = vrot.lane.b32.xlu1 %v7272_v51, %s8237_s6  ;;  %v2741_v51 = vld [vmem:[%s10157_s10 + $0x20] sm:$0xff] }
 0x668   :  { %7208 = vmatmul.mubr.msk.bf16.vlgmr.msra.gmra.mrb[24].mxu1 %vm1538_vm8, %v8181_v23  ;;  %2565 = vrot.lane.b32.xlu0 %v7269_v26, %s8237_s6  ;;  %v2737_v23 = vld [vmem:[%s10157_s10] sm:$0xff] }
 0x669   :  { %2073 = vmatpush1.bf16.msra.mxu1 %v8222_v9  ;;  %2015 = vmatprep.mubr.bf16.mxu1 %v8735_v2  ;;  %v8188_v9 = vld [vmem:[%s10155_s7 + $0x50] ss:$0 sps:$4 sm:$0xff]   ;;  %v2745_v26 = vld [vmem:[%s10157_s10 + $0x40] sm:$0xff] }
 0x66a   :  { %7219 = vmatprep.subr.msk.bf16.mxu1 %vm55_vm0, %v8223_v21  ;;  %v8189_v21 = vld [vmem:[%s10155_s7 + $0x54] sm:$0xff]  }
 0x66b   :  { %2575 = vrot.lane.b32.xlu1 %v7274_v52, %s8237_s6  ;;  %v7281_v52 = vcombine.low %v2737_v23, %v2741_v51 }
 0x66c   :  { %2573 = vrot.lane.b32.xlu0 %v7273_v28, %s8237_s6  ;;  %v7282_v28 = vcombine.high %v2737_v23, %v2741_v51 }
 0x66d   :  { %2075 = vmatpush1.bf16.msra.mxu1 %v2067_v5  ;;  %v2749_v5 = vld [vmem:[%s10157_s10 + $0x60] sm:$0xff] }
 0x66e   :  { %3505 = vmatprep.subr.bf16.mxu0 %v7282_v28 }
 0x66f   :  { %3506 = vmatpush1.bf16.msra.mxu0 %v7281_v52 }
 0x670   :  { %7209 = vmatmul.mubr.msk.bf16.gmra.mrb[28].mxu1 %vm1538_vm8, %v8182_v34  ;;  %v7290_v34 = vcombine.high %v2745_v26, %v2749_v5 }
 0x671   :  { %2104 = vmatprep.mubr.bf16.mxu1 %v8735_v2 }
 0x672   :  { %3507 = vmatprep.subr.bf16.mxu0 %v7290_v34 }
 0x678   :  { %7220 = vmatmul.mubr.msk.bf16.vlgmr.msra.gmra.mrb[24].mxu1 %vm1538_vm8, %v8183_v35  ;;  %v2757_v35 = vld [vmem:[%s10157_s10 + $0xa0] sm:$0xff] }
 0x679   :  { %2114 = vmatprep.mubr.bf16.mxu1 %v8735_v2 }
 0x680   :  { %7221 = vmatmul.mubr.msk.bf16.gmra.mrb[28].mxu1 %vm1538_vm8, %v8184_v32  ;;  %v7289_v32 = vcombine.low %v2745_v26, %v2749_v5 }
 0x681   :  { %2242 = vmatprep.mubr.bf16.mxu1 %v8735_v2 }
 0x682   :  { %3508 = vmatpush1.bf16.msra.mxu0 %v7289_v32 }
 0x6ad   :  { %v2185_v36 = vpop.permute.xlu1 %2184 }
 0x6ae   :  { %v2183_v37 = vpop.permute.xlu0 %2182 }
 0x6af   :  { %v2193_v31 = vsel %vm538_vm10, %v2183_v37, %v2185_v36 }
 0x6b0   :  { %2210 = vmatprep.subr.bf16.mxu1 %v2193_v31  ;;  %v2765_v31 = vld [vmem:[%s10157_s10 + $0xe0] sm:$0xff] }
 0x6b1   :  { %v2187_v38 = vpop.permute.xlu1 %2186 }
 0x6b2   :  { %v2181_v39 = vpop.permute.xlu0 %2180 }
 0x6b3   :  { %v2192_v40 = vsel %vm538_vm10, %v2181_v39, %v2183_v37  ;;  %v2761_v37 = vld [vmem:[%s10157_s10 + $0xc0] sm:$0xff] }
 0x6b4   :  { %2211 = vmatpush1.bf16.msra.mxu1 %v2192_v40  ;;  %v7306_v39 = vcombine.high %v2761_v37, %v2765_v31  ;;  %v2769_v40 = vld [vmem:[%s10157_s10 + $0x100] sm:$0xff] }
 0x6b5   :  { %v2191_v41 = vpop.permute.xlu1 %2190 }
 0x6b6   :  { %v2189_v42 = vpop.permute.xlu0 %2188 }
 0x6b7   :  { %v2194_v43 = vsel %vm538_vm10, %v2187_v38, %v2189_v42  ;;  %v2195_v44 = vsel %vm538_vm10, %v2189_v42, %v2191_v41  ;;  %v2773_v41 = vld [vmem:[%s10157_s10 + $0x120] sm:$0xff]  ;;  %v7305_v42 = vcombine.low %v2761_v37, %v2765_v31 }
 0x6b8   :  { %7233 = vmatprep.subr.msk.bf16.mxu1 %vm55_vm0, %v2195_v44  ;;  %v2205_v45 = vsel %vm55_vm0, %v2194_v43, 0  ;;  %v7314_v43 = vcombine.high %v2769_v40, %v2773_v41  ;;  %v2777_v44 = vld [vmem:[%s10157_s10 + $0x140] sm:$0xff] }
 0x6b9   :  { %2213 = vmatpush1.bf16.msra.mxu1 %v2205_v45  ;;  %v2781_v45 = vld [vmem:[%s10157_s10 + $0x160] sm:$0xff] }
 0x6bb   :  { %v2317_v47 = vpop.permute.xlu1 %2316 }
 0x6bc   :  { %v2315_v48 = vpop.permute.xlu0 %2314  ;;  %7234 = vmatmul.mubr.msk.bf16.vlgmr.msra.gmra.mrb[24].mxu1 %vm1538_vm8, %v8185_v46  ;;  %v7313_v46 = vcombine.low %v2769_v40, %v2773_v41  ;;  %v2739_v40 = vld [vmem:[%s10157_s10 + $0x10] sm:$0xff] }
 0x6bd   :  { %v2325_v49 = vsel %vm1761_vm7, %v2315_v48, %v2317_v47  ;;  %2252 = vmatprep.mubr.bf16.mxu1 %v8735_v2  ;;  %v7322_v47 = vcombine.high %v2777_v44, %v2781_v45  ;;  %v2743_v41 = vld [vmem:[%s10157_s10 + $0x30] sm:$0xff] }
 0x6be   :  { %2342 = vmatprep.subr.bf16.mxu1 %v2325_v49  ;;  %v2789_v49 = vld [vmem:[%s10157_s10 + $0x1a0] sm:$0xff] }
 0x6bf   :  { %v2319_v6 = vpop.permute.xlu1 %2318 }
 0x6c0   :  { %v2313_v50 = vpop.permute.xlu0 %2312 }
 0x6c1   :  { %v2324_v55 = vsel %vm1761_vm7, %v2313_v50, %v2315_v48  ;;  %v2785_v48 = vld [vmem:[%s10157_s10 + $0x180] sm:$0xff] }
 0x6c2   :  { %2343 = vmatpush1.bf16.msra.mxu1 %v2324_v55  ;;  %v7330_v50 = vcombine.high %v2785_v48, %v2789_v49  ;;  %v2797_v55 = vld [vmem:[%s10157_s10 + $0x1e0] sm:$0xff] }
 0x6c3   :  { %v2323_v56 = vpop.permute.xlu1 %2322 }
 0x6c4   :  { %v2321_v57 = vpop.permute.xlu0 %2320  ;;  %7235 = vmatmul.mubr.msk.bf16.gmra.mrb[28].mxu1 %vm1538_vm8, %v8186_v53  ;;  %v2793_v53 = vld [vmem:[%s10157_s10 + $0x1c0] sm:$0xff] }
 0x6c5   :  { %v2326_v58 = vsel %vm1761_vm7, %v2319_v6, %v2321_v57  ;;  %v2327_v59 = vsel %vm1761_vm7, %v2321_v57, %v2323_v56  ;;  %2374 = vmatprep.mubr.bf16.mxu1 %v8735_v2  ;;  %v7321_v6 = vcombine.low %v2777_v44, %v2781_v45  ;;  %v7329_v56 = vcombine.low %v2785_v48, %v2789_v49  ;;  %v2751_v48 = vld [vmem:[%s10157_s10 + $0x70] sm:$0xff]  ;;  %v8193_v49 = vld [vmem:[%s10156_s9] sm:$0x3f]  }
 0x6c6   :  { %7247 = vmatprep.subr.msk.bf16.mxu1 %vm55_vm0, %v2327_v59  ;;  %v2337_v60 = vsel %vm55_vm0, %v2326_v58, 0  ;;  %v7338_v57 = vcombine.high %v2793_v53, %v2797_v55  ;;  %v2801_v58 = vld [vmem:[%s10157_s10 + $0x200] sm:$0xff]  ;;  %v7286_v45 = vcombine.high %v2739_v40, %v2743_v41  ;;  %vm3994_vm7 = vcmask 97280  }
 0x6c7   :  { %2345 = vmatpush1.bf16.msra.mxu1 %v2337_v60  ;;  %v2437_v61 = vpop.permute.xlu1 %2436  ;;  %v2805_v59 = vld [vmem:[%s10157_s10 + $0x220] sm:$0xff]  ;;  %v7337_v60 = vcombine.low %v2793_v53, %v2797_v55  ;;  %v2755_v53 = vld [vmem:[%s10157_s10 + $0x90] sm:$0xff] }
 0x6c8   :  { %v2435_v62 = vpop.permute.xlu0 %2434  ;;  %v2759_v55 = vld [vmem:[%s10157_s10 + $0xb0] sm:$0xff] }
 0x6c9   :  { %v2446_v1 = vsel %vm2444_vm11, %v2435_v62, %v2437_v61  ;;  %v7346_v61 = vcombine.high %v2801_v58, %v2805_v59 }
 0x6ca   :  { %2463 = vmatprep.subr.bf16.mxu1 %v2446_v1  ;;  %v7345_v1 = vcombine.low %v2801_v58, %v2805_v59  ;;  %v2763_v58 = vld [vmem:[%s10157_s10 + $0xd0] sm:$0xff] }
 0x6cb   :  { %v2439_v12 = vpop.permute.xlu1 %2438  ;;  %v2767_v59 = vld [vmem:[%s10157_s10 + $0xf0] sm:$0xff] }
 0x6cc   :  { %v2433_v3 = vpop.permute.xlu0 %2432  ;;  %7248 = vmatmul.mubr.msk.bf16.vlgmr.msra.gmra.mrb[24].mxu1 %vm1538_vm8, %v8187_v63  ;;  %v2813_v63 = vld [vmem:[%s10157_s10 + $0x260] sm:$0xff] }
 0x6cd   :  { %v2445_v7 = vsel %vm2444_vm11, %v2433_v3, %v2435_v62  ;;  %2384 = vmatprep.mubr.bf16.mxu1 %v8735_v2  ;;  %v2809_v62 = vld [vmem:[%s10157_s10 + $0x240] sm:$0xff] }
 0x6ce   :  { %2464 = vmatpush1.bf16.msra.mxu1 %v2445_v7  ;;  %v2817_v3 = vld [vmem:[%s10157_s10 + $0x280] sm:$0xff] }
 0x6cf   :  { %v2443_v8 = vpop.permute.xlu1 %2442  ;;  %v2821_v7 = vld [vmem:[%s10157_s10 + $0x2a0] sm:$0xff] }
 0x6d0   :  { %v2441_v0 = vpop.permute.xlu0 %2440 }
 0x6d1   :  { %v2447_v22 = vsel %vm2444_vm11, %v2439_v12, %v2441_v0  ;;  %v2448_v25 = vsel %vm2444_vm11, %v2441_v0, %v2443_v8  ;;  %v7354_v12 = vcombine.high %v2809_v62, %v2813_v63  ;;  %v7353_v8 = vcombine.low %v2809_v62, %v2813_v63  ;;  %v2771_v62 = vld [vmem:[%s10157_s10 + $0x110] sm:$0xff] }
 0x6d2   :  { %7261 = vmatprep.subr.msk.bf16.mxu1 %vm55_vm0, %v2448_v25  ;;  %v2458_v10 = vsel %vm55_vm0, %v2447_v22, 0  ;;  %v7362_v0 = vcombine.high %v2817_v3, %v2821_v7  ;;  %v2829_v22 = vld [vmem:[%s10157_s10 + $0x2e0] sm:$0xff]  ;;  %v7361_v25 = vcombine.low %v2817_v3, %v2821_v7  ;;  %v2775_v63 = vld [vmem:[%s10157_s10 + $0x130] sm:$0xff] }
 0x6d3   :  { %2466 = vmatpush1.bf16.msra.mxu1 %v2458_v10  ;;  %v2779_v3 = vld [vmem:[%s10157_s10 + $0x150] sm:$0xff] }
 0x6d4   :  { %7249 = vmatmul.mubr.msk.bf16.gmra.mrb[28].mxu1 %vm1538_vm8, %v8188_v9  ;;  %v2825_v9 = vld [vmem:[%s10157_s10 + $0x2c0] sm:$0xff]  ;;  %v2783_v7 = vld [vmem:[%s10157_s10 + $0x170] sm:$0xff] }
 0x6d5   :  { %v2570_v29 = vpop.permute.xlu1 %2569  ;;  %2495 = vmatprep.mubr.bf16.mxu1 %v8735_v2  ;;  %v7370_v10 = vcombine.high %v2825_v9, %v2829_v22 }
 0x6d6   :  { %v2568_v11 = vpop.permute.xlu0 %2567 }
 0x6d7   :  { %v2578_v13 = vsel %vm1473_vm6, %v2568_v11, %v2570_v29  ;;  %v2833_v29 = vld [vmem:[%s10157_s10 + $0x300] sm:$0xff] }
 0x6d8   :  { %2595 = vmatprep.subr.bf16.mxu1 %v2578_v13  ;;  %v7369_v13 = vcombine.low %v2825_v9, %v2829_v22  ;;  %v2787_v9 = vld [vmem:[%s10157_s10 + $0x190] sm:$0xff] }
 0x6d9   :  { %v2572_v24 = vpop.permute.xlu1 %2571  ;;  %v2791_v22 = vld [vmem:[%s10157_s10 + $0x1b0] sm:$0xff] }
 0x6da   :  { %v2566_v14 = vpop.permute.xlu0 %2565 }
 0x6db   :  { %v2577_v16 = vsel %vm1473_vm6, %v2566_v14, %v2568_v11  ;;  %v2837_v11 = vld [vmem:[%s10157_s10 + $0x320] sm:$0xff] }
 0x6dc   :  { %7262 = vmatmul.mubr.msk.bf16.vlgmr.msra.gmra.mrb[24].mxu1 %vm1538_vm8, %v8189_v21  ;;  %v7378_v21 = vcombine.high %v2833_v29, %v2837_v11  ;;  %v2845_v14 = vld [vmem:[%s10157_s10 + $0x360] sm:$0xff] }
 0x6dd   :  { %2596 = vmatpush1.bf16.msra.mxu1 %v2577_v16  ;;  %v2576_v4 = vpop.permute.xlu1 %2575  ;;  %2505 = vmatprep.mubr.bf16.mxu1 %v8735_v2  ;;  %v7377_v16 = vcombine.low %v2833_v29, %v2837_v11  ;;  %v2795_v29 = vld [vmem:[%s10157_s10 + $0x1d0] sm:$0xff] }
 0x6de   :  { %v2574_v18 = vpop.permute.xlu0 %2573  ;;  %v2799_v11 = vld [vmem:[%s10157_s10 + $0x1f0] sm:$0xff] }
 0x6df   :  { %v2579_v19 = vsel %vm1473_vm6, %v2572_v24, %v2574_v18  ;;  %v2580_v20 = vsel %vm1473_vm6, %v2574_v18, %v2576_v4  ;;  %v2841_v24 = vld [vmem:[%s10157_s10 + $0x340] sm:$0xff]  ;;  %vm3998_vm6 = vcmask 1045504  }
 0x6e0   :  { %v2590_v27 = vsel %vm55_vm0, %v2579_v19, 0  ;;  %7275 = vmatprep.subr.msk.bf16.mxu1 %vm55_vm0, %v2580_v20  ;;  %v7386_v4 = vcombine.high %v2841_v24, %v2845_v14  ;;  %v7385_v18 = vcombine.low %v2841_v24, %v2845_v14  ;;  %v2803_v24 = vld [vmem:[%s10157_s10 + $0x210] sm:$0xff] }
 0x6e1   :  { %2598 = vmatpush1.bf16.msra.mxu1 %v2590_v27  ;;  %v2807_v14 = vld [vmem:[%s10157_s10 + $0x230] sm:$0xff] }
 0x6e4   :  { %7263 = vmatmul.mubr.msk.bf16.gmra.mrb[28].mxu1 %vm1538_vm8, %v8190_v17 }
 0x6e5   :  { %2627 = vmatprep.mubr.bf16.mxu1 %v8735_v2 }
 0x6ec   :  { %7276 = vmatmul.mubr.msk.bf16.vlgmr.msra.gmra.mrb[24].mxu1 %vm1538_vm8, %v8191_v30 }
 0x6ed   :  { %2637 = vmatprep.mubr.bf16.mxu1 %v8735_v2 }
 0x6f4   :  { %7277 = vmatmul.mubr.msk.bf16.gmra.mrb[28].mxu1 %vm1538_vm8, %v8192_v33 }
 0x6f5   :  { %2716 = vmatprep.mubr.bf16.mxu1 %v8735_v2  ;;  %v2753_v2 = vld [vmem:[%s10157_s10 + $0x80] sm:$0xff] }
 0x6f6   :  { %v7298_v36 = vcombine.high %v2753_v2, %v2757_v35  ;;  %v7297_v38 = vcombine.low %v2753_v2, %v2757_v35 }
 0x6f8   :  { %3509 = vmatprep.subr.bf16.mxu0 %v7298_v36 }
 0x6f9   :  { %3510 = vmatpush1.bf16.msra.mxu0 %v7297_v38 }
 0x6fa   :  { %3511 = vmatprep.subr.bf16.mxu0 %v7306_v39 }
 0x6fd   :  { %3512 = vmatpush1.bf16.msra.mxu0 %v7305_v42 }
 0x6fe   :  { %3513 = vmatprep.subr.bf16.mxu0 %v7314_v43 }
 0x701   :  { %3514 = vmatpush1.bf16.msra.mxu0 %v7313_v46 }
 0x702   :  { %3515 = vmatprep.subr.bf16.mxu0 %v7322_v47  ;;  %v2747_v47 = vld [vmem:[%s10157_s10 + $0x50] sm:$0xff] }
 0x705   :  { %3516 = vmatpush1.bf16.msra.mxu0 %v7321_v6  ;;  %v7285_v6 = vcombine.low %v2739_v40, %v2743_v41  ;;  %v2853_v40 = vld [vmem:[%s10157_s10 + $0x3a0] sm:$0xff] }
 0x706   :  { %3517 = vmatprep.subr.bf16.mxu0 %v7330_v50  ;;  %v7294_v50 = vcombine.high %v2747_v47, %v2751_v48 }
 0x709   :  { %3518 = vmatpush1.bf16.msra.mxu0 %v7329_v56  ;;  %v7293_v56 = vcombine.low %v2747_v47, %v2751_v48  ;;  %v2857_v47 = vld [vmem:[%s10157_s10 + $0x3c0] sm:$0xff] }
 0x70a   :  { %3519 = vmatprep.subr.bf16.mxu0 %v7338_v57  ;;  %v7302_v57 = vcombine.high %v2755_v53, %v2759_v55  ;;  %v2861_v48 = vld [vmem:[%s10157_s10 + $0x3e0] sm:$0xff] }
 0x70d   :  { %3520 = vmatpush1.bf16.msra.mxu0 %v7337_v60  ;;  %v7301_v60 = vcombine.low %v2755_v53, %v2759_v55  ;;  %v2863_v53 = vld [vmem:[%s10157_s10 + $0x3f0] sm:$0xff] }
 0x70e   :  { %3521 = vmatprep.subr.bf16.mxu0 %v7346_v61  ;;  %v7310_v61 = vcombine.high %v2763_v58, %v2767_v59 }
 0x711   :  { %3522 = vmatpush1.bf16.msra.mxu0 %v7345_v1  ;;  %v7309_v1 = vcombine.low %v2763_v58, %v2767_v59 }
 0x712   :  { %3523 = vmatprep.subr.bf16.mxu0 %v7354_v12  ;;  %v7318_v12 = vcombine.high %v2771_v62, %v2775_v63 }
 0x715   :  { %3524 = vmatpush1.bf16.msra.mxu0 %v7353_v8  ;;  %v7317_v8 = vcombine.low %v2771_v62, %v2775_v63 }
 0x716   :  { %3525 = vmatprep.subr.bf16.mxu0 %v7362_v0  ;;  %v7326_v0 = vcombine.high %v2779_v3, %v2783_v7 }
 0x719   :  { %3526 = vmatpush1.bf16.msra.mxu0 %v7361_v25  ;;  %v7325_v25 = vcombine.low %v2779_v3, %v2783_v7 }
 0x71a   :  { %3527 = vmatprep.subr.bf16.mxu0 %v7370_v10  ;;  %v7334_v10 = vcombine.high %v2787_v9, %v2791_v22 }
 0x71d   :  { %3528 = vmatpush1.bf16.msra.mxu0 %v7369_v13  ;;  %v7333_v13 = vcombine.low %v2787_v9, %v2791_v22 }
 0x71e   :  { %3529 = vmatprep.subr.bf16.mxu0 %v7378_v21  ;;  %v7342_v21 = vcombine.high %v2795_v29, %v2799_v11 }
 0x721   :  { %3530 = vmatpush1.bf16.msra.mxu0 %v7377_v16  ;;  %v7341_v16 = vcombine.low %v2795_v29, %v2799_v11 }
 0x722   :  { %3531 = vmatprep.subr.bf16.mxu0 %v7386_v4  ;;  %v7350_v4 = vcombine.high %v2803_v24, %v2807_v14 }
 0x725   :  { %3532 = vmatpush1.bf16.msra.mxu0 %v7385_v18  ;;  %v2811_v18 = vld [vmem:[%s10157_s10 + $0x250] sm:$0xff] }
 0x7bf   :  { %v2629_v19 = vpop.f32.mrb[24].mxu1 }
 0x7c0   :  { %v2652_v20 = vmax.f32 %v2629_v19, 0.0  ;;  %v2631_v27 = vpop.f32.mrb[25].mxu1  ;;  %v2815_v19 = vld [vmem:[%s10157_s10 + $0x270] sm:$0xff] }
 0x7c1   :  { %v2653_v17 = vmax.f32 %v2631_v27, 0.0  ;;  %v2633_v30 = vpop.f32.mrb[26].mxu1  ;;  %v7358_v27 = vcombine.high %v2811_v18, %v2815_v19 }
 0x7c2   :  { %v2654_v33 = vmax.f32 %v2633_v30, 0.0  ;;  %v2635_v23 = vpop.f32.mrb[27].mxu1  ;;  %v2658_v26 = vmin.f32 %v2652_v20, 6.0  ;;  %v7349_v20 = vcombine.low %v2803_v24, %v2807_v14  ;;  %v2823_v30 = vld [vmem:[%s10157_s10 + $0x2b0] sm:$0xff] }
 0x7c3   :  { %v2655_v51 = vmax.f32 %v2635_v23, 0.0  ;;  %v2659_v28 = vmin.f32 %v2653_v17, 6.0  ;;  %v2819_v17 = vld [vmem:[%s10157_s10 + $0x290] sm:$0xff] }
 0x7c4   :  { %v2660_v52 = vmin.f32 %v2654_v33, 6.0  ;;  %v7357_v33 = vcombine.low %v2811_v18, %v2815_v19  ;;  %v7366_v23 = vcombine.high %v2819_v17, %v2823_v30 }
 0x7c5   :  { %v2661_v5 = vmin.f32 %v2655_v51, 6.0  ;;  %v7365_v51 = vcombine.low %v2819_v17, %v2823_v30 }
 0x7c6   :  { %v2666_v34 = vpack.c.bf16 %v2660_v52, %v2658_v26  ;;  %v2827_v26 = vld [vmem:[%s10157_s10 + $0x2d0] sm:$0xff] }
 0x7c7   :  { %v2667_v2 = vpack.c.bf16 %v2661_v5, %v2659_v28  ;;  %v2639_v35 = vpop.f32.mrb[28].mxu1  ;;  %v2831_v52 = vld [vmem:[%s10157_s10 + $0x2f0] sm:$0xff] }
 0x7c8   :  { %v2656_v32 = vmax.f32 %v2639_v35, 0.0  ;;  %v2641_v36 = vpop.f32.mrb[29].mxu1  ;;  %v7374_v28 = vcombine.high %v2827_v26, %v2831_v52  ;;  %v7373_v5 = vcombine.low %v2827_v26, %v2831_v52 }
 0x7c9   :  { %v2657_v37 = vmax.f32 %v2641_v36, 0.0  ;;  %v2643_v31 = vpop.f32.mrb[30].mxu1  ;;  %2684 = vmatprep.subr.bf16.mxu1 %v2667_v2  ;;  %v2839_v2 = vld [vmem:[%s10157_s10 + $0x330] sm:$0xff] }
 0x7ca   :  { %v2662_v38 = vmin.f32 %v2656_v32, 6.0  ;;  %v2644_v39 = vpop.f32.mrb[31].mxu1  ;;  %2685 = vmatpush1.bf16.msra.mxu1 %v2666_v34  ;;  %v2835_v34 = vld [vmem:[%s10157_s10 + $0x310] sm:$0xff] }
 0x7cb   :  { %v2663_v42 = vmin.f32 %v2657_v37, 6.0  ;;  %v7382_v35 = vcombine.high %v2835_v34, %v2839_v2  ;;  %v7381_v32 = vcombine.low %v2835_v34, %v2839_v2  ;;  %v2843_v36 = vld [vmem:[%s10157_s10 + $0x350] sm:$0xff]  ;;  %v2849_v39 = vld [vmem:[%s10157_s10 + $0x380] sm:$0xff] }
 0x7cc   :  { %v2668_v43 = vpack.c.bf16 %v2662_v38, %v2662_v38  ;;  %v2847_v37 = vld [vmem:[%s10157_s10 + $0x370] sm:$0xff]  ;;  %v7394_v41 = vcombine.high %v2849_v39, %v2853_v40 }
 0x7cd   :  { %v2669_v44 = vpack.c.bf16 %v2663_v42, %v2663_v42  ;;  %v7390_v31 = vcombine.high %v2843_v36, %v2847_v37  ;;  %v7389_v38 = vcombine.low %v2843_v36, %v2847_v37  ;;  %v2851_v42 = vld [vmem:[%s10157_s10 + $0x390] sm:$0xff]  ;;  %v2746_v36 = vld [vmem:[%s10157_s10 + $0x48] sm:$0xff] }
 0x7ce   :  { %v2679_v46 = vsel %vm55_vm0, %v2668_v43, 0  ;;  %v2855_v43 = vld [vmem:[%s10157_s10 + $0x3b0] sm:$0xff]  ;;  %3533 = vmatprep.subr.bf16.mxu0 %v7394_v41  ;;  %v2750_v37 = vld [vmem:[%s10157_s10 + $0x68] sm:$0xff] }
 0x7cf   :  { %7279 = vmatprep.subr.msk.bf16.mxu1 %vm55_vm0, %v2669_v44  ;;  %v7393_v44 = vcombine.low %v2849_v39, %v2853_v40  ;;  %v7292_v39 = vcombine.high %v2746_v36, %v2750_v37  ;;  %v2754_v40 = vld [vmem:[%s10157_s10 + $0x88] sm:$0xff] }
 0x7d0   :  { %2687 = vmatpush1.bf16.msra.mxu1 %v2679_v46  ;;  %v7397_v46 = vcombine.low %v2851_v42, %v2855_v43  ;;  %v2758_v41 = vld [vmem:[%s10157_s10 + $0xa8] sm:$0xff] }
 0x7d1   :  { %3591 = vmatprep.subr.bf16.mxu1 %v7286_v45  ;;  %v7398_v45 = vcombine.high %v2851_v42, %v2855_v43  ;;  %3534 = vmatpush1.bf16.msra.mxu0 %v7393_v44  ;;  %v7291_v42 = vcombine.low %v2746_v36, %v2750_v37 }
 0x7d3   :  { %7280 = vmatmul.mubr.msk.bf16.vlgmr.msra.gmra.mrb[32].mxu1 %vm1538_vm8, %v8193_v49  ;;  %v7401_v49 = vcombine.low %v2857_v47, %v2861_v48  ;;  %vm4255_vm8 = vcmask 269312  }
 0x7d4   :  { %3592 = vmatpush1.bf16.msra.mxu1 %v7285_v6  ;;  %v7402_v6 = vcombine.high %v2857_v47, %v2861_v48  ;;  %v7299_v47 = vcombine.low %v2754_v40, %v2758_v41  ;;  %v7300_v48 = vcombine.high %v2754_v40, %v2758_v41  ;;  %v2814_v40 = vld [vmem:[%s10157_s10 + $0x268] sm:$0xff] }
 0x7d5   :  { %3593 = vmatprep.subr.bf16.mxu1 %v7294_v50  ;;  %v2859_v50 = vld [vmem:[%s10157_s10 + $0x3d0] sm:$0xff] }
 0x7d6   :  { %v7406_v55 = vcombine.high %v2859_v50, %v2863_v53  ;;  %3535 = vmatprep.subr.bf16.mxu0 %v7402_v6  ;;  %v7405_v58 = vcombine.low %v2859_v50, %v2863_v53 }
 0x7d7   :  { %3536 = vmatpush1.bf16.msra.mxu0 %v7401_v49 }
 0x7d8   :  { %3594 = vmatpush1.bf16.msra.mxu1 %v7293_v56  ;;  %v9114_v56 = vld [vmem:[%s10157_s10 + $0x8] sm:$0xff] }
 0x7d9   :  { %3595 = vmatprep.subr.bf16.mxu1 %v7302_v57  ;;  %v9119_v57 = vld [vmem:[%s10157_s10 + $0x28] sm:$0xff] }
 0x7da   :  { %v7283_v59 = vcombine.low %v9114_v56, %v9119_v57 }
 0x7dc   :  { %3596 = vmatpush1.bf16.msra.mxu1 %v7301_v60  ;;  %v7284_v60 = vcombine.high %v9114_v56, %v9119_v57  ;;  %v2762_v56 = vld [vmem:[%s10157_s10 + $0xc8] sm:$0xff] }
 0x7dd   :  { %3597 = vmatprep.subr.bf16.mxu1 %v7310_v61  ;;  %v3757_v61 = vld [vmem:[%s10158_s12] sm:$0xff]  ;;  %s8243_s12 = smov 95   ;;  %v2766_v57 = vld [vmem:[%s10157_s10 + $0xe8] sm:$0xff] }
 0x7de   :  { %3548 = vmatprep.subr.bf16.mxu0 %v7284_v60  ;;  %v3766_v62 = vrot.slane %v3757_v61, %v8617_v54  ;;  %v9196_v60 = vld [vmem:[#allocation4] sm:$0xff] }
 0x7df   :  { %3683 = vst.msk [vmem:[#allocation4 + $0x20] sm:$0xff] %vm3682_vm13, %v9196_v60 }
 0x7e0   :  { %3598 = vmatpush1.bf16.msra.mxu1 %v7309_v1  ;;  %v3774_v63 = vcombine.high %v3766_v62, %v3766_v62  ;;  %v3759_v1 = vcombine.high %v3757_v61, %v3757_v61  ;;  %3690 = vst.msk [vmem:[#allocation4 + $0x48] sm:$0x33] %vm3689_vm1, %v9196_v60 }
 0x7e1   :  { %3599 = vmatprep.subr.bf16.mxu1 %v7318_v12  ;;  %v3782_v12 = vrot.slane %v3766_v62, %v8617_v54 }
 0x7e2   :  { %v3796_v3 = vrot.slane %v3774_v63, %v8617_v54  ;;  %v3773_v7 = vrot.slane %v3759_v1, %v8617_v54 }
 0x7e3   :  { %v3804_v43 = vcombine.high %v3782_v12, %v3782_v12 }
 0x7e4   :  { %3600 = vmatpush1.bf16.msra.mxu1 %v7317_v8  ;;  %v3809_v8 = vpack.i.b16 %v3782_v12, %v3782_v12  ;;  %v3775_v9 = vcombine.high %v3773_v7, %v3773_v7  ;;  %v3806_v44 = vcombine.high %v3796_v3, %v3796_v3 }
 0x7e5   :  { %3601 = vmatprep.subr.bf16.mxu1 %v7326_v0  ;;  %v3816_v0 = vpack.i.b16 %v3796_v3, %v3796_v3  ;;  %v3823_v50 = vpack.i.b16 %v3804_v43, %v3804_v43 }
 0x7e6   :  { %v3814_v22 = vrot.slane %v3809_v8, %v8354_v15  ;;  %v9138_v29 = vrot.slane %v3775_v9, %v8617_v54  ;;  %v3830_v53 = vpack.i.b16 %v3806_v44, %v3806_v44  ;;  %v4539_v61 = vshrl.u32 %v3806_v44, 16  ;;  %v2822_v44 = vld [vmem:[%s10157_s10 + $0x2a8] sm:$0xff] }
 0x7e7   :  { %v3828_v1 = vrot.slane %v3823_v50, %v8354_v15 }
 0x7e8   :  { %3602 = vmatpush1.bf16.msra.mxu1 %v7325_v25  ;;  %v3821_v25 = vrot.slane %v3816_v0, %v8354_v15  ;;  %v9191_v49 = vcombine.high %v9138_v29, %v9138_v29  ;;  %v4555_v6 = vshrl.u32 %v9138_v29, 16  ;;  %v4540_v0 = vpack.i.b16 %v4539_v61, %v4539_v61  ;;  %v2846_v61 = vld [vmem:[%s10157_s10 + $0x368] sm:$0xff] }
 0x7e9   :  { %3603 = vmatprep.subr.bf16.mxu1 %v7334_v10  ;;  %v9135_v10 = vrot.slane %v3773_v7, %v8617_v54 }
 0x7ea   :  { %v9140_v11 = vcombine.low %v3814_v22, %v3821_v25  ;;  %v4556_v63 = vpack.i.b16 %v4555_v6, %v4555_v6  ;;  %v7308_v25 = vcombine.high %v2762_v56, %v2766_v57  ;;  %v2830_v6 = vld [vmem:[%s10157_s10 + $0x2e8] sm:$0xff] }
 0x7ec   :  { %3604 = vmatpush1.bf16.msra.mxu1 %v7333_v13  ;;  %v3837_v13 = vpack.i.b16 %v9135_v10, %v9135_v10  ;;  %3884 = vrot.lane.b32.xlu0 %v9140_v11, %s8243_s12  ;;  %v4561_v22 = vrot.slane %v4556_v63, %v8354_v15 }
 0x7ed   :  { %3605 = vmatprep.subr.bf16.mxu1 %v7342_v21  ;;  %v3844_v21 = vpack.i.b16 %v9138_v29, %v9138_v29  ;;  %v2770_v29 = vld [vmem:[%s10157_s10 + $0x108] sm:$0xff] }
 0x7ee   :  { %v3842_v24 = vrot.slane %v3837_v13, %v8354_v15  ;;  %v2774_v13 = vld [vmem:[%s10157_s10 + $0x128] sm:$0xff] }
 0x7ef   :  { %v3849_v14 = vrot.slane %v3844_v21, %v8354_v15 }
 0x7f0   :  { %3606 = vmatpush1.bf16.msra.mxu1 %v7341_v16  ;;  %v4515_v16 = vshrl.u32 %v3782_v12, 16  ;;  %v3835_v12 = vrot.slane %v3830_v53, %v8354_v15 }
 0x7f1   :  { %3607 = vmatprep.subr.bf16.mxu1 %v7350_v4  ;;  %v4523_v4 = vshrl.u32 %v3796_v3, 16  ;;  %v9150_v54 = vcombine.low %v3842_v24, %v3849_v14 }
 0x7f2   :  { %v4516_v18 = vpack.i.b16 %v4515_v16, %v4515_v16  ;;  %v4545_v16 = vrot.slane %v4540_v0, %v8354_v15  ;;  %v2862_v0 = vld [vmem:[%s10157_s10 + $0x3e8] sm:$0xff] }
 0x7f3   :  { %v4524_v19 = vpack.i.b16 %v4523_v4, %v4523_v4  ;;  %3888 = vrot.lane.b32.xlu0 %v9150_v54, %s8243_s12  ;;  %v7307_v4 = vcombine.low %v2762_v56, %v2766_v57 }
 0x7f4   :  { %3608 = vmatpush1.bf16.msra.mxu1 %v7349_v20  ;;  %v4521_v20 = vrot.slane %v4516_v18, %v8354_v15  ;;  %v7316_v18 = vcombine.high %v2770_v29, %v2774_v13 }
 0x7f5   :  { %3609 = vmatprep.subr.bf16.mxu1 %v7358_v27  ;;  %v4529_v27 = vrot.slane %v4524_v19, %v8354_v15  ;;  %v2778_v19 = vld [vmem:[%s10157_s10 + $0x148] sm:$0xff] }
 0x7f7   :  { %v9156_v17 = vcombine.low %v4521_v20, %v4529_v27  ;;  %v2782_v20 = vld [vmem:[%s10157_s10 + $0x168] sm:$0xff] }
 0x7f8   :  { %3610 = vmatpush1.bf16.msra.mxu1 %v7357_v33 }
 0x7f9   :  { %3611 = vmatprep.subr.bf16.mxu1 %v7366_v23  ;;  %4598 = vrot.lane.b32.xlu0 %v9156_v17, %s8244_s21 }
 0x7fc   :  { %3612 = vmatpush1.bf16.msra.mxu1 %v7365_v51 }
 0x7fd   :  { %3613 = vmatprep.subr.bf16.mxu1 %v7374_v28 }
 0x800   :  { %3614 = vmatpush1.bf16.msra.mxu1 %v7373_v5 }
 0x801   :  { %3615 = vmatprep.subr.bf16.mxu1 %v7382_v35 }
 0x804   :  { %3616 = vmatpush1.bf16.msra.mxu1 %v7381_v32 }
 0x805   :  { %3617 = vmatprep.subr.bf16.mxu1 %v7390_v31 }
 0x808   :  { %3618 = vmatpush1.bf16.msra.mxu1 %v7389_v38 }
 0x809   :  { %3619 = vmatprep.subr.bf16.mxu1 %v7398_v45  ;;  %v9182_v45 = vcombine.high %v9135_v10, %v9135_v10 }
 0x80c   :  { %3620 = vmatpush1.bf16.msra.mxu1 %v7397_v46  ;;  %v4547_v46 = vshrl.u32 %v9135_v10, 16  ;;  %v9213_v10 = vcombine.low %v3828_v1, %v3835_v12  ;;  %v2850_v1 = vld [vmem:[%s10157_s10 + $0x388] sm:$0xff] }
 0x80d   :  { %3621 = vmatprep.subr.bf16.mxu1 %v7406_v55  ;;  %v3851_v55 = vpack.i.b16 %v9182_v45, %v9182_v45  ;;  %v2854_v12 = vld [vmem:[%s10157_s10 + $0x3a8] sm:$0xff] }
 0x80e   :  { %v4548_v62 = vpack.i.b16 %v4547_v46, %v4547_v46  ;;  %3886 = vrot.lane.b32.xlu1 %v9213_v10, %s8243_s12 }
 0x80f   :  { %v3856_v3 = vrot.slane %v3851_v55, %v8354_v15  ;;  %v2834_v55 = vld [vmem:[%s10157_s10 + $0x308] sm:$0xff] }
 0x810   :  { %3622 = vmatpush1.bf16.msra.mxu1 %v7405_v58  ;;  %v4531_v58 = vshrl.u32 %v3804_v43, 16  ;;  %v4553_v9 = vrot.slane %v4548_v62, %v8354_v15  ;;  %v2818_v43 = vld [vmem:[%s10157_s10 + $0x288] sm:$0xff] }
 0x811   :  { %v7363_v50 = vcombine.low %v2818_v43, %v2822_v44 }
 0x812   :  { %v4532_v7 = vpack.i.b16 %v4531_v58, %v4531_v58  ;;  %v9221_v21 = vcombine.low %v4553_v9, %v4561_v22  ;;  %v2838_v58 = vld [vmem:[%s10157_s10 + $0x328] sm:$0xff]  ;;  %v7395_v9 = vcombine.low %v2850_v1, %v2854_v12 }
 0x813   :  { %v7380_v57 = vcombine.high %v2834_v55, %v2838_v58  ;;  %v7379_v62 = vcombine.low %v2834_v55, %v2838_v58  ;;  %v2812_v55 = vld [vmem:[%s10157_s10 + $0x258] sm:$0xff] }
 0x814   :  { %v4537_v14 = vrot.slane %v4532_v7, %v8354_v15  ;;  %4602 = vrot.lane.b32.xlu0 %v9221_v21, %s8244_s21  ;;  %v7396_v7 = vcombine.high %v2850_v1, %v2854_v12  ;;  %v2816_v58 = vld [vmem:[%s10157_s10 + $0x278] sm:$0xff] }
 0x815   :  { %v2820_v1 = vld [vmem:[%s10157_s10 + $0x298] sm:$0xff] }
 0x816   :  { %v9239_v27 = vcombine.low %v4537_v14, %v4545_v16  ;;  %v2748_v16 = vld [vmem:[%s10157_s10 + $0x58] sm:$0xff] }
 0x817   :  { %v2824_v12 = vld [vmem:[%s10157_s10 + $0x2b8] sm:$0xff] }
 0x8a6   :  { %v2718_v30 = vpop.f32.mrb[32].mxu1 }
 0x8a7   :  { %v2727_v33 = vmax.f32 %v2718_v30, 0.0  ;;  %v2720_v23 = vpop.f32.mrb[33].mxu1  ;;  %v7315_v30 = vcombine.low %v2770_v29, %v2774_v13  ;;  %v2744_v29 = vld [vmem:[%s10157_s10 + $0x38] sm:$0xff] }
 0x8a8   :  { %v2728_v51 = vmax.f32 %v2720_v23, 0.0  ;;  %v2722_v26 = vpop.f32.mrb[34].mxu1  ;;  %v2786_v23 = vld [vmem:[%s10157_s10 + $0x188] sm:$0xff] }
 0x8a9   :  { %v2729_v52 = vmax.f32 %v2722_v26, 0.0  ;;  %v2724_v28 = vpop.f32.mrb[35].mxu1  ;;  %v2731_v34 = vmin.f32 %v2727_v33, 6.0  ;;  %v7324_v33 = vcombine.high %v2778_v19, %v2782_v20  ;;  %v7323_v26 = vcombine.low %v2778_v19, %v2782_v20  ;;  %v2756_v20 = vld [vmem:[%s10157_s10 + $0x98] sm:$0xff] }
 0x8aa   :  { %v2730_v5 = vmax.f32 %v2724_v28, 0.0  ;;  %v2732_v35 = vmin.f32 %v2728_v51, 6.0  ;;  %v2790_v51 = vld [vmem:[%s10157_s10 + $0x1a8] sm:$0xff] }
 0x8ab   :  { %v2733_v2 = vmin.f32 %v2729_v52, 6.0  ;;  %v7332_v52 = vcombine.high %v2786_v23, %v2790_v51  ;;  %v2794_v28 = vld [vmem:[%s10157_s10 + $0x1c8] sm:$0xff] }
 0x8ac   :  { %v2734_v32 = vmin.f32 %v2730_v5, 6.0  ;;  %v2798_v5 = vld [vmem:[%s10157_s10 + $0x1e8] sm:$0xff] }
 0x8ad   :  { %v9166_v31 = vpack.c.bf16 %v2733_v2, %v2731_v34  ;;  %v7331_v34 = vcombine.low %v2786_v23, %v2790_v51  ;;  %v7340_v2 = vcombine.high %v2794_v28, %v2798_v5  ;;  %v7339_v36 = vcombine.low %v2794_v28, %v2798_v5  ;;  %v2764_v51 = vld [vmem:[%s10157_s10 + $0xd8] sm:$0xff] }
 0x8ae   :  { %v9168_v38 = vpack.c.bf16 %v2734_v32, %v2732_v35  ;;  %v2802_v35 = vld [vmem:[%s10157_s10 + $0x208] sm:$0xff]  ;;  %v2772_v5 = vld [vmem:[%s10157_s10 + $0x118] sm:$0xff] }
 0x8af   :  { %v2806_v32 = vld [vmem:[%s10157_s10 + $0x228] sm:$0xff] }
 0x8b0   :  { %3537 = vmatprep.mubr.bf16.mxu0 %v9168_v38  ;;  %3623 = vmatprep.mubr.bf16.mxu1 %v9168_v38  ;;  %v7348_v37 = vcombine.high %v2802_v35, %v2806_v32  ;;  %v7347_v41 = vcombine.low %v2802_v35, %v2806_v32  ;;  %v2780_v35 = vld [vmem:[%s10157_s10 + $0x158] sm:$0xff] }
 0x8b1   :  { %3538 = vmatmul.mubr.bf16.vlgmr.msra.gmra.mrb[16].mxu0 %v9166_v31  ;;  %3624 = vmatmul.mubr.bf16.vlgmr.msra.gmra.mrb[36].mxu1 %v9166_v31  ;;  %v2784_v32 = vld [vmem:[%s10157_s10 + $0x178] sm:$0xff] }
 0x8b2   :  { %3549 = vmatpush1.bf16.msra.mxu0 %v7283_v59  ;;  %3580 = vmatprep.mubr.bf16.mxu0 %v9168_v38  ;;  %v3858_v59 = vpack.i.b16 %v9191_v49, %v9191_v49 }
 0x8b3   :  { %3550 = vmatprep.subr.bf16.mxu0 %v7292_v39  ;;  %4055 = vmatprep.mubr.bf16.mxu1 %v9196_v60  ;;  %v2810_v39 = vld [vmem:[%s10157_s10 + $0x248] sm:$0xff] }
 0x8b4   :  { %v3863_v8 = vrot.slane %v3858_v59, %v8354_v15  ;;  %v7355_v46 = vcombine.low %v2810_v39, %v2814_v40  ;;  %v2842_v59 = vld [vmem:[%s10157_s10 + $0x348] sm:$0xff] }
 0x8b5   :  { %v7388_v63 = vcombine.high %v2842_v59, %v2846_v61 }
 0x8b6   :  { %3551 = vmatpush1.bf16.msra.mxu0 %v7291_v42  ;;  %v9225_v24 = vcombine.low %v3856_v3, %v3863_v8  ;;  %v7356_v42 = vcombine.high %v2810_v39, %v2814_v40  ;;  %v7387_v3 = vcombine.low %v2842_v59, %v2846_v61  ;;  %v2858_v8 = vld [vmem:[%s10157_s10 + $0x3c8] sm:$0xff]  ;;  %v2788_v39 = vld [vmem:[%s10157_s10 + $0x198] sm:$0xff] }
 0x8b7   :  { %3552 = vmatprep.subr.bf16.mxu0 %v7300_v48  ;;  %v2826_v48 = vld [vmem:[%s10157_s10 + $0x2c8] sm:$0xff]  ;;  %v7404_v22 = vcombine.high %v2858_v8, %v2862_v0  ;;  %v7403_v13 = vcombine.low %v2858_v8, %v2862_v0  ;;  %v2792_v40 = vld [vmem:[%s10157_s10 + $0x1b8] sm:$0xff]  ;;  %v7368_v8 = vcombine.high %v2820_v1, %v2824_v12 }
 0x8b8   :  { %3890 = vrot.lane.b32.xlu1 %v9225_v24, %s8243_s12  ;;  %v7372_v53 = vcombine.high %v2826_v48, %v2830_v6  ;;  %v7371_v56 = vcombine.low %v2826_v48, %v2830_v6  ;;  %v2804_v48 = vld [vmem:[%s10157_s10 + $0x218] sm:$0xff] }
 0x8b9   :  { %v2808_v6 = vld [vmem:[%s10157_s10 + $0x238] sm:$0xff] }
 0x8ba   :  { %3553 = vmatpush1.bf16.msra.mxu0 %v7299_v47  ;;  %v7364_v47 = vcombine.high %v2818_v43, %v2822_v44  ;;  %v2796_v43 = vld [vmem:[%s10157_s10 + $0x1d8] sm:$0xff]  ;;  %v7351_v59 = vcombine.low %v2804_v48, %v2808_v6 }
 0x8bb   :  { %3554 = vmatprep.subr.bf16.mxu0 %v7308_v25  ;;  %v2740_v25 = vld [vmem:[%s10157_s10 + $0x18] sm:$0xff] }
 0x8bc   :  { %4600 = vrot.lane.b32.xlu1 %v9239_v27, %s8244_s21  ;;  %v7288_v14 = vcombine.high %v2740_v25, %v2744_v29  ;;  %v2800_v44 = vld [vmem:[%s10157_s10 + $0x1f8] sm:$0xff] }
 0x8bd   :  { %v2828_v0 = vld [vmem:[%s10157_s10 + $0x2d8] sm:$0xff] }
 0x8be   :  { %3555 = vmatpush1.bf16.msra.mxu0 %v7307_v4  ;;  %v2752_v4 = vld [vmem:[%s10157_s10 + $0x78] sm:$0xff] }
 0x8bf   :  { %3556 = vmatprep.subr.bf16.mxu0 %v7316_v18  ;;  %v7287_v18 = vcombine.low %v2740_v25, %v2744_v29  ;;  %v7296_v19 = vcombine.high %v2748_v16, %v2752_v4  ;;  %v2836_v25 = vld [vmem:[%s10157_s10 + $0x318] sm:$0xff] }
 0x8c0   :  { %v2840_v29 = vld [vmem:[%s10157_s10 + $0x338] sm:$0xff] }
 0x8c2   :  { %3557 = vmatpush1.bf16.msra.mxu0 %v7315_v30  ;;  %v2760_v30 = vld [vmem:[%s10157_s10 + $0xb8] sm:$0xff] }
 0x8c3   :  { %3558 = vmatprep.subr.bf16.mxu0 %v7324_v33  ;;  %v7295_v33 = vcombine.low %v2748_v16, %v2752_v4  ;;  %v7304_v23 = vcombine.high %v2756_v20, %v2760_v30  ;;  %v2844_v16 = vld [vmem:[%s10157_s10 + $0x358] sm:$0xff] }
 0x8c4   :  { %v2848_v4 = vld [vmem:[%s10157_s10 + $0x378] sm:$0xff] }
 0x8c6   :  { %3559 = vmatpush1.bf16.msra.mxu0 %v7323_v26  ;;  %v2768_v26 = vld [vmem:[%s10157_s10 + $0xf8] sm:$0xff] }
 0x8c7   :  { %3560 = vmatprep.subr.bf16.mxu0 %v7332_v52  ;;  %v7303_v52 = vcombine.low %v2756_v20, %v2760_v30  ;;  %v7312_v28 = vcombine.high %v2764_v51, %v2768_v26  ;;  %v2852_v20 = vld [vmem:[%s10157_s10 + $0x398] sm:$0xff] }
 0x8c8   :  { %v2856_v30 = vld [vmem:[%s10157_s10 + $0x3b8] sm:$0xff] }
 0x8ca   :  { %3561 = vmatpush1.bf16.msra.mxu0 %v7331_v34  ;;  %v7311_v34 = vcombine.low %v2764_v51, %v2768_v26  ;;  %v2860_v51 = vld [vmem:[%s10157_s10 + $0x3d8] sm:$0xff] }
 0x8cb   :  { %3562 = vmatprep.subr.bf16.mxu0 %v7340_v2  ;;  %v2864_v26 = vld [vmem:[%s10157_s10 + $0x3f8] sm:$0xff] }
 0x8ce   :  { %3563 = vmatpush1.bf16.msra.mxu0 %v7339_v36 }
 0x8cf   :  { %3564 = vmatprep.subr.bf16.mxu0 %v7348_v37  ;;  %v7328_v37 = vcombine.high %v2780_v35, %v2784_v32 }
 0x8d2   :  { %3565 = vmatpush1.bf16.msra.mxu0 %v7347_v41  ;;  %v7327_v41 = vcombine.low %v2780_v35, %v2784_v32 }
 0x8d3   :  { %3566 = vmatprep.subr.bf16.mxu0 %v7356_v42  ;;  %v7336_v42 = vcombine.high %v2788_v39, %v2792_v40 }
 0x8d6   :  { %3567 = vmatpush1.bf16.msra.mxu0 %v7355_v46  ;;  %v7335_v46 = vcombine.low %v2788_v39, %v2792_v40 }
 0x8d7   :  { %3568 = vmatprep.subr.bf16.mxu0 %v7364_v47  ;;  %v7344_v47 = vcombine.high %v2796_v43, %v2800_v44 }
 0x8da   :  { %3569 = vmatpush1.bf16.msra.mxu0 %v7363_v50  ;;  %v7343_v50 = vcombine.low %v2796_v43, %v2800_v44 }
 0x8db   :  { %3570 = vmatprep.subr.bf16.mxu0 %v7372_v53  ;;  %v7352_v53 = vcombine.high %v2804_v48, %v2808_v6  ;;  %v9433_v48 = vpop.permute.xlu0 %3884  ;;  %v9435_v6 = vpop.permute.xlu1 %3886 }
 0x8de   :  { %3571 = vmatpush1.bf16.msra.mxu0 %v7371_v56  ;;  %v4563_v56 = vshrl.u32 %v9182_v45, 16 }
 0x8df   :  { %3572 = vmatprep.subr.bf16.mxu0 %v7380_v57  ;;  %v4571_v57 = vshrl.u32 %v9191_v49, 16  ;;  %v7359_v49 = vcombine.low %v2812_v55, %v2816_v58 }
 0x8e0   :  { %v4564_v61 = vpack.i.b16 %v4563_v56, %v4563_v56 }
 0x8e2   :  { %3573 = vmatpush1.bf16.msra.mxu0 %v7379_v62  ;;  %v4572_v62 = vpack.i.b16 %v4571_v57, %v4571_v57 }
 0x8e3   :  { %3574 = vmatprep.subr.bf16.mxu0 %v7388_v63  ;;  %v7360_v63 = vcombine.high %v2812_v55, %v2816_v58 }
 0x8e4   :  { %v4577_v45 = vrot.slane %v4572_v62, %v8354_v15 }
 0x8e6   :  { %3575 = vmatpush1.bf16.msra.mxu0 %v7387_v3  ;;  %v4569_v3 = vrot.slane %v4564_v61, %v8354_v15 }
 0x8e7   :  { %3576 = vmatprep.subr.bf16.mxu0 %v7396_v7 }
 0x8e8   :  { %v9375_v7 = vcombine.low %v4569_v3, %v4577_v45  ;;  %v3893_v3 = vrot.slane %v9435_v6, 4 }
 0x8ea   :  { %3577 = vmatpush1.bf16.msra.mxu0 %v7395_v9  ;;  %v2832_v9 = vld [vmem:[%s10157_s10 + $0x2f8] sm:$0xff]  ;;  %4604 = vrot.lane.b32.xlu1 %v9375_v7, %s8244_s21 }
 0x8eb   :  { %3578 = vmatprep.subr.bf16.mxu0 %v7404_v22  ;;  %v7367_v22 = vcombine.low %v2820_v1, %v2824_v12  ;;  %v7376_v15 = vcombine.high %v2828_v0, %v2832_v9 }
 0x8ee   :  { %3579 = vmatpush1.bf16.msra.mxu0 %v7403_v13  ;;  %v7375_v13 = vcombine.low %v2828_v0, %v2832_v9 }
 0x8ef   :  { %3634 = vmatprep.subr.bf16.mxu0 %v7288_v14  ;;  %v7384_v14 = vcombine.high %v2836_v25, %v2840_v29 }
 0x8f1   :  { %3581 = vmatmul.mubr.bf16.vlgmr.msra.gmra.mrb[20].mxu0 %v9166_v31 }
 0x8f2   :  { %3635 = vmatpush1.bf16.msra.mxu0 %v7287_v18  ;;  %3666 = vmatprep.mubr.bf16.mxu0 %v9168_v38  ;;  %v2776_v38 = vld [vmem:[%s10157_s10 + $0x138] sm:$0xff]  ;;  %v7383_v18 = vcombine.low %v2836_v25, %v2840_v29  ;;  %s8245_s10 = smov 32  }
 0x8f3   :  { %3636 = vmatprep.subr.bf16.mxu0 %v7296_v19  ;;  %v7320_v2 = vcombine.high %v2772_v5, %v2776_v38  ;;  %v7319_v36 = vcombine.low %v2772_v5, %v2776_v38  ;;  %v7392_v19 = vcombine.high %v2844_v16, %v2848_v4  ;;  %v7407_v5 = vcombine.low %v2860_v51, %v2864_v26 }
 0x8f6   :  { %3637 = vmatpush1.bf16.msra.mxu0 %v7295_v33  ;;  %v7391_v33 = vcombine.low %v2844_v16, %v2848_v4 }
 0x8f7   :  { %3638 = vmatprep.subr.bf16.mxu0 %v7304_v23  ;;  %v7400_v23 = vcombine.high %v2852_v20, %v2856_v30 }
 0x8fa   :  { %3639 = vmatpush1.bf16.msra.mxu0 %v7303_v52  ;;  %v7399_v52 = vcombine.low %v2852_v20, %v2856_v30 }
 0x8fb   :  { %3640 = vmatprep.subr.bf16.mxu0 %v7312_v28  ;;  %v7408_v28 = vcombine.high %v2860_v51, %v2864_v26 }
 0x8fe   :  { %3641 = vmatpush1.bf16.msra.mxu0 %v7311_v34 }
 0x8ff   :  { %3642 = vmatprep.subr.bf16.mxu0 %v7320_v2 }
 0x902   :  { %3643 = vmatpush1.bf16.msra.mxu0 %v7319_v36 }
 0x903   :  { %3644 = vmatprep.subr.bf16.mxu0 %v7328_v37 }
 0x906   :  { %3645 = vmatpush1.bf16.msra.mxu0 %v7327_v41 }
 0x907   :  { %3646 = vmatprep.subr.bf16.mxu0 %v7336_v42 }
 0x90a   :  { %3647 = vmatpush1.bf16.msra.mxu0 %v7335_v46 }
 0x90b   :  { %3648 = vmatprep.subr.bf16.mxu0 %v7344_v47 }
 0x90e   :  { %3649 = vmatpush1.bf16.msra.mxu0 %v7343_v50  ;;  %v9437_v50 = vpop.permute.xlu0 %3888 }
 0x90f   :  { %3650 = vmatprep.subr.bf16.mxu0 %v7352_v53  ;;  %v3894_v12 = vrot.slane %v9437_v50, 4 }
 0x912   :  { %3651 = vmatpush1.bf16.msra.mxu0 %v7351_v59  ;;  %v9441_v55 = vpop.permute.xlu0 %4598 }
 0x913   :  { %3652 = vmatprep.subr.bf16.mxu0 %v7360_v63 }
 0x916   :  { %3653 = vmatpush1.bf16.msra.mxu0 %v7359_v49  ;;  %v9445_v61 = vpop.permute.xlu0 %4602 }
 0x917   :  { %3654 = vmatprep.subr.bf16.mxu0 %v7368_v8  ;;  %v4608_v45 = vrot.slane %v9445_v61, 4  ;;  %v3901_v8 = vsel %vm55_vm0, %v3893_v3, %v3894_v12 }
 0x91a   :  { %3655 = vmatpush1.bf16.msra.mxu0 %v7367_v22 }
 0x91b   :  { %3656 = vmatprep.subr.bf16.mxu0 %v7376_v15 }
 0x91e   :  { %3657 = vmatpush1.bf16.msra.mxu0 %v7375_v13  ;;  %v3902_v13 = vsel %vm3896_vm4, %v3901_v8, %v9437_v50 }
 0x91f   :  { %3658 = vmatprep.subr.bf16.mxu0 %v7384_v14 }
 0x922   :  { %3659 = vmatpush1.bf16.msra.mxu0 %v7383_v18 }
 0x923   :  { %3660 = vmatprep.subr.bf16.mxu0 %v7392_v19 }
 0x926   :  { %3661 = vmatpush1.bf16.msra.mxu0 %v7391_v33 }
 0x927   :  { %3662 = vmatprep.subr.bf16.mxu0 %v7400_v23 }
 0x92a   :  { %3663 = vmatpush1.bf16.msra.mxu0 %v7399_v52  ;;  %v9439_v53 = vpop.permute.xlu1 %3890 }
 0x92b   :  { %3664 = vmatprep.subr.bf16.mxu0 %v7408_v28 }
 0x92e   :  { %3665 = vmatpush1.bf16.msra.mxu0 %v7407_v5  ;;  %v9447_v63 = vpop.permute.xlu1 %4600 }
 0x92f   :  { %v4607_v49 = vrot.slane %v9447_v63, 4 }
 0x931   :  { %3667 = vmatmul.mubr.bf16.vlgmr.msra.gmra.mrb[24].mxu0 %v9166_v31  ;;  %v4614_v0 = vsel %vm55_vm0, %v4607_v49, %v4608_v45 }
 0x932   :  { %4141 = vmatprep.mubr.bf16.mxu0 %v9196_v60  ;;  %v4615_v15 = vsel %vm4610_vm2, %v4614_v0, %v9445_v61 }
 0x984   :  { %v3539_v38 = vpop.f32.mrb[16].mxu0  ;;  %v3625_v34 = vpop.f32.mrb[36].mxu1 }
 0x985   :  { %v3541_v2 = vpop.f32.mrb[17].mxu0  ;;  %v3627_v35 = vpop.f32.mrb[37].mxu1 }
 0x986   :  { %v9411_v32 = vpack.c.bf16 %v3541_v2, %v3539_v38  ;;  %v3543_v36 = vpop.f32.mrb[18].mxu0  ;;  %v9413_v37 = vpack.c.bf16 %v3627_v35, %v3625_v34  ;;  %v3629_v39 = vpop.f32.mrb[38].mxu1  ;;  %v3892_v34 = vrot.slane %v9433_v48, 4 }
 0x987   :  { %v3545_v40 = vpop.f32.mrb[19].mxu0  ;;  %v3631_v41 = vpop.f32.mrb[39].mxu1 }
 0x988   :  { %3739 = vst [vmem:[#allocation4 + $0x4] sm:$0xff] %v9411_v32  ;;  %v7617_v31 = vpack.c.bf16 %v3545_v40, %v3543_v36  ;;  %3741 = vst [vmem:[#allocation4 + $0x14] sm:$0xff] %v9413_v37  ;;  %v7619_v42 = vpack.c.bf16 %v3631_v41, %v3629_v39  ;;  %v3897_v41 = vsel %vm3896_vm4, %v3892_v34, %v9433_v48 }
 0x98a   :  { %3743 = vst [vmem:[#allocation4 + $0x2c] sm:$0x33] %v7617_v31  ;;  %3745 = vst [vmem:[#allocation4 + $0x3c] sm:$0x33] %v7619_v42 }
 0x98f   :  { %v9421_v43 = vld [vmem:[#allocation4] sm:$0xff] }
 0x991   :  { %v9423_v44 = vld [vmem:[#allocation4 + $0x28] sm:$0x33] }
 0x992   :  { %v7425_v46 = vcombine.high %v9421_v43, %v9423_v44  ;;  %v7424_v47 = vcombine.low %v9421_v43, %v9423_v44  ;;  %v3915_v42 = vmul.bf16 %v3897_v41, %v9423_v44 }
 0x994   :  { %3969 = vrot.lane.b32.xlu1 %v7425_v46, %s8245_s10  ;;  %3967 = vrot.lane.b32.xlu0 %v7424_v47, %s8245_s10  ;;  %v3899_v46 = vsel %vm55_vm0, %v3892_v34, %v3893_v3  ;;  %v3895_v47 = vrot.slane %v9439_v53, 4 }
 0x995   :  { %v3900_v48 = vsel %vm3896_vm4, %v3899_v46, %v9435_v6 }
 0x998   :  { %4930 = vrot.lane.b32.xlu1 %v9140_v11, %s8228_s4 }
 0x9c4   :  { %v3582_v58 = vpop.f32.mrb[20].mxu0 }
 0x9c5   :  { %v3584_v56 = vpop.f32.mrb[21].mxu0 }
 0x9c6   :  { %v9443_v57 = vpack.c.bf16 %v3584_v56, %v3582_v58  ;;  %v3586_v59 = vpop.f32.mrb[22].mxu0  ;;  %v3910_v58 = vmul.bf16 %v3897_v41, %v9421_v43  ;;  %v3903_v56 = vsel %vm55_vm0, %v3894_v12, %v3895_v47 }
 0x9c7   :  { %v3588_v62 = vpop.f32.mrb[23].mxu0  ;;  %v3904_v8 = vsel %vm3896_vm4, %v3903_v56, %v9439_v53 }
 0x9c8   :  { %3740 = vst [vmem:[#allocation4 + $0xc] sm:$0xff] %v9443_v57  ;;  %v7618_v1 = vpack.c.bf16 %v3588_v62, %v3586_v59  ;;  %v7443_v59 = vcombine.high %v3910_v58, %v3915_v42  ;;  %v7442_v62 = vcombine.low %v3910_v58, %v3915_v42 }
 0x9ca   :  { %3744 = vst [vmem:[#allocation4 + $0x34] sm:$0x33] %v7618_v1 }
 0x9cf   :  { %v9460_v9 = vld [vmem:[#allocation4 + $0x8] sm:$0xff]  ;;  %v9466_v25 = vld [vmem:[#allocation4 + $0x10] sm:$0xff] }
 0x9d0   :  { %v9485_v19 = vmul.bf16 %v3902_v13, %v9466_v25  ;;  %v9488_v20 = vmul.bf16 %v4615_v15, %v9466_v25  ;;  %v3911_v3 = vmul.bf16 %v3900_v48, %v9460_v9 }
 0x9d1   :  { %v9462_v22 = vld [vmem:[#allocation4 + $0x30] sm:$0x33]  ;;  %v9468_v29 = vld [vmem:[#allocation4 + $0x38] sm:$0x33] }
 0x9d2   :  { %v7427_v14 = vcombine.high %v9460_v9, %v9462_v22  ;;  %v7426_v16 = vcombine.low %v9460_v9, %v9462_v22  ;;  %v9477_v4 = vmul.bf16 %v3902_v13, %v9468_v29  ;;  %v9480_v18 = vmul.bf16 %v4615_v15, %v9468_v29 }
 0x9d3   :  { %v7428_v23 = vcombine.low %v9466_v25, %v9468_v29  ;;  %v3916_v1 = vmul.bf16 %v3900_v48, %v9462_v22  ;;  %v4606_v13 = vrot.slane %v9441_v55, 4 }
 0x9d4   :  { %3973 = vrot.lane.b32.xlu1 %v7427_v14, %s8245_s10  ;;  %3971 = vrot.lane.b32.xlu0 %v7426_v16, %s8245_s10  ;;  %v7447_v30 = vcombine.high %v9485_v19, %v9477_v4  ;;  %v7471_v33 = vcombine.high %v9488_v20, %v9480_v18  ;;  %v7446_v16 = vcombine.low %v9485_v19, %v9477_v4 }
 0x9d5   :  { %v7445_v0 = vcombine.high %v3911_v3, %v3916_v1  ;;  %v7444_v15 = vcombine.low %v3911_v3, %v3916_v1  ;;  %v7470_v48 = vcombine.low %v9488_v20, %v9480_v18 }
 0x9d8   :  { %4934 = vrot.lane.b32.xlu1 %v9150_v54, %s8228_s4  ;;  %4932 = vrot.lane.b32.xlu0 %v9213_v10, %s8228_s4 }
 0x9dc   :  { %3975 = vrot.lane.b32.xlu0 %v7428_v23, %s8245_s10 }
 0xa04   :  { %v3668_v51 = vpop.f32.mrb[24].mxu0 }
 0xa05   :  { %v3670_v26 = vpop.f32.mrb[25].mxu0 }
 0xa06   :  { %v9501_v52 = vpack.c.bf16 %v3670_v26, %v3668_v51  ;;  %v3672_v28 = vpop.f32.mrb[26].mxu0  ;;  %v4611_v51 = vsel %vm4610_vm2, %v4606_v13, %v9441_v55 }
 0xa07   :  { %v3674_v5 = vpop.f32.mrb[27].mxu0  ;;  %v4628_v26 = vmul.bf16 %v4611_v51, %v9423_v44  ;;  %v4623_v34 = vmul.bf16 %v4611_v51, %v9421_v43 }
 0xa08   :  { %3742 = vst [vmem:[#allocation4 + $0x1c] sm:$0xff] %v9501_v52  ;;  %v7620_v38 = vpack.c.bf16 %v3674_v5, %v3672_v28  ;;  %v4612_v28 = vsel %vm55_vm0, %v4606_v13, %v4607_v49  ;;  %v3968_v13 = vpop.permute.xlu0 %3967 }
 0xa09   :  { %v7466_v41 = vcombine.low %v4623_v34, %v4628_v26  ;;  %v7467_v55 = vcombine.high %v4623_v34, %v4628_v26 }
 0xa0a   :  { %3746 = vst [vmem:[#allocation4 + $0x44] sm:$0x33] %v7620_v38 }
 0xa0f   :  { %v9505_v2 = vld [vmem:[#allocation4 + $0x18] sm:$0xff]  ;;  %v9519_v31 = vld [vmem:[#allocation4 + $0x20] sm:$0xf] }
 0xa10   :  { %v3913_v12 = vmul.bf16 %v3904_v8, %v9505_v2  ;;  %v3914_v53 = vmul.bf16 %v3895_v47, %v9519_v31 }
 0xa11   :  { %v9507_v35 = vld [vmem:[#allocation4 + $0x40] sm:$0x33]  ;;  %v9513_v40 = vld [vmem:[#allocation4 + $0x48] sm:$0x3] }
 0xa12   :  { %v7431_v36 = vcombine.high %v9505_v2, %v9507_v35  ;;  %v7430_v39 = vcombine.low %v9505_v2, %v9507_v35  ;;  %v7432_v50 = vcombine.low %v9519_v31, %v9513_v40  ;;  %v3918_v6 = vmul.bf16 %v3904_v8, %v9507_v35 }
 0xa13   :  { %v3919_v14 = vmul.bf16 %v3895_v47, %v9513_v40 }
 0xa14   :  { %3981 = vrot.lane.b32.xlu1 %v7431_v36, %s8245_s10  ;;  %3979 = vrot.lane.b32.xlu0 %v7430_v39, %s8245_s10  ;;  %v7448_v23 = vcombine.low %v3913_v12, %v3918_v6  ;;  %v7449_v5 = vcombine.high %v3913_v12, %v3918_v6  ;;  %v4605_v36 = vpop.permute.xlu1 %4604  ;;  %v4613_v39 = vsel %vm4610_vm2, %v4612_v28, %v9447_v63 }
 0xa15   :  { %v7450_v38 = vcombine.low %v3914_v53, %v3919_v14  ;;  %v4629_v44 = vmul.bf16 %v4613_v39, %v9462_v22  ;;  %v4624_v42 = vmul.bf16 %v4613_v39, %v9460_v9  ;;  %v4609_v46 = vrot.slane %v4605_v36, 4  ;;  %v9602_v53 = vld [vmem:[%s10159_s11 + $0x8] sm:$0x3f]  }
 0xa17   :  { %v7468_v49 = vcombine.low %v4624_v42, %v4629_v44  ;;  %v7469_v63 = vcombine.high %v4624_v42, %v4629_v44  ;;  %v4616_v22 = vsel %vm55_vm0, %v4608_v45, %v4609_v46  ;;  %v4632_v45 = vmul.bf16 %v4609_v46, %v9513_v40 }
 0xa18   :  { %4936 = vrot.lane.b32.xlu1 %v9225_v24, %s8228_s4  ;;  %3983 = vrot.lane.b32.xlu0 %v7432_v50, %s8245_s10  ;;  %v3970_v47 = vpop.permute.xlu1 %3969  ;;  %v4617_v58 = vsel %vm4610_vm2, %v4616_v22, %v4605_v36  ;;  %v4627_v8 = vmul.bf16 %v4609_v46, %v9519_v31  ;;  %v4926_v36 = vld [vmem:[#allocation4 + $0x30] sm:$0x33]  ;;  %v4927_v46 = vld [vmem:[#allocation4 + $0x38] sm:$0x33] }
 0xa19   :  { %v4631_v56 = vmul.bf16 %v4617_v58, %v9507_v35  ;;  %v4626_v61 = vmul.bf16 %v4617_v58, %v9505_v2  ;;  %v4925_v35 = vld [vmem:[#allocation4 + $0x28] sm:$0x33]  ;;  %v3986_v31 = vsel %vm3985_vm5, %v3968_v13, %v3970_v47 }
 0xa1a   :  { %v7474_v6 = vcombine.low %v4627_v8, %v4632_v45  ;;  %v4928_v8 = vld [vmem:[#allocation4 + $0x40] sm:$0x33]  ;;  %v4929_v13 = vld [vmem:[#allocation4 + $0x48] sm:$0x3] }
 0xa1b   :  { %v7473_v1 = vcombine.high %v4626_v61, %v4631_v56 }
 0xa1c   :  { %4239 = vrot.lane.b32.xlu1 %v7443_v59, %s8246_s29  ;;  %4237 = vrot.lane.b32.xlu0 %v7442_v62, %s8246_s29  ;;  %v4931_v50 = vpop.permute.xlu1 %4930  ;;  %v7472_v62 = vcombine.low %v4626_v61, %v4631_v56 }
 0xa1d   :  { %v4938_v59 = vrot.slane %v4931_v50, 4 }
 0xa1f   :  { %v4942_v3 = vsel %vm538_vm10, %v4938_v59, %v4931_v50 }
 0xa20   :  { %4243 = vrot.lane.b32.xlu1 %v7445_v0, %s8246_s29  ;;  %4241 = vrot.lane.b32.xlu0 %v7444_v15, %s8246_s29  ;;  %v4954_v0 = vmul.bf16 %v4942_v3, %v9421_v43  ;;  %v4959_v15 = vmul.bf16 %v4942_v3, %v4925_v35 }
 0xa22   :  { %v7486_v40 = vcombine.low %v4954_v0, %v4959_v15  ;;  %v7487_v12 = vcombine.high %v4954_v0, %v4959_v15 }
 0xa24   :  { %4245 = vrot.lane.b32.xlu0 %v7446_v16, %s8246_s29  ;;  %4249 = vrot.lane.b32.xlu1 %v7448_v23, %s8246_s29  ;;  %v4000_v23 = vsel %vm3998_vm6, %v3986_v31, 0 }
 0xa28   :  { %4251 = vrot.lane.b32.xlu0 %v7449_v5, %s8246_s29  ;;  %4253 = vrot.lane.b32.xlu1 %v7450_v38, %s8246_s29 }
 0xa2c   :  { %4678 = vrot.lane.b32.xlu0 %v7466_v41, %s8247_s30  ;;  %4680 = vrot.lane.b32.xlu1 %v7467_v55, %s8247_s30 }
 0xa30   :  { %4682 = vrot.lane.b32.xlu0 %v7468_v49, %s8247_s30  ;;  %5523 = vrot.lane.b32.xlu1 %v9156_v17, %s8234_s25 }
 0xa34   :  { %5525 = vrot.lane.b32.xlu0 %v9239_v27, %s8234_s25  ;;  %4684 = vrot.lane.b32.xlu1 %v7469_v63, %s8247_s30 }
 0xa38   :  { %4686 = vrot.lane.b32.xlu0 %v7470_v48, %s8247_s30  ;;  %5527 = vrot.lane.b32.xlu1 %v9221_v21, %s8234_s25 }
 0xa3c   :  { %4690 = vrot.lane.b32.xlu0 %v7472_v62, %s8247_s30  ;;  %4692 = vrot.lane.b32.xlu1 %v7473_v1, %s8247_s30 }
 0xa40   :  { %4694 = vrot.lane.b32.xlu0 %v7474_v6, %s8247_s30  ;;  %5529 = vrot.lane.b32.xlu1 %v9375_v7, %s8234_s25  ;;  %v4924_v6 = vld [vmem:[#allocation4 + $0x20] sm:$0xf] }
 0xa44   :  { %5009 = vrot.lane.b32.xlu0 %v7486_v40, %s8234_s25  ;;  %5011 = vrot.lane.b32.xlu1 %v7487_v12, %s8234_s25 }
 0xa46   :  { %v3974_v14 = vpop.permute.xlu1 %3973  ;;  %v3972_v16 = vpop.permute.xlu0 %3971 }
 0xa47   :  { %v3987_v43 = vsel %vm3985_vm5, %v3970_v47, %v3972_v16  ;;  %v3988_v38 = vsel %vm3985_vm5, %v3972_v16, %v3974_v14 }
 0xa48   :  { %7433 = vmatprep.subr.msk.bf16.mxu1 %vm3998_vm6, %v3987_v43  ;;  %5843 = vrot.lane.b32.xlu1 %v9140_v11, %s8247_s30  ;;  %v4006_v63 = vsel %vm3998_vm6, %v3988_v38, 0 }
 0xa49   :  { %4024 = vmatpush1.bf16.msra.mxu1 %v4000_v23 }
 0xa4a   :  { %v4935_v51 = vpop.permute.xlu1 %4934  ;;  %v4933_v26 = vpop.permute.xlu0 %4932 }
 0xa4b   :  { %v4940_v28 = vrot.slane %v4935_v51, 4  ;;  %v4939_v5 = vrot.slane %v4933_v26, 4 }
 0xa4c   :  { %7434 = vmatmul.mubr.msk.bf16.vlgmr.msra.gmra.mrb[40].mxu1 %vm3994_vm7, %v9602_v53 }
 0xa4d   :  { %v4943_v34 = vsel %vm55_vm0, %v4938_v59, %v4939_v5  ;;  %v4945_v11 = vsel %vm55_vm0, %v4939_v5, %v4940_v28  ;;  %4098 = vmatprep.mubr.bf16.mxu1 %v9196_v60  ;;  %v9660_v5 = vld [vmem:[%s10159_s11] sm:$0x3f]  }
 0xa4e   :  { %v4944_v39 = vsel %vm538_vm10, %v4943_v34, %v4933_v26  ;;  %v4946_v41 = vsel %vm538_vm10, %v4945_v11, %v4935_v51  ;;  %v9612_v55 = vpop.permute.xlu0 %3975 }
 0xa4f   :  { %v4955_v44 = vmul.bf16 %v4944_v39, %v9460_v9  ;;  %v4960_v42 = vmul.bf16 %v4944_v39, %v4926_v36  ;;  %v3989_v49 = vsel %vm3985_vm5, %v3974_v14, %v9612_v55  ;;  %v9618_v47 = vmul.bf16 %v4946_v41, %v9466_v25 }
 0xa50   :  { %7435 = vmatprep.subr.msk.bf16.mxu1 %vm3998_vm6, %v3989_v49  ;;  %v9622_v22 = vmul.bf16 %v4946_v41, %v4927_v46 }
 0xa51   :  { %v7488_v50 = vcombine.low %v4955_v44, %v4960_v42  ;;  %v7489_v58 = vcombine.high %v4955_v44, %v4960_v42  ;;  %4067 = vmatpush1.bf16.msra.mxu1 %v4006_v63  ;;  %v7429_v44 = vcombine.high %v9466_v25, %v9468_v29 }
 0xa52   :  { %v7491_v9 = vcombine.high %v9618_v47, %v9622_v22  ;;  %v7490_v48 = vcombine.low %v9618_v47, %v9622_v22 }
 0xa53   :  { %5013 = vrot.lane.b32.xlu0 %v7488_v50, %s8234_s25  ;;  %5015 = vrot.lane.b32.xlu1 %v7489_v58, %s8234_s25 }
 0xa54   :  { %7436 = vmatmul.mubr.msk.bf16.vlgmr.msra.gmra.mrb[44].mxu1 %vm3994_vm7, %v9602_v53 }
 0xa55   :  { %4184 = vmatprep.mubr.bf16.mxu1 %v9196_v60 }
 0xa57   :  { %5845 = vrot.lane.b32.xlu0 %v9213_v10, %s8247_s30  ;;  %5847 = vrot.lane.b32.xlu1 %v9150_v54, %s8247_s30 }
 0xa5b   :  { %5017 = vrot.lane.b32.xlu0 %v7490_v48, %s8234_s25 }
 0xa86   :  { %v3982_v56 = vpop.permute.xlu1 %3981  ;;  %v9638_v59 = vpop.permute.xlu0 %3979 }
 0xa87   :  { %v3992_v61 = vsel %vm3985_vm5, %v9638_v59, %v3982_v56 }
 0xa88   :  { %v4018_v10 = vsel %vm3998_vm6, %v3992_v61, 0 }
 0xa8a   :  { %v4937_v45 = vpop.permute.xlu1 %4936  ;;  %v3984_v62 = vpop.permute.xlu0 %3983 }
 0xa8b   :  { %v4941_v1 = vrot.slane %v4937_v45, 4  ;;  %v3993_v3 = vsel %vm3985_vm5, %v3982_v56, %v3984_v62 }
 0xa8c   :  { %7439 = vmatprep.subr.msk.bf16.mxu1 %vm3998_vm6, %v3993_v3 }
 0xa8d   :  { %v4947_v54 = vsel %vm55_vm0, %v4940_v28, %v4941_v1  ;;  %4153 = vmatpush1.bf16.msra.mxu1 %v4018_v10  ;;  %v4958_v31 = vmul.bf16 %v4941_v1, %v4924_v6  ;;  %v4963_v14 = vmul.bf16 %v4941_v1, %v4929_v13 }
 0xa8e   :  { %v4948_v35 = vsel %vm538_vm10, %v4947_v54, %v4937_v45  ;;  %v4240_v0 = vpop.permute.xlu1 %4239  ;;  %v4238_v15 = vpop.permute.xlu0 %4237  ;;  %v9691_v45 = vld [vmem:[#allocation4 + $0x2c] sm:$0x33] }
 0xa8f   :  { %v4957_v40 = vmul.bf16 %v4948_v35, %v9505_v2  ;;  %v4962_v12 = vmul.bf16 %v4948_v35, %v4928_v8  ;;  %v4256_v23 = vsel %vm4255_vm8, %v4238_v15, %v4240_v0  ;;  %v7494_v34 = vcombine.low %v4958_v31, %v4963_v14 }
 0xa90   :  { %7440 = vmatmul.mubr.msk.bf16.vlgmr.msra.gmra.mrb[48].mxu1 %vm3994_vm7, %v9602_v53  ;;  %v4268_v2 = vsel %vm3998_vm6, %v4256_v23, 0 }
 0xa91   :  { %v7492_v16 = vcombine.low %v4957_v40, %v4962_v12  ;;  %v7493_v43 = vcombine.high %v4957_v40, %v4962_v12  ;;  %4323 = vmatprep.mubr.bf16.mxu1 %v9196_v60  ;;  %v9701_v40 = vld [vmem:[#allocation4 + $0x34] sm:$0x33] }
 0xa92   :  { %v4244_v51 = vpop.permute.xlu1 %4243  ;;  %v4242_v26 = vpop.permute.xlu0 %4241 }
 0xa93   :  { %v4257_v28 = vsel %vm4255_vm8, %v4240_v0, %v4242_v26  ;;  %5021 = vrot.lane.b32.xlu0 %v7492_v16, %s8234_s25  ;;  %5023 = vrot.lane.b32.xlu1 %v7493_v43, %s8234_s25  ;;  %v4258_v38 = vsel %vm4255_vm8, %v4242_v26, %v4244_v51 }
 0xa94   :  { %7451 = vmatprep.subr.msk.bf16.mxu1 %vm3998_vm6, %v4257_v28  ;;  %v4274_v41 = vsel %vm3998_vm6, %v4258_v38, 0  ;;  %v9720_v38 = vld [vmem:[#allocation4 + $0x3c] sm:$0x33] }
 0xa95   :  { %4292 = vmatpush1.bf16.msra.mxu1 %v4268_v2 }
 0xa96   :  { %v9663_v11 = vpop.permute.xlu0 %4245  ;;  %v9665_v36 = vpop.permute.xlu1 %4249 }
 0xa97   :  { %v4259_v39 = vsel %vm4255_vm8, %v4244_v51, %v9663_v11  ;;  %5025 = vrot.lane.b32.xlu0 %v7494_v34, %s8234_s25  ;;  %5849 = vrot.lane.b32.xlu1 %v9225_v24, %s8247_s30  ;;  %v9716_v51 = vld [vmem:[%s10159_s11 + $0x10] sm:$0x3f]  }
 0xa98   :  { %7452 = vmatmul.mubr.msk.bf16.vlgmr.msra.gmra.mrb[40].mxu1 %vm3994_vm7, %v9660_v5  ;;  %7453 = vmatprep.subr.msk.bf16.mxu1 %vm3998_vm6, %v4259_v39 }
 0xa99   :  { %4335 = vmatpush1.bf16.msra.mxu1 %v4274_v41  ;;  %4366 = vmatprep.mubr.bf16.mxu1 %v9196_v60 }
 0xa9a   :  { %v4252_v42 = vpop.permute.xlu0 %4251  ;;  %v4254_v49 = vpop.permute.xlu1 %4253 }
 0xa9b   :  { %v4263_v46 = vsel %vm4255_vm8, %v4252_v42, %v4254_v49  ;;  %3977 = vrot.lane.b32.xlu0 %v7429_v44, %s8245_s10  ;;  %v4262_v24 = vsel %vm4255_vm8, %v9665_v36, %v4252_v42 }
 0xa9c   :  { %7457 = vmatprep.subr.msk.bf16.mxu1 %vm3998_vm6, %v4263_v46  ;;  %v4286_v58 = vsel %vm3998_vm6, %v4262_v24, 0 }
 0xa9e   :  { %v4679_v63 = vpop.permute.xlu0 %4678  ;;  %v4681_v50 = vpop.permute.xlu1 %4680 }
 0xa9f   :  { %v4697_v61 = vsel %vm4696_vm9, %v4679_v63, %v4681_v50 }
 0xaa0   :  { %7454 = vmatmul.mubr.msk.bf16.vlgmr.msra.gmra.mrb[44].mxu1 %vm3994_vm7, %v9660_v5  ;;  %v4709_v35 = vsel %vm3998_vm6, %v4697_v61, 0 }
 0xaa1   :  { %4421 = vmatpush1.bf16.msra.mxu1 %v4286_v58  ;;  %4452 = vmatprep.mubr.bf16.mxu1 %v9196_v60  ;;  %v9751_v58 = vld [vmem:[#allocation4 + $0x4c] sm:$0x3] }
 0xaa2   :  { %v4683_v25 = vpop.permute.xlu0 %4682  ;;  %v5524_v29 = vpop.permute.xlu1 %5523 }
 0xaa3   :  { %v4698_v48 = vsel %vm4696_vm9, %v4681_v50, %v4683_v25  ;;  %v5531_v56 = vrot.slane %v5524_v29, 4  ;;  %v9749_v50 = vld [vmem:[#allocation4 + $0x24] sm:$0xf] }
 0xaa4   :  { %7475 = vmatprep.subr.msk.bf16.mxu1 %vm3998_vm6, %v4698_v48 }
 0xaa5   :  { %v5535_v62 = vsel %vm577_vm14, %v5531_v56, %v5524_v29 }
 0xaa6   :  { %v5547_v1 = vmul.bf16 %v9411_v32, %v5535_v62  ;;  %v5552_v3 = vmul.bf16 %v5535_v62, %v9691_v45  ;;  %v5526_v10 = vpop.permute.xlu0 %5525  ;;  %v4685_v54 = vpop.permute.xlu1 %4684 }
 0xaa7   :  { %v5532_v8 = vrot.slane %v5526_v10, 4  ;;  %v4699_v28 = vsel %vm4696_vm9, %v4683_v25, %v4685_v54 }
 0xaa8   :  { %v7525_v0 = vcombine.low %v5547_v1, %v5552_v3  ;;  %v7526_v15 = vcombine.high %v5547_v1, %v5552_v3  ;;  %7458 = vmatmul.mubr.msk.bf16.vlgmr.msra.gmra.mrb[48].mxu1 %vm3994_vm7, %v9660_v5  ;;  %v4715_v49 = vsel %vm3998_vm6, %v4699_v28, 0 }
 0xaa9   :  { %v5536_v6 = vsel %vm55_vm0, %v5531_v56, %v5532_v8  ;;  %4733 = vmatpush1.bf16.msra.mxu1 %v4709_v35  ;;  %4764 = vmatprep.mubr.bf16.mxu1 %v9196_v60  ;;  %v9759_v56 = vld [vmem:[#allocation4 + $0x44] sm:$0x33] }
 0xaaa   :  { %v5537_v12 = vsel %vm577_vm14, %v5536_v6, %v5526_v10  ;;  %v9704_v13 = vpop.permute.xlu0 %4686  ;;  %5604 = vrot.lane.b32.xlu0 %v7526_v15, %s8228_s4  ;;  %5602 = vrot.lane.b32.xlu1 %v7525_v0, %s8228_s4  ;;  %v5528_v31 = vpop.permute.xlu1 %5527 }
 0xaab   :  { %v5548_v14 = vmul.bf16 %v9443_v57, %v5537_v12  ;;  %v5553_v16 = vmul.bf16 %v5537_v12, %v9701_v40  ;;  %v4700_v43 = vsel %vm4696_vm9, %v4685_v54, %v9704_v13  ;;  %v5533_v23 = vrot.slane %v5528_v31, 4 }
 0xaac   :  { %7477 = vmatprep.subr.msk.bf16.mxu1 %vm3998_vm6, %v4700_v43 }
 0xaad   :  { %v7527_v26 = vcombine.low %v5548_v14, %v5553_v16  ;;  %v5538_v2 = vsel %vm55_vm0, %v5532_v8, %v5533_v23  ;;  %v7528_v25 = vcombine.high %v5548_v14, %v5553_v16 }
 0xaae   :  { %v5539_v34 = vsel %vm577_vm14, %v5538_v2, %v5528_v31  ;;  %v9723_v39 = vpop.permute.xlu0 %4690  ;;  %4247 = vrot.lane.b32.xlu0 %v7447_v30, %s8246_s29  ;;  %v4693_v41 = vpop.permute.xlu1 %4692 }
 0xaaf   :  { %v9730_v44 = vmul.bf16 %v9413_v37, %v5539_v34  ;;  %v9733_v42 = vmul.bf16 %v5539_v34, %v9720_v38  ;;  %5606 = vrot.lane.b32.xlu1 %v7527_v26, %s8228_s4 }
 0xab0   :  { %7476 = vmatmul.mubr.msk.bf16.vlgmr.msra.gmra.mrb[40].mxu1 %vm3994_vm7, %v9716_v51 }
 0xab1   :  { %v7530_v46 = vcombine.high %v9730_v44, %v9733_v42  ;;  %4776 = vmatpush1.bf16.msra.mxu1 %v4715_v49  ;;  %4807 = vmatprep.mubr.bf16.mxu1 %v9196_v60  ;;  %v7529_v63 = vcombine.low %v9730_v44, %v9733_v42  ;;  %v7569_v44 = vcombine.low %v9413_v37, %v9720_v38 }
 0xab2   :  { %v4695_v4 = vpop.permute.xlu0 %4694  ;;  %6452 = vrot.lane.b32.xlu0 %v9239_v27, %s8246_s29  ;;  %v5530_v19 = vpop.permute.xlu1 %5529  ;;  %v4703_v27 = vsel %vm4696_vm9, %v9723_v39, %v4693_v41 }
 0xab3   :  { %v4704_v30 = vsel %vm4696_vm9, %v4693_v41, %v4695_v4  ;;  %v5534_v24 = vrot.slane %v5530_v19, 4  ;;  %6450 = vrot.lane.b32.xlu1 %v9156_v17, %s8246_s29  ;;  %v4727_v1 = vsel %vm3998_vm6, %v4703_v27, 0 }
 0xab4   :  { %7481 = vmatprep.subr.msk.bf16.mxu1 %vm3998_vm6, %v4704_v30 }
 0xab5   :  { %v5540_v29 = vsel %vm55_vm0, %v5533_v23, %v5534_v24  ;;  %v5551_v61 = vmul.bf16 %v5534_v24, %v9749_v50  ;;  %v5556_v62 = vmul.bf16 %v5534_v24, %v9751_v58 }
 0xab6   :  { %v5541_v48 = vsel %vm577_vm14, %v5540_v29, %v5530_v19  ;;  %5610 = vrot.lane.b32.xlu0 %v7529_v63, %s8228_s4  ;;  %v5012_v17 = vpop.permute.xlu1 %5011  ;;  %v5010_v20 = vpop.permute.xlu0 %5009 }
 0xab7   :  { %5608 = vrot.lane.b32.xlu1 %v7528_v25, %s8228_s4  ;;  %v5550_v3 = vmul.bf16 %v9501_v52, %v5541_v48  ;;  %v5555_v10 = vmul.bf16 %v5541_v48, %v9759_v56  ;;  %v7533_v35 = vcombine.low %v5551_v61, %v5556_v62 }
 0xab8   :  { %7478 = vmatmul.mubr.msk.bf16.vlgmr.msra.gmra.mrb[44].mxu1 %vm3994_vm7, %v9716_v51 }
 0xab9   :  { %4862 = vmatpush1.bf16.msra.mxu1 %v4727_v1  ;;  %4893 = vmatprep.mubr.bf16.mxu1 %v9196_v60  ;;  %v7532_v0 = vcombine.high %v5550_v3, %v5555_v10  ;;  %v7531_v18 = vcombine.low %v5550_v3, %v5555_v10  ;;  %v5254_v10 = vld [vmem:[#allocation4 + $0x2c] sm:$0x33] }
 0xaba   :  { %4688 = vrot.lane.b32.xlu0 %v7471_v33, %s8247_s30  ;;  %v5844_v54 = vpop.permute.xlu1 %5843 }
 0xabb   :  { %v5851_v8 = vrot.slane %v5844_v54, 4  ;;  %6454 = vrot.lane.b32.xlu1 %v9221_v21, %s8246_s29  ;;  %v5027_v21 = vsel %vm577_vm14, %v5010_v20, %v5012_v17  ;;  %v5255_v20 = vld [vmem:[#allocation4 + $0x34] sm:$0x33] }
 0xabc   :  { %v5039_v23 = vsel %vm3998_vm6, %v5027_v21, 0 }
 0xabd   :  { %v5855_v15 = vsel %vm4696_vm9, %v5851_v8, %v5844_v54 }
 0xabe   :  { %5616 = vrot.lane.b32.xlu0 %v7532_v0, %s8228_s4  ;;  %v5867_v6 = vmul.bf16 %v9411_v32, %v5855_v15  ;;  %v5872_v12 = vmul.bf16 %v5855_v15, %v9691_v45 }
 0xabf   :  { %5618 = vrot.lane.b32.xlu1 %v7533_v35, %s8228_s4 }
 0xac0   :  { %7482 = vmatmul.mubr.msk.bf16.vlgmr.msra.gmra.mrb[48].mxu1 %vm3994_vm7, %v9716_v51  ;;  %v7546_v33 = vcombine.high %v5867_v6, %v5872_v12  ;;  %v7545_v31 = vcombine.low %v5867_v6, %v5872_v12  ;;  %v7507_v6 = vcombine.high %v9411_v32, %v5254_v10  ;;  %v7506_v12 = vcombine.low %v9411_v32, %v5254_v10 }
 0xac1   :  { %5094 = vmatprep.mubr.bf16.mxu1 %v9196_v60 }
 0xac2   :  { %6456 = vrot.lane.b32.xlu0 %v9375_v7, %s8246_s29  ;;  %v9796_v7 = vld [vmem:[%s10159_s11 + $0x18] sm:$0x3f]  }
 0xac3   :  { %5614 = vrot.lane.b32.xlu1 %v7531_v18, %s8228_s4 }
 0xac5   :  { %v5014_v14 = vpop.permute.xlu0 %5013  ;;  %v5016_v16 = vpop.permute.xlu1 %5015 }
 0xac6   :  { %v5028_v43 = vsel %vm577_vm14, %v5012_v17, %v5014_v14  ;;  %5924 = vrot.lane.b32.xlu0 %v7546_v33, %s8244_s21  ;;  %v5029_v4 = vsel %vm577_vm14, %v5014_v14, %v5016_v16 }
 0xac7   :  { %7495 = vmatprep.subr.msk.bf16.mxu1 %vm3998_vm6, %v5028_v43  ;;  %5922 = vrot.lane.b32.xlu1 %v7545_v31, %s8244_s21  ;;  %v5045_v27 = vsel %vm3998_vm6, %v5029_v4, 0  ;;  %v7565_v4 = vcombine.low %v9411_v32, %v9691_v45 }
 0xac8   :  { %5063 = vmatpush1.bf16.msra.mxu1 %v5039_v23 }
 0xac9   :  { %v5846_v26 = vpop.permute.xlu0 %5845  ;;  %v5848_v28 = vpop.permute.xlu1 %5847 }
 0xaca   :  { %v5852_v2 = vrot.slane %v5846_v26, 4  ;;  %v5853_v34 = vrot.slane %v5848_v28, 4  ;;  %5019 = vrot.lane.b32.xlu0 %v7491_v9, %s8234_s25 }
 0xacb   :  { %7496 = vmatmul.mubr.msk.bf16.vlgmr.msra.gmra.mrb[40].mxu1 %vm3994_vm7, %v9796_v7 }
 0xacc   :  { %v5856_v41 = vsel %vm55_vm0, %v5851_v8, %v5852_v2  ;;  %v5858_v49 = vsel %vm55_vm0, %v5852_v2, %v5853_v34  ;;  %5137 = vmatprep.mubr.bf16.mxu1 %v9196_v60  ;;  %v7509_v2 = vcombine.high %v9443_v57, %v5255_v20 }
 0xacd   :  { %v5857_v19 = vsel %vm4696_vm9, %v5856_v41, %v5846_v26  ;;  %v5859_v30 = vsel %vm4696_vm9, %v5858_v49, %v5848_v28  ;;  %v9810_v24 = vpop.permute.xlu0 %5017  ;;  %v5302_v28 = vsel %vm3998_vm6, %v7506_v12, 0  ;;  %v7508_v49 = vcombine.low %v9443_v57, %v5255_v20 }
 0xace   :  { %v5868_v47 = vmul.bf16 %v9443_v57, %v5857_v19  ;;  %v5873_v22 = vmul.bf16 %v5857_v19, %v9701_v40  ;;  %v9815_v9 = vmul.bf16 %v9413_v37, %v5859_v30  ;;  %v9818_v63 = vmul.bf16 %v5859_v30, %v9720_v38  ;;  %v5257_v30 = vld [vmem:[#allocation4 + $0x44] sm:$0x33] }
 0xacf   :  { %v5030_v25 = vsel %vm577_vm14, %v5016_v16, %v9810_v24  ;;  %v7572_v37 = vcombine.high %v9501_v52, %v9759_v56 }
 0xad0   :  { %v7547_v29 = vcombine.low %v5868_v47, %v5873_v22  ;;  %v7549_v48 = vcombine.low %v9815_v9, %v9818_v63  ;;  %v7550_v17 = vcombine.high %v9815_v9, %v9818_v63  ;;  %7497 = vmatprep.subr.msk.bf16.mxu1 %vm3998_vm6, %v5030_v25  ;;  %v7548_v61 = vcombine.high %v5868_v47, %v5873_v22 }
 0xad1   :  { %5106 = vmatpush1.bf16.msra.mxu1 %v5045_v27  ;;  %v5308_v47 = vsel %vm3998_vm6, %v7508_v49, 0  ;;  %v7513_v22 = vcombine.high %v9501_v52, %v5257_v30  ;;  %v7566_v25 = vcombine.high %v9411_v32, %v9691_v45  ;;  %v7512_v27 = vcombine.low %v9501_v52, %v5257_v30  ;;  %v8219_v30 = vld [vmem:[#allocation4 + $0x14] sm:$0xff] }
 0xad2   :  { %5926 = vrot.lane.b32.xlu1 %v7547_v29, %s8244_s21  ;;  %5930 = vrot.lane.b32.xlu0 %v7549_v48, %s8244_s21  ;;  %v7573_v63 = vcombine.low %v9749_v50, %v9751_v58 }
 0xad3   :  { %v5320_v32 = vsel %vm3998_vm6, %v7512_v27, 0 }
 0xad4   :  { %7498 = vmatmul.mubr.msk.bf16.vlgmr.msra.gmra.mrb[44].mxu1 %vm3994_vm7, %v9796_v7 }
 0xad5   :  { %5223 = vmatprep.mubr.bf16.mxu1 %v9196_v60 }
 0xad6   :  { %5928 = vrot.lane.b32.xlu1 %v7548_v61, %s8244_s21  ;;  %v7568_v61 = vcombine.high %v9443_v57, %v9701_v40 }
 0xb05   :  { %v9834_v62 = vpop.permute.xlu0 %5021  ;;  %v5024_v1 = vpop.permute.xlu1 %5023 }
 0xb06   :  { %v5033_v3 = vsel %vm577_vm14, %v9834_v62, %v5024_v1 }
 0xb07   :  { %v5057_v15 = vsel %vm3998_vm6, %v5033_v3, 0 }
 0xb09   :  { %v5026_v54 = vpop.permute.xlu0 %5025  ;;  %v5850_v8 = vpop.permute.xlu1 %5849 }
 0xb0a   :  { %v5034_v35 = vsel %vm577_vm14, %v5024_v1, %v5026_v54  ;;  %v5854_v0 = vrot.slane %v5850_v8, 4 }
 0xb0b   :  { %7501 = vmatprep.subr.msk.bf16.mxu1 %vm3998_vm6, %v5034_v35 }
 0xb0c   :  { %v5860_v18 = vsel %vm55_vm0, %v5853_v34, %v5854_v0  ;;  %5192 = vmatpush1.bf16.msra.mxu1 %v5057_v15  ;;  %v5871_v23 = vmul.bf16 %v5854_v0, %v9749_v50  ;;  %v5876_v34 = vmul.bf16 %v5854_v0, %v9751_v58  ;;  %v7571_v0 = vcombine.low %v9501_v52, %v9759_v56 }
 0xb0d   :  { %v5861_v21 = vsel %vm4696_vm9, %v5860_v18, %v5850_v8  ;;  %v3978_v33 = vpop.permute.xlu0 %3977  ;;  %7514 = vmatprep.subr.msk.bf16.mxu1 %vm3998_vm6, %v7507_v6  ;;  %v8218_v18 = vld [vmem:[#allocation4 + $0x4] sm:$0xff] }
 0xb0e   :  { %v5870_v31 = vmul.bf16 %v9501_v52, %v5861_v21  ;;  %v5875_v14 = vmul.bf16 %v5861_v21, %v9759_v56  ;;  %v3990_v16 = vsel %vm3985_vm5, %v9612_v55, %v3978_v33  ;;  %v3991_v43 = vsel %vm3985_vm5, %v3978_v33, %v9638_v59  ;;  %v9867_v59 = vld [vmem:[%s10159_s11 + $0x20] sm:$0x3f]  }
 0xb0f   :  { %v4012_v26 = vsel %vm3998_vm6, %v3990_v16, 0  ;;  %7437 = vmatprep.subr.msk.bf16.mxu0 %vm3998_vm6, %v3991_v43  ;;  %7502 = vmatmul.mubr.msk.bf16.vlgmr.msra.gmra.mrb[48].mxu1 %vm3994_vm7, %v9796_v7  ;;  %v7553_v19 = vcombine.low %v5871_v23, %v5876_v34 }
 0xb10   :  { %v7551_v41 = vcombine.low %v5870_v31, %v5875_v14  ;;  %v7552_v55 = vcombine.high %v5870_v31, %v5875_v14  ;;  %4110 = vmatpush1.bf16.msra.mxu0 %v4012_v26  ;;  %5326 = vmatpush1.bf16.msra.mxu1 %v5302_v28 }
 0xb11   :  { %7516 = vmatprep.subr.msk.bf16.mxu1 %vm3998_vm6, %v7509_v2  ;;  %5357 = vmatprep.mubr.bf16.mxu1 %v9196_v60 }
 0xb12   :  { %5936 = vrot.lane.b32.xlu0 %v7552_v55, %s8244_s21  ;;  %5934 = vrot.lane.b32.xlu1 %v7551_v41, %s8244_s21 }
 0xb13   :  { %7438 = vmatmul.mubr.msk.bf16.vlgmr.msra.gmra.mrb[28].mxu0 %vm3994_vm7, %v9602_v53  ;;  %v7567_v53 = vcombine.low %v9443_v57, %v9701_v40 }
 0xb14   :  { %4409 = vmatprep.mubr.bf16.mxu0 %v9196_v60 }
 0xb16   :  { %6208 = vrot.lane.b32.xlu0 %v7565_v4, %s8248_s5  ;;  %5938 = vrot.lane.b32.xlu1 %v7553_v19, %s8244_s21 }
 0xb17   :  { %7515 = vmatmul.mubr.msk.bf16.vlgmr.msra.gmra.mrb[40].mxu1 %vm3994_vm7, %v9867_v59 }
 0xb18   :  { %5369 = vmatpush1.bf16.msra.mxu1 %v5308_v47  ;;  %5400 = vmatprep.mubr.bf16.mxu1 %v9196_v60  ;;  %v7570_v47 = vcombine.high %v8219_v30, %v9720_v38 }
 0xb19   :  { %7520 = vmatprep.subr.msk.bf16.mxu1 %vm3998_vm6, %v7513_v22 }
 0xb1a   :  { %6212 = vrot.lane.b32.xlu0 %v7567_v53, %s8248_s5  ;;  %6210 = vrot.lane.b32.xlu1 %v7566_v25, %s8248_s5 }
 0xb1c   :  { %v5605_v29 = vpop.permute.xlu0 %5604  ;;  %v5603_v48 = vpop.permute.xlu1 %5602 }
 0xb1e   :  { %6214 = vrot.lane.b32.xlu0 %v7568_v61, %s8248_s5  ;;  %5612 = vrot.lane.b32.xlu1 %v7530_v46, %s8228_s4 }
 0xb1f   :  { %7517 = vmatmul.mubr.msk.bf16.vlgmr.msra.gmra.mrb[44].mxu1 %vm3994_vm7, %v9867_v59 }
 0xb20   :  { %5455 = vmatpush1.bf16.msra.mxu1 %v5320_v32  ;;  %v4248_v1 = vpop.permute.xlu0 %4247  ;;  %5486 = vmatprep.mubr.bf16.mxu1 %v9196_v60 }
 0xb21   :  { %v4260_v3 = vsel %vm4255_vm8, %v9663_v11, %v4248_v1  ;;  %v4261_v10 = vsel %vm4255_vm8, %v4248_v1, %v9665_v36  ;;  %v5607_v54 = vpop.permute.xlu1 %5606  ;;  %v5620_v11 = vsel %vm538_vm10, %v5603_v48, %v5605_v29 }
 0xb22   :  { %v4280_v42 = vsel %vm3998_vm6, %v4260_v3, 0  ;;  %v5621_v46 = vsel %vm538_vm10, %v5605_v29, %v5607_v54  ;;  %7455 = vmatprep.subr.msk.bf16.mxu0 %vm3998_vm6, %v4261_v10  ;;  %5932 = vrot.lane.b32.xlu0 %v7550_v17, %s8244_s21  ;;  %v5632_v9 = vsel %vm3998_vm6, %v5620_v11, 0 }
 0xb23   :  { %6216 = vrot.lane.b32.xlu1 %v7569_v44, %s8248_s5  ;;  %4378 = vmatpush1.bf16.msra.mxu0 %v4280_v42 }
 0xb24   :  { %7534 = vmatprep.subr.msk.bf16.mxu1 %vm3998_vm6, %v5621_v46  ;;  %v6453_v36 = vpop.permute.xlu0 %6452 }
 0xb25   :  { %v6459_v8 = vrot.slane %v6453_v36, 4  ;;  %v6451_v35 = vpop.permute.xlu1 %6450 }
 0xb26   :  { %v6458_v15 = vrot.slane %v6451_v35, 4  ;;  %6222 = vrot.lane.b32.xlu0 %v7572_v37, %s8248_s5  ;;  %7456 = vmatmul.mubr.msk.bf16.vlgmr.msra.gmra.mrb[28].mxu0 %vm3994_vm7, %v9660_v5 }
 0xb27   :  { %6220 = vrot.lane.b32.xlu1 %v7571_v0, %s8248_s5  ;;  %7521 = vmatmul.mubr.msk.bf16.vlgmr.msra.gmra.mrb[48].mxu1 %vm3994_vm7, %v9867_v59  ;;  %v8212_v0 = vld [vmem:[#allocation4 + $0x14] ss:$40 sps:$4 sm:$0x3f]  }
 0xb28   :  { %v6462_v17 = vsel %vm4255_vm8, %v6458_v15, %v6451_v35  ;;  %v6463_v6 = vsel %vm55_vm0, %v6458_v15, %v6459_v8  ;;  %5656 = vmatpush1.bf16.msra.mxu1 %v5632_v9  ;;  %v9932_v12 = vpop.permute.xlu0 %5610  ;;  %5687 = vmatprep.mubr.bf16.mxu1 %v9196_v60 }
 0xb29   :  { %v6464_v5 = vsel %vm4255_vm8, %v6463_v6, %v6453_v36  ;;  %v6474_v20 = vmul.bf16 %v8218_v18, %v6462_v17  ;;  %v6479_v21 = vmul.bf16 %v6462_v17, %v9691_v45  ;;  %v5609_v33 = vpop.permute.xlu1 %5608  ;;  %4850 = vmatprep.mubr.bf16.mxu0 %v9196_v60  ;;  %v9947_v45 = vld [vmem:[%s10159_s11 + $0x28] sm:$0x3f]   ;;  %v10014_v6 = vld [vmem:[%s10159_s11 + $0x30] sm:$0x3f]  }
 0xb2a   :  { %v5623_v31 = vsel %vm538_vm10, %v5609_v33, %v9932_v12  ;;  %v6475_v14 = vmul.bf16 %v9443_v57, %v6464_v5  ;;  %v6480_v23 = vmul.bf16 %v6464_v5, %v9701_v40  ;;  %v5622_v28 = vsel %vm538_vm10, %v5607_v54, %v5609_v33 }
 0xb2b   :  { %v7585_v16 = vcombine.low %v6474_v20, %v6479_v21  ;;  %v7586_v43 = vcombine.high %v6474_v20, %v6479_v21  ;;  %6224 = vrot.lane.b32.xlu1 %v7573_v63, %s8248_s5  ;;  %7536 = vmatprep.subr.msk.bf16.mxu1 %vm3998_vm6, %v5623_v31  ;;  %v5638_v49 = vsel %vm3998_vm6, %v5622_v28, 0 }
 0xb2c   :  { %v4689_v26 = vpop.permute.xlu0 %4688  ;;  %v7587_v55 = vcombine.low %v6475_v14, %v6480_v23  ;;  %v7588_v27 = vcombine.high %v6475_v14, %v6480_v23 }
 0xb2d   :  { %v4701_v2 = vsel %vm4696_vm9, %v9704_v13, %v4689_v26  ;;  %v4702_v57 = vsel %vm4696_vm9, %v4689_v26, %v9723_v39  ;;  %6529 = vrot.lane.b32.xlu0 %v7585_v16, %s8243_s12  ;;  %v6455_v34 = vpop.permute.xlu1 %6454 }
 0xb2e   :  { %v4721_v41 = vsel %vm3998_vm6, %v4701_v2, 0  ;;  %v6460_v40 = vrot.slane %v6455_v34, 4  ;;  %7479 = vmatprep.subr.msk.bf16.mxu0 %vm3998_vm6, %v4702_v57 }
 0xb2f   :  { %6531 = vrot.lane.b32.xlu1 %v7586_v43, %s8243_s12  ;;  %4819 = vmatpush1.bf16.msra.mxu0 %v4721_v41 }
 0xb30   :  { %v6465_v4 = vsel %vm55_vm0, %v6459_v8, %v6460_v40  ;;  %7535 = vmatmul.mubr.msk.bf16.vlgmr.msra.gmra.mrb[40].mxu1 %vm3994_vm7, %v9947_v45  ;;  %v5617_v13 = vpop.permute.xlu0 %5616 }
 0xb31   :  { %v6466_v39 = vsel %vm4255_vm8, %v6465_v4, %v6455_v34  ;;  %5699 = vmatpush1.bf16.msra.mxu1 %v5638_v49  ;;  %6533 = vrot.lane.b32.xlu0 %v7587_v55, %s8243_s12  ;;  %v5619_v19 = vpop.permute.xlu1 %5618 }
 0xb32   :  { %v6476_v22 = vmul.bf16 %v8219_v30, %v6466_v39  ;;  %v6481_v53 = vmul.bf16 %v6466_v39, %v9720_v38  ;;  %v5627_v25 = vsel %vm538_vm10, %v5617_v13, %v5619_v19  ;;  %7480 = vmatmul.mubr.msk.bf16.vlgmr.msra.gmra.mrb[28].mxu0 %vm3994_vm7, %v9716_v51  ;;  %5730 = vmatprep.mubr.bf16.mxu1 %v9196_v60 }
 0xb33   :  { %6218 = vrot.lane.b32.xlu1 %v7570_v47, %s8248_s5  ;;  %7540 = vmatprep.subr.msk.bf16.mxu1 %vm3998_vm6, %v5627_v25 }
 0xb34   :  { %v7589_v29 = vcombine.low %v6476_v22, %v6481_v53  ;;  %v6457_v48 = vpop.permute.xlu0 %6456  ;;  %5180 = vmatprep.mubr.bf16.mxu0 %v9196_v60  ;;  %v7590_v51 = vcombine.high %v6476_v22, %v6481_v53 }
 0xb35   :  { %v6461_v61 = vrot.slane %v6457_v48, 4  ;;  %6535 = vrot.lane.b32.xlu0 %v7588_v27, %s8243_s12  ;;  %v9974_v38 = vpop.permute.xlu1 %5614 }
 0xb36   :  { %v5626_v32 = vsel %vm538_vm10, %v9974_v38, %v5617_v13  ;;  %v8214_v13 = vld [vmem:[%s10159_s11 + $0x38] sm:$0x3f]  }
 0xb37   :  { %v6467_v1 = vsel %vm55_vm0, %v6460_v40, %v6461_v61  ;;  %v5650_v3 = vsel %vm3998_vm6, %v5626_v32, 0  ;;  %6537 = vrot.lane.b32.xlu1 %v7589_v29, %s8243_s12  ;;  %v6478_v54 = vmul.bf16 %v6461_v61, %v9749_v50  ;;  %v6483_v11 = vmul.bf16 %v6461_v61, %v9751_v58 }
 0xb38   :  { %v6468_v10 = vsel %vm4255_vm8, %v6467_v1, %v6457_v48  ;;  %v5925_v44 = vpop.permute.xlu0 %5924  ;;  %7537 = vmatmul.mubr.msk.bf16.vlgmr.msra.gmra.mrb[44].mxu1 %vm3994_vm7, %v9947_v45  ;;  %vm6226_vm0 = vcmask 785408  }
 0xb39   :  { %v6477_v42 = vmul.bf16 %v9501_v52, %v6468_v10  ;;  %v6482_v46 = vmul.bf16 %v6468_v10, %v9759_v56  ;;  %5785 = vmatpush1.bf16.msra.mxu1 %v5650_v3  ;;  %6539 = vrot.lane.b32.xlu0 %v7590_v51, %s8243_s12  ;;  %v8210_v52 = vld [vmem:[#allocation4 + $0x18] ss:$40 sps:$4 sm:$0x3f]   ;;  %v7593_v58 = vcombine.low %v6478_v54, %v6483_v11  ;;  %v5923_v15 = vpop.permute.xlu1 %5922 }
 0xb3a   :  { %5816 = vmatprep.mubr.bf16.mxu1 %v9196_v60 }
 0xb3b   :  { %v7591_v36 = vcombine.low %v6477_v42, %v6482_v46  ;;  %v7592_v37 = vcombine.high %v6477_v42, %v6482_v46 }
 0xb3c   :  { %v5020_v8 = vpop.permute.xlu0 %5019 }
 0xb3d   :  { %v5031_v50 = vsel %vm577_vm14, %v9810_v24, %v5020_v8  ;;  %v5032_v35 = vsel %vm577_vm14, %v5020_v8, %v9834_v62  ;;  %6543 = vrot.lane.b32.xlu0 %v7592_v37, %s8243_s12  ;;  %6541 = vrot.lane.b32.xlu1 %v7591_v36, %s8243_s12  ;;  %v5314_v24 = vsel %vm3998_vm6, %v8212_v0, 0  ;;  %v5940_v62 = vsel %vm4610_vm2, %v5923_v15, %v5925_v44 }
 0xb3e   :  { %v5051_v56 = vsel %vm3998_vm6, %v5031_v50, 0  ;;  %7499 = vmatprep.subr.msk.bf16.mxu0 %vm3998_vm6, %v5032_v35  ;;  %v5952_v17 = vsel %vm3998_vm6, %v5940_v62, 0  ;;  %v8215_v35 = vld [vmem:[%s10159_s11 + $0x40] sm:$0x3f]  }
 0xb3f   :  { %5149 = vmatpush1.bf16.msra.mxu0 %v5051_v56 }
 0xb40   :  { %7518 = vmatprep.subr.msk.bf16.mxu0 %vm3998_vm6, %v8210_v52  ;;  %7541 = vmatmul.mubr.msk.bf16.vlgmr.msra.gmra.mrb[48].mxu1 %vm3994_vm7, %v9947_v45 }
 0xb41   :  { %6545 = vrot.lane.b32.xlu1 %v7593_v58, %s8243_s12  ;;  %6007 = vmatprep.mubr.bf16.mxu1 %v9196_v60 }
 0xb42   :  { %7500 = vmatmul.mubr.msk.bf16.vlgmr.msra.gmra.mrb[28].mxu0 %vm3994_vm7, %v9796_v7 }
 0xb43   :  { %5412 = vmatpush1.bf16.msra.mxu0 %v5314_v24  ;;  %5443 = vmatprep.mubr.bf16.mxu0 %v9196_v60 }
 0xb44   :  { %v5927_v9 = vpop.permute.xlu1 %5926  ;;  %v5931_v7 = vpop.permute.xlu0 %5930 }
 0xb45   :  { %v5941_v63 = vsel %vm4610_vm2, %v5925_v44, %v5927_v9 }
 0xb46   :  { %7554 = vmatprep.subr.msk.bf16.mxu1 %vm3998_vm6, %v5941_v63 }
 0xb47   :  { %5976 = vmatpush1.bf16.msra.mxu1 %v5952_v17 }
 0xb48   :  { %v5929_v5 = vpop.permute.xlu1 %5928 }
 0xb49   :  { %v5942_v18 = vsel %vm4610_vm2, %v5927_v9, %v5929_v5  ;;  %v5943_v20 = vsel %vm4610_vm2, %v5929_v5, %v5931_v7 }
 0xb4a   :  { %v5958_v21 = vsel %vm3998_vm6, %v5942_v18, 0  ;;  %7556 = vmatprep.subr.msk.bf16.mxu1 %vm3998_vm6, %v5943_v20  ;;  %7555 = vmatmul.mubr.msk.bf16.vlgmr.msra.gmra.mrb[40].mxu1 %vm3994_vm7, %v10014_v6 }
 0xb4b   :  { %6019 = vmatpush1.bf16.msra.mxu1 %v5958_v21  ;;  %6050 = vmatprep.mubr.bf16.mxu1 %v9196_v60 }
 0xb4e   :  { %7519 = vmatmul.mubr.msk.bf16.vlgmr.msra.gmra.mrb[28].mxu0 %vm3994_vm7, %v9867_v59 }
 0xb4f   :  { %5773 = vmatprep.mubr.bf16.mxu0 %v9196_v60 }
 0xb52   :  { %7557 = vmatmul.mubr.msk.bf16.vlgmr.msra.gmra.mrb[44].mxu1 %vm3994_vm7, %v10014_v6 }
 0xb53   :  { %6136 = vmatprep.mubr.bf16.mxu1 %v9196_v60 }
 0xb84   :  { %v5937_v33 = vpop.permute.xlu0 %5936  ;;  %v5935_v31 = vpop.permute.xlu1 %5934 }
 0xb85   :  { %v5946_v14 = vsel %vm4610_vm2, %v5935_v31, %v5937_v33 }
 0xb86   :  { %v5970_v26 = vsel %vm3998_vm6, %v5946_v14, 0 }
 0xb88   :  { %v6209_v16 = vpop.permute.xlu0 %6208  ;;  %v5939_v43 = vpop.permute.xlu1 %5938 }
 0xb89   :  { %v5947_v23 = vsel %vm4610_vm2, %v5937_v33, %v5939_v43 }
 0xb8a   :  { %7560 = vmatprep.subr.msk.bf16.mxu1 %vm3998_vm6, %v5947_v23 }
 0xb8b   :  { %6105 = vmatpush1.bf16.msra.mxu1 %v5970_v26 }
 0xb8c   :  { %v6213_v59 = vpop.permute.xlu0 %6212  ;;  %v6211_v28 = vpop.permute.xlu1 %6210 }
 0xb8d   :  { %v6227_v2 = vsel %vm6226_vm0, %v6209_v16, %v6211_v28  ;;  %v6228_v57 = vsel %vm6226_vm0, %v6211_v28, %v6213_v59 }
 0xb8e   :  { %v6239_v34 = vsel %vm3998_vm6, %v6227_v2, 0  ;;  %7561 = vmatmul.mubr.msk.bf16.vlgmr.msra.gmra.mrb[48].mxu1 %vm3994_vm7, %v10014_v6  ;;  %7574 = vmatprep.subr.msk.bf16.mxu1 %vm3998_vm6, %v6228_v57 }
 0xb8f   :  { %6263 = vmatpush1.bf16.msra.mxu1 %v6239_v34  ;;  %6294 = vmatprep.mubr.bf16.mxu1 %v9196_v60 }
 0xb90   :  { %v6215_v41 = vpop.permute.xlu0 %6214  ;;  %v5613_v40 = vpop.permute.xlu1 %5612 }
 0xb91   :  { %v5624_v55 = vsel %vm538_vm10, %v9932_v12, %v5613_v40  ;;  %v5625_v49 = vsel %vm538_vm10, %v5613_v40, %v9974_v38  ;;  %v6229_v39 = vsel %vm6226_vm0, %v6213_v59, %v6215_v41 }
 0xb92   :  { %v5644_v4 = vsel %vm3998_vm6, %v5624_v55, 0  ;;  %7538 = vmatprep.subr.msk.bf16.mxu0 %vm3998_vm6, %v5625_v49  ;;  %v6245_v25 = vsel %vm3998_vm6, %v6229_v39, 0  ;;  %v6802_v39 = vld [vmem:[%s10160_s13] sm:$0x7] }
 0xb93   :  { %5742 = vmatpush1.bf16.msra.mxu0 %v5644_v4 }
 0xb94   :  { %v5933_v19 = vpop.permute.xlu0 %5932 }
 0xb95   :  { %v5944_v30 = vsel %vm4610_vm2, %v5931_v7, %v5933_v19  ;;  %v5945_v47 = vsel %vm4610_vm2, %v5933_v19, %v5935_v31  ;;  %v6217_v12 = vpop.permute.xlu1 %6216 }
 0xb96   :  { %v5964_v22 = vsel %vm3998_vm6, %v5944_v30, 0  ;;  %v6230_v53 = vsel %vm6226_vm0, %v6215_v41, %v6217_v12  ;;  %7539 = vmatmul.mubr.msk.bf16.vlgmr.msra.gmra.mrb[28].mxu0 %vm3994_vm7, %v9947_v45  ;;  %7558 = vmatprep.subr.msk.bf16.mxu0 %vm3998_vm6, %v5945_v47 }
 0xb97   :  { %7575 = vmatmul.mubr.msk.bf16.vlgmr.msra.gmra.mrb[40].mxu1 %vm3994_vm7, %v8214_v13  ;;  %7576 = vmatprep.subr.msk.bf16.mxu1 %vm3998_vm6, %v6230_v53 }
 0xb98   :  { %6062 = vmatpush1.bf16.msra.mxu0 %v5964_v22  ;;  %6306 = vmatpush1.bf16.msra.mxu1 %v6245_v25  ;;  %v6223_v27 = vpop.permute.xlu0 %6222 }
 0xb99   :  { %v6221_v29 = vpop.permute.xlu1 %6220  ;;  %6337 = vmatprep.mubr.bf16.mxu1 %v9196_v60  ;;  %6093 = vmatprep.mubr.bf16.mxu0 %v9196_v60 }
 0xb9a   :  { %v6233_v48 = vsel %vm6226_vm0, %v6221_v29, %v6223_v27 }
 0xb9b   :  { %v6257_v38 = vsel %vm3998_vm6, %v6233_v48, 0 }
 0xb9d   :  { %v6225_v61 = vpop.permute.xlu1 %6224 }
 0xb9e   :  { %v6234_v45 = vsel %vm6226_vm0, %v6223_v27, %v6225_v61 }
 0xb9f   :  { %7577 = vmatmul.mubr.msk.bf16.vlgmr.msra.gmra.mrb[44].mxu1 %vm3994_vm7, %v8214_v13  ;;  %7580 = vmatprep.subr.msk.bf16.mxu1 %vm3998_vm6, %v6234_v45  ;;  %v6530_v32 = vpop.permute.xlu0 %6529 }
 0xba0   :  { %6392 = vmatpush1.bf16.msra.mxu1 %v6257_v38  ;;  %6423 = vmatprep.mubr.bf16.mxu1 %v9196_v60 }
 0xba1   :  { %v6532_v51 = vpop.permute.xlu1 %6531 }
 0xba2   :  { %7559 = vmatmul.mubr.msk.bf16.vlgmr.msra.gmra.mrb[28].mxu0 %vm3994_vm7, %v10014_v6  ;;  %v6547_v3 = vsel %vm3896_vm4, %v6530_v32, %v6532_v51 }
 0xba3   :  { %v6534_v1 = vpop.permute.xlu0 %6533  ;;  %6380 = vmatprep.mubr.bf16.mxu0 %v9196_v60  ;;  %v6559_v46 = vsel %vm3998_vm6, %v6547_v3, 0 }
 0xba4   :  { %v6548_v10 = vsel %vm3896_vm4, %v6532_v51, %v6534_v1 }
 0xba5   :  { %v6219_v54 = vpop.permute.xlu1 %6218  ;;  %7594 = vmatprep.subr.msk.bf16.mxu1 %vm3998_vm6, %v6548_v10 }
 0xba6   :  { %v6231_v44 = vsel %vm6226_vm0, %v6217_v12, %v6219_v54  ;;  %v6232_v42 = vsel %vm6226_vm0, %v6219_v54, %v6221_v29 }
 0xba7   :  { %v6251_v11 = vsel %vm3998_vm6, %v6231_v44, 0  ;;  %7578 = vmatprep.subr.msk.bf16.mxu0 %vm3998_vm6, %v6232_v42  ;;  %7581 = vmatmul.mubr.msk.bf16.vlgmr.msra.gmra.mrb[48].mxu1 %vm3994_vm7, %v8214_v13  ;;  %v6536_v36 = vpop.permute.xlu0 %6535 }
 0xba8   :  { %6583 = vmatpush1.bf16.msra.mxu1 %v6559_v46  ;;  %6349 = vmatpush1.bf16.msra.mxu0 %v6251_v11  ;;  %v6549_v52 = vsel %vm3896_vm4, %v6534_v1, %v6536_v36 }
 0xba9   :  { %v6538_v37 = vpop.permute.xlu1 %6537  ;;  %6614 = vmatprep.mubr.bf16.mxu1 %v9196_v60  ;;  %v6565_v56 = vsel %vm3998_vm6, %v6549_v52, 0 }
 0xbaa   :  { %v6550_v8 = vsel %vm3896_vm4, %v6536_v36, %v6538_v37 }
 0xbab   :  { %7596 = vmatprep.subr.msk.bf16.mxu1 %vm3998_vm6, %v6550_v8  ;;  %v6540_v50 = vpop.permute.xlu0 %6539 }
 0xbac   :  { %v6551_v58 = vsel %vm3896_vm4, %v6538_v37, %v6540_v50 }
 0xbad   :  { %v6571_v24 = vsel %vm3998_vm6, %v6551_v58, 0 }
 0xbae   :  { %7579 = vmatmul.mubr.msk.bf16.vlgmr.msra.gmra.mrb[28].mxu0 %vm3994_vm7, %v8214_v13 }
 0xbaf   :  { %7595 = vmatmul.mubr.msk.bf16.vlgmr.msra.gmra.mrb[40].mxu1 %vm3994_vm7, %v8215_v35  ;;  %v6542_v0 = vpop.permute.xlu1 %6541  ;;  %6700 = vmatprep.mubr.bf16.mxu0 %v9196_v60  ;;  %v6544_v62 = vpop.permute.xlu0 %6543 }
 0xbb0   :  { %6626 = vmatpush1.bf16.msra.mxu1 %v6565_v56  ;;  %v6552_v15 = vsel %vm3896_vm4, %v6540_v50, %v6542_v0  ;;  %6657 = vmatprep.mubr.bf16.mxu1 %v9196_v60  ;;  %v6553_v63 = vsel %vm3896_vm4, %v6542_v0, %v6544_v62 }
 0xbb1   :  { %7598 = vmatprep.subr.msk.bf16.mxu0 %vm3998_vm6, %v6552_v15  ;;  %v6577_v6 = vsel %vm3998_vm6, %v6553_v63, 0 }
 0xbb2   :  { %6669 = vmatpush1.bf16.msra.mxu0 %v6571_v24 }
 0xbb3   :  { %v6546_v9 = vpop.permute.xlu1 %6545 }
 0xbb4   :  { %v6554_v17 = vsel %vm3896_vm4, %v6544_v62, %v6546_v9 }
 0xbb5   :  { %7600 = vmatprep.subr.msk.bf16.mxu1 %vm3998_vm6, %v6554_v17 }
 0xbb7   :  { %7597 = vmatmul.mubr.msk.bf16.vlgmr.msra.gmra.mrb[44].mxu1 %vm3994_vm7, %v8215_v35 }
 0xbb8   :  { %6712 = vmatpush1.bf16.msra.mxu1 %v6577_v6  ;;  %6743 = vmatprep.mubr.bf16.mxu1 %v9196_v60 }
 0xbba   :  { %7599 = vmatmul.mubr.msk.bf16.vlgmr.msra.gmra.mrb[28].mxu0 %vm3994_vm7, %v8215_v35 }
 0xbbb   :  { %6870 = vmatprep.mubr.bf16.mxu0 %v9196_v60 }
 0xbbf   :  { %7601 = vmatmul.mubr.msk.bf16.vlgmr.msra.gmra.mrb[48].mxu1 %vm3994_vm7, %v8215_v35 }
 0xc82   :  { %v6616_v7 = vpop.f32.mrb[40].mxu1 }
 0xc83   :  { %v6770_v5 = vmax.f32 %v6616_v7, 0.0  ;;  %v6618_v18 = vpop.f32.mrb[41].mxu1 }
 0xc84   :  { %v6771_v20 = vmax.f32 %v6618_v18, 0.0  ;;  %v6620_v21 = vpop.f32.mrb[42].mxu1 }
 0xc85   :  { %v6778_v33 = vmax.f32 %v6620_v21, 0.0  ;;  %v6622_v31 = vpop.f32.mrb[43].mxu1  ;;  %v6786_v16 = vmin.f32 %v6770_v5, 6.0 }
 0xc86   :  { %v6779_v14 = vmax.f32 %v6622_v31, 0.0  ;;  %v6787_v23 = vmin.f32 %v6771_v20, 6.0 }
 0xc87   :  { %v6794_v43 = vmin.f32 %v6778_v33, 6.0 }
 0xc88   :  { %v6795_v26 = vmin.f32 %v6779_v14, 6.0 }
 0xc89   :  { %v6803_v59 = vpack.c.bf16 %v6794_v43, %v6786_v16 }
 0xc8a   :  { %v6804_v28 = vpack.c.bf16 %v6795_v26, %v6787_v23  ;;  %v6659_v2 = vpop.f32.mrb[44].mxu1 }
 0xc8b   :  { %v6772_v57 = vmax.f32 %v6659_v2, 0.0  ;;  %v6661_v34 = vpop.f32.mrb[45].mxu1  ;;  %v6815_v41 = vsel %vm3998_vm6, %v6803_v59, 0 }
 0xc8c   :  { %v6773_v40 = vmax.f32 %v6661_v34, 0.0  ;;  %v6663_v55 = vpop.f32.mrb[46].mxu1  ;;  %7602 = vmatprep.subr.msk.bf16.mxu0 %vm3998_vm6, %v6804_v28 }
 0xc8d   :  { %v6780_v49 = vmax.f32 %v6663_v55, 0.0  ;;  %v6665_v4 = vpop.f32.mrb[47].mxu1  ;;  %6839 = vmatpush1.bf16.msra.mxu0 %v6815_v41  ;;  %v6702_v13 = vpop.f32.mrb[28].mxu0  ;;  %v6788_v12 = vmin.f32 %v6772_v57, 6.0 }
 0xc8e   :  { %v6781_v19 = vmax.f32 %v6665_v4, 0.0  ;;  %v6774_v30 = vmax.f32 %v6702_v13, 0.0  ;;  %v6704_v47 = vpop.f32.mrb[29].mxu0  ;;  %v6789_v27 = vmin.f32 %v6773_v40, 6.0 }
 0xc8f   :  { %v6796_v22 = vmin.f32 %v6780_v49, 6.0  ;;  %v6775_v53 = vmax.f32 %v6704_v47, 0.0  ;;  %v6706_v25 = vpop.f32.mrb[30].mxu0 }
 0xc90   :  { %v6797_v29 = vmin.f32 %v6781_v19, 6.0  ;;  %v6782_v48 = vmax.f32 %v6706_v25, 0.0  ;;  %7603 = vmatmul.mubr.msk.bf16.vlgmr.msra.gmra.mrb[32].mxu0 %vm3994_vm7, %v6802_v39  ;;  %v6708_v61 = vpop.f32.mrb[31].mxu0  ;;  %v6790_v51 = vmin.f32 %v6774_v30, 6.0 }
 0xc91   :  { %v6805_v45 = vpack.c.bf16 %v6796_v22, %v6788_v12  ;;  %v6783_v38 = vmax.f32 %v6708_v61, 0.0  ;;  %6911 = vmatprep.mubr.bf16.mxu0 %v9196_v60  ;;  %v6791_v10 = vmin.f32 %v6775_v53, 6.0 }
 0xc92   :  { %v6806_v32 = vpack.c.bf16 %v6797_v29, %v6789_v27  ;;  %v6798_v1 = vmin.f32 %v6782_v48, 6.0  ;;  %v6745_v3 = vpop.f32.mrb[48].mxu1 }
 0xc93   :  { %v6799_v54 = vmin.f32 %v6783_v38, 6.0  ;;  %v6776_v44 = vmax.f32 %v6745_v3, 0.0  ;;  %v6747_v42 = vpop.f32.mrb[49].mxu1  ;;  %v6821_v46 = vsel %vm3998_vm6, %v6805_v45, 0 }
 0xc94   :  { %v6807_v11 = vpack.c.bf16 %v6798_v1, %v6790_v51  ;;  %v6777_v36 = vmax.f32 %v6747_v42, 0.0  ;;  %v6749_v37 = vpop.f32.mrb[50].mxu1  ;;  %7604 = vmatprep.subr.msk.bf16.mxu0 %vm3998_vm6, %v6806_v32 }
 0xc95   :  { %v6808_v8 = vpack.c.bf16 %v6799_v54, %v6791_v10  ;;  %v6784_v50 = vmax.f32 %v6749_v37, 0.0  ;;  %v6751_v35 = vpop.f32.mrb[51].mxu1  ;;  %6880 = vmatpush1.bf16.msra.mxu0 %v6821_v46  ;;  %v6792_v56 = vmin.f32 %v6776_v44, 6.0 }
 0xc96   :  { %v6785_v52 = vmax.f32 %v6751_v35, 0.0  ;;  %v6827_v58 = vsel %vm3998_vm6, %v6807_v11, 0  ;;  %v6793_v15 = vmin.f32 %v6777_v36, 6.0 }
 0xc97   :  { %v6800_v0 = vmin.f32 %v6784_v50, 6.0  ;;  %7606 = vmatprep.subr.msk.bf16.mxu0 %vm3998_vm6, %v6808_v8 }
 0xc98   :  { %v6801_v24 = vmin.f32 %v6785_v52, 6.0  ;;  %7605 = vmatmul.mubr.msk.bf16.vlgmr.msra.gmra.mrb[36].mxu0 %vm3994_vm7, %v6802_v39 }
 0xc99   :  { %v6809_v62 = vpack.c.bf16 %v6800_v0, %v6792_v56  ;;  %6921 = vmatpush1.bf16.msra.mxu0 %v6827_v58  ;;  %6952 = vmatprep.mubr.bf16.mxu0 %v9196_v60 }
 0xc9a   :  { %v6810_v9 = vpack.c.bf16 %v6801_v24, %v6793_v15 }
 0xc9b   :  { %v6833_v63 = vsel %vm3998_vm6, %v6809_v62, 0 }
 0xc9c   :  { %7608 = vmatprep.subr.msk.bf16.mxu0 %vm3998_vm6, %v6810_v9 }
 0xca0   :  { %7607 = vmatmul.mubr.msk.bf16.vlgmr.msra.gmra.mrb[40].mxu0 %vm3994_vm7, %v6802_v39 }
 0xca1   :  { %6962 = vmatpush1.bf16.msra.mxu0 %v6833_v63  ;;  %6993 = vmatprep.mubr.bf16.mxu0 %v9196_v60 }
 0xca8   :  { %7609 = vmatmul.mubr.msk.bf16.vlgmr.msra.gmra.mrb[44].mxu0 %vm3994_vm7, %v6802_v39 }
 0xd63   :  { %v6872_v17 = vpop.f32.mrb[32].mxu0 }
 0xd64   :  { %v7002_v6 = vmax.f32 %v6872_v17, 0.0  ;;  %v6874_v7 = vpop.f32.mrb[33].mxu0 }
 0xd65   :  { %v7003_v5 = vmax.f32 %v6874_v7, 0.0  ;;  %v6876_v18 = vpop.f32.mrb[34].mxu0 }
 0xd66   :  { %v7010_v20 = vmin.f32 %v7002_v6, 6.0  ;;  %v6877_v21 = vpop.f32.mrb[35].mxu0 }
 0xd67   :  { %v7011_v33 = vmin.f32 %v7003_v5, 6.0 }
 0xd68   :  { %7018 = vst [vmem:[%s10161_s14] sm:$0x3f] %v7010_v20 }
 0xd69   :  { %7019 = vst [vmem:[%s10161_s14 + $0x8] sm:$0x3f] %v7011_v33 }
 0xd6b   :  { %v6913_v31 = vpop.f32.mrb[36].mxu0 }
 0xd6c   :  { %v7004_v60 = vmax.f32 %v6913_v31, 0.0  ;;  %v6915_v14 = vpop.f32.mrb[37].mxu0 }
 0xd6d   :  { %v7005_v16 = vmax.f32 %v6915_v14, 0.0  ;;  %v6917_v43 = vpop.f32.mrb[38].mxu0 }
 0xd6e   :  { %v7012_v23 = vmin.f32 %v7004_v60, 6.0  ;;  %v6918_v26 = vpop.f32.mrb[39].mxu0 }
 0xd6f   :  { %v7013_v59 = vmin.f32 %v7005_v16, 6.0 }
 0xd70   :  { %7020 = vst [vmem:[%s10161_s14 + $0x10] sm:$0x3f] %v7012_v23 }
 0xd71   :  { %7021 = vst [vmem:[%s10161_s14 + $0x18] sm:$0x3f] %v7013_v59 }
 0xd73   :  { %v6954_v28 = vpop.f32.mrb[40].mxu0 }
 0xd74   :  { %v7006_v2 = vmax.f32 %v6954_v28, 0.0  ;;  %v6956_v57 = vpop.f32.mrb[41].mxu0 }
 0xd75   :  { %v7007_v34 = vmax.f32 %v6956_v57, 0.0  ;;  %v6958_v41 = vpop.f32.mrb[42].mxu0 }
 0xd76   :  { %v7014_v40 = vmin.f32 %v7006_v2, 6.0  ;;  %v6959_v55 = vpop.f32.mrb[43].mxu0 }
 0xd77   :  { %v7015_v49 = vmin.f32 %v7007_v34, 6.0 }
 0xd78   :  { %7022 = vst [vmem:[%s10161_s14 + $0x20] sm:$0x3f] %v7014_v40 }
 0xd79   :  { %7023 = vst [vmem:[%s10161_s14 + $0x28] sm:$0x3f] %v7015_v49 }
 0xd7b   :  { %v6995_v4 = vpop.f32.mrb[44].mxu0 }
 0xd7c   :  { %v7008_v13 = vmax.f32 %v6995_v4, 0.0  ;;  %v6997_v39 = vpop.f32.mrb[45].mxu0 }
 0xd7d   :  { %v7009_v19 = vmax.f32 %v6997_v39, 0.0  ;;  %v6999_v30 = vpop.f32.mrb[46].mxu0 }
 0xd7e   :  { %v7016_v47 = vmin.f32 %v7008_v13, 6.0  ;;  %v7000_v12 = vpop.f32.mrb[47].mxu0 }
 0xd7f   :  { %v7017_v22 = vmin.f32 %v7009_v19, 6.0 }
 0xd80   :  { %7024 = vst [vmem:[%s10161_s14 + $0x30] sm:$0x3f] %v7016_v47 }
 0xd81   :  { %7025 = vst [vmem:[%s10161_s14 + $0x38] sm:$0x3f] %v7017_v22 }

// kernel: phinect_gan_decoder.5
= control target key start
LH: loop header
LB: loop body
LE: loop exit
PB: predicated region body
PF: predicated region fallthrough
CT: control target
= control target key end

     0   :  { %v240_v0 = vlaneseq  ;;  %v14357_v3 = vmov 0   ;;  %v11843_v5 = vmov 1966171168   ;;  %vm63_vm0 = vcmask 1042432   ;;  %s11844_s25 = smov 64   ;;  %s11845_s28 = smov 63   ;;  %s14353_s0 = inlined_call_operand.vmem [shape: f32[6,4096], index: 0, kind: input, shape index: {}]   ;;  %s14354_s2 = inlined_call_operand.vmem [shape: bf16[2,4096], index: 2, kind: input, shape index: {}]   ;;  %s14355_s1 = inlined_call_operand.vmem [shape: bf16[9,3,6], index: 1, kind: input, shape index: {}]   ;;  %s14356_s3 = inlined_call_operand.vmem [shape: f32[3,4096], index: 3, kind: output, shape index: {}]  }
   0x1   :  { %v15_v1 = vld [vmem:[%s14353_s0] sm:$0x3f]  ;;  %v16_v2 = vld [vmem:[%s14353_s0 + $0x8] sm:$0x3f]  ;;  %47 = vst [vmem:[#allocation2] sm:$0x77] %v14357_v3  ;;  %v238_v6 = vunpack.c.l.s4 %v11843_v5  ;;  %1168 = vmatprep.mubr.bf16.mxu0 %v14357_v3  ;;  %1209 = vmatprep.mubr.bf16.mxu1 %v14357_v3 }
   0x2   :  { %48 = vst [vmem:[#allocation2 + $0x8] sm:$0x77] %v14357_v3  ;;  %49 = vst [vmem:[#allocation2 + $0x10] sm:$0x77] %v14357_v3  ;;  %v17_v4 = vld [vmem:[%s14353_s0 + $0x10] sm:$0x3f]  ;;  %v11171_v7 = vpack.c.bf16 %v16_v2, %v15_v1 }
   0x3   :  { %50 = vst [vmem:[#allocation2 + $0x18] sm:$0x77] %v14357_v3  ;;  %51 = vst [vmem:[#allocation2 + $0x20] sm:$0x77] %v14357_v3  ;;  %v18_v8 = vld [vmem:[%s14353_s0 + $0x18] sm:$0x3f]  ;;  %v239_v14 = vunpack.c.0.s8 %v238_v6 }
   0x4   :  { %52 = vst [vmem:[#allocation2 + $0x28] sm:$0x77] %v14357_v3  ;;  %53 = vst [vmem:[#allocation2 + $0x30] sm:$0x77] %v14357_v3  ;;  %v19_v9 = vld [vmem:[%s14353_s0 + $0x20] sm:$0x3f]  ;;  %v11172_v11 = vpack.c.bf16 %v18_v8, %v17_v4 }
   0x5   :  { %54 = vst [vmem:[#allocation2 + $0x38] sm:$0x77] %v14357_v3  ;;  %55 = vst [vmem:[#allocation2 + $0x40] sm:$0x77] %v14357_v3  ;;  %v20_v10 = vld [vmem:[%s14353_s0 + $0x28] sm:$0x3f] }
   0x6   :  { %56 = vst [vmem:[#allocation2 + $0x48] sm:$0x77] %v14357_v3  ;;  %57 = vst [vmem:[#allocation2 + $0x50] sm:$0x77] %v14357_v3  ;;  %v11173_v12 = vpack.c.bf16 %v20_v10, %v19_v9  ;;  %v228_v13 = vld [vmem:[%s14354_s2] sm:$0xff]  ;;  %v241_v15 = vshrl.u32 %v240_v0, 7 }
   0x7   :  { %58 = vst [vmem:[#allocation2 + $0x58] sm:$0x77] %v14357_v3  ;;  %59 = vst [vmem:[#allocation2 + $0x60] sm:$0x77] %v14357_v3  ;;  %v11911_v16 = vld [vmem:[%s14354_s2 + $0x8] sm:$0xff]  ;;  %v236_v18 = vcombine.high %v228_v13, %v228_v13  ;;  %vm64_vm1 = vcmask 530436  }
   0x8   :  { %60 = vst [vmem:[#allocation2 + $0x68] sm:$0x77] %v14357_v3  ;;  %61 = vst [vmem:[#allocation2 + $0x70] sm:$0x77] %v14357_v3  ;;  %v21_v17 = vld [vmem:[%s14353_s0 + $0x30] sm:$0x3f]  ;;  %v11925_v22 = vsub.s32 %v239_v14, %v241_v15  ;;  %v285_v45 = vcombine.high %v11911_v16, %v11911_v16 }
   0x9   :  { %62 = vst [vmem:[#allocation2 + $0x78] sm:$0x77] %v14357_v3  ;;  %195 = vst [vmem:[#allocation2 + $0x4] sm:$0x77] %v11171_v7  ;;  %v22_v19 = vld [vmem:[%s14353_s0 + $0x38] sm:$0x3f] }
   0xa   :  { %v23_v20 = vld [vmem:[%s14353_s0 + $0x40] sm:$0x3f]  ;;  %v24_v21 = vld [vmem:[%s14353_s0 + $0x48] sm:$0x3f]  ;;  %196 = vst [vmem:[#allocation2 + $0xc] sm:$0x77] %v11172_v11  ;;  %v11174_v23 = vpack.c.bf16 %v22_v19, %v21_v17  ;;  %v243_v31 = vrot.slane %v228_v13, %v11925_v22  ;;  %v250_v32 = vrot.slane %v236_v18, %v11925_v22  ;;  %v292_v33 = vrot.slane %v11911_v16, %v11925_v22  ;;  %vm65_vm2 = vmor %vm64_vm1, %vm63_vm0 }
   0xb   :  { %197 = vst [vmem:[#allocation2 + $0x14] sm:$0x77] %v11173_v12  ;;  %v11175_v24 = vpack.c.bf16 %v24_v21, %v23_v20  ;;  %v25_v25 = vld [vmem:[%s14353_s0 + $0x50] sm:$0x3f]  ;;  %v26_v26 = vld [vmem:[%s14353_s0 + $0x58] sm:$0x3f]  ;;  %v299_v1 = vrot.slane %v285_v45, %v11925_v22 }
   0xc   :  { %v11176_v27 = vpack.c.bf16 %v26_v26, %v25_v25  ;;  %v27_v28 = vld [vmem:[%s14353_s0 + $0x60] sm:$0x3f]  ;;  %v28_v29 = vld [vmem:[%s14353_s0 + $0x68] sm:$0x3f]  ;;  %v29_v30 = vld [vmem:[%s14353_s0 + $0x70] sm:$0x3f]  ;;  %v251_v40 = vcombine.high %v243_v31, %v243_v31  ;;  %v11956_v41 = vrot.slane %v243_v31, %v11925_v22  ;;  %v252_v42 = vcombine.high %v250_v32, %v250_v32 }
   0xd   :  { %198 = vst [vmem:[#allocation2 + $0x1c] sm:$0x77] %v11174_v23  ;;  %199 = vst [vmem:[#allocation2 + $0x24] sm:$0x77] %v11175_v24  ;;  %v30_v34 = vld [vmem:[%s14353_s0 + $0x78] sm:$0x3f]  ;;  %v11177_v37 = vpack.c.bf16 %v28_v29, %v27_v28  ;;  %v11959_v43 = vrot.slane %v250_v32, %v11925_v22  ;;  %v300_v44 = vcombine.high %v292_v33, %v292_v33 }
   0xe   :  { %v31_v35 = vld [vmem:[%s14353_s0 + $0x80] sm:$0x3f]  ;;  %v32_v36 = vld [vmem:[%s14353_s0 + $0x88] sm:$0x3f]  ;;  %200 = vst [vmem:[#allocation2 + $0x2c] sm:$0x77] %v11176_v27  ;;  %v11178_v38 = vpack.c.bf16 %v30_v34, %v29_v30  ;;  %v11966_v47 = vrot.slane %v251_v40, %v11925_v22  ;;  %v433_v48 = vpack.i.b16 %v11956_v41, %v11956_v41  ;;  %v11973_v50 = vrot.slane %v252_v42, %v11925_v22 }
   0xf   :  { %v11179_v39 = vpack.c.bf16 %v32_v36, %v31_v35  ;;  %201 = vst [vmem:[#allocation2 + $0x34] sm:$0x77] %v11177_v37  ;;  %v11970_v49 = vsub.s32 0, %v241_v15  ;;  %v461_v55 = vpack.i.b16 %v11959_v43, %v11959_v43  ;;  %v11987_v56 = vcombine.high %v11956_v41, %v11956_v41  ;;  %66 = vst.msk [vmem:[#allocation2 + $0x80] sm:$0x77] %vm65_vm2, %v14357_v3  ;;  %v230_v20 = vld [vmem:[%s14354_s2 + $0x10] sm:$0xff] }
  0x10   :  { %202 = vst [vmem:[#allocation2 + $0x3c] sm:$0x77] %v11178_v38  ;;  %v11963_v46 = vld [vmem:[#allocation2] sm:$0x77]  ;;  %v11990_v57 = vrot.slane %v292_v33, %v11925_v22  ;;  %v11993_v58 = vrot.slane %v300_v44, %v11925_v22  ;;  %v440_v61 = vpack.i.b16 %v11966_v47, %v11966_v47  ;;  %v468_v63 = vpack.i.b16 %v11973_v50, %v11973_v50  ;;  %v33_v38 = vld [vmem:[%s14353_s0 + $0x90] sm:$0x3f] }
  0x11   :  { %203 = vst [vmem:[#allocation2 + $0x44] sm:$0x77] %v11179_v39  ;;  %v10565_v51 = vcombine.high %v11963_v46, %v11963_v46  ;;  %v10564_v52 = vcombine.low %v11963_v46, %v11963_v46  ;;  %v11979_v53 = vld [vmem:[#allocation2 + $0x8] sm:$0x77]  ;;  %v12009_v0 = vcombine.high %v11966_v47, %v11966_v47  ;;  %v438_v4 = vrot.slane %v433_v48, %v11970_v49  ;;  %v34_v45 = vld [vmem:[%s14353_s0 + $0x98] sm:$0x3f] }
  0x12   :  { %v11981_v54 = vld [vmem:[#allocation2 + $0x10] sm:$0x77]  ;;  %v10567_v59 = vcombine.high %v11979_v53, %v11979_v53  ;;  %v10566_v60 = vcombine.low %v11979_v53, %v11979_v53  ;;  %v466_v5 = vrot.slane %v461_v55, %v11970_v49  ;;  %v447_v6 = vpack.i.b16 %v11987_v56, %v11987_v56  ;;  %v35_v48 = vld [vmem:[%s14353_s0 + $0xa0] sm:$0x3f]  ;;  %s11847_s8 = smov 127   ;;  %s11848_s11 = smov 1  }
  0x13   :  { %939 = vrot.lane.b32.xlu0 %v10565_v51, %s11844_s25  ;;  %937 = vrot.lane.b32.xlu1 %v10564_v52, %s11844_s25  ;;  %v10569_v62 = vcombine.high %v11981_v54, %v11981_v54  ;;  %v10568_v2 = vcombine.low %v11981_v54, %v11981_v54  ;;  %v445_v7 = vrot.slane %v440_v61, %v11970_v49  ;;  %v36_v51 = vld [vmem:[%s14353_s0 + $0xa8] sm:$0x3f]  ;;  %v2950_v3 = vshrl.u32 %v11987_v56, 16 }
  0x14   :  { %v489_v8 = vpack.i.b16 %v11990_v57, %v11990_v57  ;;  %v496_v9 = vpack.i.b16 %v11993_v58, %v11993_v58  ;;  %v12027_v10 = vcombine.high %v11959_v43, %v11959_v43  ;;  %v473_v11 = vrot.slane %v468_v63, %v11970_v49  ;;  %v12080_v34 = vld [vmem:[#allocation2 + $0x18] sm:$0x77]  ;;  %v12084_v36 = vld [vmem:[#allocation2 + $0x20] sm:$0x77] }
  0x15   :  { %v454_v12 = vpack.i.b16 %v12009_v0, %v12009_v0  ;;  %v12036_v13 = vcombine.high %v11973_v50, %v11973_v50  ;;  %v452_v14 = vrot.slane %v447_v6, %v11970_v49  ;;  %v301_v15 = vcombine.high %v299_v1, %v299_v1 }
  0x16   :  { %v12039_v16 = vcombine.low %v438_v4, %v445_v7  ;;  %v494_v17 = vrot.slane %v489_v8, %v11970_v49  ;;  %v501_v18 = vrot.slane %v496_v9, %v11970_v49  ;;  %v475_v19 = vpack.i.b16 %v12027_v10, %v12027_v10 }
  0x17   :  { %943 = vrot.lane.b32.xlu0 %v10567_v59, %s11844_s25  ;;  %941 = vrot.lane.b32.xlu1 %v10566_v60, %s11844_s25  ;;  %v12050_v21 = vcombine.low %v466_v5, %v473_v11  ;;  %v459_v23 = vrot.slane %v454_v12, %v11970_v49  ;;  %v482_v24 = vpack.i.b16 %v12036_v13, %v12036_v13  ;;  %v2958_v56 = vshrl.u32 %v12009_v0, 16 }
  0x18   :  { %v12056_v25 = vrot.slane %v299_v1, %v11925_v22  ;;  %v341_v26 = vrot.slane %v230_v20, %v11925_v22  ;;  %v12059_v27 = vcombine.low %v494_v17, %v501_v18  ;;  %v12063_v28 = vcombine.high %v11990_v57, %v11990_v57  ;;  %v37_v1 = vld [vmem:[%s14353_s0 + $0xb0] sm:$0x3f] }
  0x19   :  { %v12067_v29 = vcombine.high %v11993_v58, %v11993_v58  ;;  %v12070_v30 = vrot.slane %v301_v15, %v11925_v22  ;;  %v12076_v31 = vcombine.low %v452_v14, %v459_v23  ;;  %v480_v32 = vrot.slane %v475_v19, %v11970_v49  ;;  %v39_v14 = vld [vmem:[%s14353_s0 + $0xc0] sm:$0x3f]  ;;  %v40_v15 = vld [vmem:[%s14353_s0 + $0xc8] sm:$0x3f] }
  0x1a   :  { %14372 = vst [vmem:[#allocation3_spill] sm:$0xff] %v12059_v27  ;;  %v487_v33 = vrot.slane %v482_v24, %v11970_v49  ;;  %v517_v35 = vpack.i.b16 %v12056_v25, %v12056_v25  ;;  %v349_v37 = vcombine.high %v341_v26, %v341_v26  ;;  %v503_v39 = vpack.i.b16 %v12063_v28, %v12063_v28  ;;  %v12161_v24 = vld [vmem:[#allocation2 + $0x28] sm:$0x77] }
  0x1b   :  { %947 = vrot.lane.b32.xlu0 %v10569_v62, %s11844_s25  ;;  %945 = vrot.lane.b32.xlu1 %v10568_v2, %s11844_s25  ;;  %v510_v40 = vpack.i.b16 %v12067_v29, %v12067_v29  ;;  %v524_v42 = vpack.i.b16 %v12070_v30, %v12070_v30  ;;  %v334_v44 = vcombine.high %v230_v20, %v230_v20  ;;  %v38_v2 = vld [vmem:[%s14353_s0 + $0xb8] sm:$0x3f]  ;;  %vm1003_vm3 = vcmask 523264  }
  0x1c   :  { %v12108_v52 = vcombine.low %v480_v32, %v487_v33  ;;  %v10570_v55 = vcombine.low %v12080_v34, %v12080_v34  ;;  %v10571_v59 = vcombine.high %v12080_v34, %v12080_v34  ;;  %v10572_v60 = vcombine.low %v12084_v36, %v12084_v36  ;;  %v12170_v33 = vld [vmem:[%s14354_s2 + $0x18] sm:$0xff] }
  0x1d   :  { %v522_v61 = vrot.slane %v517_v35, %v11970_v49  ;;  %v12119_v62 = vcombine.high %v12056_v25, %v12056_v25  ;;  %v12123_v63 = vcombine.high %v12070_v30, %v12070_v30  ;;  %v12132_v4 = vrot.slane %v341_v26, %v11925_v22 }
  0x1e   :  { %v12135_v5 = vrot.slane %v349_v37, %v11925_v22  ;;  %v11180_v6 = vpack.c.bf16 %v34_v45, %v33_v38  ;;  %v11181_v7 = vpack.c.bf16 %v36_v51, %v35_v48  ;;  %v508_v8 = vrot.slane %v503_v39, %v11970_v49  ;;  %v12176_v39 = vld [vmem:[#allocation2 + $0x30] sm:$0x77]  ;;  %v12184_v45 = vld [vmem:[#allocation2 + $0x38] sm:$0x77] }
  0x1f   :  { %736 = vrot.lane.b32.xlu0 %v12039_v16, %s11845_s28  ;;  %740 = vrot.lane.b32.xlu1 %v12050_v21, %s11845_s28  ;;  %v515_v9 = vrot.slane %v510_v40, %v11970_v49  ;;  %v529_v11 = vrot.slane %v524_v42, %v11970_v49  ;;  %v348_v12 = vrot.slane %v334_v44, %v11925_v22  ;;  %vm1036_vm4 = vcmask 48128  }
  0x20   :  { %v12152_v17 = vcombine.high %v12132_v4, %v12132_v4  ;;  %v12156_v18 = vcombine.high %v12135_v5, %v12135_v5  ;;  %204 = vst [vmem:[#allocation2 + $0x4c] sm:$0x77] %v11180_v6  ;;  %205 = vst [vmem:[#allocation2 + $0x54] sm:$0x77] %v11181_v7  ;;  %v11182_v19 = vpack.c.bf16 %v38_v2, %v37_v1  ;;  %vm784_vm5 = vcmask 515072  }
  0x21   :  { %v10573_v23 = vcombine.high %v12084_v36, %v12084_v36  ;;  %v531_v26 = vpack.i.b16 %v12119_v62, %v12119_v62  ;;  %v538_v32 = vpack.i.b16 %v12123_v63, %v12123_v63  ;;  %v11183_v35 = vpack.c.bf16 %v40_v15, %v39_v14  ;;  %v41_v15 = vld [vmem:[%s14353_s0 + $0xd0] sm:$0x3f] }
  0x22   :  { %206 = vst [vmem:[#allocation2 + $0x5c] sm:$0x77] %v11182_v19  ;;  %v12172_v37 = vcombine.low %v508_v8, %v515_v9  ;;  %v12174_v38 = vcombine.low %v522_v61, %v529_v11  ;;  %v545_v40 = vpack.i.b16 %v12132_v4, %v12132_v4  ;;  %v350_v42 = vcombine.high %v348_v12, %v348_v12  ;;  %v42_v19 = vld [vmem:[%s14353_s0 + $0xd8] sm:$0x3f] }
  0x23   :  { %738 = vrot.lane.b32.xlu0 %v12076_v31, %s11845_s28  ;;  %744 = vrot.lane.b32.xlu1 %v12059_v27, %s11845_s28  ;;  %v552_v44 = vpack.i.b16 %v12135_v5, %v12135_v5  ;;  %v559_v48 = vpack.i.b16 %v12152_v17, %v12152_v17  ;;  %v566_v51 = vpack.i.b16 %v12156_v18, %v12156_v18  ;;  %vm786_vm6 = vcmask 1043456  }
  0x24   :  { %14373 = vst [vmem:[#allocation4_spill] sm:$0xff] %v12172_v37  ;;  %14374 = vst [vmem:[#allocation5_spill] sm:$0xff] %v12174_v38  ;;  %v10574_v61 = vcombine.low %v12161_v24, %v12161_v24  ;;  %v390_v1 = vrot.slane %v12170_v33, %v11925_v22  ;;  %v10576_v2 = vcombine.low %v12176_v39, %v12176_v39  ;;  %vm1941_vm7 = vcmask 531456  }
  0x25   :  { %207 = vst [vmem:[#allocation2 + $0x64] sm:$0x77] %v11183_v35  ;;  %v536_v6 = vrot.slane %v531_v26, %v11970_v49  ;;  %v543_v7 = vrot.slane %v538_v32, %v11970_v49  ;;  %v550_v8 = vrot.slane %v545_v40, %v11970_v49  ;;  %v12214_v14 = vrot.slane %v350_v42, %v11925_v22  ;;  %v43_v40 = vld [vmem:[%s14353_s0 + $0xe0] sm:$0x3f]  ;;  %v44_v42 = vld [vmem:[%s14353_s0 + $0xe8] sm:$0x3f] }
  0x26   :  { %v557_v26 = vrot.slane %v552_v44, %v11970_v49  ;;  %v564_v32 = vrot.slane %v559_v48, %v11970_v49  ;;  %v571_v35 = vrot.slane %v566_v51, %v11970_v49  ;;  %v398_v48 = vcombine.high %v390_v1, %v390_v1 }
  0x27   :  { %742 = vrot.lane.b32.xlu0 %v12108_v52, %s11845_s28  ;;  %949 = vrot.lane.b32.xlu1 %v10570_v55, %s11844_s25  ;;  %v2942_v55 = vshrl.u32 %v11966_v47, 16  ;;  %v12243_v51 = vrot.slane %v390_v1, %v11925_v22  ;;  %v12245_v9 = vcombine.low %v536_v6, %v543_v7  ;;  %v11184_v27 = vpack.c.bf16 %v42_v19, %v41_v15  ;;  %v45_v6 = vld [vmem:[%s14353_s0 + $0xf0] sm:$0x3f]  ;;  %v46_v7 = vld [vmem:[%s14353_s0 + $0xf8] sm:$0x3f]  ;;  %s11846_s0 = smov 65  }
  0x28   :  { %v11185_v1 = vpack.c.bf16 %v44_v42, %v43_v40  ;;  %v12266_v0 = vcombine.low %v550_v8, %v557_v26  ;;  %v12268_v20 = vcombine.low %v564_v32, %v571_v35  ;;  %v383_v15 = vcombine.high %v12170_v33, %v12170_v33 }
  0x29   :  { %v2966_v19 = vshrl.u32 %v11959_v43, 16  ;;  %v12277_v47 = vrot.slane %v398_v48, %v11925_v22  ;;  %208 = vst [vmem:[#allocation2 + $0x6c] sm:$0x77] %v11184_v27  ;;  %v14375_v8 = vshrl.u32 %v11956_v41, 16  ;;  %v2943_v26 = vpack.i.b16 %v2942_v55, %v2942_v55 }
  0x2a   :  { %209 = vst [vmem:[#allocation2 + $0x74] sm:$0x77] %v11185_v1  ;;  %v2974_v43 = vshrl.u32 %v11973_v50, 16  ;;  %v2982_v35 = vshrl.u32 %v12027_v10, 16  ;;  %v2990_v48 = vshrl.u32 %v12036_v13, 16  ;;  %v2951_v55 = vpack.i.b16 %v2950_v3, %v2950_v3 }
  0x2b   :  { %951 = vrot.lane.b32.xlu0 %v10571_v59, %s11844_s25  ;;  %953 = vrot.lane.b32.xlu1 %v10572_v60, %s11844_s25  ;;  %v10575_v59 = vcombine.high %v12161_v24, %v12161_v24  ;;  %v12196_v60 = vrot.slane %v348_v12, %v11925_v22  ;;  %v12211_v12 = vld [vmem:[#allocation2 + $0x40] sm:$0x77]  ;;  %v2935_v33 = vpack.i.b16 %v14375_v8, %v14375_v8  ;;  %v2998_v50 = vshrl.u32 %v11990_v57, 16 }
  0x2c   :  { %v2948_v27 = vrot.slane %v2943_v26, %v11970_v49  ;;  %v12298_v1 = vcombine.high %v12243_v51, %v12243_v51  ;;  %v12301_v10 = vrot.slane %v383_v15, %v11925_v22  ;;  %v2959_v13 = vpack.i.b16 %v2958_v56, %v2958_v56  ;;  %v12321_v26 = vld [vmem:[#allocation2 + $0x50] sm:$0x77] }
  0x2d   :  { %v573_v11 = vpack.i.b16 %v12196_v60, %v12196_v60  ;;  %v12240_v44 = vcombine.high %v12196_v60, %v12196_v60  ;;  %v2940_v41 = vrot.slane %v2935_v33, %v11970_v49  ;;  %v2999_v8 = vpack.i.b16 %v2998_v50, %v2998_v50 }
  0x2e   :  { %v2964_v57 = vrot.slane %v2959_v13, %v11970_v49  ;;  %v3014_v50 = vshrl.u32 %v12063_v28, 16  ;;  %v14376_v13 = vcombine.high %v12176_v39, %v12176_v39  ;;  %v3022_v28 = vshrl.u32 %v12067_v29, 16 }
  0x2f   :  { %746 = vrot.lane.b32.xlu0 %v12172_v37, %s11845_s28  ;;  %748 = vrot.lane.b32.xlu1 %v12174_v38, %s11845_s28  ;;  %v580_v38 = vpack.i.b16 %v12214_v14, %v12214_v14  ;;  %v12256_v37 = vcombine.high %v12214_v14, %v12214_v14  ;;  %v578_v40 = vrot.slane %v573_v11, %v11970_v49  ;;  %v3054_v29 = vshrl.u32 %v12123_v63, 16 }
  0x30   :  { %v587_v42 = vpack.i.b16 %v12240_v44, %v12240_v44  ;;  %vm4417_vm8 = vcmask 1039360   ;;  %vm4634_vm9 = vcmask 7168  }
  0x31   :  { %v585_v11 = vrot.slane %v580_v38, %v11970_v49  ;;  %v594_v32 = vpack.i.b16 %v12256_v37, %v12256_v37 }
  0x32   :  { %v592_v38 = vrot.slane %v587_v42, %v11970_v49  ;;  %v2983_v42 = vpack.i.b16 %v2982_v35, %v2982_v35  ;;  %v608_v35 = vpack.i.b16 %v12277_v47, %v12277_v47 }
  0x33   :  { %955 = vrot.lane.b32.xlu0 %v10573_v23, %s11844_s25  ;;  %957 = vrot.lane.b32.xlu1 %v10574_v61, %s11844_s25  ;;  %v601_v23 = vpack.i.b16 %v12243_v51, %v12243_v51  ;;  %v11186_v61 = vpack.c.bf16 %v46_v7, %v45_v6  ;;  %v2967_v6 = vpack.i.b16 %v2966_v19, %v2966_v19  ;;  %v3006_v19 = vshrl.u32 %v11993_v58, 16 }
  0x34   :  { %v2975_v7 = vpack.i.b16 %v2974_v43, %v2974_v43  ;;  %v12317_v33 = vcombine.low %v578_v40, %v585_v11  ;;  %v599_v43 = vrot.slane %v594_v32, %v11970_v49  ;;  %v2988_v58 = vrot.slane %v2983_v42, %v11970_v49 }
  0x35   :  { %210 = vst [vmem:[#allocation2 + $0x7c] sm:$0x77] %v11186_v61  ;;  %v12307_v3 = vrot.slane %v601_v23, %v11970_v49  ;;  %v2991_v61 = vpack.i.b16 %v2990_v48, %v2990_v48  ;;  %v2972_v56 = vrot.slane %v2967_v6, %v11970_v49  ;;  %v12319_v23 = vld [vmem:[#allocation2 + $0x48] sm:$0x77]  ;;  %v12328_v48 = vcombine.high %v12277_v47, %v12277_v47 }
  0x36   :  { %v2980_v15 = vrot.slane %v2975_v7, %v11970_v49  ;;  %v3004_v32 = vrot.slane %v2999_v8, %v11970_v49  ;;  %v10582_v6 = vcombine.low %v12319_v23, %v12319_v23  ;;  %v12359_v8 = vcombine.low %v592_v38, %v599_v43 }
  0x37   :  { %959 = vrot.lane.b32.xlu0 %v10575_v59, %s11844_s25  ;;  %961 = vrot.lane.b32.xlu1 %v10576_v2, %s11844_s25  ;;  %v12303_v59 = vcombine.low %v2940_v41, %v2948_v27  ;;  %v2956_v2 = vrot.slane %v2951_v55, %v11970_v49  ;;  %v2996_v40 = vrot.slane %v2991_v61, %v11970_v49  ;;  %v3062_v43 = vshrl.u32 %v12132_v4, 16 }
  0x38   :  { %v12332_v27 = vcombine.low %v2972_v56, %v2980_v15  ;;  %v3007_v55 = vpack.i.b16 %v3006_v19, %v3006_v19  ;;  %v3015_v56 = vpack.i.b16 %v3014_v50, %v3014_v50  ;;  %v3030_v15 = vshrl.u32 %v12056_v25, 16 }
  0x39   :  { %v12330_v41 = vcombine.low %v2956_v2, %v2964_v57  ;;  %v14377_v2 = vcombine.low %v12184_v45, %v12184_v45  ;;  %v12355_v42 = vcombine.low %v2988_v58, %v2996_v40  ;;  %v3023_v19 = vpack.i.b16 %v3022_v28, %v3022_v28 }
  0x3a   :  { %v3012_v61 = vrot.slane %v3007_v55, %v11970_v49  ;;  %v3020_v57 = vrot.slane %v3015_v56, %v11970_v49  ;;  %v3031_v11 = vpack.i.b16 %v3030_v15, %v3030_v15  ;;  %v14378_v58 = vcombine.high %v12184_v45, %v12184_v45 }
  0x3b   :  { %750 = vrot.lane.b32.xlu0 %v12245_v9, %s11845_s28  ;;  %752 = vrot.lane.b32.xlu1 %v12266_v0, %s11845_s28  ;;  %v14379_v25 = vcombine.low %v12211_v12, %v12211_v12  ;;  %v613_v40 = vrot.slane %v608_v35, %v11970_v49  ;;  %v3070_v55 = vshrl.u32 %v12135_v5, 16  ;;  %v3063_v56 = vpack.i.b16 %v3062_v43, %v3062_v43 }
  0x3c   :  { %v12363_v7 = vcombine.low %v3004_v32, %v3012_v61  ;;  %v3036_v63 = vrot.slane %v3031_v11, %v11970_v49  ;;  %v3055_v32 = vpack.i.b16 %v3054_v29, %v3054_v29  ;;  %v12386_v15 = vrot.slane %v12301_v10, %v11925_v22 }
  0x3d   :  { %v3078_v35 = vshrl.u32 %v12152_v17, 16  ;;  %v3068_v11 = vrot.slane %v3063_v56, %v11970_v49  ;;  %v3102_v17 = vshrl.u32 %v12214_v14, 16 }
  0x3e   :  { %v3060_v4 = vrot.slane %v3055_v32, %v11970_v49  ;;  %v14383_v32 = vcombine.high %v12211_v12, %v12211_v12 }
  0x3f   :  { %963 = vrot.lane.b32.xlu0 %v14376_v13, %s11844_s25  ;;  %965 = vrot.lane.b32.xlu1 %v14377_v2, %s11844_s25  ;;  %v3038_v13 = vshrl.u32 %v12070_v30, 16  ;;  %v3046_v2 = vshrl.u32 %v12119_v62, 16  ;;  %v3028_v30 = vrot.slane %v3023_v19, %v11970_v49  ;;  %v3071_v19 = vpack.i.b16 %v3070_v55, %v3070_v55 }
  0x41   :  { %v3039_v62 = vpack.i.b16 %v3038_v13, %v3038_v13  ;;  %v3047_v38 = vpack.i.b16 %v3046_v2, %v3046_v2  ;;  %v12380_v50 = vcombine.low %v3020_v57, %v3028_v30  ;;  %v3086_v57 = vshrl.u32 %v12156_v18, 16 }
  0x42   :  { %v3094_v13 = vshrl.u32 %v12196_v60, 16  ;;  %v3076_v29 = vrot.slane %v3071_v19, %v11970_v49  ;;  %v3103_v18 = vpack.i.b16 %v3102_v17, %v3102_v17  ;;  %v3126_v60 = vshrl.u32 %v12243_v51, 16 }
  0x43   :  { %967 = vrot.lane.b32.xlu0 %v14378_v58, %s11844_s25  ;;  %969 = vrot.lane.b32.xlu1 %v14379_v25, %s11844_s25  ;;  %v3044_v28 = vrot.slane %v3039_v62, %v11970_v49  ;;  %v3052_v61 = vrot.slane %v3047_v38, %v11970_v49  ;;  %v3079_v58 = vpack.i.b16 %v3078_v35, %v3078_v35  ;;  %v3110_v62 = vshrl.u32 %v12240_v44, 16 }
  0x44   :  { %v3087_v25 = vpack.i.b16 %v3086_v57, %v3086_v57  ;;  %v3095_v30 = vpack.i.b16 %v3094_v13, %v3094_v13  ;;  %v3118_v38 = vshrl.u32 %v12256_v37, 16  ;;  %v12405_v43 = vcombine.low %v3068_v11, %v3076_v29 }
  0x45   :  { %v12394_v5 = vcombine.low %v3036_v63, %v3044_v28  ;;  %v12399_v2 = vcombine.low %v3052_v61, %v3060_v4  ;;  %v3084_v63 = vrot.slane %v3079_v58, %v11970_v49  ;;  %v3111_v55 = vpack.i.b16 %v3110_v62, %v3110_v62  ;;  %v12445_v62 = vld [vmem:[#allocation2 + $0x58] sm:$0x77] }
  0x46   :  { %14382 = vst [vmem:[#allocation8_spill] sm:$0xff] %v12405_v43  ;;  %v3092_v14 = vrot.slane %v3087_v25, %v11970_v49  ;;  %v3100_v44 = vrot.slane %v3095_v30, %v11970_v49  ;;  %v3134_v37 = vshrl.u32 %v12277_v47, 16  ;;  %v14384_v28 = vcombine.high %v12301_v10, %v12301_v10 }
  0x47   :  { %754 = vrot.lane.b32.xlu0 %v12268_v20, %s11845_s28  ;;  %756 = vrot.lane.b32.xlu1 %v12317_v33, %s11845_s28  ;;  %14380 = vst [vmem:[#allocation6_spill] sm:$0xff] %v12394_v5  ;;  %14381 = vst [vmem:[#allocation7_spill] sm:$0xff] %v12399_v2  ;;  %v3108_v51 = vrot.slane %v3103_v18, %v11970_v49  ;;  %v3119_v56 = vpack.i.b16 %v3118_v38, %v3118_v38  ;;  %v3142_v11 = vshrl.u32 %v12298_v1, 16 }
  0x48   :  { %v427_v61 = vrot.slane %v14384_v28, %v11925_v22  ;;  %v3127_v4 = vpack.i.b16 %v3126_v60, %v3126_v60  ;;  %v12422_v19 = vcombine.low %v3084_v63, %v3092_v14  ;;  %v3135_v35 = vpack.i.b16 %v3134_v37, %v3134_v37  ;;  %v12466_v28 = vld [vmem:[#allocation2 + $0x60] sm:$0x77] }
  0x49   :  { %v12426_v57 = vcombine.low %v3100_v44, %v3108_v51  ;;  %v3124_v47 = vrot.slane %v3119_v56, %v11970_v49  ;;  %v3150_v10 = vshrl.u32 %v12328_v48, 16  ;;  %v14385_v22 = vcombine.high %v12319_v23, %v12319_v23 }
  0x4a   :  { %v3132_v13 = vrot.slane %v3127_v4, %v11970_v49  ;;  %v14386_v29 = vcombine.low %v12321_v26, %v12321_v26  ;;  %v12440_v58 = vcombine.low %v12307_v3, %v613_v40  ;;  %v3140_v17 = vrot.slane %v3135_v35, %v11970_v49 }
  0x4b   :  { %971 = vrot.lane.b32.xlu0 %v14383_v32, %s11844_s25  ;;  %973 = vrot.lane.b32.xlu1 %v10582_v6, %s11844_s25  ;;  %v3116_v6 = vrot.slane %v3111_v55, %v11970_v49  ;;  %v3143_v25 = vpack.i.b16 %v3142_v11, %v3142_v11  ;;  %v10585_v30 = vcombine.high %v12321_v26, %v12321_v26  ;;  %v3158_v3 = vshrl.u32 %v12386_v15, 16 }
  0x4c   :  { %v615_v38 = vpack.i.b16 %v12298_v1, %v12298_v1  ;;  %v3151_v18 = vpack.i.b16 %v3150_v10, %v3150_v10  ;;  %v12451_v60 = vcombine.low %v3132_v13, %v3140_v17  ;;  %v3166_v40 = vshrl.u32 %v427_v61, 16 }
  0x4d   :  { %v12449_v63 = vcombine.low %v3116_v6, %v3124_v47  ;;  %v3148_v32 = vrot.slane %v3143_v25, %v11970_v49  ;;  %v622_v14 = vpack.i.b16 %v12328_v48, %v12328_v48  ;;  %v629_v44 = vpack.i.b16 %v12386_v15, %v12386_v15 }
  0x4e   :  { %v636_v55 = vpack.i.b16 %v427_v61, %v427_v61  ;;  %v3156_v37 = vrot.slane %v3151_v18, %v11970_v49  ;;  %v10586_v1 = vcombine.low %v12445_v62, %v12445_v62  ;;  %v3159_v51 = vpack.i.b16 %v3158_v3, %v3158_v3 }
  0x4f   :  { %975 = vrot.lane.b32.xlu0 %v14385_v22, %s11844_s25  ;;  %977 = vrot.lane.b32.xlu1 %v14386_v29, %s11844_s25  ;;  %v3167_v56 = vpack.i.b16 %v3166_v40, %v3166_v40  ;;  %v10587_v4 = vcombine.high %v12445_v62, %v12445_v62  ;;  %v620_v6 = vrot.slane %v615_v38, %v11970_v49 }
  0x50   :  { %v12468_v48 = vcombine.low %v3148_v32, %v3156_v37  ;;  %v3164_v35 = vrot.slane %v3159_v51, %v11970_v49  ;;  %v627_v47 = vrot.slane %v622_v14, %v11970_v49  ;;  %v10588_v13 = vcombine.low %v12466_v28, %v12466_v28  ;;  %v12492_v14 = vld [vmem:[#allocation2 + $0x68] sm:$0x77] }
  0x51   :  { %v3172_v11 = vrot.slane %v3167_v56, %v11970_v49  ;;  %v634_v10 = vrot.slane %v629_v44, %v11970_v49  ;;  %v641_v22 = vrot.slane %v636_v55, %v11970_v49  ;;  %v2930_v17 = vcombine.high %v12386_v15, %v12386_v15  ;;  %v12506_v56 = vld [vmem:[#allocation2 + $0x70] sm:$0x77] }
  0x52   :  { %v2932_v25 = vcombine.high %v427_v61, %v427_v61  ;;  %v12486_v32 = vcombine.low %v620_v6, %v627_v47  ;;  %v10589_v15 = vcombine.high %v12466_v28, %v12466_v28  ;;  %v10590_v37 = vcombine.low %v12492_v14, %v12492_v14 }
  0x53   :  { %758 = vrot.lane.b32.xlu0 %v12359_v8, %s11845_s28  ;;  %760 = vrot.lane.b32.xlu1 %v12440_v58, %s11845_s28  ;;  %v12482_v29 = vcombine.low %v3164_v35, %v3172_v11  ;;  %v3174_v38 = vshrl.u32 %v2930_v17, 16  ;;  %v12490_v3 = vcombine.low %v634_v10, %v641_v22  ;;  %v643_v61 = vpack.i.b16 %v2930_v17, %v2930_v17  ;;  %v12522_v10 = vld [vmem:[#allocation2 + $0x78] sm:$0x77]  ;;  %v12531_v17 = vld [vmem:[#allocation2 + $0x80] sm:$0x7] }
  0x54   :  { %v3182_v18 = vshrl.u32 %v2932_v25, 16  ;;  %v10591_v6 = vcombine.high %v12492_v14, %v12492_v14  ;;  %v10592_v11 = vcombine.low %v12506_v56, %v12506_v56  ;;  %v10595_v22 = vcombine.high %v12522_v10, %v12522_v10 }
  0x55   :  { %v3175_v40 = vpack.i.b16 %v3174_v38, %v3174_v38 }
  0x57   :  { %979 = vrot.lane.b32.xlu0 %v10585_v30, %s11844_s25  ;;  %981 = vrot.lane.b32.xlu1 %v10586_v1, %s11844_s25  ;;  %v3183_v30 = vpack.i.b16 %v3182_v18, %v3182_v18  ;;  %v3180_v44 = vrot.slane %v3175_v40, %v11970_v49  ;;  %v650_v1 = vpack.i.b16 %v2932_v25, %v2932_v25 }
  0x58   :  { %v10596_v25 = vcombine.low %v12531_v17, %v12531_v17 }
  0x59   :  { %v3188_v55 = vrot.slane %v3183_v30, %v11970_v49  ;;  %v655_v35 = vrot.slane %v650_v1, %v11970_v49 }
  0x5b   :  { %983 = vrot.lane.b32.xlu0 %v10587_v4, %s11844_s25  ;;  %985 = vrot.lane.b32.xlu1 %v10588_v13, %s11844_s25  ;;  %v12504_v51 = vcombine.low %v3180_v44, %v3188_v55  ;;  %v648_v4 = vrot.slane %v643_v61, %v11970_v49  ;;  %v10593_v13 = vcombine.high %v12506_v56, %v12506_v56 }
  0x5c   :  { %v10594_v49 = vcombine.low %v12522_v10, %v12522_v10 }
  0x5d   :  { %v12517_v47 = vcombine.low %v648_v4, %v655_v35 }
  0x5f   :  { %762 = vrot.lane.b32.xlu0 %v12486_v32, %s11845_s28  ;;  %764 = vrot.lane.b32.xlu1 %v12490_v3, %s11845_s28 }
  0x63   :  { %987 = vrot.lane.b32.xlu0 %v10589_v15, %s11844_s25  ;;  %989 = vrot.lane.b32.xlu1 %v10590_v37, %s11844_s25  ;;  %v12564_v37 = vld [vmem:[%s14355_s1 + $0x2] sm:$0x3] }
  0x67   :  { %991 = vrot.lane.b32.xlu0 %v10591_v6, %s11844_s25  ;;  %993 = vrot.lane.b32.xlu1 %v10592_v11, %s11844_s25  ;;  %v14387_v11 = vmov 0  }
  0x6b   :  { %766 = vrot.lane.b32.xlu0 %v12517_v47, %s11845_s28  ;;  %995 = vrot.lane.b32.xlu1 %v10593_v13, %s11844_s25 }
  0x6f   :  { %997 = vrot.lane.b32.xlu0 %v10594_v49, %s11844_s25  ;;  %999 = vrot.lane.b32.xlu1 %v10595_v22, %s11844_s25 }
  0x73   :  { %1001 = vrot.lane.b32.xlu0 %v10596_v25, %s11844_s25  ;;  %3269 = vrot.lane.b32.xlu1 %v12303_v59, %s11846_s0 }
  0x77   :  { %3271 = vrot.lane.b32.xlu0 %v12330_v41, %s11846_s0  ;;  %3273 = vrot.lane.b32.xlu1 %v12332_v27, %s11846_s0 }
  0x7b   :  { %3275 = vrot.lane.b32.xlu1 %v12355_v42, %s11846_s0  ;;  %3277 = vrot.lane.b32.xlu0 %v12363_v7, %s11846_s0 }
  0x7f   :  { %3279 = vrot.lane.b32.xlu1 %v12380_v50, %s11846_s0  ;;  %3281 = vrot.lane.b32.xlu0 %v12394_v5, %s11846_s0 }
  0x83   :  { %3283 = vrot.lane.b32.xlu1 %v12399_v2, %s11846_s0  ;;  %3285 = vrot.lane.b32.xlu0 %v12405_v43, %s11846_s0 }
  0x85   :  { %v940_v38 = vpop.permute.xlu0 %939  ;;  %v938_v18 = vpop.permute.xlu1 %937 }
  0x86   :  { %v1004_v40 = vsel %vm1003_vm3, %v938_v18, %v940_v38 }
  0x87   :  { %v1041_v15 = vsel %vm63_vm0, %v1004_v40, 0 }
  0x89   :  { %v944_v30 = vpop.permute.xlu0 %943  ;;  %v942_v44 = vpop.permute.xlu1 %941 }
  0x8a   :  { %v1005_v55 = vsel %vm1003_vm3, %v940_v38, %v942_v44  ;;  %v1006_v61 = vsel %vm1003_vm3, %v942_v44, %v944_v30 }
  0x8b   :  { %10597 = vmatprep.subr.msk.bf16.mxu0 %vm63_vm0, %v1005_v55  ;;  %v1047_v35 = vsel %vm63_vm0, %v1006_v61, 0 }
  0x8c   :  { %1137 = vmatpush1.bf16.msra.mxu0 %v1041_v15 }
  0x8d   :  { %v948_v1 = vpop.permute.xlu0 %947  ;;  %v946_v4 = vpop.permute.xlu1 %945 }
  0x8e   :  { %v1007_v6 = vsel %vm1003_vm3, %v944_v30, %v946_v4  ;;  %v1008_v61 = vsel %vm1003_vm3, %v946_v4, %v948_v1 }
  0x8f   :  { %10599 = vmatprep.subr.msk.bf16.mxu1 %vm63_vm0, %v1007_v6  ;;  %10598 = vmatmul.mubr.msk.bf16.vlgmr.msra.gmra.mrb[0].mxu0 %vm1036_vm4, %v12564_v37 }
  0x90   :  { %1178 = vmatpush1.bf16.msra.mxu1 %v1047_v35  ;;  %1250 = vmatprep.mubr.bf16.mxu0 %v14387_v11 }
  0x91   :  { %v737_v13 = vpop.permute.xlu0 %736  ;;  %v741_v49 = vpop.permute.xlu1 %740 }
  0x92   :  { %v768_v22 = vrot.slane %v737_v13, 4  ;;  %v770_v38 = vrot.slane %v741_v49, 4 }
  0x93   :  { %10600 = vmatmul.mubr.msk.bf16.vlgmr.msra.gmra.mrb[0].mxu1 %vm1036_vm4, %v12564_v37 }
  0x94   :  { %v12575_v25 = vsel %vm784_vm5, %v768_v22, %v737_v13  ;;  %1291 = vmatprep.mubr.bf16.mxu1 %v14387_v11 }
  0x95   :  { %14388 = vst [vmem:[#allocation9_spill] sm:$0xff] %v12575_v25  ;;  %v834_v18 = vmul.bf16 %v12575_v25, %v11963_v46  ;;  %v739_v40 = vpop.permute.xlu0 %738  ;;  %v745_v30 = vpop.permute.xlu1 %744 }
  0x96   :  { %v769_v44 = vrot.slane %v739_v40, 4 }
  0x97   :  { %v10629_v55 = vcombine.low %v834_v18, %v834_v18  ;;  %v10630_v15 = vcombine.high %v834_v18, %v834_v18 }
  0x98   :  { %v787_v6 = vsel %vm786_vm6, %v768_v22, %v769_v44  ;;  %v789_v35 = vsel %vm786_vm6, %v769_v44, %v770_v38  ;;  %v772_v22 = vrot.slane %v745_v30, 4 }
  0x99   :  { %v12584_v13 = vsel %vm784_vm5, %v787_v6, %v739_v40  ;;  %1875 = vrot.lane.b32.xlu0 %v10629_v55, %s11846_s0  ;;  %v743_v43 = vpop.permute.xlu0 %742  ;;  %1877 = vrot.lane.b32.xlu1 %v10630_v15, %s11846_s0  ;;  %v950_v46 = vpop.permute.xlu1 %949  ;;  %v12592_v4 = vsel %vm784_vm5, %v789_v35, %v741_v49  ;;  %v1053_v40 = vsel %vm63_vm0, %v1008_v61, 0 }
  0x9a   :  { %v835_v25 = vmul.bf16 %v12584_v13, %v11979_v53  ;;  %v771_v2 = vrot.slane %v743_v43, 4  ;;  %v1009_v18 = vsel %vm1003_vm3, %v948_v1, %v950_v46  ;;  %v836_v53 = vmul.bf16 %v12592_v4, %v11981_v54 }
  0x9b   :  { %10601 = vmatprep.subr.msk.bf16.mxu0 %vm63_vm0, %v1009_v18 }
  0x9c   :  { %v791_v44 = vsel %vm786_vm6, %v770_v38, %v771_v2  ;;  %1219 = vmatpush1.bf16.msra.mxu0 %v1053_v40  ;;  %v10631_v6 = vcombine.low %v835_v25, %v835_v25  ;;  %v10632_v5 = vcombine.high %v835_v25, %v835_v25  ;;  %v793_v18 = vsel %vm786_vm6, %v771_v2, %v772_v22 }
  0x9d   :  { %v952_v55 = vpop.permute.xlu0 %951  ;;  %v954_v15 = vpop.permute.xlu1 %953  ;;  %v12600_v1 = vsel %vm784_vm5, %v791_v44, %v743_v43  ;;  %v10634_v61 = vcombine.high %v836_v53, %v836_v53  ;;  %v12614_v40 = vsel %vm784_vm5, %v793_v18, %v745_v30 }
  0x9e   :  { %v1010_v49 = vsel %vm1003_vm3, %v950_v46, %v952_v55  ;;  %v1011_v35 = vsel %vm1003_vm3, %v952_v55, %v954_v15  ;;  %1879 = vrot.lane.b32.xlu0 %v10631_v6, %s11846_s0  ;;  %1881 = vrot.lane.b32.xlu1 %v10632_v5, %s11846_s0  ;;  %v837_v54 = vmul.bf16 %v12600_v1, %v12080_v34 }
  0x9f   :  { %v1059_v38 = vsel %vm63_vm0, %v1010_v49, 0  ;;  %10603 = vmatprep.subr.msk.bf16.mxu1 %vm63_vm0, %v1011_v35  ;;  %v10633_v46 = vcombine.low %v836_v53, %v836_v53  ;;  %10602 = vmatmul.mubr.msk.bf16.vlgmr.msra.gmra.mrb[4].mxu0 %vm1036_vm4, %v12564_v37  ;;  %v838_v30 = vmul.bf16 %v12614_v40, %v12084_v36 }
  0xa0   :  { %1260 = vmatpush1.bf16.msra.mxu1 %v1059_v38  ;;  %1332 = vmatprep.mubr.bf16.mxu0 %v14387_v11  ;;  %v10636_v6 = vcombine.high %v837_v54, %v837_v54  ;;  %v10635_v53 = vcombine.low %v837_v54, %v837_v54 }
  0xa1   :  { %v747_v43 = vpop.permute.xlu0 %746  ;;  %v749_v25 = vpop.permute.xlu1 %748 }
  0xa2   :  { %v773_v2 = vrot.slane %v747_v43, 4  ;;  %v774_v5 = vrot.slane %v749_v25, 4  ;;  %1885 = vrot.lane.b32.xlu1 %v10634_v61, %s11846_s0  ;;  %1883 = vrot.lane.b32.xlu0 %v10633_v46, %s11846_s0  ;;  %v10638_v61 = vcombine.high %v838_v30, %v838_v30  ;;  %v10637_v46 = vcombine.low %v838_v30, %v838_v30 }
  0xa3   :  { %10604 = vmatmul.mubr.msk.bf16.vlgmr.msra.gmra.mrb[4].mxu1 %vm1036_vm4, %v12564_v37 }
  0xa4   :  { %v795_v34 = vsel %vm786_vm6, %v772_v22, %v773_v2  ;;  %1373 = vmatprep.mubr.bf16.mxu1 %v14387_v11  ;;  %v797_v35 = vsel %vm786_vm6, %v773_v2, %v774_v5 }
  0xa5   :  { %v956_v44 = vpop.permute.xlu0 %955  ;;  %v958_v55 = vpop.permute.xlu1 %957  ;;  %v12626_v49 = vsel %vm784_vm5, %v795_v34, %v747_v43  ;;  %v12638_v2 = vsel %vm784_vm5, %v797_v35, %v749_v25 }
  0xa6   :  { %v1012_v18 = vsel %vm1003_vm3, %v954_v15, %v956_v44  ;;  %1889 = vrot.lane.b32.xlu1 %v10636_v6, %s11846_s0  ;;  %1887 = vrot.lane.b32.xlu0 %v10635_v53, %s11846_s0  ;;  %v1013_v22 = vsel %vm1003_vm3, %v956_v44, %v958_v55  ;;  %v839_v36 = vmul.bf16 %v12626_v49, %v12161_v24 }
  0xa7   :  { %10605 = vmatprep.subr.msk.bf16.mxu0 %vm63_vm0, %v1013_v22  ;;  %v1065_v38 = vsel %vm63_vm0, %v1012_v18, 0  ;;  %v840_v44 = vmul.bf16 %v12638_v2, %v12176_v39 }
  0xa8   :  { %1301 = vmatpush1.bf16.msra.mxu0 %v1065_v38  ;;  %v10640_v53 = vcombine.high %v839_v36, %v839_v36  ;;  %v10639_v30 = vcombine.low %v839_v36, %v839_v36 }
  0xa9   :  { %v960_v54 = vpop.permute.xlu0 %959  ;;  %v962_v43 = vpop.permute.xlu1 %961 }
  0xaa   :  { %v1014_v15 = vsel %vm1003_vm3, %v958_v55, %v960_v54  ;;  %v1015_v34 = vsel %vm1003_vm3, %v960_v54, %v962_v43  ;;  %1893 = vrot.lane.b32.xlu1 %v10638_v61, %s11846_s0  ;;  %1891 = vrot.lane.b32.xlu0 %v10637_v46, %s11846_s0  ;;  %v10642_v54 = vcombine.high %v840_v44, %v840_v44 }
  0xab   :  { %v1071_v24 = vsel %vm63_vm0, %v1014_v15, 0  ;;  %10607 = vmatprep.subr.msk.bf16.mxu1 %vm63_vm0, %v1015_v34  ;;  %10606 = vmatmul.mubr.msk.bf16.vlgmr.msra.gmra.mrb[8].mxu0 %vm1036_vm4, %v12564_v37  ;;  %v10641_v61 = vcombine.low %v840_v44, %v840_v44 }
  0xac   :  { %1342 = vmatpush1.bf16.msra.mxu1 %v1071_v24  ;;  %1414 = vmatprep.mubr.bf16.mxu0 %v14387_v11 }
  0xad   :  { %v751_v6 = vpop.permute.xlu0 %750  ;;  %v753_v25 = vpop.permute.xlu1 %752 }
  0xae   :  { %v775_v55 = vrot.slane %v751_v6, 4  ;;  %v776_v35 = vrot.slane %v753_v25, 4  ;;  %1897 = vrot.lane.b32.xlu1 %v10640_v53, %s11846_s0  ;;  %1895 = vrot.lane.b32.xlu0 %v10639_v30, %s11846_s0 }
  0xaf   :  { %10608 = vmatmul.mubr.msk.bf16.vlgmr.msra.gmra.mrb[8].mxu1 %vm1036_vm4, %v12564_v37 }
  0xb0   :  { %v799_v18 = vsel %vm786_vm6, %v774_v5, %v775_v55  ;;  %v801_v39 = vsel %vm786_vm6, %v775_v55, %v776_v35  ;;  %1455 = vmatprep.mubr.bf16.mxu1 %v14387_v11 }
  0xb1   :  { %v12658_v22 = vsel %vm784_vm5, %v799_v18, %v751_v6  ;;  %v964_v36 = vpop.permute.xlu0 %963  ;;  %v966_v38 = vpop.permute.xlu1 %965  ;;  %v12664_v15 = vsel %vm784_vm5, %v801_v39, %v753_v25 }
  0xb2   :  { %v841_v46 = vmul.bf16 %v12658_v22, %v12184_v45  ;;  %v1016_v5 = vsel %vm1003_vm3, %v962_v43, %v964_v36  ;;  %1901 = vrot.lane.b32.xlu1 %v10642_v54, %s11846_s0  ;;  %1899 = vrot.lane.b32.xlu0 %v10641_v61, %s11846_s0  ;;  %v1017_v34 = vsel %vm1003_vm3, %v964_v36, %v966_v38 }
  0xb3   :  { %10609 = vmatprep.subr.msk.bf16.mxu0 %vm63_vm0, %v1017_v34  ;;  %v842_v24 = vmul.bf16 %v12664_v15, %v12211_v12  ;;  %v1077_v44 = vsel %vm63_vm0, %v1016_v5, 0 }
  0xb4   :  { %v10644_v53 = vcombine.high %v841_v46, %v841_v46  ;;  %v10643_v25 = vcombine.low %v841_v46, %v841_v46  ;;  %1383 = vmatpush1.bf16.msra.mxu0 %v1077_v44 }
  0xb5   :  { %v968_v6 = vpop.permute.xlu0 %967  ;;  %v970_v45 = vpop.permute.xlu1 %969  ;;  %v10645_v39 = vcombine.low %v842_v24, %v842_v24  ;;  %v10646_v44 = vcombine.high %v842_v24, %v842_v24 }
  0xb6   :  { %v1018_v43 = vsel %vm1003_vm3, %v966_v38, %v968_v6  ;;  %v1019_v30 = vsel %vm1003_vm3, %v968_v6, %v970_v45  ;;  %1905 = vrot.lane.b32.xlu1 %v10644_v53, %s11846_s0  ;;  %1903 = vrot.lane.b32.xlu0 %v10643_v25, %s11846_s0 }
  0xb7   :  { %v1083_v55 = vsel %vm63_vm0, %v1018_v43, 0  ;;  %10611 = vmatprep.subr.msk.bf16.mxu1 %vm63_vm0, %v1019_v30  ;;  %10610 = vmatmul.mubr.msk.bf16.vlgmr.msra.gmra.mrb[12].mxu0 %vm1036_vm4, %v12564_v37 }
  0xb8   :  { %1424 = vmatpush1.bf16.msra.mxu1 %v1083_v55  ;;  %1496 = vmatprep.mubr.bf16.mxu0 %v14387_v11 }
  0xb9   :  { %v755_v12 = vpop.permute.xlu0 %754  ;;  %v757_v18 = vpop.permute.xlu1 %756 }
  0xba   :  { %v777_v36 = vrot.slane %v755_v12, 4  ;;  %v778_v54 = vrot.slane %v757_v18, 4  ;;  %3287 = vrot.lane.b32.xlu1 %v12422_v19, %s11846_s0  ;;  %1907 = vrot.lane.b32.xlu0 %v10645_v39, %s11846_s0 }
  0xbb   :  { %10612 = vmatmul.mubr.msk.bf16.vlgmr.msra.gmra.mrb[12].mxu1 %vm1036_vm4, %v12564_v37 }
  0xbc   :  { %v803_v38 = vsel %vm786_vm6, %v776_v35, %v777_v36  ;;  %v805_v61 = vsel %vm786_vm6, %v777_v36, %v778_v54  ;;  %1537 = vmatprep.mubr.bf16.mxu1 %v14387_v11 }
  0xbd   :  { %v12691_v46 = vsel %vm784_vm5, %v803_v38, %v755_v12  ;;  %v972_v5 = vpop.permute.xlu0 %971  ;;  %v974_v34 = vpop.permute.xlu1 %973  ;;  %v12697_v53 = vsel %vm784_vm5, %v805_v61, %v757_v18 }
  0xbe   :  { %v843_v6 = vmul.bf16 %v12691_v46, %v12319_v23  ;;  %v1020_v35 = vsel %vm1003_vm3, %v970_v45, %v972_v5  ;;  %1909 = vrot.lane.b32.xlu1 %v10646_v44, %s11846_s0  ;;  %3289 = vrot.lane.b32.xlu0 %v12426_v57, %s11846_s0  ;;  %v1021_v25 = vsel %vm1003_vm3, %v972_v5, %v974_v34 }
  0xbf   :  { %10613 = vmatprep.subr.msk.bf16.mxu0 %vm63_vm0, %v1021_v25  ;;  %v844_v24 = vmul.bf16 %v12697_v53, %v12321_v26  ;;  %v1089_v43 = vsel %vm63_vm0, %v1020_v35, 0 }
  0xc0   :  { %v10648_v55 = vcombine.high %v843_v6, %v843_v6  ;;  %v10647_v12 = vcombine.low %v843_v6, %v843_v6  ;;  %1465 = vmatpush1.bf16.msra.mxu0 %v1089_v43 }
  0xc1   :  { %v976_v23 = vpop.permute.xlu0 %975  ;;  %v978_v30 = vpop.permute.xlu1 %977  ;;  %v10649_v38 = vcombine.low %v844_v24, %v844_v24  ;;  %v10650_v25 = vcombine.high %v844_v24, %v844_v24 }
  0xc2   :  { %v1022_v45 = vsel %vm1003_vm3, %v974_v34, %v976_v23  ;;  %v1023_v18 = vsel %vm1003_vm3, %v976_v23, %v978_v30  ;;  %1913 = vrot.lane.b32.xlu1 %v10648_v55, %s11846_s0  ;;  %1911 = vrot.lane.b32.xlu0 %v10647_v12, %s11846_s0 }
  0xc3   :  { %v1095_v39 = vsel %vm63_vm0, %v1022_v45, 0  ;;  %10615 = vmatprep.subr.msk.bf16.mxu1 %vm63_vm0, %v1023_v18  ;;  %10614 = vmatmul.mubr.msk.bf16.vlgmr.msra.gmra.mrb[16].mxu0 %vm1036_vm4, %v12564_v37 }
  0xc4   :  { %1506 = vmatpush1.bf16.msra.mxu1 %v1095_v39  ;;  %1578 = vmatprep.mubr.bf16.mxu0 %v14387_v11 }
  0xc5   :  { %v759_v26 = vpop.permute.xlu0 %758  ;;  %v761_v36 = vpop.permute.xlu1 %760 }
  0xc6   :  { %v779_v61 = vrot.slane %v759_v26, 4  ;;  %v780_v5 = vrot.slane %v761_v36, 4  ;;  %3291 = vrot.lane.b32.xlu1 %v12449_v63, %s11846_s0  ;;  %1915 = vrot.lane.b32.xlu0 %v10649_v38, %s11846_s0 }
  0xc7   :  { %10616 = vmatmul.mubr.msk.bf16.vlgmr.msra.gmra.mrb[16].mxu1 %vm1036_vm4, %v12564_v37 }
  0xc8   :  { %v807_v34 = vsel %vm786_vm6, %v778_v54, %v779_v61  ;;  %v809_v44 = vsel %vm786_vm6, %v779_v61, %v780_v5  ;;  %1619 = vmatprep.mubr.bf16.mxu1 %v14387_v11 }
  0xc9   :  { %v12725_v6 = vsel %vm784_vm5, %v807_v34, %v759_v26  ;;  %v980_v35 = vpop.permute.xlu0 %979  ;;  %v982_v43 = vpop.permute.xlu1 %981  ;;  %v12731_v55 = vsel %vm784_vm5, %v809_v44, %v761_v36 }
  0xca   :  { %v845_v23 = vmul.bf16 %v12725_v6, %v12445_v62  ;;  %v1024_v54 = vsel %vm1003_vm3, %v978_v30, %v980_v35  ;;  %1917 = vrot.lane.b32.xlu1 %v10650_v25, %s11846_s0  ;;  %3293 = vrot.lane.b32.xlu0 %v12451_v60, %s11846_s0  ;;  %v1025_v12 = vsel %vm1003_vm3, %v980_v35, %v982_v43 }
  0xcb   :  { %10617 = vmatprep.subr.msk.bf16.mxu0 %vm63_vm0, %v1025_v12  ;;  %v846_v24 = vmul.bf16 %v12731_v55, %v12466_v28  ;;  %v1101_v30 = vsel %vm63_vm0, %v1024_v54, 0 }
  0xcc   :  { %v10652_v18 = vcombine.high %v845_v23, %v845_v23  ;;  %v10651_v62 = vcombine.low %v845_v23, %v845_v23  ;;  %1547 = vmatpush1.bf16.msra.mxu0 %v1101_v30 }
  0xcd   :  { %v984_v45 = vpop.permute.xlu0 %983  ;;  %v986_v39 = vpop.permute.xlu1 %985  ;;  %v10653_v61 = vcombine.low %v846_v24, %v846_v24 }
  0xce   :  { %v1026_v26 = vsel %vm1003_vm3, %v982_v43, %v984_v45  ;;  %v1027_v36 = vsel %vm1003_vm3, %v984_v45, %v986_v39  ;;  %1921 = vrot.lane.b32.xlu1 %v10652_v18, %s11846_s0  ;;  %1919 = vrot.lane.b32.xlu0 %v10651_v62, %s11846_s0  ;;  %v10654_v45 = vcombine.high %v846_v24, %v846_v24 }
  0xcf   :  { %v1107_v38 = vsel %vm63_vm0, %v1026_v26, 0  ;;  %10619 = vmatprep.subr.msk.bf16.mxu1 %vm63_vm0, %v1027_v36  ;;  %10618 = vmatmul.mubr.msk.bf16.vlgmr.msra.gmra.mrb[20].mxu0 %vm1036_vm4, %v12564_v37 }
  0xd0   :  { %1588 = vmatpush1.bf16.msra.mxu1 %v1107_v38  ;;  %1660 = vmatprep.mubr.bf16.mxu0 %v14387_v11 }
  0xd1   :  { %v763_v28 = vpop.permute.xlu0 %762  ;;  %v765_v34 = vpop.permute.xlu1 %764 }
  0xd2   :  { %v781_v44 = vrot.slane %v763_v28, 4  ;;  %v782_v35 = vrot.slane %v765_v34, 4  ;;  %3295 = vrot.lane.b32.xlu1 %v12468_v48, %s11846_s0  ;;  %1923 = vrot.lane.b32.xlu0 %v10653_v61, %s11846_s0 }
  0xd3   :  { %10620 = vmatmul.mubr.msk.bf16.vlgmr.msra.gmra.mrb[20].mxu1 %vm1036_vm4, %v12564_v37 }
  0xd4   :  { %v811_v25 = vsel %vm786_vm6, %v780_v5, %v781_v44  ;;  %v813_v43 = vsel %vm786_vm6, %v781_v44, %v782_v35  ;;  %1701 = vmatprep.mubr.bf16.mxu1 %v14387_v11 }
  0xd5   :  { %v12758_v23 = vsel %vm784_vm5, %v811_v25, %v763_v28  ;;  %v988_v54 = vpop.permute.xlu0 %987  ;;  %v12761_v12 = vsel %vm784_vm5, %v813_v43, %v765_v34  ;;  %v990_v18 = vpop.permute.xlu1 %989 }
  0xd6   :  { %v847_v5 = vmul.bf16 %v12758_v23, %v12492_v14  ;;  %v1028_v62 = vsel %vm1003_vm3, %v986_v39, %v988_v54  ;;  %v848_v26 = vmul.bf16 %v12761_v12, %v12506_v56  ;;  %1925 = vrot.lane.b32.xlu1 %v10654_v45, %s11846_s0  ;;  %3297 = vrot.lane.b32.xlu0 %v12482_v29, %s11846_s0 }
  0xd7   :  { %v1029_v24 = vsel %vm1003_vm3, %v988_v54, %v990_v18  ;;  %v1113_v30 = vsel %vm63_vm0, %v1028_v62, 0 }
  0xd8   :  { %v10656_v36 = vcombine.high %v847_v5, %v847_v5  ;;  %v10655_v38 = vcombine.low %v847_v5, %v847_v5  ;;  %10621 = vmatprep.subr.msk.bf16.mxu0 %vm63_vm0, %v1029_v24  ;;  %v10657_v61 = vcombine.low %v848_v26, %v848_v26  ;;  %v10658_v54 = vcombine.high %v848_v26, %v848_v26 }
  0xd9   :  { %v992_v28 = vpop.permute.xlu0 %991  ;;  %v994_v14 = vpop.permute.xlu1 %993  ;;  %1629 = vmatpush1.bf16.msra.mxu0 %v1113_v30 }
  0xda   :  { %v1030_v39 = vsel %vm1003_vm3, %v990_v18, %v992_v28  ;;  %v1031_v56 = vsel %vm1003_vm3, %v992_v28, %v994_v14  ;;  %1929 = vrot.lane.b32.xlu1 %v10656_v36, %s11846_s0  ;;  %1927 = vrot.lane.b32.xlu0 %v10655_v38, %s11846_s0 }
  0xdb   :  { %v1119_v34 = vsel %vm63_vm0, %v1030_v39, 0  ;;  %10623 = vmatprep.subr.msk.bf16.mxu1 %vm63_vm0, %v1031_v56 }
  0xdc   :  { %10622 = vmatmul.mubr.msk.bf16.vlgmr.msra.gmra.mrb[24].mxu0 %vm1036_vm4, %v12564_v37  ;;  %1670 = vmatpush1.bf16.msra.mxu1 %v1119_v34 }
  0xdd   :  { %v767_v44 = vpop.permute.xlu0 %766  ;;  %v996_v25 = vpop.permute.xlu1 %995  ;;  %1742 = vmatprep.mubr.bf16.mxu0 %v14387_v11 }
  0xde   :  { %v12785_v43 = vrot.slane %v767_v44, 4  ;;  %3299 = vrot.lane.b32.xlu1 %v12504_v51, %s11846_s0  ;;  %1931 = vrot.lane.b32.xlu0 %v10657_v61, %s11846_s0  ;;  %v1032_v45 = vsel %vm1003_vm3, %v994_v14, %v996_v25 }
  0xdf   :  { %10624 = vmatmul.mubr.msk.bf16.vlgmr.msra.gmra.mrb[24].mxu1 %vm1036_vm4, %v12564_v37 }
  0xe0   :  { %v815_v18 = vsel %vm786_vm6, %v782_v35, %v12785_v43  ;;  %1783 = vmatprep.mubr.bf16.mxu1 %v14387_v11  ;;  %v850_v36 = vmul.bf16 %v12785_v43, %v12531_v17  ;;  %v1125_v35 = vsel %vm63_vm0, %v1032_v45, 0  ;;  %v11808_v45 = vld [vmem:[#allocation2] sm:$0x77] }
  0xe1   :  { %v12796_v5 = vsel %vm784_vm5, %v815_v18, %v767_v44  ;;  %v998_v62 = vpop.permute.xlu0 %997  ;;  %v1000_v24 = vpop.permute.xlu1 %999 }
  0xe2   :  { %v849_v30 = vmul.bf16 %v12796_v5, %v12522_v10  ;;  %v1034_v26 = vsel %vm1003_vm3, %v998_v62, %v1000_v24  ;;  %1933 = vrot.lane.b32.xlu0 %v10658_v54, %s11846_s0  ;;  %v1033_v38 = vsel %vm1003_vm3, %v996_v25, %v998_v62  ;;  %v10661_v61 = vcombine.low %v850_v36, %v850_v36 }
  0xe3   :  { %10625 = vmatprep.subr.msk.bf16.mxu0 %vm63_vm0, %v1033_v38  ;;  %v1131_v10 = vsel %vm63_vm0, %v1034_v26, 0 }
  0xe4   :  { %v10659_v28 = vcombine.low %v849_v30, %v849_v30  ;;  %v10660_v14 = vcombine.high %v849_v30, %v849_v30  ;;  %1711 = vmatpush1.bf16.msra.mxu0 %v1125_v35 }
  0xe5   :  { %v1002_v39 = vpop.permute.xlu0 %1001  ;;  %v3270_v56 = vpop.permute.xlu1 %3269 }
  0xe6   :  { %1935 = vrot.lane.b32.xlu1 %v10659_v28, %s11846_s0  ;;  %v1035_v17 = vsel %vm1003_vm3, %v1000_v24, %v1002_v39  ;;  %v3301_v34 = vrot.slane %v3270_v56, 4  ;;  %1937 = vrot.lane.b32.xlu0 %v10660_v14, %s11846_s0  ;;  %v11809_v28 = vld [vmem:[#allocation2 + $0x8] sm:$0x77] }
  0xe7   :  { %10627 = vmatprep.subr.msk.bf16.mxu1 %vm63_vm0, %v1035_v17  ;;  %10626 = vmatmul.mubr.msk.bf16.vlgmr.msra.gmra.mrb[28].mxu0 %vm1036_vm4, %v12564_v37  ;;  %v11810_v17 = vld [vmem:[#allocation2 + $0x10] sm:$0x77] }
  0xe8   :  { %v12814_v44 = vsel %vm1941_vm7, %v3301_v34, %v3270_v56  ;;  %1752 = vmatpush1.bf16.msra.mxu1 %v1131_v10  ;;  %2105 = vmatprep.mubr.bf16.mxu0 %v14387_v11 }
  0xe9   :  { %v3272_v25 = vpop.permute.xlu0 %3271  ;;  %v3274_v54 = vpop.permute.xlu1 %3273  ;;  %v3365_v18 = vmul.bf16 %v11808_v45, %v12814_v44 }
  0xea   :  { %1939 = vrot.lane.b32.xlu1 %v10661_v61, %s11846_s0  ;;  %v3302_v62 = vrot.slane %v3272_v25, 4  ;;  %v3303_v24 = vrot.slane %v3274_v54, 4  ;;  %4369 = vrot.lane.b32.xlu0 %v12039_v16, %s11847_s8 }
  0xeb   :  { %10628 = vmatmul.mubr.msk.bf16.vlgmr.msra.gmra.mrb[28].mxu1 %vm1036_vm4, %v12564_v37  ;;  %v10711_v38 = vcombine.low %v3365_v18, %v3365_v18  ;;  %v10712_v16 = vcombine.high %v3365_v18, %v3365_v18  ;;  %v11811_v18 = vld [vmem:[#allocation2 + $0x18] sm:$0x77] }
  0xec   :  { %v3318_v30 = vsel %vm786_vm6, %v3301_v34, %v3302_v62  ;;  %v3320_v26 = vsel %vm786_vm6, %v3302_v62, %v3303_v24  ;;  %2146 = vmatprep.mubr.bf16.mxu1 %v14387_v11 }
  0xed   :  { %v12828_v36 = vsel %vm1941_vm7, %v3318_v30, %v3272_v25  ;;  %v3276_v35 = vpop.permute.xlu1 %3275  ;;  %v12837_v39 = vsel %vm1941_vm7, %v3320_v26, %v3274_v54  ;;  %v3278_v56 = vpop.permute.xlu0 %3277 }
  0xee   :  { %v3366_v14 = vmul.bf16 %v11809_v28, %v12828_v36  ;;  %4371 = vrot.lane.b32.xlu1 %v12076_v31, %s11847_s8  ;;  %4373 = vrot.lane.b32.xlu0 %v12050_v21, %s11847_s8  ;;  %v3304_v37 = vrot.slane %v3276_v35, 4  ;;  %v3367_v61 = vmul.bf16 %v11810_v17, %v12837_v39  ;;  %v3305_v25 = vrot.slane %v3278_v56, 4  ;;  %v11812_v28 = vld [vmem:[#allocation2 + $0x20] sm:$0x77] }
  0xf0   :  { %v10713_v10 = vcombine.low %v3366_v14, %v3366_v14  ;;  %v10714_v34 = vcombine.high %v3366_v14, %v3366_v14  ;;  %v3322_v31 = vsel %vm786_vm6, %v3303_v24, %v3304_v37  ;;  %v10715_v45 = vcombine.low %v3367_v61, %v3367_v61  ;;  %v14389_v14 = vld [vmem:[#allocation3_spill] sm:$0xff] }
  0xf1   :  { %v12846_v21 = vsel %vm1941_vm7, %v3322_v31, %v3276_v35  ;;  %v3324_v54 = vsel %vm786_vm6, %v3304_v37, %v3305_v25  ;;  %v10716_v30 = vcombine.high %v3367_v61, %v3367_v61  ;;  %v3280_v26 = vpop.permute.xlu1 %3279 }
  0xf2   :  { %3467 = vrot.lane.b32.xlu1 %v10711_v38, %s11845_s28  ;;  %3469 = vrot.lane.b32.xlu0 %v10712_v16, %s11845_s28  ;;  %v3368_v62 = vmul.bf16 %v11811_v18, %v12846_v21  ;;  %v12854_v24 = vsel %vm1941_vm7, %v3324_v54, %v3278_v56  ;;  %v3306_v16 = vrot.slane %v3280_v26, 4  ;;  %v14390_v18 = vld [vmem:[#allocation4_spill] sm:$0xff] }
  0xf3   :  { %v3369_v35 = vmul.bf16 %v11812_v28, %v12854_v24 }
  0xf4   :  { %v10717_v38 = vcombine.low %v3368_v62, %v3368_v62  ;;  %v10718_v37 = vcombine.high %v3368_v62, %v3368_v62  ;;  %v3326_v61 = vsel %vm786_vm6, %v3305_v25, %v3306_v16  ;;  %v11813_v25 = vld [vmem:[#allocation2 + $0x28] sm:$0x77] }
  0xf5   :  { %v10719_v17 = vcombine.low %v3369_v35, %v3369_v35  ;;  %v12864_v56 = vsel %vm1941_vm7, %v3326_v61, %v3280_v26  ;;  %v3284_v54 = vpop.permute.xlu1 %3283  ;;  %v14391_v26 = vld [vmem:[#allocation5_spill] sm:$0xff] }
  0xf6   :  { %3471 = vrot.lane.b32.xlu1 %v10713_v10, %s11845_s28  ;;  %3473 = vrot.lane.b32.xlu0 %v10714_v34, %s11845_s28  ;;  %v3282_v10 = vpop.permute.xlu0 %3281  ;;  %v3370_v62 = vmul.bf16 %v11813_v25, %v12864_v56 }
  0xfa   :  { %3475 = vrot.lane.b32.xlu1 %v10715_v45, %s11845_s28  ;;  %4375 = vrot.lane.b32.xlu0 %v12108_v52, %s11847_s8  ;;  %v3307_v52 = vrot.slane %v3282_v10, 4  ;;  %v12866_v34 = vpop.permute.xlu0 %3285  ;;  %v10720_v45 = vcombine.high %v3369_v35, %v3369_v35  ;;  %v11814_v35 = vld [vmem:[#allocation2 + $0x30] sm:$0x77] }
  0xfc   :  { %v3328_v31 = vsel %vm786_vm6, %v3306_v16, %v3307_v52  ;;  %v10721_v16 = vcombine.low %v3370_v62, %v3370_v62 }
  0xfe   :  { %4377 = vrot.lane.b32.xlu1 %v14389_v14, %s11847_s8  ;;  %3477 = vrot.lane.b32.xlu0 %v10716_v30, %s11845_s28  ;;  %v12874_v30 = vsel %vm1941_vm7, %v3328_v31, %v3282_v10 }
 0x102   :  { %3479 = vrot.lane.b32.xlu1 %v10717_v38, %s11845_s28  ;;  %3481 = vrot.lane.b32.xlu0 %v10718_v37, %s11845_s28  ;;  %v3308_v38 = vrot.slane %v3284_v54, 4  ;;  %v3371_v37 = vmul.bf16 %v11814_v35, %v12874_v30 }
 0x104   :  { %v3330_v61 = vsel %vm786_vm6, %v3307_v52, %v3308_v38  ;;  %v10723_v10 = vcombine.low %v3371_v37, %v3371_v37 }
 0x106   :  { %3483 = vrot.lane.b32.xlu1 %v10719_v17, %s11845_s28  ;;  %4379 = vrot.lane.b32.xlu0 %v14390_v18, %s11847_s8  ;;  %v10722_v17 = vcombine.high %v3370_v62, %v3370_v62  ;;  %v3309_v18 = vrot.slane %v12866_v34, 4 }
 0x108   :  { %v3332_v62 = vsel %vm786_vm6, %v3308_v38, %v3309_v18 }
 0x109   :  { %v12901_v38 = vsel %vm1941_vm7, %v3332_v62, %v12866_v34 }
 0x10a   :  { %4381 = vrot.lane.b32.xlu1 %v14391_v26, %s11847_s8  ;;  %3485 = vrot.lane.b32.xlu0 %v10720_v45, %s11845_s28  ;;  %v12886_v45 = vsel %vm1941_vm7, %v3330_v61, %v3284_v54 }
 0x10b   :  { %v1876_v28 = vpop.permute.xlu0 %1875  ;;  %v1878_v14 = vpop.permute.xlu1 %1877 }
 0x10c   :  { %v1942_v31 = vsel %vm1941_vm7, %v1876_v28, %v1878_v14 }
 0x10d   :  { %v1978_v28 = vsel %vm63_vm0, %v1942_v31, 0 }
 0x10e   :  { %3487 = vrot.lane.b32.xlu1 %v10721_v16, %s11845_s28  ;;  %3489 = vrot.lane.b32.xlu0 %v10722_v17, %s11845_s28  ;;  %v11815_v16 = vld [vmem:[#allocation2 + $0x38] sm:$0x77]  ;;  %v10724_v17 = vcombine.high %v3371_v37, %v3371_v37 }
 0x10f   :  { %v3372_v54 = vmul.bf16 %v11815_v16, %v12886_v45 }
 0x110   :  { %v1880_v25 = vpop.permute.xlu0 %1879  ;;  %v1882_v26 = vpop.permute.xlu1 %1881 }
 0x111   :  { %v1943_v52 = vsel %vm1941_vm7, %v1878_v14, %v1880_v25  ;;  %v1944_v35 = vsel %vm1941_vm7, %v1880_v25, %v1882_v26  ;;  %v10725_v31 = vcombine.low %v3372_v54, %v3372_v54  ;;  %v11816_v25 = vld [vmem:[#allocation2 + $0x40] sm:$0x77] }
 0x112   :  { %3491 = vrot.lane.b32.xlu1 %v10723_v10, %s11845_s28  ;;  %4383 = vrot.lane.b32.xlu0 %v12245_v9, %s11847_s8  ;;  %v12906_v9 = vld [vmem:[%s14355_s1] sm:$0x3]  ;;  %v1984_v37 = vsel %vm63_vm0, %v1944_v35, 0  ;;  %v3373_v62 = vmul.bf16 %v11816_v25, %v12901_v38 }
 0x113   :  { %10662 = vmatprep.subr.msk.bf16.mxu0 %vm63_vm0, %v1943_v52 }
 0x114   :  { %2074 = vmatpush1.bf16.msra.mxu0 %v1978_v28  ;;  %v1884_v61 = vpop.permute.xlu0 %1883  ;;  %v1886_v14 = vpop.permute.xlu1 %1885  ;;  %v10726_v28 = vcombine.high %v3372_v54, %v3372_v54  ;;  %v10728_v25 = vcombine.high %v3373_v62, %v3373_v62 }
 0x115   :  { %v1945_v10 = vsel %vm1941_vm7, %v1882_v26, %v1884_v61  ;;  %v1946_v52 = vsel %vm1941_vm7, %v1884_v61, %v1886_v14 }
 0x116   :  { %4385 = vrot.lane.b32.xlu1 %v12266_v0, %s11847_s8  ;;  %3493 = vrot.lane.b32.xlu0 %v10724_v17, %s11845_s28  ;;  %v1990_v35 = vsel %vm63_vm0, %v1946_v52, 0  ;;  %v10727_v17 = vcombine.low %v3373_v62, %v3373_v62 }
 0x117   :  { %10664 = vmatprep.subr.msk.bf16.mxu1 %vm63_vm0, %v1945_v10  ;;  %10663 = vmatmul.mubr.msk.bf16.vlgmr.msra.gmra.mrb[0].mxu0 %vm1036_vm4, %v12906_v9 }
 0x118   :  { %2115 = vmatpush1.bf16.msra.mxu1 %v1984_v37  ;;  %v1888_v0 = vpop.permute.xlu0 %1887  ;;  %v1890_v16 = vpop.permute.xlu1 %1889  ;;  %2187 = vmatprep.mubr.bf16.mxu0 %v14387_v11 }
 0x119   :  { %v1947_v26 = vsel %vm1941_vm7, %v1886_v14, %v1888_v0  ;;  %v1948_v61 = vsel %vm1941_vm7, %v1888_v0, %v1890_v16 }
 0x11a   :  { %3495 = vrot.lane.b32.xlu1 %v10725_v31, %s11845_s28  ;;  %3497 = vrot.lane.b32.xlu0 %v10726_v28, %s11845_s28  ;;  %v1996_v37 = vsel %vm63_vm0, %v1948_v61, 0 }
 0x11b   :  { %10666 = vmatprep.subr.msk.bf16.mxu0 %vm63_vm0, %v1947_v26  ;;  %10665 = vmatmul.mubr.msk.bf16.vlgmr.msra.gmra.mrb[0].mxu1 %vm1036_vm4, %v12906_v9 }
 0x11c   :  { %2156 = vmatpush1.bf16.msra.mxu0 %v1990_v35  ;;  %v1892_v54 = vpop.permute.xlu0 %1891  ;;  %v1894_v10 = vpop.permute.xlu1 %1893  ;;  %2228 = vmatprep.mubr.bf16.mxu1 %v14387_v11 }
 0x11d   :  { %v1949_v14 = vsel %vm1941_vm7, %v1890_v16, %v1892_v54  ;;  %v1950_v31 = vsel %vm1941_vm7, %v1892_v54, %v1894_v10 }
 0x11e   :  { %3499 = vrot.lane.b32.xlu1 %v10727_v17, %s11845_s28  ;;  %4387 = vrot.lane.b32.xlu0 %v12268_v20, %s11847_s8  ;;  %v2002_v20 = vsel %vm63_vm0, %v1950_v31, 0 }
 0x11f   :  { %10668 = vmatprep.subr.msk.bf16.mxu1 %vm63_vm0, %v1949_v14  ;;  %10667 = vmatmul.mubr.msk.bf16.vlgmr.msra.gmra.mrb[4].mxu0 %vm1036_vm4, %v12906_v9 }
 0x120   :  { %2197 = vmatpush1.bf16.msra.mxu1 %v1996_v37  ;;  %v1896_v52 = vpop.permute.xlu0 %1895  ;;  %v1898_v28 = vpop.permute.xlu1 %1897  ;;  %2269 = vmatprep.mubr.bf16.mxu0 %v14387_v11 }
 0x121   :  { %v1951_v0 = vsel %vm1941_vm7, %v1894_v10, %v1896_v52  ;;  %v1952_v16 = vsel %vm1941_vm7, %v1896_v52, %v1898_v28 }
 0x122   :  { %4389 = vrot.lane.b32.xlu1 %v12317_v33, %s11847_s8  ;;  %3501 = vrot.lane.b32.xlu0 %v10728_v25, %s11845_s28  ;;  %v2008_v33 = vsel %vm63_vm0, %v1952_v16, 0 }
 0x123   :  { %10670 = vmatprep.subr.msk.bf16.mxu0 %vm63_vm0, %v1951_v0  ;;  %10669 = vmatmul.mubr.msk.bf16.vlgmr.msra.gmra.mrb[4].mxu1 %vm1036_vm4, %v12906_v9 }
 0x124   :  { %2238 = vmatpush1.bf16.msra.mxu0 %v2002_v20  ;;  %v1900_v62 = vpop.permute.xlu0 %1899  ;;  %v1902_v26 = vpop.permute.xlu1 %1901  ;;  %2310 = vmatprep.mubr.bf16.mxu1 %v14387_v11 }
 0x125   :  { %v1953_v35 = vsel %vm1941_vm7, %v1898_v28, %v1900_v62  ;;  %v1954_v17 = vsel %vm1941_vm7, %v1900_v62, %v1902_v26 }
 0x126   :  { %10672 = vmatprep.subr.msk.bf16.mxu1 %vm63_vm0, %v1953_v35  ;;  %v2014_v14 = vsel %vm63_vm0, %v1954_v17, 0  ;;  %v11817_v35 = vld [vmem:[#allocation2 + $0x48] sm:$0x77] }
 0x127   :  { %2279 = vmatpush1.bf16.msra.mxu1 %v2008_v33  ;;  %10671 = vmatmul.mubr.msk.bf16.vlgmr.msra.gmra.mrb[8].mxu0 %vm1036_vm4, %v12906_v9 }
 0x128   :  { %v1904_v61 = vpop.permute.xlu0 %1903  ;;  %v1906_v54 = vpop.permute.xlu1 %1905  ;;  %2351 = vmatprep.mubr.bf16.mxu0 %v14387_v11 }
 0x129   :  { %v1955_v10 = vsel %vm1941_vm7, %v1902_v26, %v1904_v61  ;;  %v1956_v37 = vsel %vm1941_vm7, %v1904_v61, %v1906_v54 }
 0x12a   :  { %10674 = vmatprep.subr.msk.bf16.mxu0 %vm63_vm0, %v1955_v10  ;;  %v2020_v0 = vsel %vm63_vm0, %v1956_v37, 0 }
 0x12b   :  { %2320 = vmatpush1.bf16.msra.mxu0 %v2014_v14  ;;  %10673 = vmatmul.mubr.msk.bf16.vlgmr.msra.gmra.mrb[8].mxu1 %vm1036_vm4, %v12906_v9 }
 0x12c   :  { %v1908_v31 = vpop.permute.xlu0 %1907  ;;  %v3288_v25 = vpop.permute.xlu1 %3287  ;;  %2392 = vmatprep.mubr.bf16.mxu1 %v14387_v11 }
 0x12d   :  { %v3310_v52 = vrot.slane %v3288_v25, 4  ;;  %v1957_v28 = vsel %vm1941_vm7, %v1906_v54, %v1908_v31 }
 0x12e   :  { %10676 = vmatprep.subr.msk.bf16.mxu1 %vm63_vm0, %v1957_v28  ;;  %v11818_v28 = vld [vmem:[#allocation2 + $0x50] sm:$0x77] }
 0x12f   :  { %v3334_v20 = vsel %vm786_vm6, %v3309_v18, %v3310_v52  ;;  %2361 = vmatpush1.bf16.msra.mxu1 %v2020_v0  ;;  %10675 = vmatmul.mubr.msk.bf16.vlgmr.msra.gmra.mrb[12].mxu0 %vm1036_vm4, %v12906_v9 }
 0x130   :  { %v12971_v16 = vsel %vm1941_vm7, %v3334_v20, %v3288_v25  ;;  %v3290_v62 = vpop.permute.xlu0 %3289  ;;  %v1910_v26 = vpop.permute.xlu1 %1909  ;;  %2433 = vmatprep.mubr.bf16.mxu0 %v14387_v11 }
 0x131   :  { %v3374_v33 = vmul.bf16 %v11817_v35, %v12971_v16  ;;  %v3311_v17 = vrot.slane %v3290_v62, 4  ;;  %v1958_v34 = vsel %vm1941_vm7, %v1908_v31, %v1910_v26 }
 0x133   :  { %v10729_v61 = vcombine.low %v3374_v33, %v3374_v33  ;;  %v10730_v54 = vcombine.high %v3374_v33, %v3374_v33  ;;  %10677 = vmatmul.mubr.msk.bf16.vlgmr.msra.gmra.mrb[12].mxu1 %vm1036_vm4, %v12906_v9  ;;  %v3336_v18 = vsel %vm786_vm6, %v3310_v52, %v3311_v17  ;;  %v2026_v52 = vsel %vm63_vm0, %v1958_v34, 0 }
 0x134   :  { %v1912_v10 = vpop.permute.xlu0 %1911  ;;  %v1914_v14 = vpop.permute.xlu1 %1913  ;;  %2474 = vmatprep.mubr.bf16.mxu1 %v14387_v11  ;;  %v12981_v37 = vsel %vm1941_vm7, %v3336_v18, %v3290_v62 }
 0x135   :  { %3505 = vrot.lane.b32.xlu0 %v10730_v54, %s11845_s28  ;;  %3503 = vrot.lane.b32.xlu1 %v10729_v61, %s11845_s28  ;;  %v1959_v25 = vsel %vm1941_vm7, %v1910_v26, %v1912_v10  ;;  %v3375_v31 = vmul.bf16 %v11818_v28, %v12981_v37  ;;  %v1960_v0 = vsel %vm1941_vm7, %v1912_v10, %v1914_v14 }
 0x136   :  { %10678 = vmatprep.subr.msk.bf16.mxu0 %vm63_vm0, %v1959_v25  ;;  %v2032_v26 = vsel %vm63_vm0, %v1960_v0, 0 }
 0x137   :  { %2402 = vmatpush1.bf16.msra.mxu0 %v2026_v52  ;;  %v10731_v20 = vcombine.low %v3375_v31, %v3375_v31  ;;  %v10732_v54 = vcombine.high %v3375_v31, %v3375_v31 }
 0x138   :  { %v1916_v35 = vpop.permute.xlu0 %1915  ;;  %v3292_v62 = vpop.permute.xlu1 %3291 }
 0x139   :  { %v3312_v33 = vrot.slane %v3292_v62, 4  ;;  %4391 = vrot.lane.b32.xlu0 %v12359_v8, %s11847_s8  ;;  %v1961_v61 = vsel %vm1941_vm7, %v1914_v14, %v1916_v35  ;;  %3507 = vrot.lane.b32.xlu1 %v10731_v20, %s11845_s28  ;;  %v11819_v14 = vld [vmem:[#allocation2 + $0x58] sm:$0x77] }
 0x13a   :  { %10680 = vmatprep.subr.msk.bf16.mxu1 %vm63_vm0, %v1961_v61  ;;  %10679 = vmatmul.mubr.msk.bf16.vlgmr.msra.gmra.mrb[16].mxu0 %vm1036_vm4, %v12906_v9 }
 0x13b   :  { %v3338_v34 = vsel %vm786_vm6, %v3311_v17, %v3312_v33  ;;  %2443 = vmatpush1.bf16.msra.mxu1 %v2032_v26  ;;  %2515 = vmatprep.mubr.bf16.mxu0 %v14387_v11  ;;  %v11820_v26 = vld [vmem:[#allocation2 + $0x60] sm:$0x77] }
 0x13c   :  { %v13000_v18 = vsel %vm1941_vm7, %v3338_v34, %v3292_v62  ;;  %v3294_v10 = vpop.permute.xlu0 %3293  ;;  %v1918_v8 = vpop.permute.xlu1 %1917 }
 0x13d   :  { %14392 = vst [vmem:[#allocation3_spill] sm:$0xff] %v13000_v18  ;;  %v3376_v25 = vmul.bf16 %v11819_v14, %v13000_v18  ;;  %v3313_v28 = vrot.slane %v3294_v10, 4  ;;  %3509 = vrot.lane.b32.xlu0 %v10732_v54, %s11845_s28  ;;  %4393 = vrot.lane.b32.xlu1 %v12440_v58, %s11847_s8  ;;  %v1962_v52 = vsel %vm1941_vm7, %v1916_v35, %v1918_v8  ;;  %v13581_v18 = vld [vmem:[#allocation2 + $0x6c] sm:$0x77] }
 0x13e   :  { %10681 = vmatmul.mubr.msk.bf16.vlgmr.msra.gmra.mrb[16].mxu1 %vm1036_vm4, %v12906_v9  ;;  %v2038_v35 = vsel %vm63_vm0, %v1962_v52, 0 }
 0x13f   :  { %v10733_v17 = vcombine.low %v3376_v25, %v3376_v25  ;;  %v10734_v31 = vcombine.high %v3376_v25, %v3376_v25  ;;  %2556 = vmatprep.mubr.bf16.mxu1 %v14387_v11  ;;  %v3340_v0 = vsel %vm786_vm6, %v3312_v33, %v3313_v28 }
 0x140   :  { %v1920_v20 = vpop.permute.xlu0 %1919  ;;  %v1922_v62 = vpop.permute.xlu1 %1921  ;;  %v13013_v61 = vsel %vm1941_vm7, %v3340_v0, %v3294_v10 }
 0x141   :  { %14393 = vst [vmem:[#allocation4_spill] sm:$0xff] %v13013_v61  ;;  %3513 = vrot.lane.b32.xlu0 %v10734_v31, %s11845_s28  ;;  %v1963_v58 = vsel %vm1941_vm7, %v1918_v8, %v1920_v20  ;;  %v3377_v54 = vmul.bf16 %v11820_v26, %v13013_v61  ;;  %3511 = vrot.lane.b32.xlu1 %v10733_v17, %s11845_s28  ;;  %v5469_v61 = vld [vmem:[#allocation2 + $0x7c] sm:$0x77] }
 0x142   :  { %10682 = vmatprep.subr.msk.bf16.mxu0 %vm63_vm0, %v1963_v58  ;;  %v1964_v33 = vsel %vm1941_vm7, %v1920_v20, %v1922_v62 }
 0x143   :  { %2484 = vmatpush1.bf16.msra.mxu0 %v2038_v35  ;;  %v10735_v34 = vcombine.low %v3377_v54, %v3377_v54  ;;  %v2044_v17 = vsel %vm63_vm0, %v1964_v33, 0  ;;  %v10736_v31 = vcombine.high %v3377_v54, %v3377_v54 }
 0x144   :  { %v1924_v14 = vpop.permute.xlu0 %1923  ;;  %v3296_v10 = vpop.permute.xlu1 %3295 }
 0x145   :  { %v3314_v25 = vrot.slane %v3296_v10, 4  ;;  %4395 = vrot.lane.b32.xlu0 %v12486_v32, %s11847_s8  ;;  %v1965_v8 = vsel %vm1941_vm7, %v1922_v62, %v1924_v14  ;;  %3515 = vrot.lane.b32.xlu1 %v10735_v34, %s11845_s28  ;;  %v11821_v62 = vld [vmem:[#allocation2 + $0x68] sm:$0x77] }
 0x146   :  { %10684 = vmatprep.subr.msk.bf16.mxu1 %vm63_vm0, %v1965_v8  ;;  %10683 = vmatmul.mubr.msk.bf16.vlgmr.msra.gmra.mrb[20].mxu0 %vm1036_vm4, %v12906_v9 }
 0x147   :  { %v3342_v52 = vsel %vm786_vm6, %v3313_v28, %v3314_v25  ;;  %2525 = vmatpush1.bf16.msra.mxu1 %v2044_v17  ;;  %2597 = vmatprep.mubr.bf16.mxu0 %v14387_v11 }
 0x148   :  { %v13032_v0 = vsel %vm1941_vm7, %v3342_v52, %v3296_v10  ;;  %v3298_v20 = vpop.permute.xlu0 %3297  ;;  %v1926_v32 = vpop.permute.xlu1 %1925 }
 0x149   :  { %14394 = vst [vmem:[#allocation5_spill] sm:$0xff] %v13032_v0  ;;  %v3378_v58 = vmul.bf16 %v11821_v62, %v13032_v0  ;;  %v3315_v26 = vrot.slane %v3298_v20, 4  ;;  %3517 = vrot.lane.b32.xlu0 %v10736_v31, %s11845_s28  ;;  %4397 = vrot.lane.b32.xlu1 %v12490_v3, %s11847_s8  ;;  %v1966_v35 = vsel %vm1941_vm7, %v1924_v14, %v1926_v32  ;;  %v11822_v31 = vld [vmem:[#allocation2 + $0x70] sm:$0x77] }
 0x14a   :  { %10685 = vmatmul.mubr.msk.bf16.vlgmr.msra.gmra.mrb[20].mxu1 %vm1036_vm4, %v12906_v9  ;;  %v2050_v14 = vsel %vm63_vm0, %v1966_v35, 0  ;;  %v5468_v0 = vld [vmem:[#allocation2 + $0x74] sm:$0x77] }
 0x14b   :  { %v10737_v28 = vcombine.low %v3378_v58, %v3378_v58  ;;  %v10738_v54 = vcombine.high %v3378_v58, %v3378_v58  ;;  %2638 = vmatprep.mubr.bf16.mxu1 %v14387_v11  ;;  %v3344_v33 = vsel %vm786_vm6, %v3314_v25, %v3315_v26 }
 0x14c   :  { %v1928_v34 = vpop.permute.xlu0 %1927  ;;  %v1930_v10 = vpop.permute.xlu1 %1929  ;;  %v13045_v8 = vsel %vm1941_vm7, %v3344_v33, %v3298_v20 }
 0x14d   :  { %14395 = vst [vmem:[#allocation10_spill] sm:$0xff] %v13045_v8  ;;  %v1968_v17 = vsel %vm1941_vm7, %v1928_v34, %v1930_v10  ;;  %3521 = vrot.lane.b32.xlu0 %v10738_v54, %s11845_s28  ;;  %v1967_v3 = vsel %vm1941_vm7, %v1926_v32, %v1928_v34  ;;  %v3379_v52 = vmul.bf16 %v11822_v31, %v13045_v8 }
 0x14e   :  { %3519 = vrot.lane.b32.xlu1 %v10737_v28, %s11845_s28  ;;  %10686 = vmatprep.subr.msk.bf16.mxu0 %vm63_vm0, %v1967_v3  ;;  %v2056_v58 = vsel %vm63_vm0, %v1968_v17, 0  ;;  %v11824_v3 = vld [vmem:[#allocation2 + $0x80] sm:$0x7] }
 0x14f   :  { %2566 = vmatpush1.bf16.msra.mxu0 %v2050_v14  ;;  %v10739_v25 = vcombine.low %v3379_v52, %v3379_v52  ;;  %v10740_v54 = vcombine.high %v3379_v52, %v3379_v52 }
 0x150   :  { %v1932_v62 = vpop.permute.xlu0 %1931  ;;  %v3300_v20 = vpop.permute.xlu1 %3299 }
 0x151   :  { %v13055_v33 = vrot.slane %v3300_v20, 4  ;;  %4399 = vrot.lane.b32.xlu0 %v12517_v47, %s11847_s8  ;;  %v1969_v32 = vsel %vm1941_vm7, %v1930_v10, %v1932_v62  ;;  %v11823_v47 = vld [vmem:[#allocation2 + $0x78] sm:$0x77] }
 0x152   :  { %3523 = vrot.lane.b32.xlu1 %v10739_v25, %s11845_s28  ;;  %10688 = vmatprep.subr.msk.bf16.mxu1 %vm63_vm0, %v1969_v32 }
 0x153   :  { %14396 = vst [vmem:[#allocation11_spill] sm:$0xff] %v13055_v33  ;;  %v3346_v28 = vsel %vm786_vm6, %v3315_v26, %v13055_v33  ;;  %2607 = vmatpush1.bf16.msra.mxu1 %v2056_v58  ;;  %10687 = vmatmul.mubr.msk.bf16.vlgmr.msra.gmra.mrb[24].mxu0 %vm1036_vm4, %v12906_v9  ;;  %v3381_v31 = vmul.bf16 %v11824_v3, %v13055_v33 }
 0x154   :  { %v13067_v35 = vsel %vm1941_vm7, %v3346_v28, %v3300_v20  ;;  %v1934_v34 = vpop.permute.xlu0 %1933  ;;  %2679 = vmatprep.mubr.bf16.mxu0 %v14387_v11 }
 0x155   :  { %14397 = vst [vmem:[#allocation12_spill] sm:$0xff] %v13067_v35  ;;  %v3380_v10 = vmul.bf16 %v11823_v47, %v13067_v35  ;;  %v1970_v17 = vsel %vm1941_vm7, %v1932_v62, %v1934_v34  ;;  %v10743_v32 = vcombine.low %v3381_v31, %v3381_v31 }
 0x156   :  { %3525 = vrot.lane.b32.xlu1 %v10740_v54, %s11845_s28  ;;  %10689 = vmatmul.mubr.msk.bf16.vlgmr.msra.gmra.mrb[24].mxu1 %vm1036_vm4, %v12906_v9  ;;  %v2062_v25 = vsel %vm63_vm0, %v1970_v17, 0  ;;  %v4352_v17 = vld [vmem:[#allocation2] sm:$0x77] }
 0x157   :  { %v10741_v26 = vcombine.low %v3380_v10, %v3380_v10  ;;  %v10742_v52 = vcombine.high %v3380_v10, %v3380_v10  ;;  %2720 = vmatprep.mubr.bf16.mxu1 %v14387_v11 }
 0x158   :  { %v1936_v14 = vpop.permute.xlu1 %1935  ;;  %v1938_v20 = vpop.permute.xlu0 %1937 }
 0x159   :  { %v1971_v58 = vsel %vm1941_vm7, %v1934_v34, %v1936_v14  ;;  %v1972_v62 = vsel %vm1941_vm7, %v1936_v14, %v1938_v20  ;;  %3527 = vrot.lane.b32.xlu0 %v10741_v26, %s11845_s28 }
 0x15a   :  { %10690 = vmatprep.subr.msk.bf16.mxu0 %vm63_vm0, %v1971_v58  ;;  %3529 = vrot.lane.b32.xlu1 %v10742_v52, %s11845_s28  ;;  %v2068_v54 = vsel %vm63_vm0, %v1972_v62, 0 }
 0x15b   :  { %2648 = vmatpush1.bf16.msra.mxu0 %v2062_v25 }
 0x15c   :  { %v1940_v28 = vpop.permute.xlu1 %1939  ;;  %v4370_v47 = vpop.permute.xlu0 %4369 }
 0x15d   :  { %v1973_v10 = vsel %vm1941_vm7, %v1938_v20, %v1940_v28  ;;  %v4401_v3 = vrot.slane %v4370_v47, 4  ;;  %3531 = vrot.lane.b32.xlu0 %v10743_v32, %s11845_s28  ;;  %v4353_v20 = vld [vmem:[#allocation2 + $0x8] sm:$0x77]  ;;  %v4354_v28 = vld [vmem:[#allocation2 + $0x10] sm:$0x77] }
 0x15e   :  { %10692 = vmatprep.subr.msk.bf16.mxu1 %vm63_vm0, %v1973_v10  ;;  %10691 = vmatmul.mubr.msk.bf16.vlgmr.msra.gmra.mrb[28].mxu0 %vm1036_vm4, %v12906_v9 }
 0x15f   :  { %2689 = vmatpush1.bf16.msra.mxu1 %v2068_v54  ;;  %v4418_v34 = vsel %vm4417_vm8, %v4401_v3, %v4370_v47  ;;  %3696 = vmatprep.mubr.bf16.mxu0 %v14387_v11 }
 0x160   :  { %v4372_v31 = vpop.permute.xlu1 %4371  ;;  %v4466_v26 = vmul.bf16 %v4418_v34, %v4352_v17  ;;  %v4374_v52 = vpop.permute.xlu0 %4373 }
 0x161   :  { %v4402_v14 = vrot.slane %v4372_v31, 4  ;;  %v4403_v25 = vrot.slane %v4374_v52, 4 }
 0x162   :  { %10693 = vmatmul.mubr.msk.bf16.vlgmr.msra.gmra.mrb[28].mxu1 %vm1036_vm4, %v12906_v9  ;;  %v10777_v58 = vcombine.low %v4466_v26, %v4466_v26  ;;  %v10778_v62 = vcombine.high %v4466_v26, %v4466_v26 }
 0x163   :  { %v4419_v32 = vsel %vm786_vm6, %v4401_v3, %v4402_v14  ;;  %3737 = vmatprep.mubr.bf16.mxu1 %v14387_v11  ;;  %v4421_v47 = vsel %vm786_vm6, %v4402_v14, %v4403_v25 }
 0x164   :  { %v4420_v54 = vsel %vm4417_vm8, %v4419_v32, %v4372_v31  ;;  %v3468_v10 = vpop.permute.xlu1 %3467  ;;  %v4422_v17 = vsel %vm4417_vm8, %v4421_v47, %v4374_v52  ;;  %v3470_v33 = vpop.permute.xlu0 %3469  ;;  %4568 = vrot.lane.b32.xlu1 %v10777_v58, %s11848_s11  ;;  %4570 = vrot.lane.b32.xlu0 %v10778_v62, %s11848_s11  ;;  %v13110_v62 = vld [vmem:[%s14355_s1 + $0x4] sm:$0x3] }
 0x165   :  { %v4467_v34 = vmul.bf16 %v4420_v54, %v4353_v20  ;;  %v3533_v9 = vsel %vm784_vm5, %v3468_v10, %v3470_v33  ;;  %v4468_v3 = vmul.bf16 %v4422_v17, %v4354_v28 }
 0x166   :  { %v3569_v8 = vsel %vm63_vm0, %v3533_v9, 0 }
 0x167   :  { %v10779_v26 = vcombine.low %v4467_v34, %v4467_v34  ;;  %v10780_v35 = vcombine.high %v4467_v34, %v4467_v34  ;;  %v10781_v52 = vcombine.low %v4468_v3, %v4468_v3  ;;  %v10782_v20 = vcombine.high %v4468_v3, %v4468_v3 }
 0x168   :  { %v3472_v31 = vpop.permute.xlu1 %3471  ;;  %v3474_v32 = vpop.permute.xlu0 %3473 }
 0x169   :  { %4572 = vrot.lane.b32.xlu1 %v10779_v26, %s11848_s11  ;;  %4574 = vrot.lane.b32.xlu0 %v10780_v35, %s11848_s11  ;;  %v3534_v14 = vsel %vm784_vm5, %v3470_v33, %v3472_v31  ;;  %v3535_v58 = vsel %vm784_vm5, %v3472_v31, %v3474_v32 }
 0x16a   :  { %10744 = vmatprep.subr.msk.bf16.mxu0 %vm63_vm0, %v3534_v14  ;;  %v3575_v54 = vsel %vm63_vm0, %v3535_v58, 0 }
 0x16b   :  { %3665 = vmatpush1.bf16.msra.mxu0 %v3569_v8  ;;  %v4355_v8 = vld [vmem:[#allocation2 + $0x18] sm:$0x77] }
 0x16c   :  { %v3476_v28 = vpop.permute.xlu1 %3475  ;;  %v4376_v47 = vpop.permute.xlu0 %4375 }
 0x16d   :  { %4576 = vrot.lane.b32.xlu1 %v10781_v52, %s11848_s11  ;;  %4578 = vrot.lane.b32.xlu0 %v10782_v20, %s11848_s11  ;;  %v3536_v33 = vsel %vm784_vm5, %v3474_v32, %v3476_v28  ;;  %v4404_v35 = vrot.slane %v4376_v47, 4  ;;  %v4356_v32 = vld [vmem:[#allocation2 + $0x20] sm:$0x77] }
 0x16e   :  { %10746 = vmatprep.subr.msk.bf16.mxu1 %vm63_vm0, %v3536_v33  ;;  %10745 = vmatmul.mubr.msk.bf16.vlgmr.msra.gmra.mrb[0].mxu0 %vm1036_vm4, %v13110_v62 }
 0x16f   :  { %3706 = vmatpush1.bf16.msra.mxu1 %v3575_v54  ;;  %3778 = vmatprep.mubr.bf16.mxu0 %v14387_v11  ;;  %v4423_v10 = vsel %vm786_vm6, %v4403_v25, %v4404_v35 }
 0x170   :  { %v4378_v17 = vpop.permute.xlu1 %4377  ;;  %v4424_v34 = vsel %vm4417_vm8, %v4423_v10, %v4376_v47  ;;  %v3478_v9 = vpop.permute.xlu0 %3477 }
 0x171   :  { %v4405_v3 = vrot.slane %v4378_v17, 4  ;;  %v4469_v26 = vmul.bf16 %v4424_v34, %v4355_v8  ;;  %v3537_v31 = vsel %vm784_vm5, %v3476_v28, %v3478_v9 }
 0x172   :  { %10747 = vmatmul.mubr.msk.bf16.vlgmr.msra.gmra.mrb[0].mxu1 %vm1036_vm4, %v13110_v62  ;;  %v3581_v54 = vsel %vm63_vm0, %v3537_v31, 0 }
 0x173   :  { %v4425_v52 = vsel %vm786_vm6, %v4404_v35, %v4405_v3  ;;  %3819 = vmatprep.mubr.bf16.mxu1 %v14387_v11  ;;  %v10783_v14 = vcombine.low %v4469_v26, %v4469_v26  ;;  %v10784_v20 = vcombine.high %v4469_v26, %v4469_v26 }
 0x174   :  { %v4426_v25 = vsel %vm4417_vm8, %v4425_v52, %v4378_v17  ;;  %v3480_v58 = vpop.permute.xlu1 %3479  ;;  %v3482_v33 = vpop.permute.xlu0 %3481 }
 0x175   :  { %v4470_v47 = vmul.bf16 %v4426_v25, %v4356_v32  ;;  %v3538_v8 = vsel %vm784_vm5, %v3478_v9, %v3480_v58  ;;  %v3539_v28 = vsel %vm784_vm5, %v3480_v58, %v3482_v33  ;;  %4580 = vrot.lane.b32.xlu1 %v10783_v14, %s11848_s11  ;;  %4582 = vrot.lane.b32.xlu0 %v10784_v20, %s11848_s11  ;;  %v4357_v9 = vld [vmem:[#allocation2 + $0x28] sm:$0x77] }
 0x176   :  { %10748 = vmatprep.subr.msk.bf16.mxu0 %vm63_vm0, %v3538_v8  ;;  %v3587_v17 = vsel %vm63_vm0, %v3539_v28, 0 }
 0x177   :  { %v10785_v35 = vcombine.low %v4470_v47, %v4470_v47  ;;  %3747 = vmatpush1.bf16.msra.mxu0 %v3581_v54  ;;  %v10786_v10 = vcombine.high %v4470_v47, %v4470_v47  ;;  %v4358_v47 = vld [vmem:[#allocation2 + $0x30] sm:$0x77] }
 0x178   :  { %v3484_v34 = vpop.permute.xlu1 %3483  ;;  %v4380_v26 = vpop.permute.xlu0 %4379 }
 0x179   :  { %v3540_v31 = vsel %vm784_vm5, %v3482_v33, %v3484_v34  ;;  %v4406_v32 = vrot.slane %v4380_v26, 4  ;;  %4584 = vrot.lane.b32.xlu1 %v10785_v35, %s11848_s11  ;;  %4586 = vrot.lane.b32.xlu0 %v10786_v10, %s11848_s11 }
 0x17a   :  { %10750 = vmatprep.subr.msk.bf16.mxu1 %vm63_vm0, %v3540_v31  ;;  %10749 = vmatmul.mubr.msk.bf16.vlgmr.msra.gmra.mrb[4].mxu0 %vm1036_vm4, %v13110_v62 }
 0x17b   :  { %3788 = vmatpush1.bf16.msra.mxu1 %v3587_v17  ;;  %v4427_v52 = vsel %vm786_vm6, %v4405_v3, %v4406_v32  ;;  %3860 = vmatprep.mubr.bf16.mxu0 %v14387_v11 }
 0x17c   :  { %v4382_v14 = vpop.permute.xlu1 %4381  ;;  %v4428_v20 = vsel %vm4417_vm8, %v4427_v52, %v4380_v26  ;;  %v3486_v25 = vpop.permute.xlu0 %3485 }
 0x17d   :  { %v4407_v58 = vrot.slane %v4382_v14, 4  ;;  %v4471_v54 = vmul.bf16 %v4428_v20, %v4357_v9  ;;  %v3541_v33 = vsel %vm784_vm5, %v3484_v34, %v3486_v25 }
 0x17e   :  { %10751 = vmatmul.mubr.msk.bf16.vlgmr.msra.gmra.mrb[4].mxu1 %vm1036_vm4, %v13110_v62  ;;  %v3593_v9 = vsel %vm63_vm0, %v3541_v33, 0  ;;  %v4359_v33 = vld [vmem:[#allocation2 + $0x38] sm:$0x77] }
 0x17f   :  { %v4429_v8 = vsel %vm786_vm6, %v4406_v32, %v4407_v58  ;;  %3901 = vmatprep.mubr.bf16.mxu1 %v14387_v11  ;;  %v10787_v3 = vcombine.low %v4471_v54, %v4471_v54  ;;  %v10788_v28 = vcombine.high %v4471_v54, %v4471_v54 }
 0x180   :  { %v4430_v35 = vsel %vm4417_vm8, %v4429_v8, %v4382_v14  ;;  %v3488_v10 = vpop.permute.xlu1 %3487  ;;  %v3490_v26 = vpop.permute.xlu0 %3489 }
 0x181   :  { %v4472_v17 = vmul.bf16 %v4430_v35, %v4358_v47  ;;  %v3542_v31 = vsel %vm784_vm5, %v3486_v25, %v3488_v10  ;;  %4588 = vrot.lane.b32.xlu1 %v10787_v3, %s11848_s11  ;;  %v3543_v32 = vsel %vm784_vm5, %v3488_v10, %v3490_v26  ;;  %4590 = vrot.lane.b32.xlu0 %v10788_v28, %s11848_s11 }
 0x182   :  { %10752 = vmatprep.subr.msk.bf16.mxu0 %vm63_vm0, %v3542_v31  ;;  %v3599_v25 = vsel %vm63_vm0, %v3543_v32, 0 }
 0x183   :  { %v10789_v34 = vcombine.low %v4472_v17, %v4472_v17  ;;  %3829 = vmatpush1.bf16.msra.mxu0 %v3593_v9  ;;  %v10790_v52 = vcombine.high %v4472_v17, %v4472_v17 }
 0x184   :  { %v3492_v20 = vpop.permute.xlu1 %3491  ;;  %v4384_v14 = vpop.permute.xlu0 %4383 }
 0x185   :  { %v3544_v54 = vsel %vm784_vm5, %v3490_v26, %v3492_v20  ;;  %v4408_v47 = vrot.slane %v4384_v14, 4  ;;  %4592 = vrot.lane.b32.xlu1 %v10789_v34, %s11848_s11  ;;  %4594 = vrot.lane.b32.xlu0 %v10790_v52, %s11848_s11  ;;  %v4360_v26 = vld [vmem:[#allocation2 + $0x40] sm:$0x77] }
 0x186   :  { %10754 = vmatprep.subr.msk.bf16.mxu1 %vm63_vm0, %v3544_v54  ;;  %10753 = vmatmul.mubr.msk.bf16.vlgmr.msra.gmra.mrb[8].mxu0 %vm1036_vm4, %v13110_v62 }
 0x187   :  { %3870 = vmatpush1.bf16.msra.mxu1 %v3599_v25  ;;  %v4431_v8 = vsel %vm786_vm6, %v4407_v58, %v4408_v47  ;;  %3942 = vmatprep.mubr.bf16.mxu0 %v14387_v11 }
 0x188   :  { %v4386_v3 = vpop.permute.xlu1 %4385  ;;  %v4432_v28 = vsel %vm4417_vm8, %v4431_v8, %v4384_v14  ;;  %v3494_v35 = vpop.permute.xlu0 %3493 }
 0x189   :  { %v4409_v10 = vrot.slane %v4386_v3, 4  ;;  %v4473_v17 = vmul.bf16 %v4432_v28, %v4359_v33  ;;  %v3545_v31 = vsel %vm784_vm5, %v3492_v20, %v3494_v35 }
 0x18a   :  { %10755 = vmatmul.mubr.msk.bf16.vlgmr.msra.gmra.mrb[8].mxu1 %vm1036_vm4, %v13110_v62  ;;  %v3605_v33 = vsel %vm63_vm0, %v3545_v31, 0  ;;  %v4361_v31 = vld [vmem:[#allocation2 + $0x48] sm:$0x77] }
 0x18b   :  { %v4433_v9 = vsel %vm786_vm6, %v4408_v47, %v4409_v10  ;;  %3983 = vmatprep.mubr.bf16.mxu1 %v14387_v11  ;;  %v10791_v58 = vcombine.low %v4473_v17, %v4473_v17  ;;  %v10792_v34 = vcombine.high %v4473_v17, %v4473_v17 }
 0x18c   :  { %v4434_v32 = vsel %vm4417_vm8, %v4433_v9, %v4386_v3  ;;  %v3496_v52 = vpop.permute.xlu1 %3495  ;;  %v3498_v14 = vpop.permute.xlu0 %3497 }
 0x18d   :  { %v4474_v54 = vmul.bf16 %v4434_v32, %v4360_v26  ;;  %v3546_v25 = vsel %vm784_vm5, %v3494_v35, %v3496_v52  ;;  %4596 = vrot.lane.b32.xlu1 %v10791_v58, %s11848_s11  ;;  %v3547_v47 = vsel %vm784_vm5, %v3496_v52, %v3498_v14  ;;  %4598 = vrot.lane.b32.xlu0 %v10792_v34, %s11848_s11 }
 0x18e   :  { %10756 = vmatprep.subr.msk.bf16.mxu0 %vm63_vm0, %v3546_v25  ;;  %v3611_v35 = vsel %vm63_vm0, %v3547_v47, 0 }
 0x18f   :  { %v10793_v20 = vcombine.low %v4474_v54, %v4474_v54  ;;  %v10794_v8 = vcombine.high %v4474_v54, %v4474_v54  ;;  %3911 = vmatpush1.bf16.msra.mxu0 %v3605_v33  ;;  %v4362_v54 = vld [vmem:[#allocation2 + $0x50] sm:$0x77] }
 0x190   :  { %v3500_v28 = vpop.permute.xlu1 %3499  ;;  %v4388_v3 = vpop.permute.xlu0 %4387 }
 0x191   :  { %v3548_v17 = vsel %vm784_vm5, %v3498_v14, %v3500_v28  ;;  %v4410_v26 = vrot.slane %v4388_v3, 4  ;;  %4600 = vrot.lane.b32.xlu1 %v10793_v20, %s11848_s11  ;;  %4602 = vrot.lane.b32.xlu0 %v10794_v8, %s11848_s11 }
 0x192   :  { %10758 = vmatprep.subr.msk.bf16.mxu1 %vm63_vm0, %v3548_v17  ;;  %10757 = vmatmul.mubr.msk.bf16.vlgmr.msra.gmra.mrb[12].mxu0 %vm1036_vm4, %v13110_v62 }
 0x193   :  { %3952 = vmatpush1.bf16.msra.mxu1 %v3611_v35  ;;  %v4435_v9 = vsel %vm786_vm6, %v4409_v10, %v4410_v26  ;;  %4024 = vmatprep.mubr.bf16.mxu0 %v14387_v11 }
 0x194   :  { %v4390_v58 = vpop.permute.xlu1 %4389  ;;  %v4436_v34 = vsel %vm4417_vm8, %v4435_v9, %v4388_v3  ;;  %v3502_v3 = vpop.permute.xlu0 %3501 }
 0x195   :  { %v4411_v32 = vrot.slane %v4390_v58, 4  ;;  %v4475_v52 = vmul.bf16 %v4436_v34, %v4361_v31  ;;  %v3549_v17 = vsel %vm784_vm5, %v3500_v28, %v3502_v3 }
 0x196   :  { %10759 = vmatmul.mubr.msk.bf16.vlgmr.msra.gmra.mrb[12].mxu1 %vm1036_vm4, %v13110_v62  ;;  %v3617_v9 = vsel %vm63_vm0, %v3549_v17, 0 }
 0x197   :  { %v4437_v14 = vsel %vm786_vm6, %v4410_v26, %v4411_v32  ;;  %4065 = vmatprep.mubr.bf16.mxu1 %v14387_v11  ;;  %v10795_v25 = vcombine.low %v4475_v52, %v4475_v52  ;;  %v10796_v10 = vcombine.high %v4475_v52, %v4475_v52 }
 0x198   :  { %v4438_v33 = vsel %vm4417_vm8, %v4437_v14, %v4390_v58  ;;  %v4363_v14 = vld [vmem:[#allocation2 + $0x58] sm:$0x77] }
 0x199   :  { %v4476_v20 = vmul.bf16 %v4438_v33, %v4362_v54  ;;  %4604 = vrot.lane.b32.xlu1 %v10795_v25, %s11848_s11  ;;  %4606 = vrot.lane.b32.xlu0 %v10796_v10, %s11848_s11 }
 0x19b   :  { %v10797_v8 = vcombine.low %v4476_v20, %v4476_v20  ;;  %v10798_v47 = vcombine.high %v4476_v20, %v4476_v20 }
 0x19d   :  { %4608 = vrot.lane.b32.xlu1 %v10797_v8, %s11848_s11  ;;  %4610 = vrot.lane.b32.xlu0 %v10798_v47, %s11848_s11 }
 0x1a7   :  { %v3506_v26 = vpop.permute.xlu0 %3505  ;;  %v3504_v35 = vpop.permute.xlu1 %3503 }
 0x1a8   :  { %v3550_v31 = vsel %vm784_vm5, %v3502_v3, %v3504_v35  ;;  %v3551_v58 = vsel %vm784_vm5, %v3504_v35, %v3506_v26  ;;  %v4364_v35 = vld [vmem:[#allocation2 + $0x60] sm:$0x77] }
 0x1a9   :  { %10760 = vmatprep.subr.msk.bf16.mxu0 %vm63_vm0, %v3550_v31  ;;  %v3623_v10 = vsel %vm63_vm0, %v3551_v58, 0 }
 0x1aa   :  { %3993 = vmatpush1.bf16.msra.mxu0 %v3617_v9 }
 0x1ab   :  { %v4392_v34 = vpop.permute.xlu0 %4391  ;;  %v3508_v54 = vpop.permute.xlu1 %3507 }
 0x1ac   :  { %v4412_v52 = vrot.slane %v4392_v34, 4  ;;  %v3552_v25 = vsel %vm784_vm5, %v3506_v26, %v3508_v54 }
 0x1ad   :  { %10761 = vmatmul.mubr.msk.bf16.vlgmr.msra.gmra.mrb[16].mxu0 %vm1036_vm4, %v13110_v62  ;;  %10762 = vmatprep.subr.msk.bf16.mxu1 %vm63_vm0, %v3552_v25 }
 0x1ae   :  { %v4439_v28 = vsel %vm786_vm6, %v4411_v32, %v4412_v52  ;;  %4106 = vmatprep.mubr.bf16.mxu0 %v14387_v11  ;;  %4034 = vmatpush1.bf16.msra.mxu1 %v3623_v10 }
 0x1af   :  { %v4440_v33 = vsel %vm4417_vm8, %v4439_v28, %v4392_v34  ;;  %v3510_v20 = vpop.permute.xlu0 %3509  ;;  %v4394_v47 = vpop.permute.xlu1 %4393 }
 0x1b0   :  { %v4477_v8 = vmul.bf16 %v4440_v33, %v4363_v14  ;;  %v4413_v3 = vrot.slane %v4394_v47, 4  ;;  %v3553_v32 = vsel %vm784_vm5, %v3508_v54, %v3510_v20 }
 0x1b1   :  { %10763 = vmatmul.mubr.msk.bf16.vlgmr.msra.gmra.mrb[16].mxu1 %vm1036_vm4, %v13110_v62  ;;  %v3629_v28 = vsel %vm63_vm0, %v3553_v32, 0 }
 0x1b2   :  { %v10799_v17 = vcombine.low %v4477_v8, %v4477_v8  ;;  %v10800_v26 = vcombine.high %v4477_v8, %v4477_v8  ;;  %v4441_v31 = vsel %vm786_vm6, %v4412_v52, %v4413_v3  ;;  %4147 = vmatprep.mubr.bf16.mxu1 %v14387_v11 }
 0x1b3   :  { %v3514_v9 = vpop.permute.xlu0 %3513  ;;  %v4442_v58 = vsel %vm4417_vm8, %v4441_v31, %v4394_v47  ;;  %v3512_v34 = vpop.permute.xlu1 %3511  ;;  %v4365_v31 = vld [vmem:[#allocation2 + $0x68] sm:$0x77] }
 0x1b4   :  { %4614 = vrot.lane.b32.xlu0 %v10800_v26, %s11848_s11  ;;  %4612 = vrot.lane.b32.xlu1 %v10799_v17, %s11848_s11  ;;  %v4478_v14 = vmul.bf16 %v4442_v58, %v4364_v35  ;;  %v3554_v25 = vsel %vm784_vm5, %v3510_v20, %v3512_v34  ;;  %v3555_v52 = vsel %vm784_vm5, %v3512_v34, %v3514_v9 }
 0x1b5   :  { %10764 = vmatprep.subr.msk.bf16.mxu0 %vm63_vm0, %v3554_v25  ;;  %v3635_v26 = vsel %vm63_vm0, %v3555_v52, 0 }
 0x1b6   :  { %v10801_v54 = vcombine.low %v4478_v14, %v4478_v14  ;;  %v10802_v10 = vcombine.high %v4478_v14, %v4478_v14  ;;  %4075 = vmatpush1.bf16.msra.mxu0 %v3629_v28  ;;  %v4366_v28 = vld [vmem:[#allocation2 + $0x70] sm:$0x77] }
 0x1b7   :  { %v4396_v33 = vpop.permute.xlu0 %4395  ;;  %v3516_v47 = vpop.permute.xlu1 %3515 }
 0x1b8   :  { %v4414_v8 = vrot.slane %v4396_v33, 4  ;;  %4618 = vrot.lane.b32.xlu0 %v10802_v10, %s11848_s11  ;;  %4616 = vrot.lane.b32.xlu1 %v10801_v54, %s11848_s11  ;;  %v3556_v17 = vsel %vm784_vm5, %v3514_v9, %v3516_v47 }
 0x1b9   :  { %10766 = vmatprep.subr.msk.bf16.mxu1 %vm63_vm0, %v3556_v17  ;;  %10765 = vmatmul.mubr.msk.bf16.vlgmr.msra.gmra.mrb[20].mxu0 %vm1036_vm4, %v13110_v62 }
 0x1ba   :  { %v4443_v20 = vsel %vm786_vm6, %v4413_v3, %v4414_v8  ;;  %4116 = vmatpush1.bf16.msra.mxu1 %v3635_v26  ;;  %4188 = vmatprep.mubr.bf16.mxu0 %v14387_v11 }
 0x1bb   :  { %v4444_v35 = vsel %vm4417_vm8, %v4443_v20, %v4396_v33  ;;  %v3518_v32 = vpop.permute.xlu0 %3517  ;;  %v4398_v34 = vpop.permute.xlu1 %4397 }
 0x1bc   :  { %v4479_v58 = vmul.bf16 %v4444_v35, %v4365_v31  ;;  %v4415_v14 = vrot.slane %v4398_v34, 4  ;;  %v3557_v3 = vsel %vm784_vm5, %v3516_v47, %v3518_v32 }
 0x1bd   :  { %10767 = vmatmul.mubr.msk.bf16.vlgmr.msra.gmra.mrb[20].mxu1 %vm1036_vm4, %v13110_v62  ;;  %v3641_v20 = vsel %vm63_vm0, %v3557_v3, 0 }
 0x1be   :  { %v10803_v25 = vcombine.low %v4479_v58, %v4479_v58  ;;  %v10804_v9 = vcombine.high %v4479_v58, %v4479_v58  ;;  %v4445_v54 = vsel %vm786_vm6, %v4414_v8, %v4415_v14  ;;  %4229 = vmatprep.mubr.bf16.mxu1 %v14387_v11 }
 0x1bf   :  { %v3522_v10 = vpop.permute.xlu0 %3521  ;;  %v4446_v52 = vsel %vm4417_vm8, %v4445_v54, %v4398_v34  ;;  %v4367_v54 = vld [vmem:[#allocation2 + $0x78] sm:$0x77] }
 0x1c0   :  { %v3520_v33 = vpop.permute.xlu1 %3519  ;;  %4622 = vrot.lane.b32.xlu0 %v10804_v9, %s11848_s11  ;;  %4620 = vrot.lane.b32.xlu1 %v10803_v25, %s11848_s11  ;;  %v4480_v31 = vmul.bf16 %v4446_v52, %v4366_v28  ;;  %v4368_v28 = vld [vmem:[#allocation2 + $0x80] sm:$0x7] }
 0x1c1   :  { %v3558_v17 = vsel %vm784_vm5, %v3518_v32, %v3520_v33  ;;  %v3559_v8 = vsel %vm784_vm5, %v3520_v33, %v3522_v10 }
 0x1c2   :  { %10768 = vmatprep.subr.msk.bf16.mxu0 %vm63_vm0, %v3558_v17  ;;  %v10805_v47 = vcombine.low %v4480_v31, %v4480_v31  ;;  %v10806_v26 = vcombine.high %v4480_v31, %v4480_v31  ;;  %v3647_v9 = vsel %vm63_vm0, %v3559_v8, 0 }
 0x1c3   :  { %4157 = vmatpush1.bf16.msra.mxu0 %v3641_v20  ;;  %v4400_v35 = vpop.permute.xlu0 %4399 }
 0x1c4   :  { %v4416_v58 = vrot.slane %v4400_v35, 4  ;;  %v3524_v34 = vpop.permute.xlu1 %3523  ;;  %4626 = vrot.lane.b32.xlu0 %v10806_v26, %s11848_s11  ;;  %4624 = vrot.lane.b32.xlu1 %v10805_v47, %s11848_s11 }
 0x1c5   :  { %v3560_v25 = vsel %vm784_vm5, %v3522_v10, %v3524_v34 }
 0x1c6   :  { %v4447_v32 = vsel %vm786_vm6, %v4415_v14, %v4416_v58  ;;  %10770 = vmatprep.subr.msk.bf16.mxu1 %vm63_vm0, %v3560_v25  ;;  %10769 = vmatmul.mubr.msk.bf16.vlgmr.msra.gmra.mrb[24].mxu0 %vm1036_vm4, %v13110_v62  ;;  %v4482_v31 = vmul.bf16 %v4416_v58, %v4368_v28 }
 0x1c7   :  { %v4448_v3 = vsel %vm4417_vm8, %v4447_v32, %v4400_v35  ;;  %4198 = vmatpush1.bf16.msra.mxu1 %v3647_v9  ;;  %4270 = vmatprep.mubr.bf16.mxu0 %v14387_v11 }
 0x1c8   :  { %v4481_v52 = vmul.bf16 %v4448_v3, %v4367_v54  ;;  %v3526_v33 = vpop.permute.xlu1 %3525  ;;  %v10809_v58 = vcombine.low %v4482_v31, %v4482_v31 }
 0x1c9   :  { %v3561_v14 = vsel %vm784_vm5, %v3524_v34, %v3526_v33 }
 0x1ca   :  { %v10807_v17 = vcombine.low %v4481_v52, %v4481_v52  ;;  %v10808_v10 = vcombine.high %v4481_v52, %v4481_v52  ;;  %10771 = vmatmul.mubr.msk.bf16.vlgmr.msra.gmra.mrb[24].mxu1 %vm1036_vm4, %v13110_v62  ;;  %v3653_v8 = vsel %vm63_vm0, %v3561_v14, 0  ;;  %v14398_v52 = vld [vmem:[#allocation6_spill] sm:$0xff] }
 0x1cb   :  { %v3528_v20 = vpop.permute.xlu0 %3527  ;;  %4311 = vmatprep.mubr.bf16.mxu1 %v14387_v11 }
 0x1cc   :  { %4630 = vrot.lane.b32.xlu0 %v10808_v10, %s11848_s11  ;;  %4628 = vrot.lane.b32.xlu1 %v10807_v17, %s11848_s11  ;;  %v3562_v47 = vsel %vm784_vm5, %v3526_v33, %v3528_v20  ;;  %v3530_v26 = vpop.permute.xlu1 %3529  ;;  %v13297_v33 = vld [vmem:[%s14355_s1 + $0x6] sm:$0x3]  ;;  %v14399_v17 = vld [vmem:[#allocation7_spill] sm:$0xff]  ;;  %v14400_v10 = vld [vmem:[#allocation8_spill] sm:$0xff] }
 0x1cd   :  { %10772 = vmatprep.subr.msk.bf16.mxu0 %vm63_vm0, %v3562_v47  ;;  %v3563_v35 = vsel %vm784_vm5, %v3528_v20, %v3530_v26 }
 0x1ce   :  { %4239 = vmatpush1.bf16.msra.mxu0 %v3653_v8  ;;  %v3659_v54 = vsel %vm63_vm0, %v3563_v35, 0 }
 0x1cf   :  { %v3532_v34 = vpop.permute.xlu0 %3531 }
 0x1d0   :  { %6356 = vrot.lane.b32.xlu0 %v12303_v59, %s11848_s11  ;;  %4632 = vrot.lane.b32.xlu1 %v10809_v58, %s11848_s11  ;;  %v3564_v25 = vsel %vm784_vm5, %v3530_v26, %v3532_v34 }
 0x1d1   :  { %10774 = vmatprep.subr.msk.bf16.mxu1 %vm63_vm0, %v3564_v25  ;;  %10773 = vmatmul.mubr.msk.bf16.vlgmr.msra.gmra.mrb[28].mxu0 %vm1036_vm4, %v13110_v62 }
 0x1d2   :  { %4280 = vmatpush1.bf16.msra.mxu1 %v3659_v54  ;;  %4798 = vmatprep.mubr.bf16.mxu0 %v14387_v11 }
 0x1d4   :  { %6360 = vrot.lane.b32.xlu0 %v12332_v27, %s11848_s11  ;;  %6358 = vrot.lane.b32.xlu1 %v12330_v41, %s11848_s11 }
 0x1d5   :  { %10775 = vmatmul.mubr.msk.bf16.vlgmr.msra.gmra.mrb[28].mxu1 %vm1036_vm4, %v13110_v62 }
 0x1d6   :  { %v4569_v59 = vpop.permute.xlu1 %4568  ;;  %v4571_v32 = vpop.permute.xlu0 %4570  ;;  %4839 = vmatprep.mubr.bf16.mxu1 %v14387_v11 }
 0x1d7   :  { %v4635_v9 = vsel %vm4634_vm9, %v4569_v59, %v4571_v32 }
 0x1d8   :  { %6362 = vrot.lane.b32.xlu1 %v12355_v42, %s11848_s11  ;;  %6364 = vrot.lane.b32.xlu0 %v12363_v7, %s11848_s11  ;;  %v4671_v62 = vsel %vm63_vm0, %v4635_v9, 0 }
 0x1db   :  { %v4573_v27 = vpop.permute.xlu1 %4572  ;;  %v4575_v28 = vpop.permute.xlu0 %4574 }
 0x1dc   :  { %v4637_v41 = vsel %vm4634_vm9, %v4573_v27, %v4575_v28  ;;  %v4636_v3 = vsel %vm4634_vm9, %v4571_v32, %v4573_v27  ;;  %6366 = vrot.lane.b32.xlu1 %v12380_v50, %s11848_s11  ;;  %6368 = vrot.lane.b32.xlu0 %v14398_v52, %s11848_s11 }
 0x1dd   :  { %10810 = vmatprep.subr.msk.bf16.mxu0 %vm63_vm0, %v4636_v3  ;;  %v4677_v7 = vsel %vm63_vm0, %v4637_v41, 0 }
 0x1de   :  { %4767 = vmatpush1.bf16.msra.mxu0 %v4671_v62 }
 0x1df   :  { %v4577_v42 = vpop.permute.xlu1 %4576  ;;  %v4579_v50 = vpop.permute.xlu0 %4578 }
 0x1e0   :  { %v4638_v31 = vsel %vm4634_vm9, %v4575_v28, %v4577_v42  ;;  %6370 = vrot.lane.b32.xlu1 %v14399_v17, %s11848_s11  ;;  %6372 = vrot.lane.b32.xlu0 %v14400_v10, %s11848_s11  ;;  %v4639_v14 = vsel %vm4634_vm9, %v4577_v42, %v4579_v50 }
 0x1e1   :  { %10812 = vmatprep.subr.msk.bf16.mxu1 %vm63_vm0, %v4638_v31  ;;  %10811 = vmatmul.mubr.msk.bf16.vlgmr.msra.gmra.mrb[0].mxu0 %vm1036_vm4, %v13297_v33  ;;  %v4683_v47 = vsel %vm63_vm0, %v4639_v14, 0 }
 0x1e2   :  { %4808 = vmatpush1.bf16.msra.mxu1 %v4677_v7  ;;  %4880 = vmatprep.mubr.bf16.mxu0 %v14387_v11 }
 0x1e4   :  { %6374 = vrot.lane.b32.xlu1 %v12422_v19, %s11848_s11  ;;  %6376 = vrot.lane.b32.xlu0 %v12426_v57, %s11848_s11 }
 0x1e5   :  { %10813 = vmatmul.mubr.msk.bf16.vlgmr.msra.gmra.mrb[0].mxu1 %vm1036_vm4, %v13297_v33 }
 0x1e6   :  { %4921 = vmatprep.mubr.bf16.mxu1 %v14387_v11 }
 0x1e7   :  { %v4581_v20 = vpop.permute.xlu1 %4580  ;;  %v4583_v8 = vpop.permute.xlu0 %4582 }
 0x1e8   :  { %v4640_v26 = vsel %vm4634_vm9, %v4579_v50, %v4581_v20  ;;  %6378 = vrot.lane.b32.xlu1 %v12449_v63, %s11848_s11  ;;  %v4641_v35 = vsel %vm4634_vm9, %v4581_v20, %v4583_v8  ;;  %6380 = vrot.lane.b32.xlu0 %v12451_v60, %s11848_s11 }
 0x1e9   :  { %10814 = vmatprep.subr.msk.bf16.mxu0 %vm63_vm0, %v4640_v26  ;;  %v4689_v57 = vsel %vm63_vm0, %v4641_v35, 0 }
 0x1ea   :  { %4849 = vmatpush1.bf16.msra.mxu0 %v4683_v47 }
 0x1eb   :  { %v4585_v19 = vpop.permute.xlu1 %4584  ;;  %v4587_v34 = vpop.permute.xlu0 %4586 }
 0x1ec   :  { %v4642_v58 = vsel %vm4634_vm9, %v4583_v8, %v4585_v19  ;;  %6382 = vrot.lane.b32.xlu1 %v12468_v48, %s11848_s11  ;;  %6384 = vrot.lane.b32.xlu0 %v12482_v29, %s11848_s11  ;;  %v4643_v63 = vsel %vm4634_vm9, %v4585_v19, %v4587_v34 }
 0x1ed   :  { %10816 = vmatprep.subr.msk.bf16.mxu1 %vm63_vm0, %v4642_v58  ;;  %10815 = vmatmul.mubr.msk.bf16.vlgmr.msra.gmra.mrb[4].mxu0 %vm1036_vm4, %v13297_v33  ;;  %v4695_v48 = vsel %vm63_vm0, %v4643_v63, 0 }
 0x1ee   :  { %4890 = vmatpush1.bf16.msra.mxu1 %v4689_v57  ;;  %4962 = vmatprep.mubr.bf16.mxu0 %v14387_v11 }
 0x1f0   :  { %6386 = vrot.lane.b32.xlu1 %v12504_v51, %s11848_s11 }
 0x1f1   :  { %10817 = vmatmul.mubr.msk.bf16.vlgmr.msra.gmra.mrb[4].mxu1 %vm1036_vm4, %v13297_v33 }
 0x1f2   :  { %5003 = vmatprep.mubr.bf16.mxu1 %v14387_v11 }
 0x1f3   :  { %v4589_v60 = vpop.permute.xlu1 %4588  ;;  %v4591_v25 = vpop.permute.xlu0 %4590 }
 0x1f4   :  { %v4644_v54 = vsel %vm4634_vm9, %v4587_v34, %v4589_v60  ;;  %v4645_v29 = vsel %vm4634_vm9, %v4589_v60, %v4591_v25 }
 0x1f5   :  { %10818 = vmatprep.subr.msk.bf16.mxu0 %vm63_vm0, %v4644_v54  ;;  %v4701_v32 = vsel %vm63_vm0, %v4645_v29, 0 }
 0x1f6   :  { %4931 = vmatpush1.bf16.msra.mxu0 %v4695_v48 }
 0x1f7   :  { %v4593_v59 = vpop.permute.xlu1 %4592  ;;  %v4595_v9 = vpop.permute.xlu0 %4594 }
 0x1f8   :  { %v4646_v51 = vsel %vm4634_vm9, %v4591_v25, %v4593_v59  ;;  %v4647_v27 = vsel %vm4634_vm9, %v4593_v59, %v4595_v9 }
 0x1f9   :  { %10820 = vmatprep.subr.msk.bf16.mxu1 %vm63_vm0, %v4646_v51  ;;  %10819 = vmatmul.mubr.msk.bf16.vlgmr.msra.gmra.mrb[8].mxu0 %vm1036_vm4, %v13297_v33  ;;  %v4707_v41 = vsel %vm63_vm0, %v4647_v27, 0 }
 0x1fa   :  { %4972 = vmatpush1.bf16.msra.mxu1 %v4701_v32  ;;  %5044 = vmatprep.mubr.bf16.mxu0 %v14387_v11 }
 0x1fd   :  { %10821 = vmatmul.mubr.msk.bf16.vlgmr.msra.gmra.mrb[8].mxu1 %vm1036_vm4, %v13297_v33 }
 0x1fe   :  { %5085 = vmatprep.mubr.bf16.mxu1 %v14387_v11 }
 0x1ff   :  { %v4597_v28 = vpop.permute.xlu1 %4596  ;;  %v4599_v62 = vpop.permute.xlu0 %4598 }
 0x200   :  { %v4648_v3 = vsel %vm4634_vm9, %v4595_v9, %v4597_v28  ;;  %v4649_v52 = vsel %vm4634_vm9, %v4597_v28, %v4599_v62 }
 0x201   :  { %10822 = vmatprep.subr.msk.bf16.mxu0 %vm63_vm0, %v4648_v3  ;;  %v4713_v7 = vsel %vm63_vm0, %v4649_v52, 0 }
 0x202   :  { %5013 = vmatpush1.bf16.msra.mxu0 %v4707_v41 }
 0x203   :  { %v4601_v42 = vpop.permute.xlu1 %4600  ;;  %v4603_v17 = vpop.permute.xlu0 %4602 }
 0x204   :  { %v4650_v31 = vsel %vm4634_vm9, %v4599_v62, %v4601_v42  ;;  %v4651_v50 = vsel %vm4634_vm9, %v4601_v42, %v4603_v17 }
 0x205   :  { %10824 = vmatprep.subr.msk.bf16.mxu1 %vm63_vm0, %v4650_v31  ;;  %10823 = vmatmul.mubr.msk.bf16.vlgmr.msra.gmra.mrb[12].mxu0 %vm1036_vm4, %v13297_v33  ;;  %v4719_v14 = vsel %vm63_vm0, %v4651_v50, 0  ;;  %v5454_v31 = vld [vmem:[#allocation2 + $0x4] sm:$0x77] }
 0x206   :  { %5054 = vmatpush1.bf16.msra.mxu1 %v4713_v7  ;;  %5126 = vmatprep.mubr.bf16.mxu0 %v14387_v11 }
 0x209   :  { %10825 = vmatmul.mubr.msk.bf16.vlgmr.msra.gmra.mrb[12].mxu1 %vm1036_vm4, %v13297_v33 }
 0x20a   :  { %5167 = vmatprep.mubr.bf16.mxu1 %v14387_v11 }
 0x20b   :  { %v4605_v10 = vpop.permute.xlu1 %4604  ;;  %v4607_v20 = vpop.permute.xlu0 %4606 }
 0x20c   :  { %v4652_v47 = vsel %vm4634_vm9, %v4603_v17, %v4605_v10  ;;  %v4653_v26 = vsel %vm4634_vm9, %v4605_v10, %v4607_v20 }
 0x20d   :  { %10826 = vmatprep.subr.msk.bf16.mxu0 %vm63_vm0, %v4652_v47  ;;  %v4725_v35 = vsel %vm63_vm0, %v4653_v26, 0  ;;  %v5455_v26 = vld [vmem:[#allocation2 + $0xc] sm:$0x77] }
 0x20e   :  { %5095 = vmatpush1.bf16.msra.mxu0 %v4719_v14  ;;  %v10844_v14 = vcombine.high %v5454_v31, %v5454_v31 }
 0x20f   :  { %v4609_v8 = vpop.permute.xlu1 %4608  ;;  %v4611_v57 = vpop.permute.xlu0 %4610 }
 0x210   :  { %v4654_v19 = vsel %vm4634_vm9, %v4607_v20, %v4609_v8  ;;  %v4655_v58 = vsel %vm4634_vm9, %v4609_v8, %v4611_v57  ;;  %v10843_v20 = vcombine.low %v5454_v31, %v5454_v31 }
 0x211   :  { %10828 = vmatprep.subr.msk.bf16.mxu1 %vm63_vm0, %v4654_v19  ;;  %10827 = vmatmul.mubr.msk.bf16.vlgmr.msra.gmra.mrb[16].mxu0 %vm1036_vm4, %v13297_v33  ;;  %v4731_v48 = vsel %vm63_vm0, %v4655_v58, 0 }
 0x212   :  { %5136 = vmatpush1.bf16.msra.mxu1 %v4725_v35  ;;  %5208 = vmatprep.mubr.bf16.mxu0 %v14387_v11  ;;  %v5456_v35 = vld [vmem:[#allocation2 + $0x14] sm:$0x77] }
 0x215   :  { %10829 = vmatmul.mubr.msk.bf16.vlgmr.msra.gmra.mrb[16].mxu1 %vm1036_vm4, %v13297_v33 }
 0x216   :  { %5249 = vmatprep.mubr.bf16.mxu1 %v14387_v11 }
 0x226   :  { %v4613_v34 = vpop.permute.xlu1 %4612  ;;  %v4615_v63 = vpop.permute.xlu0 %4614 }
 0x227   :  { %v4656_v60 = vsel %vm4634_vm9, %v4611_v57, %v4613_v34  ;;  %v4657_v54 = vsel %vm4634_vm9, %v4613_v34, %v4615_v63  ;;  %v5556_v34 = vsel %vm63_vm0, %v10843_v20, 0  ;;  %v13439_v20 = vld [vmem:[#allocation2 + $0xc] sm:$0x77] }
 0x228   :  { %10830 = vmatprep.subr.msk.bf16.mxu0 %vm63_vm0, %v4656_v60  ;;  %v4737_v59 = vsel %vm63_vm0, %v4657_v54, 0  ;;  %v10845_v60 = vcombine.low %v5455_v26, %v5455_v26 }
 0x229   :  { %5177 = vmatpush1.bf16.msra.mxu0 %v4731_v48 }
 0x22a   :  { %v4617_v25 = vpop.permute.xlu1 %4616  ;;  %v4619_v32 = vpop.permute.xlu0 %4618 }
 0x22b   :  { %v4658_v29 = vsel %vm4634_vm9, %v4615_v63, %v4617_v25  ;;  %v4659_v51 = vsel %vm4634_vm9, %v4617_v25, %v4619_v32  ;;  %v10846_v63 = vcombine.high %v5455_v26, %v5455_v26  ;;  %v10848_v25 = vcombine.high %v5456_v35, %v5456_v35 }
 0x22c   :  { %10831 = vmatmul.mubr.msk.bf16.vlgmr.msra.gmra.mrb[20].mxu0 %vm1036_vm4, %v13297_v33  ;;  %10832 = vmatprep.subr.msk.bf16.mxu1 %vm63_vm0, %v4658_v29  ;;  %v4743_v41 = vsel %vm63_vm0, %v4659_v51, 0 }
 0x22d   :  { %5290 = vmatprep.mubr.bf16.mxu0 %v14387_v11  ;;  %5218 = vmatpush1.bf16.msra.mxu1 %v4737_v59  ;;  %v5457_v59 = vld [vmem:[#allocation2 + $0x1c] sm:$0x77] }
 0x230   :  { %10833 = vmatmul.mubr.msk.bf16.vlgmr.msra.gmra.mrb[20].mxu1 %vm1036_vm4, %v13297_v33 }
 0x231   :  { %5331 = vmatprep.mubr.bf16.mxu1 %v14387_v11 }
 0x232   :  { %v4621_v9 = vpop.permute.xlu1 %4620  ;;  %v4623_v27 = vpop.permute.xlu0 %4622 }
 0x233   :  { %v4660_v28 = vsel %vm4634_vm9, %v4619_v32, %v4621_v9  ;;  %v4661_v3 = vsel %vm4634_vm9, %v4621_v9, %v4623_v27  ;;  %v13421_v32 = vld [vmem:[#allocation2 + $0x4] sm:$0x77] }
 0x234   :  { %10834 = vmatprep.subr.msk.bf16.mxu0 %vm63_vm0, %v4660_v28  ;;  %v4749_v42 = vsel %vm63_vm0, %v4661_v3, 0  ;;  %v10847_v3 = vcombine.low %v5456_v35, %v5456_v35 }
 0x235   :  { %5259 = vmatpush1.bf16.msra.mxu0 %v4743_v41  ;;  %v5562_v41 = vsel %vm63_vm0, %v10845_v60, 0  ;;  %v13448_v60 = vld [vmem:[#allocation2 + $0x14] sm:$0x77] }
 0x236   :  { %v4625_v62 = vpop.permute.xlu1 %4624  ;;  %v4627_v7 = vpop.permute.xlu0 %4626  ;;  %v5568_v35 = vsel %vm63_vm0, %v10847_v3, 0 }
 0x237   :  { %v4662_v52 = vsel %vm4634_vm9, %v4623_v27, %v4625_v62  ;;  %v4663_v17 = vsel %vm4634_vm9, %v4625_v62, %v4627_v7 }
 0x238   :  { %10835 = vmatmul.mubr.msk.bf16.vlgmr.msra.gmra.mrb[24].mxu0 %vm1036_vm4, %v13297_v33  ;;  %10836 = vmatprep.subr.msk.bf16.mxu1 %vm63_vm0, %v4662_v52  ;;  %v4755_v8 = vsel %vm63_vm0, %v4663_v17, 0 }
 0x239   :  { %5372 = vmatprep.mubr.bf16.mxu0 %v14387_v11  ;;  %5300 = vmatpush1.bf16.msra.mxu1 %v4749_v42  ;;  %v10850_v42 = vcombine.high %v5457_v59, %v5457_v59 }
 0x23c   :  { %10837 = vmatmul.mubr.msk.bf16.vlgmr.msra.gmra.mrb[24].mxu1 %vm1036_vm4, %v13297_v33 }
 0x23d   :  { %5413 = vmatprep.mubr.bf16.mxu1 %v14387_v11 }
 0x23e   :  { %v4631_v50 = vpop.permute.xlu0 %4630  ;;  %v4629_v10 = vpop.permute.xlu1 %4628 }
 0x23f   :  { %v4664_v47 = vsel %vm4634_vm9, %v4627_v7, %v4629_v10  ;;  %v4665_v19 = vsel %vm4634_vm9, %v4629_v10, %v4631_v50  ;;  %v13436_v10 = vld [vmem:[%s14355_s1 + $0x8] sm:$0x3] }
 0x240   :  { %10838 = vmatprep.subr.msk.bf16.mxu0 %vm63_vm0, %v4664_v47  ;;  %v4761_v29 = vsel %vm63_vm0, %v4665_v19, 0  ;;  %v10849_v19 = vcombine.low %v5457_v59, %v5457_v59 }
 0x241   :  { %5341 = vmatpush1.bf16.msra.mxu0 %v4755_v8 }
 0x242   :  { %v6357_v57 = vpop.permute.xlu0 %6356  ;;  %v4633_v58 = vpop.permute.xlu1 %4632  ;;  %10875 = vmatprep.subr.msk.bf16.mxu0 %vm63_vm0, %v10844_v14  ;;  %v5458_v14 = vld [vmem:[#allocation2 + $0x24] sm:$0x77] }
 0x243   :  { %v6388_v48 = vrot.slane %v6357_v57, 4  ;;  %v4666_v54 = vsel %vm4634_vm9, %v4631_v50, %v4633_v58 }
 0x244   :  { %10840 = vmatprep.subr.msk.bf16.mxu1 %vm63_vm0, %v4666_v54  ;;  %10839 = vmatmul.mubr.msk.bf16.vlgmr.msra.gmra.mrb[28].mxu0 %vm1036_vm4, %v13297_v33 }
 0x245   :  { %v6404_v51 = vsel %vm4634_vm9, %v6388_v48, %v6357_v57  ;;  %5382 = vmatpush1.bf16.msra.mxu1 %v4761_v29  ;;  %5652 = vmatpush1.bf16.msra.mxu0 %v5556_v34 }
 0x246   :  { %v6452_v9 = vmul.bf16 %v6404_v51, %v13421_v32  ;;  %v6361_v27 = vpop.permute.xlu0 %6360  ;;  %v6359_v28 = vpop.permute.xlu1 %6358  ;;  %5683 = vmatprep.mubr.bf16.mxu0 %v14387_v11  ;;  %10877 = vmatprep.subr.msk.bf16.mxu1 %vm63_vm0, %v10846_v63  ;;  %v5459_v63 = vld [vmem:[#allocation2 + $0x2c] sm:$0x77] }
 0x247   :  { %v6390_v62 = vrot.slane %v6361_v27, 4  ;;  %v6389_v52 = vrot.slane %v6359_v28, 4  ;;  %10879 = vmatprep.subr.msk.bf16.mxu0 %vm63_vm0, %v10848_v25 }
 0x248   :  { %v10908_v7 = vcombine.low %v6452_v9, %v6452_v9  ;;  %v10909_v31 = vcombine.high %v6452_v9, %v6452_v9  ;;  %10841 = vmatmul.mubr.msk.bf16.vlgmr.msra.gmra.mrb[28].mxu1 %vm1036_vm4, %v13297_v33 }
 0x249   :  { %v6405_v17 = vsel %vm786_vm6, %v6388_v48, %v6389_v52  ;;  %v6407_v50 = vsel %vm786_vm6, %v6389_v52, %v6390_v62  ;;  %5693 = vmatpush1.bf16.msra.mxu1 %v5562_v41  ;;  %5724 = vmatprep.mubr.bf16.mxu1 %v14387_v11  ;;  %v10852_v48 = vcombine.high %v5458_v14, %v5458_v14 }
 0x24a   :  { %v6406_v47 = vsel %vm4634_vm9, %v6405_v17, %v6359_v28  ;;  %v6408_v26 = vsel %vm4634_vm9, %v6407_v50, %v6361_v27  ;;  %6554 = vrot.lane.b32.xlu0 %v10908_v7, %s11847_s8  ;;  %6556 = vrot.lane.b32.xlu1 %v10909_v31, %s11847_s8  ;;  %v6363_v33 = vpop.permute.xlu1 %6362  ;;  %v6365_v8 = vpop.permute.xlu0 %6364  ;;  %v5574_v27 = vsel %vm63_vm0, %v10849_v19, 0  ;;  %v10851_v28 = vcombine.low %v5458_v14, %v5458_v14 }
 0x24b   :  { %v6453_v57 = vmul.bf16 %v6406_v47, %v13439_v20  ;;  %v6391_v58 = vrot.slane %v6363_v33, 4  ;;  %v6392_v34 = vrot.slane %v6365_v8, 4  ;;  %10881 = vmatprep.subr.msk.bf16.mxu1 %vm63_vm0, %v10850_v42  ;;  %v6454_v51 = vmul.bf16 %v6408_v26, %v13448_v60  ;;  %v13460_v42 = vld [vmem:[#allocation2 + $0x1c] sm:$0x77] }
 0x24c   :  { %10876 = vmatmul.mubr.msk.bf16.vlgmr.msra.gmra.mrb[0].mxu0 %vm1036_vm4, %v13436_v10  ;;  %v10854_v41 = vcombine.high %v5459_v63, %v5459_v63  ;;  %v5580_v47 = vsel %vm63_vm0, %v10851_v28, 0  ;;  %v10853_v26 = vcombine.low %v5459_v63, %v5459_v63  ;;  %v5462_v28 = vld [vmem:[#allocation2 + $0x44] sm:$0x77] }
 0x24d   :  { %v10910_v54 = vcombine.low %v6453_v57, %v6453_v57  ;;  %v10911_v25 = vcombine.high %v6453_v57, %v6453_v57  ;;  %v6409_v29 = vsel %vm786_vm6, %v6390_v62, %v6391_v58  ;;  %5734 = vmatpush1.bf16.msra.mxu0 %v5568_v35  ;;  %5765 = vmatprep.mubr.bf16.mxu0 %v14387_v11  ;;  %v5460_v62 = vld [vmem:[#allocation2 + $0x34] sm:$0x77]  ;;  %v5461_v57 = vld [vmem:[#allocation2 + $0x3c] sm:$0x77] }
 0x24e   :  { %v6410_v59 = vsel %vm4634_vm9, %v6409_v29, %v6363_v33  ;;  %v6367_v9 = vpop.permute.xlu1 %6366  ;;  %v6411_v3 = vsel %vm786_vm6, %v6391_v58, %v6392_v34  ;;  %v6369_v7 = vpop.permute.xlu0 %6368  ;;  %10883 = vmatprep.subr.msk.bf16.mxu0 %vm63_vm0, %v10852_v48  ;;  %v10913_v17 = vcombine.high %v6454_v51, %v6454_v51  ;;  %v10912_v50 = vcombine.low %v6454_v51, %v6454_v51  ;;  %v13473_v58 = vld [vmem:[#allocation2 + $0x24] sm:$0x77] }
 0x24f   :  { %6560 = vrot.lane.b32.xlu1 %v10911_v25, %s11847_s8  ;;  %6558 = vrot.lane.b32.xlu0 %v10910_v54, %s11847_s8  ;;  %v6393_v52 = vrot.slane %v6367_v9, 4  ;;  %v6455_v31 = vmul.bf16 %v6410_v59, %v13460_v42  ;;  %v6412_v14 = vsel %vm4634_vm9, %v6411_v3, %v6365_v8  ;;  %v10856_v33 = vcombine.high %v5460_v62, %v5460_v62 }
 0x250   :  { %10878 = vmatmul.mubr.msk.bf16.vlgmr.msra.gmra.mrb[0].mxu1 %vm1036_vm4, %v13436_v10  ;;  %v6394_v19 = vrot.slane %v6369_v7, 4  ;;  %v6456_v25 = vmul.bf16 %v6412_v14, %v13473_v58  ;;  %v5586_v63 = vsel %vm63_vm0, %v10853_v26, 0  ;;  %v10855_v29 = vcombine.low %v5460_v62, %v5460_v62 }
 0x251   :  { %5775 = vmatpush1.bf16.msra.mxu1 %v5574_v27  ;;  %5806 = vmatprep.mubr.bf16.mxu1 %v14387_v11  ;;  %v6413_v35 = vsel %vm786_vm6, %v6392_v34, %v6393_v52  ;;  %v10914_v8 = vcombine.low %v6455_v31, %v6455_v31  ;;  %v10915_v54 = vcombine.high %v6455_v31, %v6455_v31 }
 0x252   :  { %10885 = vmatprep.subr.msk.bf16.mxu1 %vm63_vm0, %v10854_v41  ;;  %v6371_v48 = vpop.permute.xlu1 %6370  ;;  %v6414_v34 = vsel %vm4634_vm9, %v6413_v35, %v6367_v9  ;;  %v10858_v51 = vcombine.high %v5461_v57, %v5461_v57  ;;  %v6415_v59 = vsel %vm786_vm6, %v6393_v52, %v6394_v19  ;;  %v13485_v41 = vld [vmem:[#allocation2 + $0x2c] sm:$0x77]  ;;  %v6373_v3 = vpop.permute.xlu0 %6372  ;;  %v10916_v9 = vcombine.low %v6456_v25, %v6456_v25  ;;  %v13497_v35 = vld [vmem:[#allocation2 + $0x34] sm:$0x77] }
 0x253   :  { %6564 = vrot.lane.b32.xlu1 %v10913_v17, %s11847_s8  ;;  %6562 = vrot.lane.b32.xlu0 %v10912_v50, %s11847_s8  ;;  %v6395_v27 = vrot.slane %v6371_v48, 4  ;;  %v10917_v31 = vcombine.high %v6456_v25, %v6456_v25  ;;  %v6457_v17 = vmul.bf16 %v6414_v34, %v13485_v41  ;;  %v6416_v52 = vsel %vm4634_vm9, %v6415_v59, %v6369_v7  ;;  %v5464_v59 = vld [vmem:[#allocation2 + $0x54] sm:$0x77] }
 0x254   :  { %10880 = vmatmul.mubr.msk.bf16.vlgmr.msra.gmra.mrb[4].mxu0 %vm1036_vm4, %v13436_v10  ;;  %v5592_v62 = vsel %vm63_vm0, %v10855_v29, 0  ;;  %v10857_v50 = vcombine.low %v5461_v57, %v5461_v57  ;;  %v10860_v14 = vcombine.high %v5462_v28, %v5462_v28  ;;  %v6396_v26 = vrot.slane %v6373_v3, 4 }
 0x255   :  { %5816 = vmatpush1.bf16.msra.mxu0 %v5580_v47  ;;  %5847 = vmatprep.mubr.bf16.mxu0 %v14387_v11  ;;  %v6417_v47 = vsel %vm786_vm6, %v6394_v19, %v6395_v27  ;;  %v10918_v7 = vcombine.low %v6457_v17, %v6457_v17  ;;  %v6458_v25 = vmul.bf16 %v6416_v52, %v13497_v35 }
 0x256   :  { %10887 = vmatprep.subr.msk.bf16.mxu0 %vm63_vm0, %v10856_v33  ;;  %v5463_v33 = vld [vmem:[#allocation2 + $0x4c] sm:$0x77]  ;;  %v6418_v57 = vsel %vm4634_vm9, %v6417_v47, %v6371_v48  ;;  %v5598_v19 = vsel %vm63_vm0, %v10857_v50, 0  ;;  %v10859_v34 = vcombine.low %v5462_v28, %v5462_v28  ;;  %v6419_v29 = vsel %vm786_vm6, %v6395_v27, %v6396_v26 }
 0x257   :  { %6568 = vrot.lane.b32.xlu1 %v10915_v54, %s11847_s8  ;;  %6566 = vrot.lane.b32.xlu0 %v10914_v8, %s11847_s8  ;;  %v6375_v8 = vpop.permute.xlu1 %6374  ;;  %v10919_v54 = vcombine.high %v6457_v17, %v6457_v17  ;;  %v10920_v48 = vcombine.low %v6458_v25, %v6458_v25  ;;  %v10921_v17 = vcombine.high %v6458_v25, %v6458_v25 }
 0x258   :  { %10882 = vmatmul.mubr.msk.bf16.vlgmr.msra.gmra.mrb[4].mxu1 %vm1036_vm4, %v13436_v10  ;;  %v6420_v28 = vsel %vm4634_vm9, %v6419_v29, %v6373_v3  ;;  %v5604_v27 = vsel %vm63_vm0, %v10859_v34, 0  ;;  %v10864_v50 = vcombine.high %v5464_v59, %v5464_v59  ;;  %v10863_v34 = vcombine.low %v5464_v59, %v5464_v59 }
 0x259   :  { %5857 = vmatpush1.bf16.msra.mxu1 %v5586_v63  ;;  %5888 = vmatprep.mubr.bf16.mxu1 %v14387_v11  ;;  %v10862_v63 = vcombine.high %v5463_v33, %v5463_v33 }
 0x25a   :  { %10889 = vmatprep.subr.msk.bf16.mxu1 %vm63_vm0, %v10858_v51  ;;  %v6397_v51 = vrot.slane %v6375_v8, 4  ;;  %v5616_v59 = vsel %vm63_vm0, %v10863_v34, 0 }
 0x25b   :  { %6572 = vrot.lane.b32.xlu1 %v10917_v31, %s11847_s8  ;;  %6570 = vrot.lane.b32.xlu0 %v10916_v9, %s11847_s8  ;;  %v13509_v9 = vld [vmem:[#allocation2 + $0x3c] sm:$0x77]  ;;  %v6377_v31 = vpop.permute.xlu0 %6376  ;;  %v6379_v25 = vpop.permute.xlu1 %6378 }
 0x25c   :  { %10884 = vmatmul.mubr.msk.bf16.vlgmr.msra.gmra.mrb[8].mxu0 %vm1036_vm4, %v13436_v10  ;;  %v6459_v52 = vmul.bf16 %v6418_v57, %v13509_v9  ;;  %v6398_v47 = vrot.slane %v6377_v31, 4 }
 0x25d   :  { %5898 = vmatpush1.bf16.msra.mxu0 %v5592_v62  ;;  %5929 = vmatprep.mubr.bf16.mxu0 %v14387_v11  ;;  %v10861_v62 = vcombine.low %v5463_v33, %v5463_v33 }
 0x25e   :  { %10891 = vmatprep.subr.msk.bf16.mxu0 %vm63_vm0, %v10860_v14  ;;  %v6421_v14 = vsel %vm786_vm6, %v6396_v26, %v6397_v51  ;;  %v10922_v3 = vcombine.low %v6459_v52, %v6459_v52  ;;  %v10923_v57 = vcombine.high %v6459_v52, %v6459_v52  ;;  %v6423_v29 = vsel %vm786_vm6, %v6397_v51, %v6398_v47  ;;  %v13533_v52 = vld [vmem:[#allocation2 + $0x4c] sm:$0x77] }
 0x25f   :  { %6576 = vrot.lane.b32.xlu1 %v10919_v54, %s11847_s8  ;;  %6574 = vrot.lane.b32.xlu0 %v10918_v7, %s11847_s8  ;;  %v5465_v7 = vld [vmem:[#allocation2 + $0x5c] sm:$0x77]  ;;  %v13521_v54 = vld [vmem:[#allocation2 + $0x44] sm:$0x77]  ;;  %v6422_v33 = vsel %vm4634_vm9, %v6421_v14, %v6375_v8  ;;  %v5610_v26 = vsel %vm63_vm0, %v10861_v62, 0  ;;  %v6424_v51 = vsel %vm4634_vm9, %v6423_v29, %v6377_v31 }
 0x260   :  { %10886 = vmatmul.mubr.msk.bf16.vlgmr.msra.gmra.mrb[8].mxu1 %vm1036_vm4, %v13436_v10  ;;  %v6461_v62 = vmul.bf16 %v6422_v33, %v13533_v52  ;;  %v13545_v33 = vld [vmem:[#allocation2 + $0x54] sm:$0x77] }
 0x261   :  { %5939 = vmatpush1.bf16.msra.mxu1 %v5598_v19  ;;  %5970 = vmatprep.mubr.bf16.mxu1 %v14387_v11  ;;  %v6460_v19 = vmul.bf16 %v6420_v28, %v13521_v54  ;;  %v6381_v28 = vpop.permute.xlu0 %6380 }
 0x262   :  { %10893 = vmatprep.subr.msk.bf16.mxu1 %vm63_vm0, %v10862_v63  ;;  %v10866_v63 = vcombine.high %v5465_v7, %v5465_v7  ;;  %v10926_v31 = vcombine.low %v6461_v62, %v6461_v62  ;;  %v10927_v34 = vcombine.high %v6461_v62, %v6461_v62 }
 0x263   :  { %6580 = vrot.lane.b32.xlu1 %v10921_v17, %s11847_s8  ;;  %6578 = vrot.lane.b32.xlu0 %v10920_v48, %s11847_s8  ;;  %v6399_v48 = vrot.slane %v6379_v25, 4  ;;  %v5466_v17 = vld [vmem:[#allocation2 + $0x64] sm:$0x77]  ;;  %v10924_v8 = vcombine.low %v6460_v19, %v6460_v19 }
 0x264   :  { %10888 = vmatmul.mubr.msk.bf16.vlgmr.msra.gmra.mrb[12].mxu0 %vm1036_vm4, %v13436_v10  ;;  %v10868_v14 = vcombine.high %v5466_v17, %v5466_v17  ;;  %v10867_v29 = vcombine.low %v5466_v17, %v5466_v17 }
 0x265   :  { %5980 = vmatpush1.bf16.msra.mxu0 %v5604_v27  ;;  %6011 = vmatprep.mubr.bf16.mxu0 %v14387_v11  ;;  %v10925_v27 = vcombine.high %v6460_v19, %v6460_v19  ;;  %v5467_v19 = vld [vmem:[#allocation2 + $0x6c] sm:$0x77] }
 0x266   :  { %10895 = vmatprep.subr.msk.bf16.mxu0 %vm63_vm0, %v10864_v50  ;;  %v10865_v50 = vcombine.low %v5465_v7, %v5465_v7  ;;  %v5628_v17 = vsel %vm63_vm0, %v10867_v29, 0 }
 0x267   :  { %6584 = vrot.lane.b32.xlu1 %v10923_v57, %s11847_s8  ;;  %6582 = vrot.lane.b32.xlu0 %v10922_v3, %s11847_s8  ;;  %v6425_v3 = vsel %vm786_vm6, %v6398_v47, %v6399_v48  ;;  %v6400_v57 = vrot.slane %v6381_v28, 4 }
 0x268   :  { %10890 = vmatmul.mubr.msk.bf16.vlgmr.msra.gmra.mrb[12].mxu1 %vm1036_vm4, %v13436_v10  ;;  %v6426_v47 = vsel %vm4634_vm9, %v6425_v3, %v6379_v25  ;;  %v5622_v7 = vsel %vm63_vm0, %v10865_v50, 0  ;;  %v10869_v3 = vcombine.low %v5467_v19, %v5467_v19 }
 0x269   :  { %6021 = vmatpush1.bf16.msra.mxu1 %v5610_v26  ;;  %6052 = vmatprep.mubr.bf16.mxu1 %v14387_v11  ;;  %v6383_v26 = vpop.permute.xlu1 %6382 }
 0x26a   :  { %10897 = vmatprep.subr.msk.bf16.mxu1 %vm63_vm0, %v10866_v63  ;;  %v6462_v63 = vmul.bf16 %v6424_v51, %v13545_v33  ;;  %v6401_v62 = vrot.slane %v6383_v26, 4  ;;  %v13557_v51 = vld [vmem:[#allocation2 + $0x5c] sm:$0x77] }
 0x26b   :  { %6588 = vrot.lane.b32.xlu1 %v10925_v27, %s11847_s8  ;;  %6586 = vrot.lane.b32.xlu0 %v10924_v8, %s11847_s8  ;;  %v10870_v8 = vcombine.high %v5467_v19, %v5467_v19  ;;  %v6427_v27 = vsel %vm786_vm6, %v6399_v48, %v6400_v57  ;;  %v5634_v19 = vsel %vm63_vm0, %v10869_v3, 0  ;;  %v10873_v3 = vcombine.low %v5469_v61, %v5469_v61 }
 0x26c   :  { %10892 = vmatmul.mubr.msk.bf16.vlgmr.msra.gmra.mrb[16].mxu0 %vm1036_vm4, %v13436_v10  ;;  %v10928_v25 = vcombine.low %v6462_v63, %v6462_v63  ;;  %v10929_v50 = vcombine.high %v6462_v63, %v6462_v63  ;;  %v6428_v48 = vsel %vm4634_vm9, %v6427_v27, %v6381_v28  ;;  %v10871_v27 = vcombine.low %v5468_v0, %v5468_v0 }
 0x26d   :  { %6062 = vmatpush1.bf16.msra.mxu0 %v5616_v59  ;;  %6093 = vmatprep.mubr.bf16.mxu0 %v14387_v11  ;;  %v6385_v59 = vpop.permute.xlu0 %6384 }
 0x26e   :  { %10899 = vmatprep.subr.msk.bf16.mxu0 %vm63_vm0, %v10868_v14  ;;  %v6463_v14 = vmul.bf16 %v6426_v47, %v13557_v51  ;;  %v6402_v63 = vrot.slane %v6385_v59, 4  ;;  %v13569_v47 = vld [vmem:[#allocation2 + $0x64] sm:$0x77] }
 0x26f   :  { %6592 = vrot.lane.b32.xlu1 %v10927_v34, %s11847_s8  ;;  %6590 = vrot.lane.b32.xlu0 %v10926_v31, %s11847_s8  ;;  %v10872_v31 = vcombine.high %v5468_v0, %v5468_v0  ;;  %v6429_v34 = vsel %vm786_vm6, %v6400_v57, %v6401_v62 }
 0x270   :  { %10894 = vmatmul.mubr.msk.bf16.vlgmr.msra.gmra.mrb[16].mxu1 %vm1036_vm4, %v13436_v10  ;;  %v10930_v28 = vcombine.low %v6463_v14, %v6463_v14  ;;  %v10931_v29 = vcombine.high %v6463_v14, %v6463_v14  ;;  %v6430_v57 = vsel %vm4634_vm9, %v6429_v34, %v6383_v26  ;;  %v13593_v34 = vld [vmem:[#allocation2 + $0x74] sm:$0x77] }
 0x271   :  { %6103 = vmatpush1.bf16.msra.mxu1 %v5622_v7  ;;  %6134 = vmatprep.mubr.bf16.mxu1 %v14387_v11  ;;  %v6387_v7 = vpop.permute.xlu1 %6386 }
 0x272   :  { %10901 = vmatprep.subr.msk.bf16.mxu1 %vm63_vm0, %v10870_v8  ;;  %v6464_v8 = vmul.bf16 %v6428_v48, %v13569_v47  ;;  %v6403_v14 = vrot.slane %v6387_v7, 4 }
 0x273   :  { %6596 = vrot.lane.b32.xlu1 %v10929_v50, %s11847_s8  ;;  %6594 = vrot.lane.b32.xlu0 %v10928_v25, %s11847_s8  ;;  %v10874_v25 = vcombine.high %v5469_v61, %v5469_v61  ;;  %v6431_v50 = vsel %vm786_vm6, %v6401_v62, %v6402_v63  ;;  %v5640_v62 = vsel %vm63_vm0, %v10871_v27, 0 }
 0x274   :  { %10896 = vmatmul.mubr.msk.bf16.vlgmr.msra.gmra.mrb[20].mxu0 %vm1036_vm4, %v13436_v10  ;;  %v10932_v48 = vcombine.low %v6464_v8, %v6464_v8  ;;  %v10933_v26 = vcombine.high %v6464_v8, %v6464_v8  ;;  %v6432_v0 = vsel %vm4634_vm9, %v6431_v50, %v6385_v59  ;;  %v13603_v8 = vld [vmem:[#allocation2 + $0x7c] sm:$0x77] }
 0x275   :  { %6144 = vmatpush1.bf16.msra.mxu0 %v5628_v17  ;;  %6175 = vmatprep.mubr.bf16.mxu0 %v14387_v11  ;;  %v6465_v17 = vmul.bf16 %v6430_v57, %v13581_v18  ;;  %v6466_v59 = vmul.bf16 %v6432_v0, %v13593_v34 }
 0x276   :  { %10903 = vmatprep.subr.msk.bf16.mxu0 %vm63_vm0, %v10872_v31  ;;  %v6433_v31 = vsel %vm786_vm6, %v6402_v63, %v6403_v14  ;;  %v5646_v63 = vsel %vm63_vm0, %v10873_v3, 0 }
 0x277   :  { %6600 = vrot.lane.b32.xlu1 %v10931_v29, %s11847_s8  ;;  %6598 = vrot.lane.b32.xlu0 %v10930_v28, %s11847_s8  ;;  %v10934_v28 = vcombine.low %v6465_v17, %v6465_v17  ;;  %v10935_v29 = vcombine.high %v6465_v17, %v6465_v17  ;;  %v6434_v61 = vsel %vm4634_vm9, %v6433_v31, %v6387_v7  ;;  %v13611_v7 = vld [vmem:[#allocation2 + $0x84] sm:$0x7] }
 0x278   :  { %10898 = vmatmul.mubr.msk.bf16.vlgmr.msra.gmra.mrb[20].mxu1 %vm1036_vm4, %v13436_v10  ;;  %v10936_v57 = vcombine.low %v6466_v59, %v6466_v59  ;;  %v6467_v27 = vmul.bf16 %v6434_v61, %v13603_v8  ;;  %v7443_v61 = vmul.bf16 %v13473_v58, %v12614_v40 }
 0x279   :  { %6185 = vmatpush1.bf16.msra.mxu1 %v5634_v19  ;;  %6216 = vmatprep.mubr.bf16.mxu1 %v14387_v11  ;;  %v10937_v19 = vcombine.high %v6466_v59, %v6466_v59 }
 0x27a   :  { %10905 = vmatprep.subr.msk.bf16.mxu1 %vm63_vm0, %v10874_v25  ;;  %v14401_v25 = vld [vmem:[#allocation9_spill] sm:$0xff]  ;;  %v10939_v17 = vcombine.high %v6467_v27, %v6467_v27 }
 0x27b   :  { %6604 = vrot.lane.b32.xlu1 %v10933_v26, %s11847_s8  ;;  %6602 = vrot.lane.b32.xlu0 %v10932_v48, %s11847_s8  ;;  %v7439_v50 = vmul.bf16 %v13421_v32, %v14401_v25  ;;  %v6468_v48 = vmul.bf16 %v6403_v14, %v13611_v7  ;;  %v10938_v26 = vcombine.low %v6467_v27, %v6467_v27 }
 0x27c   :  { %10900 = vmatmul.mubr.msk.bf16.vlgmr.msra.gmra.mrb[24].mxu0 %vm1036_vm4, %v13436_v10  ;;  %v7445_v27 = vmul.bf16 %v13497_v35, %v12638_v2  ;;  %v10983_v25 = vcombine.high %v7443_v61, %v7443_v61 }
 0x27d   :  { %6226 = vmatpush1.bf16.msra.mxu0 %v5640_v62  ;;  %6257 = vmatprep.mubr.bf16.mxu0 %v14387_v11  ;;  %v10974_v0 = vcombine.low %v7439_v50, %v7439_v50  ;;  %v7440_v62 = vmul.bf16 %v13439_v20, %v12584_v13  ;;  %v10940_v3 = vcombine.low %v6468_v48, %v6468_v48 }
 0x27e   :  { %v10975_v14 = vcombine.high %v7439_v50, %v7439_v50  ;;  %v7442_v13 = vmul.bf16 %v13460_v42, %v12600_v1  ;;  %v10986_v50 = vcombine.low %v7445_v27, %v7445_v27  ;;  %v7446_v48 = vmul.bf16 %v13509_v9, %v12658_v22 }
 0x27f   :  { %6608 = vrot.lane.b32.xlu1 %v10935_v29, %s11847_s8  ;;  %6606 = vrot.lane.b32.xlu0 %v10934_v28, %s11847_s8  ;;  %v10976_v31 = vcombine.low %v7440_v62, %v7440_v62  ;;  %v7441_v28 = vmul.bf16 %v13448_v60, %v12592_v4 }
 0x280   :  { %10902 = vmatmul.mubr.msk.bf16.vlgmr.msra.gmra.mrb[24].mxu1 %vm1036_vm4, %v13436_v10  ;;  %v10980_v59 = vcombine.low %v7442_v13, %v7442_v13  ;;  %v10981_v4 = vcombine.high %v7442_v13, %v7442_v13  ;;  %v10989_v2 = vcombine.high %v7446_v48, %v7446_v48  ;;  %v7451_v13 = vmul.bf16 %v13569_v47, %v12731_v55 }
 0x281   :  { %6267 = vmatpush1.bf16.msra.mxu1 %v5646_v63  ;;  %6298 = vmatprep.mubr.bf16.mxu1 %v14387_v11  ;;  %v10978_v29 = vcombine.low %v7441_v28, %v7441_v28  ;;  %v10979_v63 = vcombine.high %v7441_v28, %v7441_v28  ;;  %v7450_v28 = vmul.bf16 %v13557_v51, %v12725_v6 }
 0x282   :  { %v7453_v55 = vmul.bf16 %v13593_v34, %v12761_v12 }
 0x283   :  { %6612 = vrot.lane.b32.xlu1 %v10937_v19, %s11847_s8  ;;  %6610 = vrot.lane.b32.xlu0 %v10936_v57, %s11847_s8  ;;  %v7444_v57 = vmul.bf16 %v13485_v41, %v12626_v49  ;;  %v10982_v19 = vcombine.low %v7443_v61, %v7443_v61  ;;  %v10987_v49 = vcombine.high %v7445_v27, %v7445_v27 }
 0x284   :  { %10904 = vmatmul.mubr.msk.bf16.vlgmr.msra.gmra.mrb[28].mxu0 %vm1036_vm4, %v13436_v10 }
 0x285   :  { %6783 = vmatprep.mubr.bf16.mxu0 %v14387_v11  ;;  %v10984_v1 = vcombine.low %v7444_v57, %v7444_v57  ;;  %v10985_v40 = vcombine.high %v7444_v57, %v7444_v57 }
 0x287   :  { %6616 = vrot.lane.b32.xlu1 %v10939_v17, %s11847_s8  ;;  %6614 = vrot.lane.b32.xlu0 %v10938_v26, %s11847_s8  ;;  %v10988_v26 = vcombine.low %v7446_v48, %v7446_v48  ;;  %v7447_v17 = vmul.bf16 %v13521_v54, %v12664_v15 }
 0x288   :  { %10906 = vmatmul.mubr.msk.bf16.vlgmr.msra.gmra.mrb[28].mxu1 %vm1036_vm4, %v13436_v10  ;;  %v10977_v10 = vcombine.high %v7440_v62, %v7440_v62  ;;  %v7448_v62 = vmul.bf16 %v13533_v52, %v12691_v46 }
 0x289   :  { %6824 = vmatprep.mubr.bf16.mxu1 %v14387_v11  ;;  %v10991_v22 = vcombine.high %v7447_v17, %v7447_v17 }
 0x28a   :  { %v10993_v15 = vcombine.high %v7448_v62, %v7448_v62 }
 0x28b   :  { %7541 = vrot.lane.b32.xlu1 %v10974_v0, %s11846_s0  ;;  %6618 = vrot.lane.b32.xlu0 %v10940_v3, %s11847_s8  ;;  %v10990_v0 = vcombine.low %v7447_v17, %v7447_v17  ;;  %v10992_v3 = vcombine.low %v7448_v62, %v7448_v62  ;;  %v7455_v17 = vmul.bf16 %v13611_v7, %v12785_v43 }
 0x28f   :  { %7545 = vrot.lane.b32.xlu1 %v10976_v31, %s11846_s0  ;;  %7543 = vrot.lane.b32.xlu0 %v10975_v14, %s11846_s0  ;;  %v7449_v14 = vmul.bf16 %v13545_v33, %v12697_v53  ;;  %v10997_v53 = vcombine.high %v7450_v28, %v7450_v28 }
 0x291   :  { %v10994_v31 = vcombine.low %v7449_v14, %v7449_v14  ;;  %v10995_v46 = vcombine.high %v7449_v14, %v7449_v14 }
 0x293   :  { %7549 = vrot.lane.b32.xlu1 %v10978_v29, %s11846_s0  ;;  %7547 = vrot.lane.b32.xlu0 %v10977_v10, %s11846_s0  ;;  %v10996_v10 = vcombine.low %v7450_v28, %v7450_v28  ;;  %v10998_v29 = vcombine.low %v7451_v13, %v7451_v13  ;;  %v11041_v28 = vcombine.high %v13421_v32, %v13421_v32 }
 0x297   :  { %7553 = vrot.lane.b32.xlu1 %v10980_v59, %s11846_s0  ;;  %7551 = vrot.lane.b32.xlu0 %v10979_v63, %s11846_s0  ;;  %v7452_v59 = vmul.bf16 %v13581_v18, %v12758_v23  ;;  %v10999_v63 = vcombine.high %v7451_v13, %v7451_v13  ;;  %v7454_v23 = vmul.bf16 %v13603_v8, %v12796_v5 }
 0x299   :  { %v11001_v57 = vcombine.high %v7452_v59, %v7452_v59  ;;  %v11004_v48 = vcombine.low %v7454_v23, %v7454_v23 }
 0x29b   :  { %7557 = vrot.lane.b32.xlu1 %v10982_v19, %s11846_s0  ;;  %7555 = vrot.lane.b32.xlu0 %v10981_v4, %s11846_s0  ;;  %v11000_v4 = vcombine.low %v7452_v59, %v7452_v59  ;;  %v11002_v19 = vcombine.low %v7453_v55, %v7453_v55 }
 0x29f   :  { %7561 = vrot.lane.b32.xlu1 %v10984_v1, %s11846_s0  ;;  %7559 = vrot.lane.b32.xlu0 %v10983_v25, %s11846_s0 }
 0x2a3   :  { %7565 = vrot.lane.b32.xlu1 %v10986_v50, %s11846_s0  ;;  %7563 = vrot.lane.b32.xlu0 %v10985_v40, %s11846_s0  ;;  %v11003_v50 = vcombine.high %v7453_v55, %v7453_v55 }
 0x2a7   :  { %7569 = vrot.lane.b32.xlu1 %v10988_v26, %s11846_s0  ;;  %7567 = vrot.lane.b32.xlu0 %v10987_v49, %s11846_s0 }
 0x2ab   :  { %7573 = vrot.lane.b32.xlu1 %v10990_v0, %s11846_s0  ;;  %7571 = vrot.lane.b32.xlu0 %v10989_v2, %s11846_s0  ;;  %v13694_v2 = vld [vmem:[%s14355_s1 + $0xa] sm:$0x3] }
 0x2af   :  { %7577 = vrot.lane.b32.xlu1 %v10992_v3, %s11846_s0  ;;  %7575 = vrot.lane.b32.xlu0 %v10991_v22, %s11846_s0  ;;  %v11005_v22 = vcombine.high %v7454_v23, %v7454_v23 }
 0x2b3   :  { %7581 = vrot.lane.b32.xlu1 %v10994_v31, %s11846_s0  ;;  %7579 = vrot.lane.b32.xlu0 %v10993_v15, %s11846_s0  ;;  %v11006_v15 = vcombine.low %v7455_v17, %v7455_v17  ;;  %v11048_v17 = vcombine.low %v13473_v58, %v13473_v58 }
 0x2b7   :  { %7585 = vrot.lane.b32.xlu1 %v10996_v10, %s11846_s0  ;;  %7583 = vrot.lane.b32.xlu0 %v10995_v46, %s11846_s0  ;;  %v11040_v46 = vcombine.low %v13421_v32, %v13421_v32  ;;  %v11043_v32 = vcombine.high %v13439_v20, %v13439_v20 }
 0x2bb   :  { %7589 = vrot.lane.b32.xlu1 %v10998_v29, %s11846_s0  ;;  %7587 = vrot.lane.b32.xlu0 %v10997_v53, %s11846_s0 }
 0x2bc   :  { %v6555_v6 = vpop.permute.xlu0 %6554  ;;  %v6557_v61 = vpop.permute.xlu1 %6556 }
 0x2bd   :  { %v6620_v1 = vsel %vm4417_vm8, %v6555_v6, %v6557_v61  ;;  %v11042_v6 = vcombine.low %v13439_v20, %v13439_v20  ;;  %v11045_v20 = vcombine.high %v13448_v60, %v13448_v60 }
 0x2be   :  { %v6656_v12 = vsel %vm63_vm0, %v6620_v1, 0 }
 0x2bf   :  { %7593 = vrot.lane.b32.xlu1 %v11000_v4, %s11846_s0  ;;  %7591 = vrot.lane.b32.xlu0 %v10999_v63, %s11846_s0 }
 0x2c1   :  { %v6559_v27 = vpop.permute.xlu0 %6558  ;;  %v6561_v25 = vpop.permute.xlu1 %6560 }
 0x2c2   :  { %v6621_v40 = vsel %vm4417_vm8, %v6557_v61, %v6559_v27  ;;  %v6622_v49 = vsel %vm4417_vm8, %v6559_v27, %v6561_v25 }
 0x2c3   :  { %7597 = vrot.lane.b32.xlu1 %v11002_v19, %s11846_s0  ;;  %7595 = vrot.lane.b32.xlu0 %v11001_v57, %s11846_s0  ;;  %v6662_v62 = vsel %vm63_vm0, %v6622_v49, 0  ;;  %v11044_v19 = vcombine.low %v13448_v60, %v13448_v60  ;;  %v11047_v60 = vcombine.high %v13460_v42, %v13460_v42 }
 0x2c4   :  { %10941 = vmatprep.subr.msk.bf16.mxu0 %vm63_vm0, %v6621_v40 }
 0x2c5   :  { %6752 = vmatpush1.bf16.msra.mxu0 %v6656_v12  ;;  %v6563_v5 = vpop.permute.xlu0 %6562  ;;  %v6565_v26 = vpop.permute.xlu1 %6564  ;;  %v11046_v12 = vcombine.low %v13460_v42, %v13460_v42  ;;  %v11049_v42 = vcombine.high %v13473_v58, %v13473_v58  ;;  %v11051_v58 = vcombine.high %v13485_v41, %v13485_v41 }
 0x2c6   :  { %v6623_v0 = vsel %vm4417_vm8, %v6561_v25, %v6563_v5  ;;  %v6624_v43 = vsel %vm4417_vm8, %v6563_v5, %v6565_v26 }
 0x2c7   :  { %7601 = vrot.lane.b32.xlu1 %v11004_v48, %s11846_s0  ;;  %7599 = vrot.lane.b32.xlu0 %v11003_v50, %s11846_s0  ;;  %v6668_v10 = vsel %vm63_vm0, %v6624_v43, 0 }
 0x2c8   :  { %10943 = vmatprep.subr.msk.bf16.mxu1 %vm63_vm0, %v6623_v0  ;;  %10942 = vmatmul.mubr.msk.bf16.vlgmr.msra.gmra.mrb[0].mxu0 %vm1036_vm4, %v13694_v2 }
 0x2c9   :  { %6793 = vmatpush1.bf16.msra.mxu1 %v6662_v62  ;;  %v6567_v3 = vpop.permute.xlu0 %6566  ;;  %v6569_v14 = vpop.permute.xlu1 %6568  ;;  %6865 = vmatprep.mubr.bf16.mxu0 %v14387_v11 }
 0x2ca   :  { %v6625_v31 = vsel %vm4417_vm8, %v6565_v26, %v6567_v3  ;;  %v6626_v13 = vsel %vm4417_vm8, %v6567_v3, %v6569_v14 }
 0x2cb   :  { %7605 = vrot.lane.b32.xlu1 %v11006_v15, %s11846_s0  ;;  %7603 = vrot.lane.b32.xlu0 %v11005_v22, %s11846_s0  ;;  %v6674_v61 = vsel %vm63_vm0, %v6626_v13, 0  ;;  %v11052_v13 = vcombine.low %v13497_v35, %v13497_v35 }
 0x2cc   :  { %10945 = vmatprep.subr.msk.bf16.mxu0 %vm63_vm0, %v6625_v31  ;;  %10944 = vmatmul.mubr.msk.bf16.vlgmr.msra.gmra.mrb[0].mxu1 %vm1036_vm4, %v13694_v2 }
 0x2cd   :  { %6834 = vmatpush1.bf16.msra.mxu0 %v6668_v10  ;;  %v6571_v53 = vpop.permute.xlu0 %6570  ;;  %v6573_v29 = vpop.permute.xlu1 %6572  ;;  %6906 = vmatprep.mubr.bf16.mxu1 %v14387_v11 }
 0x2ce   :  { %v6627_v59 = vsel %vm4417_vm8, %v6569_v14, %v6571_v53  ;;  %v6628_v63 = vsel %vm4417_vm8, %v6571_v53, %v6573_v29  ;;  %v11050_v14 = vcombine.low %v13485_v41, %v13485_v41  ;;  %v11053_v41 = vcombine.high %v13497_v35, %v13497_v35 }
 0x2cf   :  { %8513 = vrot.lane.b32.xlu1 %v11041_v28, %s11844_s25  ;;  %8511 = vrot.lane.b32.xlu0 %v11040_v46, %s11844_s25  ;;  %v6680_v23 = vsel %vm63_vm0, %v6628_v63, 0  ;;  %v11055_v35 = vcombine.high %v13509_v9, %v13509_v9 }
 0x2d0   :  { %10947 = vmatprep.subr.msk.bf16.mxu1 %vm63_vm0, %v6627_v59  ;;  %10946 = vmatmul.mubr.msk.bf16.vlgmr.msra.gmra.mrb[4].mxu0 %vm1036_vm4, %v13694_v2 }
 0x2d1   :  { %6875 = vmatpush1.bf16.msra.mxu1 %v6674_v61  ;;  %v6575_v4 = vpop.permute.xlu0 %6574  ;;  %v6577_v55 = vpop.permute.xlu1 %6576  ;;  %6947 = vmatprep.mubr.bf16.mxu0 %v14387_v11  ;;  %v11054_v61 = vcombine.low %v13509_v9, %v13509_v9  ;;  %v11057_v9 = vcombine.high %v13521_v54, %v13521_v54 }
 0x2d2   :  { %v6629_v57 = vsel %vm4417_vm8, %v6573_v29, %v6575_v4  ;;  %v6630_v1 = vsel %vm4417_vm8, %v6575_v4, %v6577_v55 }
 0x2d3   :  { %8517 = vrot.lane.b32.xlu1 %v11043_v32, %s11844_s25  ;;  %8515 = vrot.lane.b32.xlu0 %v11042_v6, %s11844_s25  ;;  %v6686_v50 = vsel %vm63_vm0, %v6630_v1, 0 }
 0x2d4   :  { %10949 = vmatprep.subr.msk.bf16.mxu0 %vm63_vm0, %v6629_v57  ;;  %10948 = vmatmul.mubr.msk.bf16.vlgmr.msra.gmra.mrb[4].mxu1 %vm1036_vm4, %v13694_v2 }
 0x2d5   :  { %6916 = vmatpush1.bf16.msra.mxu0 %v6680_v23  ;;  %v6579_v27 = vpop.permute.xlu0 %6578  ;;  %v6581_v25 = vpop.permute.xlu1 %6580  ;;  %6988 = vmatprep.mubr.bf16.mxu1 %v14387_v11 }
 0x2d6   :  { %v6631_v40 = vsel %vm4417_vm8, %v6577_v55, %v6579_v27  ;;  %v6632_v48 = vsel %vm4417_vm8, %v6579_v27, %v6581_v25 }
 0x2d7   :  { %8521 = vrot.lane.b32.xlu1 %v11045_v20, %s11844_s25  ;;  %8519 = vrot.lane.b32.xlu0 %v11044_v19, %s11844_s25  ;;  %v6692_v0 = vsel %vm63_vm0, %v6632_v48, 0  ;;  %v11056_v19 = vcombine.low %v13521_v54, %v13521_v54  ;;  %v11059_v54 = vcombine.high %v13533_v52, %v13533_v52 }
 0x2d8   :  { %10951 = vmatprep.subr.msk.bf16.mxu1 %vm63_vm0, %v6631_v40  ;;  %10950 = vmatmul.mubr.msk.bf16.vlgmr.msra.gmra.mrb[8].mxu0 %vm1036_vm4, %v13694_v2 }
 0x2d9   :  { %6957 = vmatpush1.bf16.msra.mxu1 %v6686_v50  ;;  %v6583_v49 = vpop.permute.xlu0 %6582  ;;  %v6585_v5 = vpop.permute.xlu1 %6584  ;;  %7029 = vmatprep.mubr.bf16.mxu0 %v14387_v11 }
 0x2da   :  { %v6633_v26 = vsel %vm4417_vm8, %v6581_v25, %v6583_v49  ;;  %v6634_v62 = vsel %vm4417_vm8, %v6583_v49, %v6585_v5 }
 0x2db   :  { %8525 = vrot.lane.b32.xlu1 %v11047_v60, %s11844_s25  ;;  %8523 = vrot.lane.b32.xlu0 %v11046_v12, %s11844_s25  ;;  %v6698_v15 = vsel %vm63_vm0, %v6634_v62, 0  ;;  %v11058_v60 = vcombine.low %v13533_v52, %v13533_v52  ;;  %v11061_v52 = vcombine.high %v13545_v33, %v13545_v33 }
 0x2dc   :  { %10953 = vmatprep.subr.msk.bf16.mxu0 %vm63_vm0, %v6633_v26  ;;  %10952 = vmatmul.mubr.msk.bf16.vlgmr.msra.gmra.mrb[8].mxu1 %vm1036_vm4, %v13694_v2  ;;  %v11060_v26 = vcombine.low %v13545_v33, %v13545_v33  ;;  %v11063_v33 = vcombine.high %v13557_v51, %v13557_v51 }
 0x2dd   :  { %6998 = vmatpush1.bf16.msra.mxu0 %v6692_v0  ;;  %v6587_v22 = vpop.permute.xlu0 %6586  ;;  %v6589_v43 = vpop.permute.xlu1 %6588  ;;  %7070 = vmatprep.mubr.bf16.mxu1 %v14387_v11 }
 0x2de   :  { %v6635_v3 = vsel %vm4417_vm8, %v6585_v5, %v6587_v22  ;;  %v6636_v31 = vsel %vm4417_vm8, %v6587_v22, %v6589_v43 }
 0x2df   :  { %8529 = vrot.lane.b32.xlu1 %v11049_v42, %s11844_s25  ;;  %8527 = vrot.lane.b32.xlu0 %v11048_v17, %s11844_s25  ;;  %v6704_v53 = vsel %vm63_vm0, %v6636_v31, 0 }
 0x2e0   :  { %10955 = vmatprep.subr.msk.bf16.mxu1 %vm63_vm0, %v6635_v3  ;;  %10954 = vmatmul.mubr.msk.bf16.vlgmr.msra.gmra.mrb[12].mxu0 %vm1036_vm4, %v13694_v2 }
 0x2e1   :  { %7039 = vmatpush1.bf16.msra.mxu1 %v6698_v15  ;;  %v6591_v28 = vpop.permute.xlu0 %6590  ;;  %v6593_v46 = vpop.permute.xlu1 %6592  ;;  %7111 = vmatprep.mubr.bf16.mxu0 %v14387_v11 }
 0x2e2   :  { %v6637_v10 = vsel %vm4417_vm8, %v6589_v43, %v6591_v28  ;;  %v6638_v29 = vsel %vm4417_vm8, %v6591_v28, %v6593_v46  ;;  %v11062_v43 = vcombine.low %v13557_v51, %v13557_v51  ;;  %v11065_v51 = vcombine.high %v13569_v47, %v13569_v47 }
 0x2e3   :  { %8533 = vrot.lane.b32.xlu1 %v11051_v58, %s11844_s25  ;;  %8531 = vrot.lane.b32.xlu0 %v11050_v14, %s11844_s25  ;;  %v6710_v63 = vsel %vm63_vm0, %v6638_v29, 0  ;;  %v11064_v28 = vcombine.low %v13569_v47, %v13569_v47  ;;  %v11067_v47 = vcombine.high %v13581_v18, %v13581_v18  ;;  %v11066_v29 = vcombine.low %v13581_v18, %v13581_v18 }
 0x2e4   :  { %10957 = vmatprep.subr.msk.bf16.mxu0 %vm63_vm0, %v6637_v10  ;;  %10956 = vmatmul.mubr.msk.bf16.vlgmr.msra.gmra.mrb[12].mxu1 %vm1036_vm4, %v13694_v2  ;;  %v11069_v18 = vcombine.high %v13593_v34, %v13593_v34 }
 0x2e5   :  { %7080 = vmatpush1.bf16.msra.mxu0 %v6704_v53  ;;  %v6595_v59 = vpop.permute.xlu0 %6594  ;;  %v6597_v32 = vpop.permute.xlu1 %6596  ;;  %7152 = vmatprep.mubr.bf16.mxu1 %v14387_v11 }
 0x2e6   :  { %v6639_v6 = vsel %vm4417_vm8, %v6593_v46, %v6595_v59  ;;  %v6640_v4 = vsel %vm4417_vm8, %v6595_v59, %v6597_v32 }
 0x2e7   :  { %8537 = vrot.lane.b32.xlu1 %v11053_v41, %s11844_s25  ;;  %8535 = vrot.lane.b32.xlu0 %v11052_v13, %s11844_s25  ;;  %v6716_v23 = vsel %vm63_vm0, %v6640_v4, 0  ;;  %v11068_v4 = vcombine.low %v13593_v34, %v13593_v34 }
 0x2e8   :  { %10959 = vmatprep.subr.msk.bf16.mxu1 %vm63_vm0, %v6639_v6  ;;  %10958 = vmatmul.mubr.msk.bf16.vlgmr.msra.gmra.mrb[16].mxu0 %vm1036_vm4, %v13694_v2 }
 0x2e9   :  { %7121 = vmatpush1.bf16.msra.mxu1 %v6710_v63  ;;  %v6599_v55 = vpop.permute.xlu0 %6598  ;;  %v6601_v57 = vpop.permute.xlu1 %6600  ;;  %7193 = vmatprep.mubr.bf16.mxu0 %v14387_v11 }
 0x2ea   :  { %v6641_v20 = vsel %vm4417_vm8, %v6597_v32, %v6599_v55  ;;  %v6642_v1 = vsel %vm4417_vm8, %v6599_v55, %v6601_v57 }
 0x2eb   :  { %8541 = vrot.lane.b32.xlu1 %v11055_v35, %s11844_s25  ;;  %8539 = vrot.lane.b32.xlu0 %v11054_v61, %s11844_s25  ;;  %v6722_v12 = vsel %vm63_vm0, %v6642_v1, 0  ;;  %v11825_v1 = vld [vmem:[#allocation2 + $0x4] sm:$0x77] }
 0x2ec   :  { %10961 = vmatprep.subr.msk.bf16.mxu0 %vm63_vm0, %v6641_v20  ;;  %10960 = vmatmul.mubr.msk.bf16.vlgmr.msra.gmra.mrb[16].mxu1 %vm1036_vm4, %v13694_v2  ;;  %v13901_v20 = vld [vmem:[%s14355_s1 + $0xc] sm:$0x3] }
 0x2ed   :  { %7162 = vmatpush1.bf16.msra.mxu0 %v6716_v23  ;;  %v6603_v27 = vpop.permute.xlu0 %6602  ;;  %v6605_v25 = vpop.permute.xlu1 %6604  ;;  %7234 = vmatprep.mubr.bf16.mxu1 %v14387_v11  ;;  %v11070_v23 = vcombine.low %v13603_v8, %v13603_v8 }
 0x2ee   :  { %v6643_v40 = vsel %vm4417_vm8, %v6601_v57, %v6603_v27  ;;  %v6644_v50 = vsel %vm4417_vm8, %v6603_v27, %v6605_v25  ;;  %v9396_v27 = vmul.bf16 %v11825_v1, %v12814_v44 }
 0x2ef   :  { %8545 = vrot.lane.b32.xlu1 %v11057_v9, %s11844_s25  ;;  %8543 = vrot.lane.b32.xlu0 %v11056_v19, %s11844_s25  ;;  %v6728_v42 = vsel %vm63_vm0, %v6644_v50, 0  ;;  %v11826_v50 = vld [vmem:[#allocation2 + $0xc] sm:$0x77] }
 0x2f0   :  { %10963 = vmatprep.subr.msk.bf16.mxu1 %vm63_vm0, %v6643_v40  ;;  %10962 = vmatmul.mubr.msk.bf16.vlgmr.msra.gmra.mrb[20].mxu0 %vm1036_vm4, %v13694_v2  ;;  %v11106_v44 = vcombine.low %v9396_v27, %v9396_v27 }
 0x2f1   :  { %7203 = vmatpush1.bf16.msra.mxu1 %v6722_v12  ;;  %v6607_v48 = vpop.permute.xlu0 %6606  ;;  %v6609_v49 = vpop.permute.xlu1 %6608  ;;  %7275 = vmatprep.mubr.bf16.mxu0 %v14387_v11 }
 0x2f2   :  { %v6645_v5 = vsel %vm4417_vm8, %v6605_v25, %v6607_v48  ;;  %v6646_v17 = vsel %vm4417_vm8, %v6607_v48, %v6609_v49  ;;  %v9397_v48 = vmul.bf16 %v11826_v50, %v12828_v36  ;;  %v11107_v36 = vcombine.high %v9396_v27, %v9396_v27 }
 0x2f3   :  { %8549 = vrot.lane.b32.xlu1 %v11059_v54, %s11844_s25  ;;  %8547 = vrot.lane.b32.xlu0 %v11058_v60, %s11844_s25  ;;  %v6734_v3 = vsel %vm63_vm0, %v6646_v17, 0  ;;  %v11827_v17 = vld [vmem:[#allocation2 + $0x14] sm:$0x77] }
 0x2f4   :  { %10965 = vmatprep.subr.msk.bf16.mxu0 %vm63_vm0, %v6645_v5  ;;  %10964 = vmatmul.mubr.msk.bf16.vlgmr.msra.gmra.mrb[20].mxu1 %vm1036_vm4, %v13694_v2 }
 0x2f5   :  { %7244 = vmatpush1.bf16.msra.mxu0 %v6728_v42  ;;  %v6611_v0 = vpop.permute.xlu0 %6610  ;;  %v6613_v62 = vpop.permute.xlu1 %6612  ;;  %7316 = vmatprep.mubr.bf16.mxu1 %v14387_v11  ;;  %v11108_v42 = vcombine.low %v9397_v48, %v9397_v48 }
 0x2f6   :  { %v6647_v22 = vsel %vm4417_vm8, %v6609_v49, %v6611_v0  ;;  %v6648_v58 = vsel %vm4417_vm8, %v6611_v0, %v6613_v62  ;;  %v9398_v0 = vmul.bf16 %v11827_v17, %v12837_v39  ;;  %v11109_v39 = vcombine.high %v9397_v48, %v9397_v48 }
 0x2f7   :  { %8553 = vrot.lane.b32.xlu1 %v11061_v52, %s11844_s25  ;;  %8551 = vrot.lane.b32.xlu0 %v11060_v26, %s11844_s25  ;;  %v6740_v46 = vsel %vm63_vm0, %v6648_v58, 0 }
 0x2f8   :  { %10967 = vmatprep.subr.msk.bf16.mxu1 %vm63_vm0, %v6647_v22  ;;  %10966 = vmatmul.mubr.msk.bf16.vlgmr.msra.gmra.mrb[24].mxu0 %vm1036_vm4, %v13694_v2  ;;  %v11110_v58 = vcombine.low %v9398_v0, %v9398_v0 }
 0x2f9   :  { %7285 = vmatpush1.bf16.msra.mxu1 %v6734_v3  ;;  %v6615_v14 = vpop.permute.xlu0 %6614  ;;  %v6617_v15 = vpop.permute.xlu1 %6616  ;;  %7357 = vmatprep.mubr.bf16.mxu0 %v14387_v11 }
 0x2fa   :  { %v6649_v31 = vsel %vm4417_vm8, %v6613_v62, %v6615_v14  ;;  %v6650_v10 = vsel %vm4417_vm8, %v6615_v14, %v6617_v15  ;;  %v11828_v14 = vld [vmem:[#allocation2 + $0x1c] sm:$0x77] }
 0x2fb   :  { %8557 = vrot.lane.b32.xlu1 %v11063_v33, %s11844_s25  ;;  %8555 = vrot.lane.b32.xlu0 %v11062_v43, %s11844_s25  ;;  %v6746_v59 = vsel %vm63_vm0, %v6650_v10, 0 }
 0x2fc   :  { %10969 = vmatprep.subr.msk.bf16.mxu0 %vm63_vm0, %v6649_v31  ;;  %10968 = vmatmul.mubr.msk.bf16.vlgmr.msra.gmra.mrb[24].mxu1 %vm1036_vm4, %v13694_v2 }
 0x2fd   :  { %7326 = vmatpush1.bf16.msra.mxu0 %v6740_v46  ;;  %v6619_v41 = vpop.permute.xlu0 %6618  ;;  %v7542_v13 = vpop.permute.xlu1 %7541  ;;  %7398 = vmatprep.mubr.bf16.mxu1 %v14387_v11 }
 0x2fe   :  { %v6651_v53 = vsel %vm4417_vm8, %v6617_v15, %v6619_v41  ;;  %v9399_v15 = vmul.bf16 %v11828_v14, %v12846_v21  ;;  %v11111_v21 = vcombine.high %v9398_v0, %v9398_v0 }
 0x2ff   :  { %8561 = vrot.lane.b32.xlu1 %v11065_v51, %s11844_s25  ;;  %8559 = vrot.lane.b32.xlu0 %v11064_v28, %s11844_s25 }
 0x300   :  { %10971 = vmatprep.subr.msk.bf16.mxu1 %vm63_vm0, %v6651_v53  ;;  %10970 = vmatmul.mubr.msk.bf16.vlgmr.msra.gmra.mrb[28].mxu0 %vm1036_vm4, %v13694_v2  ;;  %v11112_v41 = vcombine.low %v9399_v15, %v9399_v15 }
 0x301   :  { %7367 = vmatpush1.bf16.msra.mxu1 %v6746_v59  ;;  %v7544_v32 = vpop.permute.xlu0 %7543  ;;  %v7546_v6 = vpop.permute.xlu1 %7545  ;;  %7770 = vmatprep.mubr.bf16.mxu0 %v14387_v11 }
 0x302   :  { %v7607_v35 = vsel %vm1941_vm7, %v7542_v13, %v7544_v32  ;;  %v7608_v61 = vsel %vm1941_vm7, %v7544_v32, %v7546_v6  ;;  %v11829_v13 = vld [vmem:[#allocation2 + $0x24] sm:$0x77] }
 0x303   :  { %v7643_v63 = vsel %vm63_vm0, %v7607_v35, 0  ;;  %8565 = vrot.lane.b32.xlu1 %v11067_v47, %s11844_s25  ;;  %8563 = vrot.lane.b32.xlu0 %v11066_v29, %s11844_s25  ;;  %v9400_v53 = vmul.bf16 %v11829_v13, %v12854_v24  ;;  %v11113_v24 = vcombine.high %v9399_v15, %v9399_v15 }
 0x304   :  { %11007 = vmatprep.subr.msk.bf16.mxu0 %vm63_vm0, %v7608_v61  ;;  %10972 = vmatmul.mubr.msk.bf16.vlgmr.msra.gmra.mrb[28].mxu1 %vm1036_vm4, %v13694_v2  ;;  %v11071_v2 = vcombine.high %v13603_v8, %v13603_v8  ;;  %v11072_v8 = vcombine.low %v13611_v7, %v13611_v7  ;;  %v11830_v61 = vld [vmem:[#allocation2 + $0x2c] sm:$0x77] }
 0x305   :  { %7739 = vmatpush1.bf16.msra.mxu0 %v7643_v63  ;;  %v7548_v55 = vpop.permute.xlu0 %7547  ;;  %v7550_v57 = vpop.permute.xlu1 %7549  ;;  %7811 = vmatprep.mubr.bf16.mxu1 %v14387_v11  ;;  %v11114_v35 = vcombine.low %v9400_v53, %v9400_v53  ;;  %v9401_v63 = vmul.bf16 %v11830_v61, %v12864_v56  ;;  %v11115_v56 = vcombine.high %v9400_v53, %v9400_v53  ;;  %v11836_v53 = vld [vmem:[#allocation2 + $0x5c] sm:$0x77] }
 0x306   :  { %v7609_v9 = vsel %vm1941_vm7, %v7546_v6, %v7548_v55  ;;  %v7610_v19 = vsel %vm1941_vm7, %v7548_v55, %v7550_v57 }
 0x307   :  { %v7649_v34 = vsel %vm63_vm0, %v7609_v9, 0  ;;  %8569 = vrot.lane.b32.xlu1 %v11069_v18, %s11844_s25  ;;  %8567 = vrot.lane.b32.xlu0 %v11068_v4, %s11844_s25 }
 0x308   :  { %11009 = vmatprep.subr.msk.bf16.mxu1 %vm63_vm0, %v7610_v19  ;;  %11008 = vmatmul.mubr.msk.bf16.vlgmr.msra.gmra.mrb[0].mxu0 %vm1036_vm4, %v13901_v20  ;;  %v11116_v19 = vcombine.low %v9401_v63, %v9401_v63 }
 0x309   :  { %7780 = vmatpush1.bf16.msra.mxu1 %v7649_v34  ;;  %v7552_v25 = vpop.permute.xlu0 %7551  ;;  %v7554_v40 = vpop.permute.xlu1 %7553  ;;  %7852 = vmatprep.mubr.bf16.mxu0 %v14387_v11  ;;  %v11831_v34 = vld [vmem:[#allocation2 + $0x34] sm:$0x77] }
 0x30a   :  { %v7611_v54 = vsel %vm1941_vm7, %v7550_v57, %v7552_v25  ;;  %v7612_v60 = vsel %vm1941_vm7, %v7552_v25, %v7554_v40 }
 0x30b   :  { %v7655_v12 = vsel %vm63_vm0, %v7611_v54, 0  ;;  %8573 = vrot.lane.b32.xlu1 %v11071_v2, %s11844_s25  ;;  %8571 = vrot.lane.b32.xlu0 %v11070_v23, %s11844_s25  ;;  %v9402_v2 = vmul.bf16 %v11831_v34, %v12874_v30  ;;  %v11117_v30 = vcombine.high %v9401_v63, %v9401_v63 }
 0x30c   :  { %11011 = vmatprep.subr.msk.bf16.mxu0 %vm63_vm0, %v7612_v60  ;;  %11010 = vmatmul.mubr.msk.bf16.vlgmr.msra.gmra.mrb[0].mxu1 %vm1036_vm4, %v13901_v20  ;;  %v11832_v60 = vld [vmem:[#allocation2 + $0x3c] sm:$0x77] }
 0x30d   :  { %7821 = vmatpush1.bf16.msra.mxu0 %v7655_v12  ;;  %v7556_v49 = vpop.permute.xlu0 %7555  ;;  %v7558_v5 = vpop.permute.xlu1 %7557  ;;  %7893 = vmatprep.mubr.bf16.mxu1 %v14387_v11  ;;  %v11118_v54 = vcombine.low %v9402_v2, %v9402_v2  ;;  %v9403_v12 = vmul.bf16 %v11832_v60, %v12886_v45  ;;  %v11119_v45 = vcombine.high %v9402_v2, %v9402_v2 }
 0x30e   :  { %v7613_v52 = vsel %vm1941_vm7, %v7554_v40, %v7556_v49  ;;  %v7614_v26 = vsel %vm1941_vm7, %v7556_v49, %v7558_v5 }
 0x30f   :  { %v7661_v7 = vsel %vm63_vm0, %v7613_v52, 0  ;;  %8575 = vrot.lane.b32.xlu0 %v11072_v8, %s11844_s25  ;;  %9498 = vrot.lane.b32.xlu1 %v11106_v44, %s11845_s28  ;;  %v11833_v52 = vld [vmem:[#allocation2 + $0x44] sm:$0x77] }
 0x310   :  { %11013 = vmatprep.subr.msk.bf16.mxu1 %vm63_vm0, %v7614_v26  ;;  %11012 = vmatmul.mubr.msk.bf16.vlgmr.msra.gmra.mrb[4].mxu0 %vm1036_vm4, %v13901_v20  ;;  %v9404_v26 = vmul.bf16 %v11833_v52, %v12901_v38  ;;  %v11121_v38 = vcombine.high %v9403_v12, %v9403_v12 }
 0x311   :  { %7862 = vmatpush1.bf16.msra.mxu1 %v7661_v7  ;;  %v7560_v62 = vpop.permute.xlu0 %7559  ;;  %v7562_v22 = vpop.permute.xlu1 %7561  ;;  %7934 = vmatprep.mubr.bf16.mxu0 %v14387_v11 }
 0x312   :  { %v7615_v33 = vsel %vm1941_vm7, %v7558_v5, %v7560_v62  ;;  %v7616_v43 = vsel %vm1941_vm7, %v7560_v62, %v7562_v22  ;;  %v11120_v5 = vcombine.low %v9403_v12, %v9403_v12  ;;  %v11122_v62 = vcombine.low %v9404_v26, %v9404_v26 }
 0x313   :  { %v7667_v3 = vsel %vm63_vm0, %v7615_v33, 0  ;;  %9500 = vrot.lane.b32.xlu0 %v11107_v36, %s11845_s28  ;;  %9502 = vrot.lane.b32.xlu1 %v11108_v42, %s11845_s28 }
 0x314   :  { %11015 = vmatprep.subr.msk.bf16.mxu0 %vm63_vm0, %v7616_v43  ;;  %11014 = vmatmul.mubr.msk.bf16.vlgmr.msra.gmra.mrb[4].mxu1 %vm1036_vm4, %v13901_v20 }
 0x315   :  { %7903 = vmatpush1.bf16.msra.mxu0 %v7667_v3  ;;  %v7564_v31 = vpop.permute.xlu0 %7563  ;;  %v7566_v51 = vpop.permute.xlu1 %7565  ;;  %7975 = vmatprep.mubr.bf16.mxu1 %v14387_v11 }
 0x316   :  { %v7617_v28 = vsel %vm1941_vm7, %v7562_v22, %v7564_v31  ;;  %v7618_v46 = vsel %vm1941_vm7, %v7564_v31, %v7566_v51  ;;  %v11834_v22 = vld [vmem:[#allocation2 + $0x4c] sm:$0x77]  ;;  %v11835_v31 = vld [vmem:[#allocation2 + $0x54] sm:$0x77] }
 0x317   :  { %v7673_v10 = vsel %vm63_vm0, %v7617_v28, 0  ;;  %9504 = vrot.lane.b32.xlu0 %v11109_v39, %s11845_s28  ;;  %9506 = vrot.lane.b32.xlu1 %v11110_v58, %s11845_s28  ;;  %v9405_v33 = vmul.bf16 %v11834_v22, %v12971_v16  ;;  %v11123_v16 = vcombine.high %v9404_v26, %v9404_v26 }
 0x318   :  { %11017 = vmatprep.subr.msk.bf16.mxu1 %vm63_vm0, %v7618_v46  ;;  %11016 = vmatmul.mubr.msk.bf16.vlgmr.msra.gmra.mrb[8].mxu0 %vm1036_vm4, %v13901_v20 }
 0x319   :  { %7944 = vmatpush1.bf16.msra.mxu1 %v7673_v10  ;;  %v7568_v47 = vpop.permute.xlu0 %7567  ;;  %v7570_v29 = vpop.permute.xlu1 %7569  ;;  %8016 = vmatprep.mubr.bf16.mxu0 %v14387_v11  ;;  %v11124_v15 = vcombine.low %v9405_v33, %v9405_v33 }
 0x31a   :  { %v7619_v59 = vsel %vm1941_vm7, %v7566_v51, %v7568_v47  ;;  %v7620_v32 = vsel %vm1941_vm7, %v7568_v47, %v7570_v29  ;;  %v9406_v51 = vmul.bf16 %v11835_v31, %v12981_v37  ;;  %v11125_v37 = vcombine.high %v9405_v33, %v9405_v33  ;;  %v14402_v47 = vld [vmem:[#allocation3_spill] sm:$0xff] }
 0x31b   :  { %v7679_v6 = vsel %vm63_vm0, %v7619_v59, 0  ;;  %9508 = vrot.lane.b32.xlu0 %v11111_v21, %s11845_s28  ;;  %9510 = vrot.lane.b32.xlu1 %v11112_v41, %s11845_s28 }
 0x31c   :  { %11019 = vmatprep.subr.msk.bf16.mxu0 %vm63_vm0, %v7620_v32  ;;  %11018 = vmatmul.mubr.msk.bf16.vlgmr.msra.gmra.mrb[8].mxu1 %vm1036_vm4, %v13901_v20  ;;  %v11126_v13 = vcombine.low %v9406_v51, %v9406_v51  ;;  %v11127_v61 = vcombine.high %v9406_v51, %v9406_v51 }
 0x31d   :  { %7985 = vmatpush1.bf16.msra.mxu0 %v7679_v6  ;;  %v7572_v18 = vpop.permute.xlu0 %7571  ;;  %v7574_v4 = vpop.permute.xlu1 %7573  ;;  %8057 = vmatprep.mubr.bf16.mxu1 %v14387_v11 }
 0x31e   :  { %v7621_v55 = vsel %vm1941_vm7, %v7570_v29, %v7572_v18  ;;  %v7622_v57 = vsel %vm1941_vm7, %v7572_v18, %v7574_v4  ;;  %v9407_v29 = vmul.bf16 %v11836_v53, %v14402_v47  ;;  %v11837_v18 = vld [vmem:[#allocation2 + $0x64] sm:$0x77] }
 0x31f   :  { %v7685_v9 = vsel %vm63_vm0, %v7621_v55, 0  ;;  %9512 = vrot.lane.b32.xlu0 %v11113_v24, %s11845_s28  ;;  %9514 = vrot.lane.b32.xlu1 %v11114_v35, %s11845_s28 }
 0x320   :  { %11021 = vmatprep.subr.msk.bf16.mxu1 %vm63_vm0, %v7622_v57  ;;  %11020 = vmatmul.mubr.msk.bf16.vlgmr.msra.gmra.mrb[12].mxu0 %vm1036_vm4, %v13901_v20  ;;  %v11128_v63 = vcombine.low %v9407_v29, %v9407_v29  ;;  %v11129_v2 = vcombine.high %v9407_v29, %v9407_v29 }
 0x321   :  { %8026 = vmatpush1.bf16.msra.mxu1 %v7685_v9  ;;  %v7576_v23 = vpop.permute.xlu0 %7575  ;;  %v7578_v1 = vpop.permute.xlu1 %7577  ;;  %8098 = vmatprep.mubr.bf16.mxu0 %v14387_v11 }
 0x322   :  { %v7623_v27 = vsel %vm1941_vm7, %v7574_v4, %v7576_v23  ;;  %v7624_v25 = vsel %vm1941_vm7, %v7576_v23, %v7578_v1  ;;  %v14403_v4 = vld [vmem:[#allocation4_spill] sm:$0xff] }
 0x323   :  { %v7691_v40 = vsel %vm63_vm0, %v7623_v27, 0  ;;  %9516 = vrot.lane.b32.xlu0 %v11115_v56, %s11845_s28  ;;  %9518 = vrot.lane.b32.xlu1 %v11116_v19, %s11845_s28  ;;  %v9408_v55 = vmul.bf16 %v11837_v18, %v14403_v4  ;;  %v14404_v27 = vld [vmem:[#allocation5_spill] sm:$0xff] }
 0x324   :  { %11023 = vmatprep.subr.msk.bf16.mxu0 %vm63_vm0, %v7624_v25  ;;  %11022 = vmatmul.mubr.msk.bf16.vlgmr.msra.gmra.mrb[12].mxu1 %vm1036_vm4, %v13901_v20 }
 0x325   :  { %8067 = vmatpush1.bf16.msra.mxu0 %v7691_v40  ;;  %v7580_v8 = vpop.permute.xlu0 %7579  ;;  %v7582_v44 = vpop.permute.xlu1 %7581  ;;  %8139 = vmatprep.mubr.bf16.mxu1 %v14387_v11  ;;  %v11130_v23 = vcombine.low %v9408_v55, %v9408_v55 }
 0x326   :  { %v7625_v50 = vsel %vm1941_vm7, %v7578_v1, %v7580_v8  ;;  %v7626_v48 = vsel %vm1941_vm7, %v7580_v8, %v7582_v44  ;;  %v11838_v1 = vld [vmem:[#allocation2 + $0x6c] sm:$0x77]  ;;  %v11131_v8 = vcombine.high %v9408_v55, %v9408_v55 }
 0x327   :  { %v7697_v49 = vsel %vm63_vm0, %v7625_v50, 0  ;;  %9520 = vrot.lane.b32.xlu0 %v11117_v30, %s11845_s28  ;;  %9522 = vrot.lane.b32.xlu1 %v11118_v54, %s11845_s28  ;;  %v9409_v25 = vmul.bf16 %v11838_v1, %v14404_v27  ;;  %v11839_v50 = vld [vmem:[#allocation2 + $0x74] sm:$0x77] }
 0x328   :  { %11025 = vmatprep.subr.msk.bf16.mxu1 %vm63_vm0, %v7626_v48  ;;  %11024 = vmatmul.mubr.msk.bf16.vlgmr.msra.gmra.mrb[16].mxu0 %vm1036_vm4, %v13901_v20  ;;  %v14405_v48 = vld [vmem:[#allocation10_spill] sm:$0xff] }
 0x329   :  { %8108 = vmatpush1.bf16.msra.mxu1 %v7697_v49  ;;  %v7584_v7 = vpop.permute.xlu0 %7583  ;;  %v7586_v36 = vpop.permute.xlu1 %7585  ;;  %8180 = vmatprep.mubr.bf16.mxu0 %v14387_v11  ;;  %v9410_v49 = vmul.bf16 %v11839_v50, %v14405_v48  ;;  %v11133_v52 = vcombine.high %v9409_v25, %v9409_v25 }
 0x32a   :  { %v7627_v42 = vsel %vm1941_vm7, %v7582_v44, %v7584_v7  ;;  %v7628_v17 = vsel %vm1941_vm7, %v7584_v7, %v7586_v36  ;;  %v11132_v44 = vcombine.low %v9409_v25, %v9409_v25  ;;  %v11840_v7 = vld [vmem:[#allocation2 + $0x7c] sm:$0x77] }
 0x32b   :  { %v7703_v0 = vsel %vm63_vm0, %v7627_v42, 0  ;;  %9524 = vrot.lane.b32.xlu0 %v11119_v45, %s11845_s28  ;;  %9526 = vrot.lane.b32.xlu1 %v11120_v5, %s11845_s28  ;;  %v11134_v26 = vcombine.low %v9410_v49, %v9410_v49 }
 0x32c   :  { %11027 = vmatprep.subr.msk.bf16.mxu0 %vm63_vm0, %v7628_v17  ;;  %11026 = vmatmul.mubr.msk.bf16.vlgmr.msra.gmra.mrb[16].mxu1 %vm1036_vm4, %v13901_v20 }
 0x32d   :  { %8149 = vmatpush1.bf16.msra.mxu0 %v7703_v0  ;;  %v7588_v43 = vpop.permute.xlu0 %7587  ;;  %v7590_v3 = vpop.permute.xlu1 %7589  ;;  %8221 = vmatprep.mubr.bf16.mxu1 %v14387_v11 }
 0x32e   :  { %v7629_v39 = vsel %vm1941_vm7, %v7586_v36, %v7588_v43  ;;  %v7630_v58 = vsel %vm1941_vm7, %v7588_v43, %v7590_v3  ;;  %v14406_v36 = vld [vmem:[#allocation12_spill] sm:$0xff] }
 0x32f   :  { %v7709_v14 = vsel %vm63_vm0, %v7629_v39, 0  ;;  %9528 = vrot.lane.b32.xlu0 %v11121_v38, %s11845_s28  ;;  %9530 = vrot.lane.b32.xlu1 %v11122_v62, %s11845_s28  ;;  %v9411_v42 = vmul.bf16 %v11840_v7, %v14406_v36 }
 0x330   :  { %11029 = vmatprep.subr.msk.bf16.mxu1 %vm63_vm0, %v7630_v58  ;;  %11028 = vmatmul.mubr.msk.bf16.vlgmr.msra.gmra.mrb[20].mxu0 %vm1036_vm4, %v13901_v20  ;;  %v14076_v58 = vld [vmem:[%s14355_s1 + $0xe] sm:$0x3] }
 0x331   :  { %8190 = vmatpush1.bf16.msra.mxu1 %v7709_v14  ;;  %v7592_v28 = vpop.permute.xlu0 %7591  ;;  %v7594_v46 = vpop.permute.xlu1 %7593  ;;  %8262 = vmatprep.mubr.bf16.mxu0 %v14387_v11  ;;  %v11136_v33 = vcombine.low %v9411_v42, %v9411_v42  ;;  %v11841_v14 = vld [vmem:[#allocation2 + $0x84] sm:$0x7] }
 0x332   :  { %v7631_v10 = vsel %vm1941_vm7, %v7590_v3, %v7592_v28  ;;  %v7632_v21 = vsel %vm1941_vm7, %v7592_v28, %v7594_v46  ;;  %v11137_v28 = vcombine.high %v9411_v42, %v9411_v42 }
 0x333   :  { %v7715_v41 = vsel %vm63_vm0, %v7631_v10, 0  ;;  %9532 = vrot.lane.b32.xlu0 %v11123_v16, %s11845_s28  ;;  %9534 = vrot.lane.b32.xlu1 %v11124_v15, %s11845_s28  ;;  %v14407_v16 = vld [vmem:[#allocation11_spill] sm:$0xff] }
 0x334   :  { %11031 = vmatprep.subr.msk.bf16.mxu0 %vm63_vm0, %v7632_v21  ;;  %11030 = vmatmul.mubr.msk.bf16.vlgmr.msra.gmra.mrb[20].mxu1 %vm1036_vm4, %v13901_v20  ;;  %v9412_v15 = vmul.bf16 %v11841_v14, %v14407_v16 }
 0x335   :  { %8231 = vmatpush1.bf16.msra.mxu0 %v7715_v41  ;;  %v7596_v59 = vpop.permute.xlu0 %7595  ;;  %v7598_v32 = vpop.permute.xlu1 %7597  ;;  %8303 = vmatprep.mubr.bf16.mxu1 %v14387_v11 }
 0x336   :  { %v7633_v6 = vsel %vm1941_vm7, %v7594_v46, %v7596_v59  ;;  %v7634_v24 = vsel %vm1941_vm7, %v7596_v59, %v7598_v32  ;;  %v11138_v41 = vcombine.low %v9412_v15, %v9412_v15 }
 0x337   :  { %v7721_v35 = vsel %vm63_vm0, %v7633_v6, 0  ;;  %9536 = vrot.lane.b32.xlu0 %v11125_v37, %s11845_s28  ;;  %9538 = vrot.lane.b32.xlu1 %v11126_v13, %s11845_s28 }
 0x338   :  { %11033 = vmatprep.subr.msk.bf16.mxu1 %vm63_vm0, %v7634_v24  ;;  %11032 = vmatmul.mubr.msk.bf16.vlgmr.msra.gmra.mrb[24].mxu0 %vm1036_vm4, %v13901_v20 }
 0x339   :  { %8272 = vmatpush1.bf16.msra.mxu1 %v7721_v35  ;;  %v7600_v57 = vpop.permute.xlu0 %7599  ;;  %v7602_v9 = vpop.permute.xlu1 %7601  ;;  %8344 = vmatprep.mubr.bf16.mxu0 %v14387_v11 }
 0x33a   :  { %v7635_v56 = vsel %vm1941_vm7, %v7598_v32, %v7600_v57  ;;  %v7636_v19 = vsel %vm1941_vm7, %v7600_v57, %v7602_v9 }
 0x33b   :  { %v7727_v34 = vsel %vm63_vm0, %v7635_v56, 0  ;;  %9540 = vrot.lane.b32.xlu0 %v11127_v61, %s11845_s28  ;;  %9542 = vrot.lane.b32.xlu1 %v11128_v63, %s11845_s28 }
 0x33c   :  { %11035 = vmatprep.subr.msk.bf16.mxu0 %vm63_vm0, %v7636_v19  ;;  %11034 = vmatmul.mubr.msk.bf16.vlgmr.msra.gmra.mrb[24].mxu1 %vm1036_vm4, %v13901_v20 }
 0x33d   :  { %8313 = vmatpush1.bf16.msra.mxu0 %v7727_v34  ;;  %v7604_v40 = vpop.permute.xlu0 %7603  ;;  %v7606_v30 = vpop.permute.xlu1 %7605  ;;  %8385 = vmatprep.mubr.bf16.mxu1 %v14387_v11 }
 0x33e   :  { %v7637_v54 = vsel %vm1941_vm7, %v7602_v9, %v7604_v40  ;;  %v7638_v60 = vsel %vm1941_vm7, %v7604_v40, %v7606_v30 }
 0x33f   :  { %v7733_v12 = vsel %vm63_vm0, %v7637_v54, 0  ;;  %9544 = vrot.lane.b32.xlu0 %v11129_v2, %s11845_s28  ;;  %9546 = vrot.lane.b32.xlu1 %v11130_v23, %s11845_s28 }
 0x340   :  { %11037 = vmatprep.subr.msk.bf16.mxu1 %vm63_vm0, %v7638_v60  ;;  %11036 = vmatmul.mubr.msk.bf16.vlgmr.msra.gmra.mrb[28].mxu0 %vm1036_vm4, %v13901_v20 }
 0x341   :  { %8354 = vmatpush1.bf16.msra.mxu1 %v7733_v12  ;;  %v8512_v45 = vpop.permute.xlu0 %8511  ;;  %v8514_v5 = vpop.permute.xlu1 %8513  ;;  %8740 = vmatprep.mubr.bf16.mxu0 %v14387_v11 }
 0x342   :  { %v8577_v17 = vsel %vm1003_vm3, %v8512_v45, %v8514_v5 }
 0x343   :  { %9548 = vrot.lane.b32.xlu0 %v11131_v8, %s11845_s28  ;;  %9550 = vrot.lane.b32.xlu1 %v11132_v44, %s11845_s28  ;;  %v8613_v22 = vsel %vm63_vm0, %v8577_v17, 0 }
 0x344   :  { %11038 = vmatmul.mubr.msk.bf16.vlgmr.msra.gmra.mrb[28].mxu1 %vm1036_vm4, %v13901_v20  ;;  %v11135_v20 = vcombine.high %v9410_v49, %v9410_v49 }
 0x345   :  { %v8516_v0 = vpop.permute.xlu0 %8515  ;;  %v8518_v38 = vpop.permute.xlu1 %8517  ;;  %8781 = vmatprep.mubr.bf16.mxu1 %v14387_v11 }
 0x346   :  { %v8578_v62 = vsel %vm1003_vm3, %v8514_v5, %v8516_v0  ;;  %v8579_v43 = vsel %vm1003_vm3, %v8516_v0, %v8518_v38 }
 0x347   :  { %9552 = vrot.lane.b32.xlu0 %v11133_v52, %s11845_s28  ;;  %9554 = vrot.lane.b32.xlu1 %v11134_v26, %s11845_s28  ;;  %v8619_v51 = vsel %vm63_vm0, %v8579_v43, 0 }
 0x348   :  { %11073 = vmatprep.subr.msk.bf16.mxu0 %vm63_vm0, %v8578_v62 }
 0x349   :  { %8709 = vmatpush1.bf16.msra.mxu0 %v8613_v22  ;;  %v8520_v3 = vpop.permute.xlu0 %8519  ;;  %v8522_v39 = vpop.permute.xlu1 %8521 }
 0x34a   :  { %v8580_v31 = vsel %vm1003_vm3, %v8518_v38, %v8520_v3  ;;  %v8581_v46 = vsel %vm1003_vm3, %v8520_v3, %v8522_v39 }
 0x34b   :  { %9556 = vrot.lane.b32.xlu0 %v11135_v20, %s11845_s28  ;;  %9558 = vrot.lane.b32.xlu1 %v11136_v33, %s11845_s28  ;;  %v8625_v13 = vsel %vm63_vm0, %v8581_v46, 0 }
 0x34c   :  { %11074 = vmatmul.mubr.msk.bf16.vlgmr.msra.gmra.mrb[0].mxu0 %vm1036_vm4, %v14076_v58  ;;  %11075 = vmatprep.subr.msk.bf16.mxu1 %vm63_vm0, %v8580_v31 }
 0x34d   :  { %8750 = vmatpush1.bf16.msra.mxu1 %v8619_v51  ;;  %v8524_v10 = vpop.permute.xlu0 %8523  ;;  %v8526_v21 = vpop.permute.xlu1 %8525  ;;  %8822 = vmatprep.mubr.bf16.mxu0 %v14387_v11 }
 0x34e   :  { %v8582_v37 = vsel %vm1003_vm3, %v8522_v39, %v8524_v10  ;;  %v8583_v53 = vsel %vm1003_vm3, %v8524_v10, %v8526_v21 }
 0x34f   :  { %9560 = vrot.lane.b32.xlu0 %v11137_v28, %s11845_s28  ;;  %9562 = vrot.lane.b32.xlu1 %v11138_v41, %s11845_s28  ;;  %v8631_v32 = vsel %vm63_vm0, %v8583_v53, 0 }
 0x350   :  { %11076 = vmatmul.mubr.msk.bf16.vlgmr.msra.gmra.mrb[0].mxu1 %vm1036_vm4, %v14076_v58  ;;  %11077 = vmatprep.subr.msk.bf16.mxu0 %vm63_vm0, %v8582_v37 }
 0x351   :  { %8791 = vmatpush1.bf16.msra.mxu0 %v8625_v13  ;;  %v8528_v47 = vpop.permute.xlu0 %8527  ;;  %v8530_v29 = vpop.permute.xlu1 %8529  ;;  %8863 = vmatprep.mubr.bf16.mxu1 %v14387_v11 }
 0x352   :  { %v8584_v59 = vsel %vm1003_vm3, %v8526_v21, %v8528_v47  ;;  %v8585_v6 = vsel %vm1003_vm3, %v8528_v47, %v8530_v29 }
 0x353   :  { %11079 = vmatprep.subr.msk.bf16.mxu1 %vm63_vm0, %v8584_v59  ;;  %v8637_v63 = vsel %vm63_vm0, %v8585_v6, 0 }
 0x354   :  { %11078 = vmatmul.mubr.msk.bf16.vlgmr.msra.gmra.mrb[4].mxu0 %vm1036_vm4, %v14076_v58  ;;  %8832 = vmatpush1.bf16.msra.mxu1 %v8631_v32 }
 0x355   :  { %v8532_v24 = vpop.permute.xlu0 %8531  ;;  %v8534_v35 = vpop.permute.xlu1 %8533  ;;  %8904 = vmatprep.mubr.bf16.mxu0 %v14387_v11 }
 0x356   :  { %v8586_v61 = vsel %vm1003_vm3, %v8530_v29, %v8532_v24  ;;  %v8587_v18 = vsel %vm1003_vm3, %v8532_v24, %v8534_v35 }
 0x357   :  { %11081 = vmatprep.subr.msk.bf16.mxu0 %vm63_vm0, %v8586_v61  ;;  %v8643_v9 = vsel %vm63_vm0, %v8587_v18, 0  ;;  %v14196_v18 = vld [vmem:[%s14355_s1 + $0x10] sm:$0x3] }
 0x358   :  { %11080 = vmatmul.mubr.msk.bf16.vlgmr.msra.gmra.mrb[4].mxu1 %vm1036_vm4, %v14076_v58  ;;  %8873 = vmatpush1.bf16.msra.mxu0 %v8637_v63 }
 0x359   :  { %v8536_v4 = vpop.permute.xlu0 %8535  ;;  %v8538_v55 = vpop.permute.xlu1 %8537  ;;  %8945 = vmatprep.mubr.bf16.mxu1 %v14387_v11 }
 0x35a   :  { %v8588_v57 = vsel %vm1003_vm3, %v8534_v35, %v8536_v4  ;;  %v8589_v56 = vsel %vm1003_vm3, %v8536_v4, %v8538_v55 }
 0x35b   :  { %11083 = vmatprep.subr.msk.bf16.mxu1 %vm63_vm0, %v8588_v57  ;;  %v8649_v23 = vsel %vm63_vm0, %v8589_v56, 0 }
 0x35c   :  { %11082 = vmatmul.mubr.msk.bf16.vlgmr.msra.gmra.mrb[8].mxu0 %vm1036_vm4, %v14076_v58  ;;  %8914 = vmatpush1.bf16.msra.mxu1 %v8643_v9 }
 0x35d   :  { %v8540_v19 = vpop.permute.xlu0 %8539  ;;  %v8542_v34 = vpop.permute.xlu1 %8541  ;;  %8986 = vmatprep.mubr.bf16.mxu0 %v14387_v11 }
 0x35e   :  { %v8590_v2 = vsel %vm1003_vm3, %v8538_v55, %v8540_v19  ;;  %v8591_v1 = vsel %vm1003_vm3, %v8540_v19, %v8542_v34 }
 0x35f   :  { %11085 = vmatprep.subr.msk.bf16.mxu0 %vm63_vm0, %v8590_v2  ;;  %v8655_v30 = vsel %vm63_vm0, %v8591_v1, 0 }
 0x360   :  { %11084 = vmatmul.mubr.msk.bf16.vlgmr.msra.gmra.mrb[8].mxu1 %vm1036_vm4, %v14076_v58  ;;  %8955 = vmatpush1.bf16.msra.mxu0 %v8649_v23 }
 0x361   :  { %v8544_v27 = vpop.permute.xlu0 %8543  ;;  %v8546_v25 = vpop.permute.xlu1 %8545  ;;  %9027 = vmatprep.mubr.bf16.mxu1 %v14387_v11 }
 0x362   :  { %v8592_v40 = vsel %vm1003_vm3, %v8542_v34, %v8544_v27  ;;  %v8593_v54 = vsel %vm1003_vm3, %v8544_v27, %v8546_v25 }
 0x363   :  { %11087 = vmatprep.subr.msk.bf16.mxu1 %vm63_vm0, %v8592_v40  ;;  %v8661_v44 = vsel %vm63_vm0, %v8593_v54, 0 }
 0x364   :  { %11086 = vmatmul.mubr.msk.bf16.vlgmr.msra.gmra.mrb[12].mxu0 %vm1036_vm4, %v14076_v58  ;;  %8996 = vmatpush1.bf16.msra.mxu1 %v8655_v30 }
 0x365   :  { %v8548_v60 = vpop.permute.xlu0 %8547  ;;  %v8550_v12 = vpop.permute.xlu1 %8549  ;;  %9068 = vmatprep.mubr.bf16.mxu0 %v14387_v11 }
 0x366   :  { %v8594_v8 = vsel %vm1003_vm3, %v8546_v25, %v8548_v60  ;;  %v8595_v50 = vsel %vm1003_vm3, %v8548_v60, %v8550_v12 }
 0x367   :  { %11089 = vmatprep.subr.msk.bf16.mxu0 %vm63_vm0, %v8594_v8  ;;  %v8667_v5 = vsel %vm63_vm0, %v8595_v50, 0 }
 0x368   :  { %11088 = vmatmul.mubr.msk.bf16.vlgmr.msra.gmra.mrb[12].mxu1 %vm1036_vm4, %v14076_v58  ;;  %9037 = vmatpush1.bf16.msra.mxu0 %v8661_v44 }
 0x369   :  { %v8552_v48 = vpop.permute.xlu0 %8551  ;;  %v8554_v49 = vpop.permute.xlu1 %8553  ;;  %9109 = vmatprep.mubr.bf16.mxu1 %v14387_v11 }
 0x36a   :  { %v8596_v45 = vsel %vm1003_vm3, %v8550_v12, %v8552_v48  ;;  %v8597_v52 = vsel %vm1003_vm3, %v8552_v48, %v8554_v49 }
 0x36b   :  { %11091 = vmatprep.subr.msk.bf16.mxu1 %vm63_vm0, %v8596_v45  ;;  %v8673_v42 = vsel %vm63_vm0, %v8597_v52, 0 }
 0x36c   :  { %11090 = vmatmul.mubr.msk.bf16.vlgmr.msra.gmra.mrb[16].mxu0 %vm1036_vm4, %v14076_v58  ;;  %9078 = vmatpush1.bf16.msra.mxu1 %v8667_v5 }
 0x36d   :  { %v8556_v26 = vpop.permute.xlu0 %8555  ;;  %v8558_v7 = vpop.permute.xlu1 %8557  ;;  %9150 = vmatprep.mubr.bf16.mxu0 %v14387_v11 }
 0x36e   :  { %v8598_v36 = vsel %vm1003_vm3, %v8554_v49, %v8556_v26  ;;  %v8599_v17 = vsel %vm1003_vm3, %v8556_v26, %v8558_v7 }
 0x36f   :  { %11093 = vmatprep.subr.msk.bf16.mxu0 %vm63_vm0, %v8598_v36  ;;  %v8679_v22 = vsel %vm63_vm0, %v8599_v17, 0 }
 0x370   :  { %11092 = vmatmul.mubr.msk.bf16.vlgmr.msra.gmra.mrb[16].mxu1 %vm1036_vm4, %v14076_v58  ;;  %9119 = vmatpush1.bf16.msra.mxu0 %v8673_v42 }
 0x371   :  { %v8560_v0 = vpop.permute.xlu0 %8559  ;;  %v8562_v38 = vpop.permute.xlu1 %8561  ;;  %9191 = vmatprep.mubr.bf16.mxu1 %v14387_v11 }
 0x372   :  { %v8600_v62 = vsel %vm1003_vm3, %v8558_v7, %v8560_v0  ;;  %v8601_v20 = vsel %vm1003_vm3, %v8560_v0, %v8562_v38 }
 0x373   :  { %11095 = vmatprep.subr.msk.bf16.mxu1 %vm63_vm0, %v8600_v62  ;;  %v8685_v39 = vsel %vm63_vm0, %v8601_v20, 0 }
 0x374   :  { %11094 = vmatmul.mubr.msk.bf16.vlgmr.msra.gmra.mrb[20].mxu0 %vm1036_vm4, %v14076_v58  ;;  %9160 = vmatpush1.bf16.msra.mxu1 %v8679_v22 }
 0x375   :  { %v8564_v33 = vpop.permute.xlu0 %8563  ;;  %v8566_v43 = vpop.permute.xlu1 %8565  ;;  %9232 = vmatprep.mubr.bf16.mxu0 %v14387_v11 }
 0x376   :  { %v8602_v3 = vsel %vm1003_vm3, %v8562_v38, %v8564_v33  ;;  %v8603_v14 = vsel %vm1003_vm3, %v8564_v33, %v8566_v43 }
 0x377   :  { %11097 = vmatprep.subr.msk.bf16.mxu0 %vm63_vm0, %v8602_v3  ;;  %v8691_v51 = vsel %vm63_vm0, %v8603_v14, 0 }
 0x378   :  { %11096 = vmatmul.mubr.msk.bf16.vlgmr.msra.gmra.mrb[20].mxu1 %vm1036_vm4, %v14076_v58  ;;  %9201 = vmatpush1.bf16.msra.mxu0 %v8685_v39 }
 0x379   :  { %v8568_v16 = vpop.permute.xlu0 %8567  ;;  %v8570_v15 = vpop.permute.xlu1 %8569  ;;  %9273 = vmatprep.mubr.bf16.mxu1 %v14387_v11 }
 0x37a   :  { %v8604_v31 = vsel %vm1003_vm3, %v8566_v43, %v8568_v16  ;;  %v8605_v28 = vsel %vm1003_vm3, %v8568_v16, %v8570_v15 }
 0x37b   :  { %11099 = vmatprep.subr.msk.bf16.mxu1 %vm63_vm0, %v8604_v31  ;;  %v8697_v41 = vsel %vm63_vm0, %v8605_v28, 0 }
 0x37c   :  { %11098 = vmatmul.mubr.msk.bf16.vlgmr.msra.gmra.mrb[24].mxu0 %vm1036_vm4, %v14076_v58  ;;  %9242 = vmatpush1.bf16.msra.mxu1 %v8691_v51 }
 0x37d   :  { %v8572_v46 = vpop.permute.xlu0 %8571  ;;  %v8574_v10 = vpop.permute.xlu1 %8573  ;;  %9314 = vmatprep.mubr.bf16.mxu0 %v14387_v11 }
 0x37e   :  { %v8606_v21 = vsel %vm1003_vm3, %v8570_v15, %v8572_v46  ;;  %v8607_v37 = vsel %vm1003_vm3, %v8572_v46, %v8574_v10 }
 0x37f   :  { %11101 = vmatprep.subr.msk.bf16.mxu0 %vm63_vm0, %v8606_v21  ;;  %v8703_v29 = vsel %vm63_vm0, %v8607_v37, 0 }
 0x380   :  { %11100 = vmatmul.mubr.msk.bf16.vlgmr.msra.gmra.mrb[24].mxu1 %vm1036_vm4, %v14076_v58  ;;  %9283 = vmatpush1.bf16.msra.mxu0 %v8697_v41 }
 0x381   :  { %v8576_v13 = vpop.permute.xlu0 %8575  ;;  %v9499_v53 = vpop.permute.xlu1 %9498  ;;  %9355 = vmatprep.mubr.bf16.mxu1 %v14387_v11 }
 0x382   :  { %v8608_v47 = vsel %vm1003_vm3, %v8574_v10, %v8576_v13 }
 0x383   :  { %11103 = vmatprep.subr.msk.bf16.mxu1 %vm63_vm0, %v8608_v47 }
 0x384   :  { %11102 = vmatmul.mubr.msk.bf16.vlgmr.msra.gmra.mrb[28].mxu0 %vm1036_vm4, %v14076_v58  ;;  %9324 = vmatpush1.bf16.msra.mxu1 %v8703_v29 }
 0x385   :  { %v9501_v59 = vpop.permute.xlu0 %9500  ;;  %v9503_v32 = vpop.permute.xlu1 %9502  ;;  %9727 = vmatprep.mubr.bf16.mxu0 %v14387_v11 }
 0x386   :  { %v9564_v6 = vsel %vm784_vm5, %v9499_v53, %v9501_v59  ;;  %v9565_v24 = vsel %vm784_vm5, %v9501_v59, %v9503_v32 }
 0x387   :  { %v9600_v35 = vsel %vm63_vm0, %v9564_v6, 0  ;;  %11139 = vmatprep.subr.msk.bf16.mxu0 %vm63_vm0, %v9565_v24 }
 0x388   :  { %11104 = vmatmul.mubr.msk.bf16.vlgmr.msra.gmra.mrb[28].mxu1 %vm1036_vm4, %v14076_v58  ;;  %9696 = vmatpush1.bf16.msra.mxu0 %v9600_v35 }
 0x389   :  { %v9505_v61 = vpop.permute.xlu0 %9504  ;;  %v9507_v63 = vpop.permute.xlu1 %9506  ;;  %9768 = vmatprep.mubr.bf16.mxu1 %v14387_v11 }
 0x38a   :  { %v9566_v4 = vsel %vm784_vm5, %v9503_v32, %v9505_v61  ;;  %v9567_v55 = vsel %vm784_vm5, %v9505_v61, %v9507_v63 }
 0x38b   :  { %v9606_v57 = vsel %vm63_vm0, %v9566_v4, 0  ;;  %11141 = vmatprep.subr.msk.bf16.mxu1 %vm63_vm0, %v9567_v55 }
 0x38c   :  { %11140 = vmatmul.mubr.msk.bf16.vlgmr.msra.gmra.mrb[0].mxu0 %vm1036_vm4, %v14196_v18  ;;  %9737 = vmatpush1.bf16.msra.mxu1 %v9606_v57 }
 0x38d   :  { %v9509_v58 = vpop.permute.xlu0 %9508  ;;  %v9511_v9 = vpop.permute.xlu1 %9510  ;;  %9809 = vmatprep.mubr.bf16.mxu0 %v14387_v11 }
 0x38e   :  { %v9568_v56 = vsel %vm784_vm5, %v9507_v63, %v9509_v58  ;;  %v9569_v19 = vsel %vm784_vm5, %v9509_v58, %v9511_v9 }
 0x38f   :  { %v9612_v34 = vsel %vm63_vm0, %v9568_v56, 0  ;;  %11143 = vmatprep.subr.msk.bf16.mxu0 %vm63_vm0, %v9569_v19 }
 0x390   :  { %11142 = vmatmul.mubr.msk.bf16.vlgmr.msra.gmra.mrb[0].mxu1 %vm1036_vm4, %v14196_v18  ;;  %9778 = vmatpush1.bf16.msra.mxu0 %v9612_v34 }
 0x391   :  { %v9513_v2 = vpop.permute.xlu0 %9512  ;;  %v9515_v23 = vpop.permute.xlu1 %9514  ;;  %9850 = vmatprep.mubr.bf16.mxu1 %v14387_v11 }
 0x392   :  { %v9570_v1 = vsel %vm784_vm5, %v9511_v9, %v9513_v2  ;;  %v9571_v27 = vsel %vm784_vm5, %v9513_v2, %v9515_v23 }
 0x393   :  { %v9618_v25 = vsel %vm63_vm0, %v9570_v1, 0  ;;  %11145 = vmatprep.subr.msk.bf16.mxu1 %vm63_vm0, %v9571_v27 }
 0x394   :  { %11144 = vmatmul.mubr.msk.bf16.vlgmr.msra.gmra.mrb[4].mxu0 %vm1036_vm4, %v14196_v18  ;;  %9819 = vmatpush1.bf16.msra.mxu1 %v9618_v25 }
 0x395   :  { %v9517_v40 = vpop.permute.xlu0 %9516  ;;  %v9519_v30 = vpop.permute.xlu1 %9518  ;;  %9891 = vmatprep.mubr.bf16.mxu0 %v14387_v11 }
 0x396   :  { %v9572_v54 = vsel %vm784_vm5, %v9515_v23, %v9517_v40  ;;  %v9573_v60 = vsel %vm784_vm5, %v9517_v40, %v9519_v30 }
 0x397   :  { %v9624_v12 = vsel %vm63_vm0, %v9572_v54, 0  ;;  %11147 = vmatprep.subr.msk.bf16.mxu0 %vm63_vm0, %v9573_v60 }
 0x398   :  { %11146 = vmatmul.mubr.msk.bf16.vlgmr.msra.gmra.mrb[4].mxu1 %vm1036_vm4, %v14196_v18  ;;  %9860 = vmatpush1.bf16.msra.mxu0 %v9624_v12 }
 0x399   :  { %v9521_v8 = vpop.permute.xlu0 %9520  ;;  %v9523_v44 = vpop.permute.xlu1 %9522  ;;  %9932 = vmatprep.mubr.bf16.mxu1 %v14387_v11 }
 0x39a   :  { %v9574_v50 = vsel %vm784_vm5, %v9519_v30, %v9521_v8  ;;  %v9575_v48 = vsel %vm784_vm5, %v9521_v8, %v9523_v44 }
 0x39b   :  { %v9630_v49 = vsel %vm63_vm0, %v9574_v50, 0  ;;  %11149 = vmatprep.subr.msk.bf16.mxu1 %vm63_vm0, %v9575_v48 }
 0x39c   :  { %11148 = vmatmul.mubr.msk.bf16.vlgmr.msra.gmra.mrb[8].mxu0 %vm1036_vm4, %v14196_v18  ;;  %9901 = vmatpush1.bf16.msra.mxu1 %v9630_v49 }
 0x39d   :  { %v9525_v45 = vpop.permute.xlu0 %9524  ;;  %v9527_v5 = vpop.permute.xlu1 %9526  ;;  %9973 = vmatprep.mubr.bf16.mxu0 %v14387_v11 }
 0x39e   :  { %v9576_v52 = vsel %vm784_vm5, %v9523_v44, %v9525_v45  ;;  %v9577_v26 = vsel %vm784_vm5, %v9525_v45, %v9527_v5 }
 0x39f   :  { %v9636_v7 = vsel %vm63_vm0, %v9576_v52, 0  ;;  %11151 = vmatprep.subr.msk.bf16.mxu0 %vm63_vm0, %v9577_v26 }
 0x3a0   :  { %11150 = vmatmul.mubr.msk.bf16.vlgmr.msra.gmra.mrb[8].mxu1 %vm1036_vm4, %v14196_v18  ;;  %9942 = vmatpush1.bf16.msra.mxu0 %v9636_v7 }
 0x3a1   :  { %v9529_v36 = vpop.permute.xlu0 %9528  ;;  %v9531_v42 = vpop.permute.xlu1 %9530  ;;  %10014 = vmatprep.mubr.bf16.mxu1 %v14387_v11 }
 0x3a2   :  { %v9578_v17 = vsel %vm784_vm5, %v9527_v5, %v9529_v36  ;;  %v9579_v0 = vsel %vm784_vm5, %v9529_v36, %v9531_v42 }
 0x3a3   :  { %v9642_v38 = vsel %vm63_vm0, %v9578_v17, 0  ;;  %11153 = vmatprep.subr.msk.bf16.mxu1 %vm63_vm0, %v9579_v0 }
 0x3a4   :  { %11152 = vmatmul.mubr.msk.bf16.vlgmr.msra.gmra.mrb[12].mxu0 %vm1036_vm4, %v14196_v18  ;;  %9983 = vmatpush1.bf16.msra.mxu1 %v9642_v38 }
 0x3a5   :  { %v9533_v62 = vpop.permute.xlu0 %9532  ;;  %v9535_v22 = vpop.permute.xlu1 %9534  ;;  %10055 = vmatprep.mubr.bf16.mxu0 %v14387_v11 }
 0x3a6   :  { %v9580_v20 = vsel %vm784_vm5, %v9531_v42, %v9533_v62  ;;  %v9581_v33 = vsel %vm784_vm5, %v9533_v62, %v9535_v22 }
 0x3a7   :  { %v9648_v43 = vsel %vm63_vm0, %v9580_v20, 0  ;;  %11155 = vmatprep.subr.msk.bf16.mxu0 %vm63_vm0, %v9581_v33 }
 0x3a8   :  { %11154 = vmatmul.mubr.msk.bf16.vlgmr.msra.gmra.mrb[12].mxu1 %vm1036_vm4, %v14196_v18  ;;  %10024 = vmatpush1.bf16.msra.mxu0 %v9648_v43 }
 0x3a9   :  { %v9537_v3 = vpop.permute.xlu0 %9536  ;;  %v9539_v39 = vpop.permute.xlu1 %9538  ;;  %10096 = vmatprep.mubr.bf16.mxu1 %v14387_v11 }
 0x3aa   :  { %v9582_v14 = vsel %vm784_vm5, %v9535_v22, %v9537_v3  ;;  %v9583_v16 = vsel %vm784_vm5, %v9537_v3, %v9539_v39 }
 0x3ab   :  { %v9654_v15 = vsel %vm63_vm0, %v9582_v14, 0  ;;  %11157 = vmatprep.subr.msk.bf16.mxu1 %vm63_vm0, %v9583_v16 }
 0x3ac   :  { %11156 = vmatmul.mubr.msk.bf16.vlgmr.msra.gmra.mrb[16].mxu0 %vm1036_vm4, %v14196_v18  ;;  %10065 = vmatpush1.bf16.msra.mxu1 %v9654_v15 }
 0x3ad   :  { %v9541_v31 = vpop.permute.xlu0 %9540  ;;  %v9543_v51 = vpop.permute.xlu1 %9542  ;;  %10137 = vmatprep.mubr.bf16.mxu0 %v14387_v11 }
 0x3ae   :  { %v9584_v28 = vsel %vm784_vm5, %v9539_v39, %v9541_v31  ;;  %v9585_v46 = vsel %vm784_vm5, %v9541_v31, %v9543_v51 }
 0x3af   :  { %v9660_v10 = vsel %vm63_vm0, %v9584_v28, 0  ;;  %11159 = vmatprep.subr.msk.bf16.mxu0 %vm63_vm0, %v9585_v46 }
 0x3b0   :  { %11158 = vmatmul.mubr.msk.bf16.vlgmr.msra.gmra.mrb[16].mxu1 %vm1036_vm4, %v14196_v18  ;;  %10106 = vmatpush1.bf16.msra.mxu0 %v9660_v10 }
 0x3b1   :  { %v9545_v21 = vpop.permute.xlu0 %9544  ;;  %v9547_v41 = vpop.permute.xlu1 %9546  ;;  %10178 = vmatprep.mubr.bf16.mxu1 %v14387_v11 }
 0x3b2   :  { %v9586_v37 = vsel %vm784_vm5, %v9543_v51, %v9545_v21  ;;  %v9587_v13 = vsel %vm784_vm5, %v9545_v21, %v9547_v41 }
 0x3b3   :  { %v9666_v53 = vsel %vm63_vm0, %v9586_v37, 0  ;;  %11161 = vmatprep.subr.msk.bf16.mxu1 %vm63_vm0, %v9587_v13 }
 0x3b4   :  { %11160 = vmatmul.mubr.msk.bf16.vlgmr.msra.gmra.mrb[20].mxu0 %vm1036_vm4, %v14196_v18  ;;  %10147 = vmatpush1.bf16.msra.mxu1 %v9666_v53 }
 0x3b5   :  { %v9549_v47 = vpop.permute.xlu0 %9548  ;;  %v9551_v29 = vpop.permute.xlu1 %9550  ;;  %10219 = vmatprep.mubr.bf16.mxu0 %v14387_v11 }
 0x3b6   :  { %v9588_v59 = vsel %vm784_vm5, %v9547_v41, %v9549_v47  ;;  %v9589_v32 = vsel %vm784_vm5, %v9549_v47, %v9551_v29 }
 0x3b7   :  { %v9672_v6 = vsel %vm63_vm0, %v9588_v59, 0  ;;  %11163 = vmatprep.subr.msk.bf16.mxu0 %vm63_vm0, %v9589_v32 }
 0x3b8   :  { %11162 = vmatmul.mubr.msk.bf16.vlgmr.msra.gmra.mrb[20].mxu1 %vm1036_vm4, %v14196_v18  ;;  %10188 = vmatpush1.bf16.msra.mxu0 %v9672_v6 }
 0x3b9   :  { %v9553_v24 = vpop.permute.xlu0 %9552  ;;  %v9555_v35 = vpop.permute.xlu1 %9554  ;;  %10260 = vmatprep.mubr.bf16.mxu1 %v14387_v11 }
 0x3ba   :  { %v9590_v61 = vsel %vm784_vm5, %v9551_v29, %v9553_v24  ;;  %v9591_v63 = vsel %vm784_vm5, %v9553_v24, %v9555_v35 }
 0x3bb   :  { %v9678_v4 = vsel %vm63_vm0, %v9590_v61, 0  ;;  %11165 = vmatprep.subr.msk.bf16.mxu1 %vm63_vm0, %v9591_v63 }
 0x3bc   :  { %11164 = vmatmul.mubr.msk.bf16.vlgmr.msra.gmra.mrb[24].mxu0 %vm1036_vm4, %v14196_v18  ;;  %10229 = vmatpush1.bf16.msra.mxu1 %v9678_v4 }
 0x3bd   :  { %v9557_v55 = vpop.permute.xlu0 %9556  ;;  %v9559_v57 = vpop.permute.xlu1 %9558  ;;  %10301 = vmatprep.mubr.bf16.mxu0 %v14387_v11 }
 0x3be   :  { %v9592_v58 = vsel %vm784_vm5, %v9555_v35, %v9557_v55  ;;  %v9593_v9 = vsel %vm784_vm5, %v9557_v55, %v9559_v57 }
 0x3bf   :  { %v9684_v56 = vsel %vm63_vm0, %v9592_v58, 0  ;;  %11167 = vmatprep.subr.msk.bf16.mxu0 %vm63_vm0, %v9593_v9 }
 0x3c0   :  { %11166 = vmatmul.mubr.msk.bf16.vlgmr.msra.gmra.mrb[24].mxu1 %vm1036_vm4, %v14196_v18  ;;  %10270 = vmatpush1.bf16.msra.mxu0 %v9684_v56 }
 0x3c1   :  { %v9561_v19 = vpop.permute.xlu0 %9560  ;;  %v9563_v34 = vpop.permute.xlu1 %9562  ;;  %10342 = vmatprep.mubr.bf16.mxu1 %v14387_v11 }
 0x3c2   :  { %v9594_v2 = vsel %vm784_vm5, %v9559_v57, %v9561_v19  ;;  %v9595_v23 = vsel %vm784_vm5, %v9561_v19, %v9563_v34 }
 0x3c3   :  { %v9690_v1 = vsel %vm63_vm0, %v9594_v2, 0  ;;  %11169 = vmatprep.subr.msk.bf16.mxu1 %vm63_vm0, %v9595_v23 }
 0x3c4   :  { %11168 = vmatmul.mubr.msk.bf16.vlgmr.msra.gmra.mrb[28].mxu0 %vm1036_vm4, %v14196_v18  ;;  %10311 = vmatpush1.bf16.msra.mxu1 %v9690_v1 }
 0x3c8   :  { %11170 = vmatmul.mubr.msk.bf16.vlgmr.msra.gmra.mrb[28].mxu1 %vm1036_vm4, %v14196_v18 }
 0x45f   :  { %v9729_v27 = vpop.f32.mrb[0].mxu0 }
 0x460   :  { %v10383_v25 = vmax.f32 %v9729_v27, 0.0  ;;  %v9731_v40 = vpop.f32.mrb[1].mxu0 }
 0x461   :  { %v10384_v30 = vmax.f32 %v9731_v40, 0.0  ;;  %v9733_v11 = vpop.f32.mrb[2].mxu0 }
 0x462   :  { %v10415_v54 = vmin.f32 %v10383_v25, 6.0  ;;  %v9734_v60 = vpop.f32.mrb[3].mxu0 }
 0x463   :  { %v10416_v12 = vmin.f32 %v10384_v30, 6.0  ;;  %v9770_v8 = vpop.f32.mrb[0].mxu1 }
 0x464   :  { %v10385_v44 = vmax.f32 %v9770_v8, 0.0  ;;  %v9772_v50 = vpop.f32.mrb[1].mxu1 }
 0x465   :  { %v10479_v48 = vcombine.low %v10415_v54, %v10416_v12  ;;  %v10386_v49 = vmax.f32 %v9772_v50, 0.0  ;;  %v9774_v45 = vpop.f32.mrb[2].mxu1 }
 0x466   :  { %v10417_v5 = vmin.f32 %v10385_v44, 6.0  ;;  %v9775_v52 = vpop.f32.mrb[3].mxu1 }
 0x467   :  { %10511 = vst [vmem:[%s14356_s3] sm:$0x77] %v10479_v48  ;;  %v10418_v18 = vmin.f32 %v10386_v49, 6.0  ;;  %v9811_v26 = vpop.f32.mrb[4].mxu0 }
 0x468   :  { %v10387_v7 = vmax.f32 %v9811_v26, 0.0  ;;  %v9813_v36 = vpop.f32.mrb[5].mxu0 }
 0x469   :  { %v10480_v42 = vcombine.low %v10417_v5, %v10418_v18  ;;  %v10388_v17 = vmax.f32 %v9813_v36, 0.0  ;;  %v9815_v0 = vpop.f32.mrb[6].mxu0 }
 0x46a   :  { %v10419_v38 = vmin.f32 %v10387_v7, 6.0  ;;  %v9816_v62 = vpop.f32.mrb[7].mxu0 }
 0x46b   :  { %10512 = vst [vmem:[%s14356_s3 + $0x8] sm:$0x77] %v10480_v42  ;;  %v10420_v22 = vmin.f32 %v10388_v17, 6.0  ;;  %v9852_v20 = vpop.f32.mrb[4].mxu1 }
 0x46c   :  { %v10389_v33 = vmax.f32 %v9852_v20, 0.0  ;;  %v9854_v43 = vpop.f32.mrb[5].mxu1 }
 0x46d   :  { %v10481_v3 = vcombine.low %v10419_v38, %v10420_v22  ;;  %v10390_v39 = vmax.f32 %v9854_v43, 0.0  ;;  %v9856_v14 = vpop.f32.mrb[6].mxu1 }
 0x46e   :  { %v10421_v16 = vmin.f32 %v10389_v33, 6.0  ;;  %v9857_v15 = vpop.f32.mrb[7].mxu1 }
 0x46f   :  { %10513 = vst [vmem:[%s14356_s3 + $0x10] sm:$0x77] %v10481_v3  ;;  %v10422_v31 = vmin.f32 %v10390_v39, 6.0  ;;  %v9893_v51 = vpop.f32.mrb[8].mxu0 }
 0x470   :  { %v10391_v28 = vmax.f32 %v9893_v51, 0.0  ;;  %v9895_v46 = vpop.f32.mrb[9].mxu0 }
 0x471   :  { %v10482_v10 = vcombine.low %v10421_v16, %v10422_v31  ;;  %v10392_v21 = vmax.f32 %v9895_v46, 0.0  ;;  %v9897_v41 = vpop.f32.mrb[10].mxu0 }
 0x472   :  { %v10423_v37 = vmin.f32 %v10391_v28, 6.0  ;;  %v9898_v13 = vpop.f32.mrb[11].mxu0 }
 0x473   :  { %10514 = vst [vmem:[%s14356_s3 + $0x18] sm:$0x77] %v10482_v10  ;;  %v10424_v53 = vmin.f32 %v10392_v21, 6.0  ;;  %v9934_v47 = vpop.f32.mrb[8].mxu1 }
 0x474   :  { %v10393_v29 = vmax.f32 %v9934_v47, 0.0  ;;  %v9936_v59 = vpop.f32.mrb[9].mxu1 }
 0x475   :  { %v10483_v32 = vcombine.low %v10423_v37, %v10424_v53  ;;  %v10394_v6 = vmax.f32 %v9936_v59, 0.0  ;;  %v9938_v24 = vpop.f32.mrb[10].mxu1 }
 0x476   :  { %v10425_v35 = vmin.f32 %v10393_v29, 6.0  ;;  %v9939_v61 = vpop.f32.mrb[11].mxu1 }
 0x477   :  { %10515 = vst [vmem:[%s14356_s3 + $0x20] sm:$0x77] %v10483_v32  ;;  %v10426_v63 = vmin.f32 %v10394_v6, 6.0  ;;  %v9975_v4 = vpop.f32.mrb[12].mxu0 }
 0x478   :  { %v10395_v55 = vmax.f32 %v9975_v4, 0.0  ;;  %v9977_v57 = vpop.f32.mrb[13].mxu0 }
 0x479   :  { %v10484_v58 = vcombine.low %v10425_v35, %v10426_v63  ;;  %v10396_v9 = vmax.f32 %v9977_v57, 0.0  ;;  %v9979_v56 = vpop.f32.mrb[14].mxu0 }
 0x47a   :  { %v10427_v19 = vmin.f32 %v10395_v55, 6.0  ;;  %v9980_v34 = vpop.f32.mrb[15].mxu0 }
 0x47b   :  { %10516 = vst [vmem:[%s14356_s3 + $0x28] sm:$0x77] %v10484_v58  ;;  %v10428_v2 = vmin.f32 %v10396_v9, 6.0  ;;  %v10016_v23 = vpop.f32.mrb[12].mxu1 }
 0x47c   :  { %v10397_v1 = vmax.f32 %v10016_v23, 0.0  ;;  %v10018_v27 = vpop.f32.mrb[13].mxu1 }
 0x47d   :  { %v10485_v25 = vcombine.low %v10427_v19, %v10428_v2  ;;  %v10398_v40 = vmax.f32 %v10018_v27, 0.0  ;;  %v10020_v30 = vpop.f32.mrb[14].mxu1 }
 0x47e   :  { %v10429_v11 = vmin.f32 %v10397_v1, 6.0  ;;  %v10021_v54 = vpop.f32.mrb[15].mxu1 }
 0x47f   :  { %10517 = vst [vmem:[%s14356_s3 + $0x30] sm:$0x77] %v10485_v25  ;;  %v10430_v60 = vmin.f32 %v10398_v40, 6.0  ;;  %v10057_v12 = vpop.f32.mrb[16].mxu0 }
 0x480   :  { %v10399_v8 = vmax.f32 %v10057_v12, 0.0  ;;  %v10059_v44 = vpop.f32.mrb[17].mxu0 }
 0x481   :  { %v10486_v50 = vcombine.low %v10429_v11, %v10430_v60  ;;  %v10400_v48 = vmax.f32 %v10059_v44, 0.0  ;;  %v10061_v49 = vpop.f32.mrb[18].mxu0 }
 0x482   :  { %v10431_v45 = vmin.f32 %v10399_v8, 6.0  ;;  %v10062_v5 = vpop.f32.mrb[19].mxu0 }
 0x483   :  { %10518 = vst [vmem:[%s14356_s3 + $0x38] sm:$0x77] %v10486_v50  ;;  %v10432_v52 = vmin.f32 %v10400_v48, 6.0  ;;  %v10098_v18 = vpop.f32.mrb[16].mxu1 }
 0x484   :  { %v10401_v26 = vmax.f32 %v10098_v18, 0.0  ;;  %v10100_v7 = vpop.f32.mrb[17].mxu1 }
 0x485   :  { %v10487_v36 = vcombine.low %v10431_v45, %v10432_v52  ;;  %v10402_v42 = vmax.f32 %v10100_v7, 0.0  ;;  %v10102_v17 = vpop.f32.mrb[18].mxu1 }
 0x486   :  { %v10433_v0 = vmin.f32 %v10401_v26, 6.0  ;;  %v10103_v38 = vpop.f32.mrb[19].mxu1 }
 0x487   :  { %10519 = vst [vmem:[%s14356_s3 + $0x40] sm:$0x77] %v10487_v36  ;;  %v10434_v62 = vmin.f32 %v10402_v42, 6.0  ;;  %v10139_v22 = vpop.f32.mrb[20].mxu0 }
 0x488   :  { %v10403_v20 = vmax.f32 %v10139_v22, 0.0  ;;  %v10141_v33 = vpop.f32.mrb[21].mxu0 }
 0x489   :  { %v10488_v43 = vcombine.low %v10433_v0, %v10434_v62  ;;  %v10404_v3 = vmax.f32 %v10141_v33, 0.0  ;;  %v10143_v39 = vpop.f32.mrb[22].mxu0 }
 0x48a   :  { %v10435_v14 = vmin.f32 %v10403_v20, 6.0  ;;  %v10144_v16 = vpop.f32.mrb[23].mxu0 }
 0x48b   :  { %10520 = vst [vmem:[%s14356_s3 + $0x48] sm:$0x77] %v10488_v43  ;;  %v10436_v15 = vmin.f32 %v10404_v3, 6.0  ;;  %v10180_v31 = vpop.f32.mrb[20].mxu1 }
 0x48c   :  { %v10405_v51 = vmax.f32 %v10180_v31, 0.0  ;;  %v10182_v28 = vpop.f32.mrb[21].mxu1 }
 0x48d   :  { %v10489_v46 = vcombine.low %v10435_v14, %v10436_v15  ;;  %v10406_v10 = vmax.f32 %v10182_v28, 0.0  ;;  %v10184_v21 = vpop.f32.mrb[22].mxu1 }
 0x48e   :  { %v10437_v41 = vmin.f32 %v10405_v51, 6.0  ;;  %v10185_v37 = vpop.f32.mrb[23].mxu1 }
 0x48f   :  { %10521 = vst [vmem:[%s14356_s3 + $0x50] sm:$0x77] %v10489_v46  ;;  %v10438_v13 = vmin.f32 %v10406_v10, 6.0  ;;  %v10221_v53 = vpop.f32.mrb[24].mxu0 }
 0x490   :  { %v10407_v47 = vmax.f32 %v10221_v53, 0.0  ;;  %v10223_v29 = vpop.f32.mrb[25].mxu0 }
 0x491   :  { %v10490_v59 = vcombine.low %v10437_v41, %v10438_v13  ;;  %v10408_v32 = vmax.f32 %v10223_v29, 0.0  ;;  %v10225_v6 = vpop.f32.mrb[26].mxu0 }
 0x492   :  { %v10439_v24 = vmin.f32 %v10407_v47, 6.0  ;;  %v10226_v35 = vpop.f32.mrb[27].mxu0 }
 0x493   :  { %10522 = vst [vmem:[%s14356_s3 + $0x58] sm:$0x77] %v10490_v59  ;;  %v10440_v61 = vmin.f32 %v10408_v32, 6.0  ;;  %v10262_v63 = vpop.f32.mrb[24].mxu1 }
 0x494   :  { %v10409_v4 = vmax.f32 %v10262_v63, 0.0  ;;  %v10264_v55 = vpop.f32.mrb[25].mxu1 }
 0x495   :  { %v10491_v57 = vcombine.low %v10439_v24, %v10440_v61  ;;  %v10410_v58 = vmax.f32 %v10264_v55, 0.0  ;;  %v10266_v9 = vpop.f32.mrb[26].mxu1 }
 0x496   :  { %v10441_v56 = vmin.f32 %v10409_v4, 6.0  ;;  %v10267_v19 = vpop.f32.mrb[27].mxu1 }
 0x497   :  { %10523 = vst [vmem:[%s14356_s3 + $0x60] sm:$0x77] %v10491_v57  ;;  %v10442_v34 = vmin.f32 %v10410_v58, 6.0  ;;  %v10303_v2 = vpop.f32.mrb[28].mxu0 }
 0x498   :  { %v10411_v23 = vmax.f32 %v10303_v2, 0.0  ;;  %v10305_v1 = vpop.f32.mrb[29].mxu0 }
 0x499   :  { %v10492_v27 = vcombine.low %v10441_v56, %v10442_v34  ;;  %v10412_v25 = vmax.f32 %v10305_v1, 0.0  ;;  %v10307_v40 = vpop.f32.mrb[30].mxu0 }
 0x49a   :  { %v10443_v30 = vmin.f32 %v10411_v23, 6.0  ;;  %v10308_v11 = vpop.f32.mrb[31].mxu0 }
 0x49b   :  { %10524 = vst [vmem:[%s14356_s3 + $0x68] sm:$0x77] %v10492_v27  ;;  %v10444_v54 = vmin.f32 %v10412_v25, 6.0  ;;  %v10344_v60 = vpop.f32.mrb[28].mxu1 }
 0x49c   :  { %v10413_v12 = vmax.f32 %v10344_v60, 0.0  ;;  %v10346_v8 = vpop.f32.mrb[29].mxu1 }
 0x49d   :  { %v10493_v44 = vcombine.low %v10443_v30, %v10444_v54  ;;  %v10414_v50 = vmax.f32 %v10346_v8, 0.0  ;;  %v10348_v48 = vpop.f32.mrb[30].mxu1 }
 0x49e   :  { %v10445_v49 = vmin.f32 %v10413_v12, 6.0  ;;  %v10349_v45 = vpop.f32.mrb[31].mxu1 }
 0x49f   :  { %10525 = vst [vmem:[%s14356_s3 + $0x70] sm:$0x77] %v10493_v44  ;;  %v10446_v5 = vmin.f32 %v10414_v50, 6.0 }
 0x4a1   :  { %v10494_v52 = vcombine.low %v10445_v49, %v10446_v5 }
 0x4a3   :  { %10526 = vst [vmem:[%s14356_s3 + $0x78] sm:$0x77] %v10494_v52 }

</bundles_post_ra>
